<compile_context>
chip_gen: v5e
topology: v5e:2x2
jax: 0.10.0
libtpu: 0.0.40
codegen_flags: <defaults>
</compile_context>

<pallas_src>
import jax
import jax.numpy as jnp
from jax import lax
from jax.experimental import pallas as pl
from jax.experimental.pallas import tpu as pltpu


# ----------------------------------------------------------------------------
# Fused PPYOLODetBlock kernel (whole chain, one image per grid step)
# ----------------------------------------------------------------------------
def _make_block_kernel(H, W, ch):
    HW = H * W
    # Halo rows so every (dy, dx) shifted slice stays in-bounds; round up to the
    # f32 sublane granule (8) so the interior store and the dx==0 taps are aligned.
    PAD = ((W + 1 + 7) // 8) * 8

    def kernel(x_ref,
               w0_ref, b0_ref, w1_ref, b1_ref, w2_ref, b2_ref,
               w3_ref, b3_ref, wr_ref, br_ref, wt_ref, bt_ref,
               route_ref, tip_ref, pbuf):
        # Column masks that kill contributions wrapping across image rows when the
        # flat row index is shifted by dx = +/-1.  (All 3x3 inputs have `ch` chans.)
        col = lax.broadcasted_iota(jnp.int32, (HW, ch), 0) % W
        mask_l = (col >= 1).astype(jnp.float32)        # valid positions for dx = -1
        mask_r = (col <= W - 2).astype(jnp.float32)    # valid positions for dx = +1

        # Zero the halo rows of the padded scratch once per image.
        zpad = jnp.zeros((PAD, ch), jnp.float32)
        pbuf[0:PAD, :] = zpad
        pbuf[PAD + HW:, :] = zpad

        def leaky(v):
            return jnp.where(v > 0, v, 0.1 * v)

        def conv1x1(a, w_ref, b_ref):
            acc = jnp.dot(a.astype(jnp.bfloat16), w_ref[...],
                          preferred_element_type=jnp.float32)
            return leaky(acc + b_ref[...])

        def conv3x3(a, w_ref, b_ref):
            # Stage the (HW, ch) activation into the zero-padded scratch, then
            # accumulate the 9 taps as shifted-row matmuls (no im2col, no HBM).
            pbuf[PAD:PAD + HW, :] = a.astype(jnp.float32)
            cout = w_ref.shape[2]
            acc = jnp.zeros((HW, cout), jnp.float32)
            for t in range(9):                      # static unroll: 9 MXU calls
                dy, dx = t // 3 - 1, t % 3 - 1
                start = PAD + dy * W + dx
                patch = pbuf[start:start + HW, :]
                if dx == -1:
                    patch = patch * mask_l
                elif dx == 1:
                    patch = patch * mask_r
                acc = acc + jnp.dot(patch.astype(jnp.bfloat16), w_ref[t],
                                    preferred_element_type=jnp.float32)
            return leaky(acc + b_ref[...])

        x = x_ref[...]                               # (HW, ch_in) bf16
        a = conv1x1(x, w0_ref, b0_ref)               # (HW, ch)   f32
        a = conv3x3(a, w1_ref, b1_ref)               # (HW, 2ch)  f32
        a = conv1x1(a, w2_ref, b2_ref)               # (HW, ch)   f32
        a = conv3x3(a, w3_ref, b3_ref)               # (HW, 2ch)  f32
        route = conv1x1(a, wr_ref, br_ref)           # (HW, ch)   f32
        route_ref[...] = route.astype(route_ref.dtype)
        tip = conv3x3(route, wt_ref, bt_ref)         # (HW, 2ch)  f32
        tip_ref[...] = tip.astype(tip_ref.dtype)

    return kernel, PAD


# ----------------------------------------------------------------------------
# Host-side glue: BN folding + weight layout (plain JAX)
# ----------------------------------------------------------------------------
def _fold_bn(p, eps=1e-5):
    scale = p["gamma"] / jnp.sqrt(p["var"] + eps)     # (Cout,)
    w = p["w"] * scale                                # (k,k,Cin,Cout), HWIO
    b = p["beta"] - p["mean"] * scale                 # (Cout,)
    return w, b


def _folded_kernel_weights(p):
    """Fold BN, reshape to kernel layout, cast weights to bf16 (bias stays f32)."""
    w, b = _fold_bn(p)
    k = w.shape[0]                                    # static (shape), jit-safe
    cin, cout = w.shape[2], w.shape[3]
    if k == 1:
        w2 = w.reshape(cin, cout)
    else:
        w2 = w.reshape(k * k, cin, cout)              # tap-major: t = (dy+1)*3+(dx+1)
    return w2.astype(jnp.bfloat16), b.reshape(1, cout).astype(jnp.float32)


# ----------------------------------------------------------------------------
# PPYOLODetBlock forward (NCHW in, (route, tip) NCHW out)
# ----------------------------------------------------------------------------
@jax.jit
def ppyolo_det_block_forward(inputs_nchw, params):
    N, cin, H, W = inputs_nchw.shape
    ch = params["conv0"]["w"].shape[-1]
    HW = H * W

    # NCHW -> flat channels-last (C rides the 128-lane axis), bf16 at the boundary.
    x = jnp.transpose(inputs_nchw, (0, 2, 3, 1)).reshape(N, HW, cin)
    x = x.astype(jnp.bfloat16)

    w0, b0 = _folded_kernel_weights(params["conv0"])
    w1, b1 = _folded_kernel_weights(params["conv1"])
    w2, b2 = _folded_kernel_weights(params["conv2"])
    w3, b3 = _folded_kernel_weights(params["conv3"])
    wr, br = _folded_kernel_weights(params["route"])
    wt, bt = _folded_kernel_weights(params["tip"])
    w_args = (w0, b0, w1, b1, w2, b2, w3, b3, wr, br, wt, bt)

    def const_spec(arr):
        nd = arr.ndim
        return pl.BlockSpec(arr.shape, lambda n, _nd=nd: (0,) * _nd)

    in_specs = [pl.BlockSpec((None, HW, cin), lambda n: (n, 0, 0))]
    in_specs += [const_spec(a) for a in w_args]

    out_specs = [
        pl.BlockSpec((None, HW, ch), lambda n: (n, 0, 0)),
        pl.BlockSpec((None, HW, 2 * ch), lambda n: (n, 0, 0)),
    ]
    out_shape = (
        jax.ShapeDtypeStruct((N, HW, ch), jnp.bfloat16),
        jax.ShapeDtypeStruct((N, HW, 2 * ch), jnp.bfloat16),
    )

    kernel, pad = _make_block_kernel(H, W, ch)
    route_flat, tip_flat = pl.pallas_call(
        kernel,
        out_shape=out_shape,
        grid=(N,),
        in_specs=in_specs,
        out_specs=out_specs,
        scratch_shapes=[pltpu.VMEM((HW + 2 * pad, ch), jnp.float32)],
        compiler_params=pltpu.CompilerParams(
            dimension_semantics=("parallel",)),
    )(x, *w_args)

    route = route_flat.reshape(N, H, W, ch).transpose(0, 3, 1, 2)
    tip = tip_flat.reshape(N, H, W, 2 * ch).transpose(0, 3, 1, 2)
    return route.astype(jnp.float32), tip.astype(jnp.float32)


# ----------------------------------------------------------------------------
# Parameter construction (deterministic, synthetic; arrays only -> jit-safe)
# ----------------------------------------------------------------------------
def _make_convbn_params(key, cin, cout, ksize):
    kw_, kg, kb, km, kv = jax.random.split(key, 5)
    fan_in = cin * ksize * ksize
    w = jax.random.normal(kw_, (ksize, ksize, cin, cout), jnp.float32)
    w = w * (1.0 / jnp.sqrt(fan_in))
    return {
        "w": w,
        "gamma": 1.0 + 0.1 * jax.random.normal(kg, (cout,), jnp.float32),
        "beta": 0.1 * jax.random.normal(kb, (cout,), jnp.float32),
        "mean": 0.1 * jax.random.normal(km, (cout,), jnp.float32),
        "var": jnp.abs(jax.random.normal(kv, (cout,), jnp.float32)) + 0.5,
    }


def make_ppyolo_det_block_params(key, ch_in, ch):
    """cfg: conv0(1x1) conv1(3x3) conv2(1x1) conv3(3x3) route(1x1) | tip(3x3)."""
    cfg = [
        ("conv0", ch_in, ch, 1),
        ("conv1", ch, ch * 2, 3),
        ("conv2", ch * 2, ch, 1),
        ("conv3", ch, ch * 2, 3),
        ("route", ch * 2, ch, 1),
        ("tip", ch, ch * 2, 3),
    ]
    keys = jax.random.split(key, len(cfg))
    return {name: _make_convbn_params(k, ci, co, ks)
            for k, (name, ci, co, ks) in zip(keys, cfg)}


# ----------------------------------------------------------------------------
# Pure-JAX reference (same bf16 rounding of input/weights as the kernel boundary)
# ----------------------------------------------------------------------------
def _ref_conv_bn_leaky(x_nhwc, p):
    w, b = _fold_bn(p)
    w = w.astype(jnp.bfloat16).astype(jnp.float32)
    y = lax.conv_general_dilated(
        x_nhwc, w, window_strides=(1, 1), padding="SAME",
        dimension_numbers=("NHWC", "HWIO", "NHWC")) + b
    return jnp.where(y > 0, y, 0.1 * y)


def ref_forward(inputs_nchw, params):
    x = jnp.transpose(inputs_nchw, (0, 2, 3, 1))
    x = x.astype(jnp.bfloat16).astype(jnp.float32)
    for name in ("conv0", "conv1", "conv2", "conv3", "route"):
        x = _ref_conv_bn_leaky(x, params[name])
    route = x
    tip = _ref_conv_bn_leaky(route, params["tip"])
    return jnp.transpose(route, (0, 3, 1, 2)), jnp.transpose(tip, (0, 3, 1, 2))


# ----------------------------------------------------------------------------
if __name__ == "__main__":
    key = jax.random.PRNGKey(0)
    k_in, k_params = jax.random.split(key)

    N, CH_IN, H, W = 2, 8, 16, 16
    CH = 8   # toy width; real PPYOLO uses ch in {64..512}

    inputs = jax.random.normal(k_in, (N, CH_IN, H, W), jnp.float32)
    params = make_ppyolo_det_block_params(k_params, CH_IN, CH)

    route, tip = jax.block_until_ready(ppyolo_det_block_forward(inputs, params))

    assert route.shape == (N, CH, H, W), route.shape
    assert tip.shape == (N, 2 * CH, H, W), tip.shape

    route_ref, tip_ref = ref_forward(inputs, params)
    assert jnp.allclose(route, route_ref, rtol=5e-2, atol=5e-2), \
        float(jnp.max(jnp.abs(route - route_ref)))
    assert jnp.allclose(tip, tip_ref, rtol=5e-2, atol=5e-2), \
        float(jnp.max(jnp.abs(tip - tip_ref)))

    print("KERNEL_OK")
</pallas_src>

<mosaic_0001>
module attributes {stable_mosaic.version = 11 : i64} {
  func.func @kernel(%arg0: i32, %arg1: memref<1x256x8xbf16, #tpu.memory_space<vmem>>, %arg2: memref<8x8xbf16, #tpu.memory_space<vmem>>, %arg3: memref<1x8xf32, #tpu.memory_space<vmem>>, %arg4: memref<9x8x16xbf16, #tpu.memory_space<vmem>>, %arg5: memref<1x16xf32, #tpu.memory_space<vmem>>, %arg6: memref<16x8xbf16, #tpu.memory_space<vmem>>, %arg7: memref<1x8xf32, #tpu.memory_space<vmem>>, %arg8: memref<9x8x16xbf16, #tpu.memory_space<vmem>>, %arg9: memref<1x16xf32, #tpu.memory_space<vmem>>, %arg10: memref<16x8xbf16, #tpu.memory_space<vmem>>, %arg11: memref<1x8xf32, #tpu.memory_space<vmem>>, %arg12: memref<9x8x16xbf16, #tpu.memory_space<vmem>>, %arg13: memref<1x16xf32, #tpu.memory_space<vmem>>, %arg14: memref<1x256x8xbf16, #tpu.memory_space<vmem>>, %arg15: memref<1x256x16xbf16, #tpu.memory_space<vmem>>, %arg16: memref<304x8xf32, #tpu.memory_space<vmem>>) attributes {dimension_semantics = [#tpu.dimension_semantics<parallel>], iteration_bounds = array<i64: 2>, scalar_prefetch = 0 : i64, scratch_operands = 1 : i64, tpu.core_type = #tpu.core_type<tc>, window_params = [{transform_indices = @transform_0, window_bounds = array<i64: 1, 256, 8>}, {pipeline_mode = #tpu.pipeline_mode<synchronous>, transform_indices = @transform_1, window_bounds = array<i64: 8, 8>}, {pipeline_mode = #tpu.pipeline_mode<synchronous>, transform_indices = @transform_2, window_bounds = array<i64: 1, 8>}, {pipeline_mode = #tpu.pipeline_mode<synchronous>, transform_indices = @transform_3, window_bounds = array<i64: 9, 8, 16>}, {pipeline_mode = #tpu.pipeline_mode<synchronous>, transform_indices = @transform_4, window_bounds = array<i64: 1, 16>}, {pipeline_mode = #tpu.pipeline_mode<synchronous>, transform_indices = @transform_5, window_bounds = array<i64: 16, 8>}, {pipeline_mode = #tpu.pipeline_mode<synchronous>, transform_indices = @transform_6, window_bounds = array<i64: 1, 8>}, {pipeline_mode = #tpu.pipeline_mode<synchronous>, transform_indices = @transform_7, window_bounds = array<i64: 9, 8, 16>}, {pipeline_mode = #tpu.pipeline_mode<synchronous>, transform_indices = @transform_8, window_bounds = array<i64: 1, 16>}, {pipeline_mode = #tpu.pipeline_mode<synchronous>, transform_indices = @transform_9, window_bounds = array<i64: 16, 8>}, {pipeline_mode = #tpu.pipeline_mode<synchronous>, transform_indices = @transform_10, window_bounds = array<i64: 1, 8>}, {pipeline_mode = #tpu.pipeline_mode<synchronous>, transform_indices = @transform_11, window_bounds = array<i64: 9, 8, 16>}, {pipeline_mode = #tpu.pipeline_mode<synchronous>, transform_indices = @transform_12, window_bounds = array<i64: 1, 16>}, {transform_indices = @transform_13, window_bounds = array<i64: 1, 256, 8>}, {transform_indices = @transform_14, window_bounds = array<i64: 1, 256, 16>}]} {
    %0 = tpu.iota {dimensions = array<i32: 0>} : vector<256x8xi32>
    %c16_i32 = arith.constant 16 : i32
    %c0_i32 = arith.constant 0 : i32
    %1 = arith.cmpi eq, %c16_i32, %c0_i32 : i32
    %c1_i32 = arith.constant 1 : i32
    %2 = arith.select %1, %c1_i32, %c16_i32 : i32
    %3 = vector.broadcast %2 : i32 to vector<256x8xi32>
    %4 = arith.remsi %0, %3 : vector<256x8xi32>
    %c0_i32_0 = arith.constant 0 : i32
    %5 = vector.broadcast %c0_i32_0 : i32 to vector<256x8xi32>
    %6 = arith.cmpi ne, %4, %5 : vector<256x8xi32>
    %c0_i32_1 = arith.constant 0 : i32
    %7 = vector.broadcast %c0_i32_1 : i32 to vector<256x8xi32>
    %8 = arith.cmpi slt, %4, %7 : vector<256x8xi32>
    %c0_i32_2 = arith.constant 0 : i32
    %9 = arith.cmpi slt, %2, %c0_i32_2 : i32
    %10 = vector.broadcast %9 : i1 to vector<256x8xi1>
    %11 = vector.broadcast %10 : vector<256x8xi1> to vector<256x8xi1>
    %12 = arith.xori %8, %11 : vector<256x8xi1>
    %13 = arith.andi %12, %6 : vector<256x8xi1>
    %14 = vector.broadcast %2 : i32 to vector<256x8xi32>
    %15 = arith.addi %4, %14 : vector<256x8xi32>
    %16 = arith.select %13, %15, %4 : vector<256x8xi1>, vector<256x8xi32>
    %c1_i32_3 = arith.constant 1 : i32
    %17 = vector.broadcast %c1_i32_3 : i32 to vector<256x8xi32>
    %18 = arith.cmpi sge, %16, %17 : vector<256x8xi32>
    %19 = arith.extui %18 : vector<256x8xi1> to vector<256x8xi32>
    %20 = arith.sitofp %19 : vector<256x8xi32> to vector<256x8xf32>
    %c14_i32 = arith.constant 14 : i32
    %21 = vector.broadcast %c14_i32 : i32 to vector<256x8xi32>
    %22 = arith.cmpi sle, %16, %21 : vector<256x8xi32>
    %23 = arith.extui %22 : vector<256x8xi1> to vector<256x8xi32>
    %24 = arith.sitofp %23 : vector<256x8xi32> to vector<256x8xf32>
    %cst = arith.constant 0.000000e+00 : f32
    %25 = vector.broadcast %cst : f32 to vector<24x8xf32>
    %c0 = arith.constant 0 : index
    %c0_4 = arith.constant 0 : index
    %26 = vector.load %arg16[%c0, %c0_4] : memref<304x8xf32, #tpu.memory_space<vmem>>, vector<24x8xf32>
    tpu.vector_store %arg16[%c0, %c0_4], %25 {strides = array<i32>} : memref<304x8xf32, #tpu.memory_space<vmem>>, vector<24x8xf32>,
    %c280 = arith.constant 280 : index
    %c0_5 = arith.constant 0 : index
    %27 = vector.load %arg16[%c280, %c0_5] : memref<304x8xf32, #tpu.memory_space<vmem>>, vector<24x8xf32>
    tpu.vector_store %arg16[%c280, %c0_5], %25 {strides = array<i32>} : memref<304x8xf32, #tpu.memory_space<vmem>>, vector<24x8xf32>,
    %c0_6 = arith.constant 0 : index
    %c0_7 = arith.constant 0 : index
    %c0_8 = arith.constant 0 : index
    %28 = vector.load %arg1[%c0_6, %c0_7, %c0_8] : memref<1x256x8xbf16, #tpu.memory_space<vmem>>, vector<1x256x8xbf16>
    %29 = vector.shape_cast %28 : vector<1x256x8xbf16> to vector<256x8xbf16>
    %c0_9 = arith.constant 0 : index
    %c0_10 = arith.constant 0 : index
    %30 = vector.load %arg2[%c0_9, %c0_10] : memref<8x8xbf16, #tpu.memory_space<vmem>>, vector<8x8xbf16>
    %cst_11 = arith.constant dense<0.000000e+00> : vector<256x8xf32>
    %31 = tpu.matmul %29, %30, %cst_11 {dimension_numbers = #tpu.dot_dimension_numbers<[1], [0], [0], [1], [0, 0, 1, 1], [], []>} : vector<256x8xbf16>, vector<8x8xbf16>, vector<256x8xf32> -> vector<256x8xf32>
    %c0_12 = arith.constant 0 : index
    %c0_13 = arith.constant 0 : index
    %32 = vector.load %arg3[%c0_12, %c0_13] : memref<1x8xf32, #tpu.memory_space<vmem>>, vector<1x8xf32>
    %33 = vector.broadcast %32 : vector<1x8xf32> to vector<256x8xf32>
    %34 = arith.addf %31, %33 : vector<256x8xf32>
    %cst_14 = arith.constant 0.000000e+00 : f32
    %35 = vector.broadcast %cst_14 : f32 to vector<256x8xf32>
    %36 = arith.cmpf ogt, %34, %35 : vector<256x8xf32>
    %cst_15 = arith.constant 1.000000e-01 : f32
    %37 = vector.broadcast %cst_15 : f32 to vector<256x8xf32>
    %38 = arith.mulf %37, %34 : vector<256x8xf32>
    %39 = arith.select %36, %34, %38 : vector<256x8xi1>, vector<256x8xf32>
    %c24 = arith.constant 24 : index
    %c0_16 = arith.constant 0 : index
    %40 = vector.load %arg16[%c24, %c0_16] : memref<304x8xf32, #tpu.memory_space<vmem>>, vector<256x8xf32>
    tpu.vector_store %arg16[%c24, %c0_16], %39 {strides = array<i32>} : memref<304x8xf32, #tpu.memory_space<vmem>>, vector<256x8xf32>,
    %cst_17 = arith.constant 0.000000e+00 : f32
    %41 = vector.broadcast %cst_17 : f32 to vector<256x16xf32>
    %c7 = arith.constant 7 : index
    %c0_18 = arith.constant 0 : index
    %42 = vector.load %arg16[%c7, %c0_18] : memref<304x8xf32, #tpu.memory_space<vmem>>, vector<256x8xf32>
    %43 = arith.mulf %42, %20 : vector<256x8xf32>
    %44 = arith.truncf %43 : vector<256x8xf32> to vector<256x8xbf16>
    %c0_19 = arith.constant 0 : index
    %c0_20 = arith.constant 0 : index
    %c0_21 = arith.constant 0 : index
    %45 = vector.load %arg4[%c0_19, %c0_20, %c0_21] : memref<9x8x16xbf16, #tpu.memory_space<vmem>>, vector<1x8x16xbf16>
    %46 = vector.shape_cast %45 : vector<1x8x16xbf16> to vector<8x16xbf16>
    %cst_22 = arith.constant dense<0.000000e+00> : vector<256x16xf32>
    %47 = tpu.matmul %44, %46, %cst_22 {dimension_numbers = #tpu.dot_dimension_numbers<[1], [0], [0], [1], [0, 0, 1, 1], [], []>} : vector<256x8xbf16>, vector<8x16xbf16>, vector<256x16xf32> -> vector<256x16xf32>
    %48 = arith.addf %41, %47 : vector<256x16xf32>
    %c8 = arith.constant 8 : index
    %c0_23 = arith.constant 0 : index
    %49 = vector.load %arg16[%c8, %c0_23] : memref<304x8xf32, #tpu.memory_space<vmem>>, vector<256x8xf32>
    %50 = arith.truncf %49 : vector<256x8xf32> to vector<256x8xbf16>
    %c1 = arith.constant 1 : index
    %c0_24 = arith.constant 0 : index
    %c0_25 = arith.constant 0 : index
    %51 = vector.load %arg4[%c1, %c0_24, %c0_25] : memref<9x8x16xbf16, #tpu.memory_space<vmem>>, vector<1x8x16xbf16>
    %52 = vector.shape_cast %51 : vector<1x8x16xbf16> to vector<8x16xbf16>
    %cst_26 = arith.constant dense<0.000000e+00> : vector<256x16xf32>
    %53 = tpu.matmul %50, %52, %cst_26 {dimension_numbers = #tpu.dot_dimension_numbers<[1], [0], [0], [1], [0, 0, 1, 1], [], []>} : vector<256x8xbf16>, vector<8x16xbf16>, vector<256x16xf32> -> vector<256x16xf32>
    %54 = arith.addf %48, %53 : vector<256x16xf32>
    %c9 = arith.constant 9 : index
    %c0_27 = arith.constant 0 : index
    %55 = vector.load %arg16[%c9, %c0_27] : memref<304x8xf32, #tpu.memory_space<vmem>>, vector<256x8xf32>
    %56 = arith.mulf %55, %24 : vector<256x8xf32>
    %57 = arith.truncf %56 : vector<256x8xf32> to vector<256x8xbf16>
    %c2 = arith.constant 2 : index
    %c0_28 = arith.constant 0 : index
    %c0_29 = arith.constant 0 : index
    %58 = vector.load %arg4[%c2, %c0_28, %c0_29] : memref<9x8x16xbf16, #tpu.memory_space<vmem>>, vector<1x8x16xbf16>
    %59 = vector.shape_cast %58 : vector<1x8x16xbf16> to vector<8x16xbf16>
    %cst_30 = arith.constant dense<0.000000e+00> : vector<256x16xf32>
    %60 = tpu.matmul %57, %59, %cst_30 {dimension_numbers = #tpu.dot_dimension_numbers<[1], [0], [0], [1], [0, 0, 1, 1], [], []>} : vector<256x8xbf16>, vector<8x16xbf16>, vector<256x16xf32> -> vector<256x16xf32>
    %61 = arith.addf %54, %60 : vector<256x16xf32>
    %c23 = arith.constant 23 : index
    %c0_31 = arith.constant 0 : index
    %62 = vector.load %arg16[%c23, %c0_31] : memref<304x8xf32, #tpu.memory_space<vmem>>, vector<256x8xf32>
    %63 = arith.mulf %62, %20 : vector<256x8xf32>
    %64 = arith.truncf %63 : vector<256x8xf32> to vector<256x8xbf16>
    %c3 = arith.constant 3 : index
    %c0_32 = arith.constant 0 : index
    %c0_33 = arith.constant 0 : index
    %65 = vector.load %arg4[%c3, %c0_32, %c0_33] : memref<9x8x16xbf16, #tpu.memory_space<vmem>>, vector<1x8x16xbf16>
    %66 = vector.shape_cast %65 : vector<1x8x16xbf16> to vector<8x16xbf16>
    %cst_34 = arith.constant dense<0.000000e+00> : vector<256x16xf32>
    %67 = tpu.matmul %64, %66, %cst_34 {dimension_numbers = #tpu.dot_dimension_numbers<[1], [0], [0], [1], [0, 0, 1, 1], [], []>} : vector<256x8xbf16>, vector<8x16xbf16>, vector<256x16xf32> -> vector<256x16xf32>
    %68 = arith.addf %61, %67 : vector<256x16xf32>
    %c24_35 = arith.constant 24 : index
    %c0_36 = arith.constant 0 : index
    %69 = vector.load %arg16[%c24_35, %c0_36] : memref<304x8xf32, #tpu.memory_space<vmem>>, vector<256x8xf32>
    %70 = arith.truncf %69 : vector<256x8xf32> to vector<256x8xbf16>
    %c4 = arith.constant 4 : index
    %c0_37 = arith.constant 0 : index
    %c0_38 = arith.constant 0 : index
    %71 = vector.load %arg4[%c4, %c0_37, %c0_38] : memref<9x8x16xbf16, #tpu.memory_space<vmem>>, vector<1x8x16xbf16>
    %72 = vector.shape_cast %71 : vector<1x8x16xbf16> to vector<8x16xbf16>
    %cst_39 = arith.constant dense<0.000000e+00> : vector<256x16xf32>
    %73 = tpu.matmul %70, %72, %cst_39 {dimension_numbers = #tpu.dot_dimension_numbers<[1], [0], [0], [1], [0, 0, 1, 1], [], []>} : vector<256x8xbf16>, vector<8x16xbf16>, vector<256x16xf32> -> vector<256x16xf32>
    %74 = arith.addf %68, %73 : vector<256x16xf32>
    %c25 = arith.constant 25 : index
    %c0_40 = arith.constant 0 : index
    %75 = vector.load %arg16[%c25, %c0_40] : memref<304x8xf32, #tpu.memory_space<vmem>>, vector<256x8xf32>
    %76 = arith.mulf %75, %24 : vector<256x8xf32>
    %77 = arith.truncf %76 : vector<256x8xf32> to vector<256x8xbf16>
    %c5 = arith.constant 5 : index
    %c0_41 = arith.constant 0 : index
    %c0_42 = arith.constant 0 : index
    %78 = vector.load %arg4[%c5, %c0_41, %c0_42] : memref<9x8x16xbf16, #tpu.memory_space<vmem>>, vector<1x8x16xbf16>
    %79 = vector.shape_cast %78 : vector<1x8x16xbf16> to vector<8x16xbf16>
    %cst_43 = arith.constant dense<0.000000e+00> : vector<256x16xf32>
    %80 = tpu.matmul %77, %79, %cst_43 {dimension_numbers = #tpu.dot_dimension_numbers<[1], [0], [0], [1], [0, 0, 1, 1], [], []>} : vector<256x8xbf16>, vector<8x16xbf16>, vector<256x16xf32> -> vector<256x16xf32>
    %81 = arith.addf %74, %80 : vector<256x16xf32>
    %c39 = arith.constant 39 : index
    %c0_44 = arith.constant 0 : index
    %82 = vector.load %arg16[%c39, %c0_44] : memref<304x8xf32, #tpu.memory_space<vmem>>, vector<256x8xf32>
    %83 = arith.mulf %82, %20 : vector<256x8xf32>
    %84 = arith.truncf %83 : vector<256x8xf32> to vector<256x8xbf16>
    %c6 = arith.constant 6 : index
    %c0_45 = arith.constant 0 : index
    %c0_46 = arith.constant 0 : index
    %85 = vector.load %arg4[%c6, %c0_45, %c0_46] : memref<9x8x16xbf16, #tpu.memory_space<vmem>>, vector<1x8x16xbf16>
    %86 = vector.shape_cast %85 : vector<1x8x16xbf16> to vector<8x16xbf16>
    %cst_47 = arith.constant dense<0.000000e+00> : vector<256x16xf32>
    %87 = tpu.matmul %84, %86, %cst_47 {dimension_numbers = #tpu.dot_dimension_numbers<[1], [0], [0], [1], [0, 0, 1, 1], [], []>} : vector<256x8xbf16>, vector<8x16xbf16>, vector<256x16xf32> -> vector<256x16xf32>
    %88 = arith.addf %81, %87 : vector<256x16xf32>
    %c40 = arith.constant 40 : index
    %c0_48 = arith.constant 0 : index
    %89 = vector.load %arg16[%c40, %c0_48] : memref<304x8xf32, #tpu.memory_space<vmem>>, vector<256x8xf32>
    %90 = arith.truncf %89 : vector<256x8xf32> to vector<256x8xbf16>
    %c7_49 = arith.constant 7 : index
    %c0_50 = arith.constant 0 : index
    %c0_51 = arith.constant 0 : index
    %91 = vector.load %arg4[%c7_49, %c0_50, %c0_51] : memref<9x8x16xbf16, #tpu.memory_space<vmem>>, vector<1x8x16xbf16>
    %92 = vector.shape_cast %91 : vector<1x8x16xbf16> to vector<8x16xbf16>
    %cst_52 = arith.constant dense<0.000000e+00> : vector<256x16xf32>
    %93 = tpu.matmul %90, %92, %cst_52 {dimension_numbers = #tpu.dot_dimension_numbers<[1], [0], [0], [1], [0, 0, 1, 1], [], []>} : vector<256x8xbf16>, vector<8x16xbf16>, vector<256x16xf32> -> vector<256x16xf32>
    %94 = arith.addf %88, %93 : vector<256x16xf32>
    %c41 = arith.constant 41 : index
    %c0_53 = arith.constant 0 : index
    %95 = vector.load %arg16[%c41, %c0_53] : memref<304x8xf32, #tpu.memory_space<vmem>>, vector<256x8xf32>
    %96 = arith.mulf %95, %24 : vector<256x8xf32>
    %97 = arith.truncf %96 : vector<256x8xf32> to vector<256x8xbf16>
    %c8_54 = arith.constant 8 : index
    %c0_55 = arith.constant 0 : index
    %c0_56 = arith.constant 0 : index
    %98 = vector.load %arg4[%c8_54, %c0_55, %c0_56] : memref<9x8x16xbf16, #tpu.memory_space<vmem>>, vector<1x8x16xbf16>
    %99 = vector.shape_cast %98 : vector<1x8x16xbf16> to vector<8x16xbf16>
    %cst_57 = arith.constant dense<0.000000e+00> : vector<256x16xf32>
    %100 = tpu.matmul %97, %99, %cst_57 {dimension_numbers = #tpu.dot_dimension_numbers<[1], [0], [0], [1], [0, 0, 1, 1], [], []>} : vector<256x8xbf16>, vector<8x16xbf16>, vector<256x16xf32> -> vector<256x16xf32>
    %101 = arith.addf %94, %100 : vector<256x16xf32>
    %c0_58 = arith.constant 0 : index
    %c0_59 = arith.constant 0 : index
    %102 = vector.load %arg5[%c0_58, %c0_59] : memref<1x16xf32, #tpu.memory_space<vmem>>, vector<1x16xf32>
    %103 = vector.broadcast %102 : vector<1x16xf32> to vector<256x16xf32>
    %104 = arith.addf %101, %103 : vector<256x16xf32>
    %cst_60 = arith.constant 0.000000e+00 : f32
    %105 = vector.broadcast %cst_60 : f32 to vector<256x16xf32>
    %106 = arith.cmpf ogt, %104, %105 : vector<256x16xf32>
    %cst_61 = arith.constant 1.000000e-01 : f32
    %107 = vector.broadcast %cst_61 : f32 to vector<256x16xf32>
    %108 = arith.mulf %107, %104 : vector<256x16xf32>
    %109 = arith.select %106, %104, %108 : vector<256x16xi1>, vector<256x16xf32>
    %110 = arith.truncf %109 : vector<256x16xf32> to vector<256x16xbf16>
    %c0_62 = arith.constant 0 : index
    %c0_63 = arith.constant 0 : index
    %111 = vector.load %arg6[%c0_62, %c0_63] : memref<16x8xbf16, #tpu.memory_space<vmem>>, vector<16x8xbf16>
    %cst_64 = arith.constant dense<0.000000e+00> : vector<256x8xf32>
    %112 = tpu.matmul %110, %111, %cst_64 {dimension_numbers = #tpu.dot_dimension_numbers<[1], [0], [0], [1], [0, 0, 1, 1], [], []>} : vector<256x16xbf16>, vector<16x8xbf16>, vector<256x8xf32> -> vector<256x8xf32>
    %c0_65 = arith.constant 0 : index
    %c0_66 = arith.constant 0 : index
    %113 = vector.load %arg7[%c0_65, %c0_66] : memref<1x8xf32, #tpu.memory_space<vmem>>, vector<1x8xf32>
    %114 = vector.broadcast %113 : vector<1x8xf32> to vector<256x8xf32>
    %115 = arith.addf %112, %114 : vector<256x8xf32>
    %cst_67 = arith.constant 0.000000e+00 : f32
    %116 = vector.broadcast %cst_67 : f32 to vector<256x8xf32>
    %117 = arith.cmpf ogt, %115, %116 : vector<256x8xf32>
    %cst_68 = arith.constant 1.000000e-01 : f32
    %118 = vector.broadcast %cst_68 : f32 to vector<256x8xf32>
    %119 = arith.mulf %118, %115 : vector<256x8xf32>
    %120 = arith.select %117, %115, %119 : vector<256x8xi1>, vector<256x8xf32>
    %c24_69 = arith.constant 24 : index
    %c0_70 = arith.constant 0 : index
    %121 = vector.load %arg16[%c24_69, %c0_70] : memref<304x8xf32, #tpu.memory_space<vmem>>, vector<256x8xf32>
    tpu.vector_store %arg16[%c24_69, %c0_70], %120 {strides = array<i32>} : memref<304x8xf32, #tpu.memory_space<vmem>>, vector<256x8xf32>,
    %cst_71 = arith.constant 0.000000e+00 : f32
    %122 = vector.broadcast %cst_71 : f32 to vector<256x16xf32>
    %c7_72 = arith.constant 7 : index
    %c0_73 = arith.constant 0 : index
    %123 = vector.load %arg16[%c7_72, %c0_73] : memref<304x8xf32, #tpu.memory_space<vmem>>, vector<256x8xf32>
    %124 = arith.mulf %123, %20 : vector<256x8xf32>
    %125 = arith.truncf %124 : vector<256x8xf32> to vector<256x8xbf16>
    %c0_74 = arith.constant 0 : index
    %c0_75 = arith.constant 0 : index
    %c0_76 = arith.constant 0 : index
    %126 = vector.load %arg8[%c0_74, %c0_75, %c0_76] : memref<9x8x16xbf16, #tpu.memory_space<vmem>>, vector<1x8x16xbf16>
    %127 = vector.shape_cast %126 : vector<1x8x16xbf16> to vector<8x16xbf16>
    %cst_77 = arith.constant dense<0.000000e+00> : vector<256x16xf32>
    %128 = tpu.matmul %125, %127, %cst_77 {dimension_numbers = #tpu.dot_dimension_numbers<[1], [0], [0], [1], [0, 0, 1, 1], [], []>} : vector<256x8xbf16>, vector<8x16xbf16>, vector<256x16xf32> -> vector<256x16xf32>
    %129 = arith.addf %122, %128 : vector<256x16xf32>
    %c8_78 = arith.constant 8 : index
    %c0_79 = arith.constant 0 : index
    %130 = vector.load %arg16[%c8_78, %c0_79] : memref<304x8xf32, #tpu.memory_space<vmem>>, vector<256x8xf32>
    %131 = arith.truncf %130 : vector<256x8xf32> to vector<256x8xbf16>
    %c1_80 = arith.constant 1 : index
    %c0_81 = arith.constant 0 : index
    %c0_82 = arith.constant 0 : index
    %132 = vector.load %arg8[%c1_80, %c0_81, %c0_82] : memref<9x8x16xbf16, #tpu.memory_space<vmem>>, vector<1x8x16xbf16>
    %133 = vector.shape_cast %132 : vector<1x8x16xbf16> to vector<8x16xbf16>
    %cst_83 = arith.constant dense<0.000000e+00> : vector<256x16xf32>
    %134 = tpu.matmul %131, %133, %cst_83 {dimension_numbers = #tpu.dot_dimension_numbers<[1], [0], [0], [1], [0, 0, 1, 1], [], []>} : vector<256x8xbf16>, vector<8x16xbf16>, vector<256x16xf32> -> vector<256x16xf32>
    %135 = arith.addf %129, %134 : vector<256x16xf32>
    %c9_84 = arith.constant 9 : index
    %c0_85 = arith.constant 0 : index
    %136 = vector.load %arg16[%c9_84, %c0_85] : memref<304x8xf32, #tpu.memory_space<vmem>>, vector<256x8xf32>
    %137 = arith.mulf %136, %24 : vector<256x8xf32>
    %138 = arith.truncf %137 : vector<256x8xf32> to vector<256x8xbf16>
    %c2_86 = arith.constant 2 : index
    %c0_87 = arith.constant 0 : index
    %c0_88 = arith.constant 0 : index
    %139 = vector.load %arg8[%c2_86, %c0_87, %c0_88] : memref<9x8x16xbf16, #tpu.memory_space<vmem>>, vector<1x8x16xbf16>
    %140 = vector.shape_cast %139 : vector<1x8x16xbf16> to vector<8x16xbf16>
    %cst_89 = arith.constant dense<0.000000e+00> : vector<256x16xf32>
    %141 = tpu.matmul %138, %140, %cst_89 {dimension_numbers = #tpu.dot_dimension_numbers<[1], [0], [0], [1], [0, 0, 1, 1], [], []>} : vector<256x8xbf16>, vector<8x16xbf16>, vector<256x16xf32> -> vector<256x16xf32>
    %142 = arith.addf %135, %141 : vector<256x16xf32>
    %c23_90 = arith.constant 23 : index
    %c0_91 = arith.constant 0 : index
    %143 = vector.load %arg16[%c23_90, %c0_91] : memref<304x8xf32, #tpu.memory_space<vmem>>, vector<256x8xf32>
    %144 = arith.mulf %143, %20 : vector<256x8xf32>
    %145 = arith.truncf %144 : vector<256x8xf32> to vector<256x8xbf16>
    %c3_92 = arith.constant 3 : index
    %c0_93 = arith.constant 0 : index
    %c0_94 = arith.constant 0 : index
    %146 = vector.load %arg8[%c3_92, %c0_93, %c0_94] : memref<9x8x16xbf16, #tpu.memory_space<vmem>>, vector<1x8x16xbf16>
    %147 = vector.shape_cast %146 : vector<1x8x16xbf16> to vector<8x16xbf16>
    %cst_95 = arith.constant dense<0.000000e+00> : vector<256x16xf32>
    %148 = tpu.matmul %145, %147, %cst_95 {dimension_numbers = #tpu.dot_dimension_numbers<[1], [0], [0], [1], [0, 0, 1, 1], [], []>} : vector<256x8xbf16>, vector<8x16xbf16>, vector<256x16xf32> -> vector<256x16xf32>
    %149 = arith.addf %142, %148 : vector<256x16xf32>
    %c24_96 = arith.constant 24 : index
    %c0_97 = arith.constant 0 : index
    %150 = vector.load %arg16[%c24_96, %c0_97] : memref<304x8xf32, #tpu.memory_space<vmem>>, vector<256x8xf32>
    %151 = arith.truncf %150 : vector<256x8xf32> to vector<256x8xbf16>
    %c4_98 = arith.constant 4 : index
    %c0_99 = arith.constant 0 : index
    %c0_100 = arith.constant 0 : index
    %152 = vector.load %arg8[%c4_98, %c0_99, %c0_100] : memref<9x8x16xbf16, #tpu.memory_space<vmem>>, vector<1x8x16xbf16>
    %153 = vector.shape_cast %152 : vector<1x8x16xbf16> to vector<8x16xbf16>
    %cst_101 = arith.constant dense<0.000000e+00> : vector<256x16xf32>
    %154 = tpu.matmul %151, %153, %cst_101 {dimension_numbers = #tpu.dot_dimension_numbers<[1], [0], [0], [1], [0, 0, 1, 1], [], []>} : vector<256x8xbf16>, vector<8x16xbf16>, vector<256x16xf32> -> vector<256x16xf32>
    %155 = arith.addf %149, %154 : vector<256x16xf32>
    %c25_102 = arith.constant 25 : index
    %c0_103 = arith.constant 0 : index
    %156 = vector.load %arg16[%c25_102, %c0_103] : memref<304x8xf32, #tpu.memory_space<vmem>>, vector<256x8xf32>
    %157 = arith.mulf %156, %24 : vector<256x8xf32>
    %158 = arith.truncf %157 : vector<256x8xf32> to vector<256x8xbf16>
    %c5_104 = arith.constant 5 : index
    %c0_105 = arith.constant 0 : index
    %c0_106 = arith.constant 0 : index
    %159 = vector.load %arg8[%c5_104, %c0_105, %c0_106] : memref<9x8x16xbf16, #tpu.memory_space<vmem>>, vector<1x8x16xbf16>
    %160 = vector.shape_cast %159 : vector<1x8x16xbf16> to vector<8x16xbf16>
    %cst_107 = arith.constant dense<0.000000e+00> : vector<256x16xf32>
    %161 = tpu.matmul %158, %160, %cst_107 {dimension_numbers = #tpu.dot_dimension_numbers<[1], [0], [0], [1], [0, 0, 1, 1], [], []>} : vector<256x8xbf16>, vector<8x16xbf16>, vector<256x16xf32> -> vector<256x16xf32>
    %162 = arith.addf %155, %161 : vector<256x16xf32>
    %c39_108 = arith.constant 39 : index
    %c0_109 = arith.constant 0 : index
    %163 = vector.load %arg16[%c39_108, %c0_109] : memref<304x8xf32, #tpu.memory_space<vmem>>, vector<256x8xf32>
    %164 = arith.mulf %163, %20 : vector<256x8xf32>
    %165 = arith.truncf %164 : vector<256x8xf32> to vector<256x8xbf16>
    %c6_110 = arith.constant 6 : index
    %c0_111 = arith.constant 0 : index
    %c0_112 = arith.constant 0 : index
    %166 = vector.load %arg8[%c6_110, %c0_111, %c0_112] : memref<9x8x16xbf16, #tpu.memory_space<vmem>>, vector<1x8x16xbf16>
    %167 = vector.shape_cast %166 : vector<1x8x16xbf16> to vector<8x16xbf16>
    %cst_113 = arith.constant dense<0.000000e+00> : vector<256x16xf32>
    %168 = tpu.matmul %165, %167, %cst_113 {dimension_numbers = #tpu.dot_dimension_numbers<[1], [0], [0], [1], [0, 0, 1, 1], [], []>} : vector<256x8xbf16>, vector<8x16xbf16>, vector<256x16xf32> -> vector<256x16xf32>
    %169 = arith.addf %162, %168 : vector<256x16xf32>
    %c40_114 = arith.constant 40 : index
    %c0_115 = arith.constant 0 : index
    %170 = vector.load %arg16[%c40_114, %c0_115] : memref<304x8xf32, #tpu.memory_space<vmem>>, vector<256x8xf32>
    %171 = arith.truncf %170 : vector<256x8xf32> to vector<256x8xbf16>
    %c7_116 = arith.constant 7 : index
    %c0_117 = arith.constant 0 : index
    %c0_118 = arith.constant 0 : index
    %172 = vector.load %arg8[%c7_116, %c0_117, %c0_118] : memref<9x8x16xbf16, #tpu.memory_space<vmem>>, vector<1x8x16xbf16>
    %173 = vector.shape_cast %172 : vector<1x8x16xbf16> to vector<8x16xbf16>
    %cst_119 = arith.constant dense<0.000000e+00> : vector<256x16xf32>
    %174 = tpu.matmul %171, %173, %cst_119 {dimension_numbers = #tpu.dot_dimension_numbers<[1], [0], [0], [1], [0, 0, 1, 1], [], []>} : vector<256x8xbf16>, vector<8x16xbf16>, vector<256x16xf32> -> vector<256x16xf32>
    %175 = arith.addf %169, %174 : vector<256x16xf32>
    %c41_120 = arith.constant 41 : index
    %c0_121 = arith.constant 0 : index
    %176 = vector.load %arg16[%c41_120, %c0_121] : memref<304x8xf32, #tpu.memory_space<vmem>>, vector<256x8xf32>
    %177 = arith.mulf %176, %24 : vector<256x8xf32>
    %178 = arith.truncf %177 : vector<256x8xf32> to vector<256x8xbf16>
    %c8_122 = arith.constant 8 : index
    %c0_123 = arith.constant 0 : index
    %c0_124 = arith.constant 0 : index
    %179 = vector.load %arg8[%c8_122, %c0_123, %c0_124] : memref<9x8x16xbf16, #tpu.memory_space<vmem>>, vector<1x8x16xbf16>
    %180 = vector.shape_cast %179 : vector<1x8x16xbf16> to vector<8x16xbf16>
    %cst_125 = arith.constant dense<0.000000e+00> : vector<256x16xf32>
    %181 = tpu.matmul %178, %180, %cst_125 {dimension_numbers = #tpu.dot_dimension_numbers<[1], [0], [0], [1], [0, 0, 1, 1], [], []>} : vector<256x8xbf16>, vector<8x16xbf16>, vector<256x16xf32> -> vector<256x16xf32>
    %182 = arith.addf %175, %181 : vector<256x16xf32>
    %c0_126 = arith.constant 0 : index
    %c0_127 = arith.constant 0 : index
    %183 = vector.load %arg9[%c0_126, %c0_127] : memref<1x16xf32, #tpu.memory_space<vmem>>, vector<1x16xf32>
    %184 = vector.broadcast %183 : vector<1x16xf32> to vector<256x16xf32>
    %185 = arith.addf %182, %184 : vector<256x16xf32>
    %cst_128 = arith.constant 0.000000e+00 : f32
    %186 = vector.broadcast %cst_128 : f32 to vector<256x16xf32>
    %187 = arith.cmpf ogt, %185, %186 : vector<256x16xf32>
    %cst_129 = arith.constant 1.000000e-01 : f32
    %188 = vector.broadcast %cst_129 : f32 to vector<256x16xf32>
    %189 = arith.mulf %188, %185 : vector<256x16xf32>
    %190 = arith.select %187, %185, %189 : vector<256x16xi1>, vector<256x16xf32>
    %191 = arith.truncf %190 : vector<256x16xf32> to vector<256x16xbf16>
    %c0_130 = arith.constant 0 : index
    %c0_131 = arith.constant 0 : index
    %192 = vector.load %arg10[%c0_130, %c0_131] : memref<16x8xbf16, #tpu.memory_space<vmem>>, vector<16x8xbf16>
    %cst_132 = arith.constant dense<0.000000e+00> : vector<256x8xf32>
    %193 = tpu.matmul %191, %192, %cst_132 {dimension_numbers = #tpu.dot_dimension_numbers<[1], [0], [0], [1], [0, 0, 1, 1], [], []>} : vector<256x16xbf16>, vector<16x8xbf16>, vector<256x8xf32> -> vector<256x8xf32>
    %c0_133 = arith.constant 0 : index
    %c0_134 = arith.constant 0 : index
    %194 = vector.load %arg11[%c0_133, %c0_134] : memref<1x8xf32, #tpu.memory_space<vmem>>, vector<1x8xf32>
    %195 = vector.broadcast %194 : vector<1x8xf32> to vector<256x8xf32>
    %196 = arith.addf %193, %195 : vector<256x8xf32>
    %cst_135 = arith.constant 0.000000e+00 : f32
    %197 = vector.broadcast %cst_135 : f32 to vector<256x8xf32>
    %198 = arith.cmpf ogt, %196, %197 : vector<256x8xf32>
    %cst_136 = arith.constant 1.000000e-01 : f32
    %199 = vector.broadcast %cst_136 : f32 to vector<256x8xf32>
    %200 = arith.mulf %199, %196 : vector<256x8xf32>
    %201 = arith.select %198, %196, %200 : vector<256x8xi1>, vector<256x8xf32>
    %202 = arith.truncf %201 : vector<256x8xf32> to vector<256x8xbf16>
    %c0_137 = arith.constant 0 : index
    %c0_138 = arith.constant 0 : index
    %c0_139 = arith.constant 0 : index
    %203 = vector.load %arg14[%c0_137, %c0_138, %c0_139] : memref<1x256x8xbf16, #tpu.memory_space<vmem>>, vector<1x256x8xbf16>
    %204 = vector.shape_cast %203 : vector<1x256x8xbf16> to vector<256x8xbf16>
    %205 = vector.shape_cast %202 : vector<256x8xbf16> to vector<1x256x8xbf16>
    tpu.vector_store %arg14[%c0_137, %c0_138, %c0_139], %205 {strides = array<i32>} : memref<1x256x8xbf16, #tpu.memory_space<vmem>>, vector<1x256x8xbf16>,
    %c24_140 = arith.constant 24 : index
    %c0_141 = arith.constant 0 : index
    %206 = vector.load %arg16[%c24_140, %c0_141] : memref<304x8xf32, #tpu.memory_space<vmem>>, vector<256x8xf32>
    tpu.vector_store %arg16[%c24_140, %c0_141], %201 {strides = array<i32>} : memref<304x8xf32, #tpu.memory_space<vmem>>, vector<256x8xf32>,
    %cst_142 = arith.constant 0.000000e+00 : f32
    %207 = vector.broadcast %cst_142 : f32 to vector<256x16xf32>
    %c7_143 = arith.constant 7 : index
    %c0_144 = arith.constant 0 : index
    %208 = vector.load %arg16[%c7_143, %c0_144] : memref<304x8xf32, #tpu.memory_space<vmem>>, vector<256x8xf32>
    %209 = arith.mulf %208, %20 : vector<256x8xf32>
    %210 = arith.truncf %209 : vector<256x8xf32> to vector<256x8xbf16>
    %c0_145 = arith.constant 0 : index
    %c0_146 = arith.constant 0 : index
    %c0_147 = arith.constant 0 : index
    %211 = vector.load %arg12[%c0_145, %c0_146, %c0_147] : memref<9x8x16xbf16, #tpu.memory_space<vmem>>, vector<1x8x16xbf16>
    %212 = vector.shape_cast %211 : vector<1x8x16xbf16> to vector<8x16xbf16>
    %cst_148 = arith.constant dense<0.000000e+00> : vector<256x16xf32>
    %213 = tpu.matmul %210, %212, %cst_148 {dimension_numbers = #tpu.dot_dimension_numbers<[1], [0], [0], [1], [0, 0, 1, 1], [], []>} : vector<256x8xbf16>, vector<8x16xbf16>, vector<256x16xf32> -> vector<256x16xf32>
    %214 = arith.addf %207, %213 : vector<256x16xf32>
    %c8_149 = arith.constant 8 : index
    %c0_150 = arith.constant 0 : index
    %215 = vector.load %arg16[%c8_149, %c0_150] : memref<304x8xf32, #tpu.memory_space<vmem>>, vector<256x8xf32>
    %216 = arith.truncf %215 : vector<256x8xf32> to vector<256x8xbf16>
    %c1_151 = arith.constant 1 : index
    %c0_152 = arith.constant 0 : index
    %c0_153 = arith.constant 0 : index
    %217 = vector.load %arg12[%c1_151, %c0_152, %c0_153] : memref<9x8x16xbf16, #tpu.memory_space<vmem>>, vector<1x8x16xbf16>
    %218 = vector.shape_cast %217 : vector<1x8x16xbf16> to vector<8x16xbf16>
    %cst_154 = arith.constant dense<0.000000e+00> : vector<256x16xf32>
    %219 = tpu.matmul %216, %218, %cst_154 {dimension_numbers = #tpu.dot_dimension_numbers<[1], [0], [0], [1], [0, 0, 1, 1], [], []>} : vector<256x8xbf16>, vector<8x16xbf16>, vector<256x16xf32> -> vector<256x16xf32>
    %220 = arith.addf %214, %219 : vector<256x16xf32>
    %c9_155 = arith.constant 9 : index
    %c0_156 = arith.constant 0 : index
    %221 = vector.load %arg16[%c9_155, %c0_156] : memref<304x8xf32, #tpu.memory_space<vmem>>, vector<256x8xf32>
    %222 = arith.mulf %221, %24 : vector<256x8xf32>
    %223 = arith.truncf %222 : vector<256x8xf32> to vector<256x8xbf16>
    %c2_157 = arith.constant 2 : index
    %c0_158 = arith.constant 0 : index
    %c0_159 = arith.constant 0 : index
    %224 = vector.load %arg12[%c2_157, %c0_158, %c0_159] : memref<9x8x16xbf16, #tpu.memory_space<vmem>>, vector<1x8x16xbf16>
    %225 = vector.shape_cast %224 : vector<1x8x16xbf16> to vector<8x16xbf16>
    %cst_160 = arith.constant dense<0.000000e+00> : vector<256x16xf32>
    %226 = tpu.matmul %223, %225, %cst_160 {dimension_numbers = #tpu.dot_dimension_numbers<[1], [0], [0], [1], [0, 0, 1, 1], [], []>} : vector<256x8xbf16>, vector<8x16xbf16>, vector<256x16xf32> -> vector<256x16xf32>
    %227 = arith.addf %220, %226 : vector<256x16xf32>
    %c23_161 = arith.constant 23 : index
    %c0_162 = arith.constant 0 : index
    %228 = vector.load %arg16[%c23_161, %c0_162] : memref<304x8xf32, #tpu.memory_space<vmem>>, vector<256x8xf32>
    %229 = arith.mulf %228, %20 : vector<256x8xf32>
    %230 = arith.truncf %229 : vector<256x8xf32> to vector<256x8xbf16>
    %c3_163 = arith.constant 3 : index
    %c0_164 = arith.constant 0 : index
    %c0_165 = arith.constant 0 : index
    %231 = vector.load %arg12[%c3_163, %c0_164, %c0_165] : memref<9x8x16xbf16, #tpu.memory_space<vmem>>, vector<1x8x16xbf16>
    %232 = vector.shape_cast %231 : vector<1x8x16xbf16> to vector<8x16xbf16>
    %cst_166 = arith.constant dense<0.000000e+00> : vector<256x16xf32>
    %233 = tpu.matmul %230, %232, %cst_166 {dimension_numbers = #tpu.dot_dimension_numbers<[1], [0], [0], [1], [0, 0, 1, 1], [], []>} : vector<256x8xbf16>, vector<8x16xbf16>, vector<256x16xf32> -> vector<256x16xf32>
    %234 = arith.addf %227, %233 : vector<256x16xf32>
    %c24_167 = arith.constant 24 : index
    %c0_168 = arith.constant 0 : index
    %235 = vector.load %arg16[%c24_167, %c0_168] : memref<304x8xf32, #tpu.memory_space<vmem>>, vector<256x8xf32>
    %236 = arith.truncf %235 : vector<256x8xf32> to vector<256x8xbf16>
    %c4_169 = arith.constant 4 : index
    %c0_170 = arith.constant 0 : index
    %c0_171 = arith.constant 0 : index
    %237 = vector.load %arg12[%c4_169, %c0_170, %c0_171] : memref<9x8x16xbf16, #tpu.memory_space<vmem>>, vector<1x8x16xbf16>
    %238 = vector.shape_cast %237 : vector<1x8x16xbf16> to vector<8x16xbf16>
    %cst_172 = arith.constant dense<0.000000e+00> : vector<256x16xf32>
    %239 = tpu.matmul %236, %238, %cst_172 {dimension_numbers = #tpu.dot_dimension_numbers<[1], [0], [0], [1], [0, 0, 1, 1], [], []>} : vector<256x8xbf16>, vector<8x16xbf16>, vector<256x16xf32> -> vector<256x16xf32>
    %240 = arith.addf %234, %239 : vector<256x16xf32>
    %c25_173 = arith.constant 25 : index
    %c0_174 = arith.constant 0 : index
    %241 = vector.load %arg16[%c25_173, %c0_174] : memref<304x8xf32, #tpu.memory_space<vmem>>, vector<256x8xf32>
    %242 = arith.mulf %241, %24 : vector<256x8xf32>
    %243 = arith.truncf %242 : vector<256x8xf32> to vector<256x8xbf16>
    %c5_175 = arith.constant 5 : index
    %c0_176 = arith.constant 0 : index
    %c0_177 = arith.constant 0 : index
    %244 = vector.load %arg12[%c5_175, %c0_176, %c0_177] : memref<9x8x16xbf16, #tpu.memory_space<vmem>>, vector<1x8x16xbf16>
    %245 = vector.shape_cast %244 : vector<1x8x16xbf16> to vector<8x16xbf16>
    %cst_178 = arith.constant dense<0.000000e+00> : vector<256x16xf32>
    %246 = tpu.matmul %243, %245, %cst_178 {dimension_numbers = #tpu.dot_dimension_numbers<[1], [0], [0], [1], [0, 0, 1, 1], [], []>} : vector<256x8xbf16>, vector<8x16xbf16>, vector<256x16xf32> -> vector<256x16xf32>
    %247 = arith.addf %240, %246 : vector<256x16xf32>
    %c39_179 = arith.constant 39 : index
    %c0_180 = arith.constant 0 : index
    %248 = vector.load %arg16[%c39_179, %c0_180] : memref<304x8xf32, #tpu.memory_space<vmem>>, vector<256x8xf32>
    %249 = arith.mulf %248, %20 : vector<256x8xf32>
    %250 = arith.truncf %249 : vector<256x8xf32> to vector<256x8xbf16>
    %c6_181 = arith.constant 6 : index
    %c0_182 = arith.constant 0 : index
    %c0_183 = arith.constant 0 : index
    %251 = vector.load %arg12[%c6_181, %c0_182, %c0_183] : memref<9x8x16xbf16, #tpu.memory_space<vmem>>, vector<1x8x16xbf16>
    %252 = vector.shape_cast %251 : vector<1x8x16xbf16> to vector<8x16xbf16>
    %cst_184 = arith.constant dense<0.000000e+00> : vector<256x16xf32>
    %253 = tpu.matmul %250, %252, %cst_184 {dimension_numbers = #tpu.dot_dimension_numbers<[1], [0], [0], [1], [0, 0, 1, 1], [], []>} : vector<256x8xbf16>, vector<8x16xbf16>, vector<256x16xf32> -> vector<256x16xf32>
    %254 = arith.addf %247, %253 : vector<256x16xf32>
    %c40_185 = arith.constant 40 : index
    %c0_186 = arith.constant 0 : index
    %255 = vector.load %arg16[%c40_185, %c0_186] : memref<304x8xf32, #tpu.memory_space<vmem>>, vector<256x8xf32>
    %256 = arith.truncf %255 : vector<256x8xf32> to vector<256x8xbf16>
    %c7_187 = arith.constant 7 : index
    %c0_188 = arith.constant 0 : index
    %c0_189 = arith.constant 0 : index
    %257 = vector.load %arg12[%c7_187, %c0_188, %c0_189] : memref<9x8x16xbf16, #tpu.memory_space<vmem>>, vector<1x8x16xbf16>
    %258 = vector.shape_cast %257 : vector<1x8x16xbf16> to vector<8x16xbf16>
    %cst_190 = arith.constant dense<0.000000e+00> : vector<256x16xf32>
    %259 = tpu.matmul %256, %258, %cst_190 {dimension_numbers = #tpu.dot_dimension_numbers<[1], [0], [0], [1], [0, 0, 1, 1], [], []>} : vector<256x8xbf16>, vector<8x16xbf16>, vector<256x16xf32> -> vector<256x16xf32>
    %260 = arith.addf %254, %259 : vector<256x16xf32>
    %c41_191 = arith.constant 41 : index
    %c0_192 = arith.constant 0 : index
    %261 = vector.load %arg16[%c41_191, %c0_192] : memref<304x8xf32, #tpu.memory_space<vmem>>, vector<256x8xf32>
    %262 = arith.mulf %261, %24 : vector<256x8xf32>
    %263 = arith.truncf %262 : vector<256x8xf32> to vector<256x8xbf16>
    %c8_193 = arith.constant 8 : index
    %c0_194 = arith.constant 0 : index
    %c0_195 = arith.constant 0 : index
    %264 = vector.load %arg12[%c8_193, %c0_194, %c0_195] : memref<9x8x16xbf16, #tpu.memory_space<vmem>>, vector<1x8x16xbf16>
    %265 = vector.shape_cast %264 : vector<1x8x16xbf16> to vector<8x16xbf16>
    %cst_196 = arith.constant dense<0.000000e+00> : vector<256x16xf32>
    %266 = tpu.matmul %263, %265, %cst_196 {dimension_numbers = #tpu.dot_dimension_numbers<[1], [0], [0], [1], [0, 0, 1, 1], [], []>} : vector<256x8xbf16>, vector<8x16xbf16>, vector<256x16xf32> -> vector<256x16xf32>
    %267 = arith.addf %260, %266 : vector<256x16xf32>
    %c0_197 = arith.constant 0 : index
    %c0_198 = arith.constant 0 : index
    %268 = vector.load %arg13[%c0_197, %c0_198] : memref<1x16xf32, #tpu.memory_space<vmem>>, vector<1x16xf32>
    %269 = vector.broadcast %268 : vector<1x16xf32> to vector<256x16xf32>
    %270 = arith.addf %267, %269 : vector<256x16xf32>
    %cst_199 = arith.constant 0.000000e+00 : f32
    %271 = vector.broadcast %cst_199 : f32 to vector<256x16xf32>
    %272 = arith.cmpf ogt, %270, %271 : vector<256x16xf32>
    %cst_200 = arith.constant 1.000000e-01 : f32
    %273 = vector.broadcast %cst_200 : f32 to vector<256x16xf32>
    %274 = arith.mulf %273, %270 : vector<256x16xf32>
    %275 = arith.select %272, %270, %274 : vector<256x16xi1>, vector<256x16xf32>
    %276 = arith.truncf %275 : vector<256x16xf32> to vector<256x16xbf16>
    %c0_201 = arith.constant 0 : index
    %c0_202 = arith.constant 0 : index
    %c0_203 = arith.constant 0 : index
    %277 = vector.load %arg15[%c0_201, %c0_202, %c0_203] : memref<1x256x16xbf16, #tpu.memory_space<vmem>>, vector<1x256x16xbf16>
    %278 = vector.shape_cast %277 : vector<1x256x16xbf16> to vector<256x16xbf16>
    %279 = vector.shape_cast %276 : vector<256x16xbf16> to vector<1x256x16xbf16>
    tpu.vector_store %arg15[%c0_201, %c0_202, %c0_203], %279 {strides = array<i32>} : memref<1x256x16xbf16, #tpu.memory_space<vmem>>, vector<1x256x16xbf16>,
    return
  }
  func.func @transform_0(%arg0: i32) -> (i32, i32, i32) {
    %c0_i32 = arith.constant 0 : i32
    %c0_i32_0 = arith.constant 0 : i32
    %c0_i32_1 = arith.constant 0 : i32
    return %arg0, %c0_i32, %c0_i32_0 : i32, i32, i32
  }
  func.func @transform_1(%arg0: i32) -> (i32, i32) {
    %c0_i32 = arith.constant 0 : i32
    %c0_i32_0 = arith.constant 0 : i32
    %c0_i32_1 = arith.constant 0 : i32
    return %c0_i32, %c0_i32_0 : i32, i32
  }
  func.func @transform_2(%arg0: i32) -> (i32, i32) {
    %c0_i32 = arith.constant 0 : i32
    %c0_i32_0 = arith.constant 0 : i32
    %c0_i32_1 = arith.constant 0 : i32
    return %c0_i32, %c0_i32_0 : i32, i32
  }
  func.func @transform_3(%arg0: i32) -> (i32, i32, i32) {
    %c0_i32 = arith.constant 0 : i32
    %c0_i32_0 = arith.constant 0 : i32
    %c0_i32_1 = arith.constant 0 : i32
    %c0_i32_2 = arith.constant 0 : i32
    return %c0_i32, %c0_i32_0, %c0_i32_1 : i32, i32, i32
  }
  func.func @transform_4(%arg0: i32) -> (i32, i32) {
    %c0_i32 = arith.constant 0 : i32
    %c0_i32_0 = arith.constant 0 : i32
    %c0_i32_1 = arith.constant 0 : i32
    return %c0_i32, %c0_i32_0 : i32, i32
  }
  func.func @transform_5(%arg0: i32) -> (i32, i32) {
    %c0_i32 = arith.constant 0 : i32
    %c0_i32_0 = arith.constant 0 : i32
    %c0_i32_1 = arith.constant 0 : i32
    return %c0_i32, %c0_i32_0 : i32, i32
  }
  func.func @transform_6(%arg0: i32) -> (i32, i32) {
    %c0_i32 = arith.constant 0 : i32
    %c0_i32_0 = arith.constant 0 : i32
    %c0_i32_1 = arith.constant 0 : i32
    return %c0_i32, %c0_i32_0 : i32, i32
  }
  func.func @transform_7(%arg0: i32) -> (i32, i32, i32) {
    %c0_i32 = arith.constant 0 : i32
    %c0_i32_0 = arith.constant 0 : i32
    %c0_i32_1 = arith.constant 0 : i32
    %c0_i32_2 = arith.constant 0 : i32
    return %c0_i32, %c0_i32_0, %c0_i32_1 : i32, i32, i32
  }
  func.func @transform_8(%arg0: i32) -> (i32, i32) {
    %c0_i32 = arith.constant 0 : i32
    %c0_i32_0 = arith.constant 0 : i32
    %c0_i32_1 = arith.constant 0 : i32
    return %c0_i32, %c0_i32_0 : i32, i32
  }
  func.func @transform_9(%arg0: i32) -> (i32, i32) {
    %c0_i32 = arith.constant 0 : i32
    %c0_i32_0 = arith.constant 0 : i32
    %c0_i32_1 = arith.constant 0 : i32
    return %c0_i32, %c0_i32_0 : i32, i32
  }
  func.func @transform_10(%arg0: i32) -> (i32, i32) {
    %c0_i32 = arith.constant 0 : i32
    %c0_i32_0 = arith.constant 0 : i32
    %c0_i32_1 = arith.constant 0 : i32
    return %c0_i32, %c0_i32_0 : i32, i32
  }
  func.func @transform_11(%arg0: i32) -> (i32, i32, i32) {
    %c0_i32 = arith.constant 0 : i32
    %c0_i32_0 = arith.constant 0 : i32
    %c0_i32_1 = arith.constant 0 : i32
    %c0_i32_2 = arith.constant 0 : i32
    return %c0_i32, %c0_i32_0, %c0_i32_1 : i32, i32, i32
  }
  func.func @transform_12(%arg0: i32) -> (i32, i32) {
    %c0_i32 = arith.constant 0 : i32
    %c0_i32_0 = arith.constant 0 : i32
    %c0_i32_1 = arith.constant 0 : i32
    return %c0_i32, %c0_i32_0 : i32, i32
  }
  func.func @transform_13(%arg0: i32) -> (i32, i32, i32) {
    %c0_i32 = arith.constant 0 : i32
    %c0_i32_0 = arith.constant 0 : i32
    %c0_i32_1 = arith.constant 0 : i32
    return %arg0, %c0_i32, %c0_i32_0 : i32, i32, i32
  }
  func.func @transform_14(%arg0: i32) -> (i32, i32, i32) {
    %c0_i32 = arith.constant 0 : i32
    %c0_i32_0 = arith.constant 0 : i32
    %c0_i32_1 = arith.constant 0 : i32
    return %arg0, %c0_i32, %c0_i32_0 : i32, i32, i32
  }
}

</mosaic_0001>

<bundles_post_ra>
// kernel: ppyolo_det_block_forward.1
= control target key start
LH: loop header
LB: loop body
LE: loop exit
PB: predicated region body
PF: predicated region fallthrough
CT: control target
= control target key end

     0   :  { %s9825_s29 = smov 0   ;;  %s13697_s0 = inlined_call_operand.vmem [shape: bf16[2,256,8], index: 0, kind: input, shape index: {}]   ;;  %s13698_s1 = inlined_call_operand.vmem [shape: bf16[8,8], index: 1, kind: input, shape index: {}]   ;;  %s13699_s2 = inlined_call_operand.vmem [shape: f32[1,8], index: 2, kind: input, shape index: {}]   ;;  %s13700_s3 = inlined_call_operand.vmem [shape: bf16[9,8,16], index: 3, kind: input, shape index: {}]   ;;  %s13701_s4 = inlined_call_operand.vmem [shape: f32[1,16], index: 4, kind: input, shape index: {}]   ;;  %s13702_s5 = inlined_call_operand.vmem [shape: bf16[16,8], index: 5, kind: input, shape index: {}]   ;;  %s13703_s6 = inlined_call_operand.vmem [shape: f32[1,8], index: 6, kind: input, shape index: {}]   ;;  %s13704_s7 = inlined_call_operand.vmem [shape: bf16[9,8,16], index: 7, kind: input, shape index: {}]   ;;  %s13705_s8 = inlined_call_operand.vmem [shape: f32[1,16], index: 8, kind: input, shape index: {}]   ;;  %s13706_s9 = inlined_call_operand.vmem [shape: bf16[16,8], index: 9, kind: input, shape index: {}]   ;;  %s13707_s10 = inlined_call_operand.vmem [shape: f32[1,8], index: 10, kind: input, shape index: {}]   ;;  %s13708_s11 = inlined_call_operand.vmem [shape: bf16[9,8,16], index: 11, kind: input, shape index: {}]   ;;  %s13709_s12 = inlined_call_operand.vmem [shape: f32[1,16], index: 12, kind: input, shape index: {}]   ;;  %s13710_s13 = inlined_call_operand.vmem [shape: bf16[2,256,8], index: 13, kind: output, shape index: {0}]   ;;  %s13711_s14 = inlined_call_operand.vmem [shape: bf16[2,256,16], index: 14, kind: output, shape index: {1}]  }
   0x1 LB: > { %s9060_s30 = sadd.s32 4294967295, %s9747_s29   ;;  %p9064_p0 = scmp.ge.s32.totalorder %s9747_s29, 1  ;;  %s9747_s29 = sphi %s9825_s29, %s25_s29  }
   0x2   : > { %p415_p1 = scmp.lt.s32.totalorder %s9747_s29, 3 }
   0x4   : > { %p416_p2 = pnand %p9064_p0, %p415_p1 }
   0x6   : > { %419 = sbr.rel (%p416_p2) target bundleno = 2645 (0xa55), region = 72 }
   0xb   : > { %v1130_v0 = vld [vmem:[%s13698_s1] sm:$0xf]  ;;  %vm1263_vm0 = vcmask 1043456   ;;  %p466_p3 = scmp.lt.s32.totalorder %s9060_s30, 1  ;;  %vm1091_vm1 = vcmask 64512   ;;  %v13714_v14 = vmov 0.0   ;;  %v482_v24 = vlaneseq }
   0xc   : > { %v1265_v1 = vsel %vm1263_vm0, %v1130_v0, 0  ;;  %1093 = vst.msk [vmem:[#allocation2 + $0x8] sm:$0xff] %vm1091_vm1, %v13714_v14  ;;  %v9183_v17 = vld [vmem:[%s13700_s3 + $0x4] sm:$0xf]  ;;  %v1564_v18 = vld [vmem:[%s13700_s3] sm:$0xf] }
   0xd   : > { %1274 = vmatpush.bf16.msra.mxu0 %v1265_v1  ;;  %s14331_s30 = smov (!%p466_p3, %s9060_s30), 1  ;;  %9702 = vmatpush.bf16.msra.mxu2 %v1265_v1  ;;  %1094 = vst.msk [vmem:[#allocation2 + $0x10] sm:$0xff] %vm1091_vm1, %v13714_v14  ;;  %v1664_v19 = vsel %vm1263_vm0, %v9183_v17, 0  ;;  %v1804_v20 = vsel %vm1263_vm0, %v1564_v18, 0  ;;  %v9894_v25 = vshrl.u32 %v482_v24, 7 }
   0xe   : > { %s9837_s17 = sshll.u32 %s14331_s30, 7  ;;  %1092 = vst.msk [vmem:[#allocation2] sm:$0xff] %vm1091_vm1, %v13714_v14  ;;  %1673 = vmatpush.bf16.msra.mxu1 %v1664_v19  ;;  %9703 = vmatpush.bf16.msra.mxu3 %v1664_v19  ;;  %v9233_v29 = vld [vmem:[%s13700_s3 + $0xc] sm:$0xf]  ;;  %v9912_v35 = vld [vmem:[%s13699_s2] ss:$0 sm:$0xff] }
   0xf   : > { %s9843_s20 = scalar_lea.vmem %s13697_s0, %s9837_s17  ;;  %1095 = vst.msk [vmem:[#allocation2 + $0x118] sm:$0xff] %vm1091_vm1, %v13714_v14  ;;  %v519_v28 = vand.u32 15, %v9894_v25  ;;  %v2280_v30 = vsel %vm1263_vm0, %v9233_v29, 0  ;;  %v485_v42 = vadd.s32 16, %v9894_v25  ;;  %s12315_s16 = scalar_lea.vmem %s13710_s13, %s9837_s17 }
  0x10   : > { %v9684_v2 = vld [vmem:[%s9843_s20] sm:$0xff]  ;;  %v9685_v4 = vld [vmem:[%s9843_s20 + $0x8] sm:$0xff]  ;;  %v9686_v6 = vld [vmem:[%s9843_s20 + $0x10] sm:$0xff]  ;;  %1096 = vst.msk [vmem:[#allocation2 + $0x120] sm:$0xff] %vm1091_vm1, %v13714_v14 }
  0x11   : > { %v9692_v3 = vld [vmem:[%s9843_s20 + $0x40] sm:$0xff]  ;;  %9167 = vmatmul.msk.bf16.vlgmr.msra.gmra.mxu0 %vm1091_vm1, %v9684_v2  ;;  %v9693_v5 = vld [vmem:[%s9843_s20 + $0x48] sm:$0xff]  ;;  %v9694_v7 = vld [vmem:[%s9843_s20 + $0x50] sm:$0xff]  ;;  %1097 = vst.msk [vmem:[#allocation2 + $0x128] sm:$0xff] %vm1091_vm1, %v13714_v14  ;;  %1813 = vmatpush.bf16.msrb.mxu2 %v1804_v20  ;;  %vm899_vm2 = vcmp.ge.s32.totalorder %v519_v28, 1  ;;  %v533_v47 = vand.u32 15, %v485_v42 }
  0x12   : > { %9175 = vmatmul.msk.bf16.vlgmr.msra.gmra.mxu2 %vm1091_vm1, %v9692_v3  ;;  %v9687_v8 = vld [vmem:[%s9843_s20 + $0x18] sm:$0xff]  ;;  %v9688_v10 = vld [vmem:[%s9843_s20 + $0x20] sm:$0xff]  ;;  %v9689_v12 = vld [vmem:[%s9843_s20 + $0x28] sm:$0xff]  ;;  %2289 = vmatpush.bf16.msrb.mxu0 %v2280_v30  ;;  %v9906_v31 = vsel %vm899_vm2, 1.0, %v13714_v14 }
  0x13   : > { %v9695_v9 = vld [vmem:[%s9843_s20 + $0x58] sm:$0xff]  ;;  %v9696_v11 = vld [vmem:[%s9843_s20 + $0x60] sm:$0xff]  ;;  %v9697_v13 = vld [vmem:[%s9843_s20 + $0x68] sm:$0xff]  ;;  %13876 = vst [vmem:[#allocation3_spill] sm:$0xff] %v9906_v31  ;;  %vm901_vm6 = vcmp.ge.s32.totalorder %v533_v47, 1 }
  0x14   : > { %v9690_v15 = vld [vmem:[%s9843_s20 + $0x30] sm:$0xff]  ;;  %v1565_v21 = vld [vmem:[#allocation2 + $0x8] sm:$0xff]  ;;  %v9691_v26 = vld [vmem:[%s9843_s20 + $0x38] sm:$0xff]  ;;  %v9925_v56 = vsel %vm901_vm6, 1.0, %v13714_v14 }
  0x15   : > { %v9698_v16 = vld [vmem:[%s9843_s20 + $0x70] sm:$0xff]  ;;  %v9699_v27 = vld [vmem:[%s9843_s20 + $0x78] sm:$0xff]  ;;  %v1484_v32 = vld [vmem:[#allocation2 + $0x7] sm:$0xff]  ;;  %13877 = vst [vmem:[#allocation4_spill] sm:$0xff] %v9925_v56  ;;  %s13472_s20 = scalar_lea.vmem %s13711_s14, %s9837_s17 }
  0x16   : > { %v1566_v22 = vld [vmem:[#allocation2 + $0x10] sm:$0xff]  ;;  %v1516_v33 = vmul.f32 %v9906_v31, %v1484_v32 }
  0x17   : > { %v1597_v23 = vpack.c.bf16 %v1566_v22, %v1565_v21  ;;  %v1485_v34 = vld [vmem:[#allocation2 + $0xf] sm:$0xff] }
  0x18   : > { %v1548_v36 = vpack.c.bf16 %v1485_v34, %v1516_v33 }
  0x19   : > { %9184 = vmatmul.msk.bf16.vlgmr.msra.gmra.mxu1 %vm1091_vm1, %v1597_v23 }
  0x21   : > { %9168 = vmatmul.msk.bf16.gmra.mxu0 %vm1091_vm1, %v9685_v4 }
  0x22   : > { %9176 = vmatmul.msk.bf16.gmra.mxu2 %vm1091_vm1, %v9693_v5 }
  0x31   : > { %9169 = vmatmul.msk.bf16.gmra.mxu0 %vm1091_vm1, %v9686_v6  ;;  %v487_v6 = vadd.s32 32, %v9894_v25 }
  0x32   : > { %9177 = vmatmul.msk.bf16.gmra.mxu2 %vm1091_vm1, %v9694_v7 }
  0x41   : > { %9170 = vmatmul.msk.bf16.gmra.mxu0 %vm1091_vm1, %v9687_v8 }
  0x42   : > { %9178 = vmatmul.msk.bf16.gmra.mxu2 %vm1091_vm1, %v9695_v9 }
  0x51   : > { %9171 = vmatmul.msk.bf16.gmra.mxu0 %vm1091_vm1, %v9688_v10 }
  0x52   : > { %9179 = vmatmul.msk.bf16.gmra.mxu2 %vm1091_vm1, %v9696_v11  ;;  %v547_v11 = vand.u32 15, %v487_v6 }
  0x54   : > { %vm903_vm11 = vcmp.ge.s32.totalorder %v547_v11, 1 }
  0x55   : > { %v9945_v21 = vsel %vm903_vm11, 1.0, %v13714_v14 }
  0x56   : > { %13878 = vst [vmem:[#allocation5_spill] sm:$0xff] %v9945_v21 }
  0x61   : > { %9172 = vmatmul.msk.bf16.gmra.mxu0 %vm1091_vm1, %v9689_v12 }
  0x62   : > { %9180 = vmatmul.msk.bf16.gmra.mxu2 %vm1091_vm1, %v9697_v13 }
  0x71   : > { %9173 = vmatmul.msk.bf16.gmra.mxu0 %vm1091_vm1, %v9690_v15 }
  0x72   : > { %9181 = vmatmul.msk.bf16.gmra.mxu2 %vm1091_vm1, %v9698_v16 }
  0x81   : > { %9174 = vmatmul.msk.bf16.gmra.mxu0 %vm1091_vm1, %v9691_v26 }
  0x82   : > { %9182 = vmatmul.msk.bf16.gmra.mxu2 %vm1091_vm1, %v9699_v27 }
  0x8e   : > { %v1276_v37 = vpop.f32.mrf.mxu0 }
  0x8f   : > { %v1277_v38 = vadd.f32 %v9912_v35, %v1276_v37 }
  0x91   : > { %vm1356_vm3 = vcmp.gt.f32.partialorder %v1277_v38, 0.0  ;;  %v1388_v39 = vmul.f32 0.1, %v1277_v38 }
  0x92   : > { %9200 = vmatmul.msk.bf16.vlgmr.msrb.gmra.mxu2 %vm1091_vm1, %v1548_v36 }
  0x93   : > { %v1420_v40 = vsel %vm1356_vm3, %v1277_v38, %v1388_v39  ;;  %v489_v38 = vadd.s32 48, %v9894_v25 }
  0x94   : > { %1452 = vst.msk [vmem:[#allocation2 + $0x18] sm:$0xff] %vm1091_vm1, %v1420_v40 }
  0x95   : > { %v1316_v41 = vpop.f32.mrf.mxu2 }
  0x96   : > { %v1317_v43 = vadd.f32 %v9912_v35, %v1316_v41  ;;  %v1278_v44 = vpop.f32.mrf.mxu0 }
  0x97   : > { %v1279_v45 = vadd.f32 %v9912_v35, %v1278_v44 }
  0x98   : > { %vm1372_vm4 = vcmp.gt.f32.partialorder %v1317_v43, 0.0  ;;  %v1404_v46 = vmul.f32 0.1, %v1317_v43 }
  0x99   : > { %vm1357_vm5 = vcmp.gt.f32.partialorder %v1279_v45, 0.0  ;;  %v1389_v48 = vmul.f32 0.1, %v1279_v45 }
  0x9a   : > { %v1436_v49 = vsel %vm1372_vm4, %v1317_v43, %v1404_v46  ;;  %v561_v43 = vand.u32 15, %v489_v38  ;;  %v493_v38 = vadd.s32 80, %v9894_v25 }
  0x9b   : > { %1468 = vst.msk [vmem:[#allocation2 + $0x98] sm:$0xff] %vm1091_vm1, %v1436_v49  ;;  %v1421_v50 = vsel %vm1357_vm5, %v1279_v45, %v1389_v48  ;;  %v1486_v57 = vld [vmem:[#allocation2 + $0x17] sm:$0xff] }
  0x9c   : > { %1453 = vst.msk [vmem:[#allocation2 + $0x20] sm:$0xff] %vm1091_vm1, %v1421_v50  ;;  %v1518_v60 = vmul.f32 %v9925_v56, %v1486_v57  ;;  %v2181_v61 = vmul.f32 %v9906_v31, %v1486_v57  ;;  %v1567_v63 = vld [vmem:[#allocation2 + $0x18] sm:$0xff]  ;;  %vm905_vm2 = vcmp.ge.s32.totalorder %v561_v43, 1  ;;  %v589_v43 = vand.u32 15, %v493_v38 }
  0x9d   : > { %v1318_v51 = vpop.f32.mrf.mxu2 }
  0x9e   : > { %v1319_v52 = vadd.f32 %v9912_v35, %v1318_v51  ;;  %v1281_v53 = vpop.f32.mrf.mxu0 }
  0x9f   : > { %v1282_v54 = vadd.f32 %v9912_v35, %v1281_v53 }
  0xa0   : > { %vm1373_vm7 = vcmp.gt.f32.partialorder %v1319_v52, 0.0  ;;  %v1405_v55 = vmul.f32 0.1, %v1319_v52 }
  0xa1   : > { %vm1358_vm8 = vcmp.gt.f32.partialorder %v1282_v54, 0.0  ;;  %v1390_v58 = vmul.f32 0.1, %v1282_v54 }
  0xa2   : > { %v1437_v59 = vsel %vm1373_vm7, %v1319_v52, %v1405_v55  ;;  %v9965_v52 = vsel %vm905_vm2, 1.0, %v13714_v14 }
  0xa3   : > { %1469 = vst.msk [vmem:[#allocation2 + $0xa0] sm:$0xff] %vm1091_vm1, %v1437_v59  ;;  %v1422_v62 = vsel %vm1358_vm8, %v1282_v54, %v1390_v58  ;;  %v1568_v0 = vld [vmem:[#allocation2 + $0x20] sm:$0xff] }
  0xa4   : > { %v1487_v1 = vld [vmem:[#allocation2 + $0x1f] sm:$0xff]  ;;  %1454 = vst.msk [vmem:[#allocation2 + $0x28] sm:$0xff] %vm1091_vm1, %v1422_v62  ;;  %v9931_v2 = vpack.c.bf16 %v1568_v0, %v1567_v63 }
  0xa5   : > { %v1549_v3 = vpack.c.bf16 %v1487_v1, %v1518_v60  ;;  %v2213_v4 = vpack.c.bf16 %v1487_v1, %v2181_v61  ;;  %v1321_v5 = vpop.f32.mrf.mxu2  ;;  %13879 = vst [vmem:[#allocation6_spill] sm:$0xff] %v9965_v52 }
  0xa6   : > { %v1322_v7 = vadd.f32 %v9912_v35, %v1321_v5  ;;  %v1283_v8 = vpop.f32.mrf.mxu0  ;;  %9185 = vmatmul.msk.bf16.gmra.mxu1 %vm1091_vm1, %v9931_v2 }
  0xa7   : > { %9201 = vmatmul.msk.bf16.gmra.mxu2 %vm1091_vm1, %v1549_v3  ;;  %v1284_v9 = vadd.f32 %v9912_v35, %v1283_v8  ;;  %9234 = vmatmul.msk.bf16.vlgmr.msrb.gmra.mxu0 %vm1091_vm1, %v2213_v4  ;;  %v491_v4 = vadd.s32 64, %v9894_v25 }
  0xa8   : > { %vm1374_vm9 = vcmp.gt.f32.partialorder %v1322_v7, 0.0  ;;  %v1406_v10 = vmul.f32 0.1, %v1322_v7 }
  0xa9   : > { %vm1359_vm10 = vcmp.gt.f32.partialorder %v1284_v9, 0.0  ;;  %v1391_v12 = vmul.f32 0.1, %v1284_v9 }
  0xaa   : > { %v1438_v13 = vsel %vm1374_vm9, %v1322_v7, %v1406_v10 }
  0xab   : > { %1470 = vst.msk [vmem:[#allocation2 + $0xa8] sm:$0xff] %vm1091_vm1, %v1438_v13  ;;  %v1423_v15 = vsel %vm1359_vm10, %v1284_v9, %v1391_v12  ;;  %v1488_v22 = vld [vmem:[#allocation2 + $0x27] sm:$0xff]  ;;  %v575_v9 = vand.u32 15, %v491_v4 }
  0xac   : > { %1455 = vst.msk [vmem:[#allocation2 + $0x30] sm:$0xff] %vm1091_vm1, %v1423_v15  ;;  %v1520_v26 = vmul.f32 %v9945_v21, %v1488_v22  ;;  %v2183_v27 = vmul.f32 %v9925_v56, %v1488_v22  ;;  %v1569_v29 = vld [vmem:[#allocation2 + $0x28] sm:$0xff] }
  0xad   : > { %v1323_v16 = vpop.f32.mrf.mxu2  ;;  %vm907_vm7 = vcmp.ge.s32.totalorder %v575_v9, 1 }
  0xae   : > { %v1324_v17 = vadd.f32 %v9912_v35, %v1323_v16  ;;  %v1286_v18 = vpop.f32.mrf.mxu0 }
  0xaf   : > { %v1287_v19 = vadd.f32 %v9912_v35, %v1286_v18 }
  0xb0   : > { %vm1375_vm12 = vcmp.gt.f32.partialorder %v1324_v17, 0.0  ;;  %v1407_v20 = vmul.f32 0.1, %v1324_v17 }
  0xb1   : > { %vm1360_vm13 = vcmp.gt.f32.partialorder %v1287_v19, 0.0  ;;  %v1392_v23 = vmul.f32 0.1, %v1287_v19 }
  0xb2   : > { %v1439_v24 = vsel %vm1375_vm12, %v1324_v17, %v1407_v20  ;;  %vm909_vm12 = vcmp.ge.s32.totalorder %v589_v43, 1 }
  0xb3   : > { %1471 = vst.msk [vmem:[#allocation2 + $0xb0] sm:$0xff] %vm1091_vm1, %v1439_v24  ;;  %v1424_v28 = vsel %vm1360_vm13, %v1287_v19, %v1392_v23  ;;  %v1570_v30 = vld [vmem:[#allocation2 + $0x30] sm:$0xff]  ;;  %v9985_v19 = vsel %vm907_vm7, 1.0, %v13714_v14 }
  0xb4   : > { %v1489_v32 = vld [vmem:[#allocation2 + $0x2f] sm:$0xff]  ;;  %1456 = vst.msk [vmem:[#allocation2 + $0x38] sm:$0xff] %vm1091_vm1, %v1424_v28  ;;  %v9951_v33 = vpack.c.bf16 %v1570_v30, %v1569_v29 }
  0xb5   : > { %v1550_v34 = vpack.c.bf16 %v1489_v32, %v1520_v26  ;;  %v2214_v36 = vpack.c.bf16 %v1489_v32, %v2183_v27  ;;  %v1326_v37 = vpop.f32.mrf.mxu2  ;;  %13880 = vst [vmem:[#allocation7_spill] sm:$0xff] %v9985_v19 }
  0xb6   : > { %v1327_v39 = vadd.f32 %v9912_v35, %v1326_v37  ;;  %v1288_v40 = vpop.f32.mrf.mxu0  ;;  %9186 = vmatmul.msk.bf16.gmra.mxu1 %vm1091_vm1, %v9951_v33 }
  0xb7   : > { %9202 = vmatmul.msk.bf16.gmra.mxu2 %vm1091_vm1, %v1550_v34  ;;  %v1289_v41 = vadd.f32 %v9912_v35, %v1288_v40  ;;  %9235 = vmatmul.msk.bf16.gmra.mxu0 %vm1091_vm1, %v2214_v36 }
  0xb8   : > { %vm1376_vm14 = vcmp.gt.f32.partialorder %v1327_v39, 0.0  ;;  %v1408_v42 = vmul.f32 0.1, %v1327_v39 }
  0xb9   : > { %vm1361_vm15 = vcmp.gt.f32.partialorder %v1289_v41, 0.0  ;;  %v1393_v44 = vmul.f32 0.1, %v1289_v41 }
  0xba   : > { %v1440_v45 = vsel %vm1376_vm14, %v1327_v39, %v1408_v42 }
  0xbb   : > { %1472 = vst.msk [vmem:[#allocation2 + $0xb8] sm:$0xff] %vm1091_vm1, %v1440_v45  ;;  %v1425_v46 = vsel %vm1361_vm15, %v1289_v41, %v1393_v44  ;;  %v1490_v53 = vld [vmem:[#allocation2 + $0x37] sm:$0xff] }
  0xbc   : > { %1457 = vst.msk [vmem:[#allocation2 + $0x40] sm:$0xff] %vm1091_vm1, %v1425_v46  ;;  %v1522_v57 = vmul.f32 %v9965_v52, %v1490_v53  ;;  %v2185_v58 = vmul.f32 %v9945_v21, %v1490_v53  ;;  %v1571_v60 = vld [vmem:[#allocation2 + $0x38] sm:$0xff]  ;;  %v10005_v53 = vsel %vm909_vm12, 1.0, %v13714_v14 }
  0xbd   : > { %v1328_v47 = vpop.f32.mrf.mxu2  ;;  %13881 = vst [vmem:[#allocation8_spill] sm:$0xff] %v10005_v53 }
  0xbe   : > { %v1329_v48 = vadd.f32 %v9912_v35, %v1328_v47  ;;  %v1291_v49 = vpop.f32.mrf.mxu0 }
  0xbf   : > { %v1292_v50 = vadd.f32 %v9912_v35, %v1291_v49 }
  0xc0   : > { %vm1377_vm3 = vcmp.gt.f32.partialorder %v1329_v48, 0.0  ;;  %v1409_v51 = vmul.f32 0.1, %v1329_v48 }
  0xc1   : > { %vm1362_vm4 = vcmp.gt.f32.partialorder %v1292_v50, 0.0  ;;  %v1394_v54 = vmul.f32 0.1, %v1292_v50 }
  0xc2   : > { %v1441_v55 = vsel %vm1377_vm3, %v1329_v48, %v1409_v51 }
  0xc3   : > { %1473 = vst.msk [vmem:[#allocation2 + $0xc0] sm:$0xff] %vm1091_vm1, %v1441_v55  ;;  %v1426_v59 = vsel %vm1362_vm4, %v1292_v50, %v1394_v54  ;;  %v1572_v61 = vld [vmem:[#allocation2 + $0x40] sm:$0xff] }
  0xc4   : > { %v1491_v62 = vld [vmem:[#allocation2 + $0x3f] sm:$0xff]  ;;  %1458 = vst.msk [vmem:[#allocation2 + $0x48] sm:$0xff] %vm1091_vm1, %v1426_v59  ;;  %v9971_v63 = vpack.c.bf16 %v1572_v61, %v1571_v60 }
  0xc5   : > { %v1551_v0 = vpack.c.bf16 %v1491_v62, %v1522_v57  ;;  %v2215_v1 = vpack.c.bf16 %v1491_v62, %v2185_v58  ;;  %v1331_v3 = vpop.f32.mrf.mxu2 }
  0xc6   : > { %v1332_v5 = vadd.f32 %v9912_v35, %v1331_v3  ;;  %v1293_v6 = vpop.f32.mrf.mxu0  ;;  %9187 = vmatmul.msk.bf16.gmra.mxu1 %vm1091_vm1, %v9971_v63 }
  0xc7   : > { %9203 = vmatmul.msk.bf16.gmra.mxu2 %vm1091_vm1, %v1551_v0  ;;  %v1294_v7 = vadd.f32 %v9912_v35, %v1293_v6  ;;  %9236 = vmatmul.msk.bf16.gmra.mxu0 %vm1091_vm1, %v2215_v1  ;;  %v495_v6 = vadd.s32 96, %v9894_v25 }
  0xc8   : > { %vm1378_vm5 = vcmp.gt.f32.partialorder %v1332_v5, 0.0  ;;  %v1410_v8 = vmul.f32 0.1, %v1332_v5 }
  0xc9   : > { %vm1363_vm6 = vcmp.gt.f32.partialorder %v1294_v7, 0.0  ;;  %v1395_v10 = vmul.f32 0.1, %v1294_v7 }
  0xca   : > { %v1442_v11 = vsel %vm1378_vm5, %v1332_v5, %v1410_v8 }
  0xcb   : > { %1474 = vst.msk [vmem:[#allocation2 + $0xc8] sm:$0xff] %vm1091_vm1, %v1442_v11  ;;  %v1427_v12 = vsel %vm1363_vm6, %v1294_v7, %v1395_v10  ;;  %v1492_v20 = vld [vmem:[#allocation2 + $0x47] sm:$0xff]  ;;  %v603_v11 = vand.u32 15, %v495_v6 }
  0xcc   : > { %1459 = vst.msk [vmem:[#allocation2 + $0x50] sm:$0xff] %vm1091_vm1, %v1427_v12  ;;  %v1524_v24 = vmul.f32 %v9985_v19, %v1492_v20  ;;  %v2187_v26 = vmul.f32 %v9965_v52, %v1492_v20  ;;  %v1573_v28 = vld [vmem:[#allocation2 + $0x48] sm:$0xff] }
  0xcd   : > { %v1333_v13 = vpop.f32.mrf.mxu2  ;;  %vm911_vm3 = vcmp.ge.s32.totalorder %v603_v11, 1 }
  0xce   : > { %v1334_v15 = vadd.f32 %v9912_v35, %v1333_v13  ;;  %v1296_v16 = vpop.f32.mrf.mxu0 }
  0xcf   : > { %v1297_v17 = vadd.f32 %v9912_v35, %v1296_v16 }
  0xd0   : > { %vm1379_vm8 = vcmp.gt.f32.partialorder %v1334_v15, 0.0  ;;  %v1411_v18 = vmul.f32 0.1, %v1334_v15 }
  0xd1   : > { %vm1364_vm9 = vcmp.gt.f32.partialorder %v1297_v17, 0.0  ;;  %v1396_v22 = vmul.f32 0.1, %v1297_v17 }
  0xd2   : > { %v1443_v23 = vsel %vm1379_vm8, %v1334_v15, %v1411_v18 }
  0xd3   : > { %1475 = vst.msk [vmem:[#allocation2 + $0xd0] sm:$0xff] %vm1091_vm1, %v1443_v23  ;;  %v1428_v27 = vsel %vm1364_vm9, %v1297_v17, %v1396_v22  ;;  %v1574_v29 = vld [vmem:[#allocation2 + $0x50] sm:$0xff]  ;;  %v10025_v23 = vsel %vm911_vm3, 1.0, %v13714_v14 }
  0xd4   : > { %v1493_v30 = vld [vmem:[#allocation2 + $0x4f] sm:$0xff]  ;;  %1460 = vst.msk [vmem:[#allocation2 + $0x58] sm:$0xff] %vm1091_vm1, %v1428_v27  ;;  %v9991_v32 = vpack.c.bf16 %v1574_v29, %v1573_v28 }
  0xd5   : > { %v1552_v34 = vpack.c.bf16 %v1493_v30, %v1524_v24  ;;  %v2216_v36 = vpack.c.bf16 %v1493_v30, %v2187_v26  ;;  %v1336_v37 = vpop.f32.mrf.mxu2  ;;  %13882 = vst [vmem:[#allocation9_spill] sm:$0xff] %v10025_v23  ;;  %v9250_v30 = vld [vmem:[%s13700_s3 + $0x10] sm:$0xf] }
  0xd6   : > { %v1337_v39 = vadd.f32 %v9912_v35, %v1336_v37  ;;  %v1298_v40 = vpop.f32.mrf.mxu0  ;;  %9188 = vmatmul.msk.bf16.gmra.mxu1 %vm1091_vm1, %v9991_v32 }
  0xd7   : > { %9204 = vmatmul.msk.bf16.gmra.mxu2 %vm1091_vm1, %v1552_v34  ;;  %v1299_v41 = vadd.f32 %v9912_v35, %v1298_v40  ;;  %9237 = vmatmul.msk.bf16.gmra.mxu0 %vm1091_vm1, %v2216_v36 }
  0xd8   : > { %vm1380_vm10 = vcmp.gt.f32.partialorder %v1337_v39, 0.0  ;;  %v1412_v42 = vmul.f32 0.1, %v1337_v39 }
  0xd9   : > { %vm1365_vm11 = vcmp.gt.f32.partialorder %v1299_v41, 0.0  ;;  %v1397_v44 = vmul.f32 0.1, %v1299_v41 }
  0xda   : > { %v1444_v45 = vsel %vm1380_vm10, %v1337_v39, %v1412_v42  ;;  %v2502_v39 = vsel %vm1263_vm0, %v9250_v30, 0 }
  0xdb   : > { %1476 = vst.msk [vmem:[#allocation2 + $0xd8] sm:$0xff] %vm1091_vm1, %v1444_v45  ;;  %v1429_v46 = vsel %vm1365_vm11, %v1299_v41, %v1397_v44  ;;  %v1494_v54 = vld [vmem:[#allocation2 + $0x57] sm:$0xff]  ;;  %v497_v44 = vadd.s32 112, %v9894_v25  ;;  %2511 = vmatpush.bf16.msrb.mxu1 %v2502_v39  ;;  %v1675_v39 = vpop.f32.mrf.mxu1 }
  0xdc   : > { %1461 = vst.msk [vmem:[#allocation2 + $0x60] sm:$0xff] %vm1091_vm1, %v1429_v46  ;;  %v1526_v58 = vmul.f32 %v10005_v53, %v1494_v54  ;;  %v2189_v59 = vmul.f32 %v9985_v19, %v1494_v54  ;;  %v1575_v61 = vld [vmem:[#allocation2 + $0x58] sm:$0xff]  ;;  %v3133_v19 = vld [vmem:[#allocation2 + $0x28] sm:$0xff] }
  0xdd   : > { %v1338_v47 = vpop.f32.mrf.mxu2 }
  0xde   : > { %v1339_v48 = vadd.f32 %v9912_v35, %v1338_v47  ;;  %v1301_v49 = vpop.f32.mrf.mxu0  ;;  %v9216_v47 = vld [vmem:[%s13700_s3 + $0x8] sm:$0xf] }
  0xdf   : > { %v1302_v50 = vadd.f32 %v9912_v35, %v1301_v49 }
  0xe0   : > { %vm1381_vm13 = vcmp.gt.f32.partialorder %v1339_v48, 0.0  ;;  %v1413_v51 = vmul.f32 0.1, %v1339_v48 }
  0xe1   : > { %vm1366_vm14 = vcmp.gt.f32.partialorder %v1302_v50, 0.0  ;;  %v1398_v55 = vmul.f32 0.1, %v1302_v50 }
  0xe2   : > { %v1445_v57 = vsel %vm1381_vm13, %v1339_v48, %v1413_v51  ;;  %v617_v51 = vand.u32 15, %v497_v44 }
  0xe3   : > { %1477 = vst.msk [vmem:[#allocation2 + $0xe0] sm:$0xff] %vm1091_vm1, %v1445_v57  ;;  %v1430_v60 = vsel %vm1366_vm14, %v1302_v50, %v1398_v55  ;;  %v1576_v62 = vld [vmem:[#allocation2 + $0x60] sm:$0xff]  ;;  %v2026_v50 = vsel %vm1263_vm0, %v9216_v47, 0 }
  0xe4   : > { %v1495_v0 = vld [vmem:[#allocation2 + $0x5f] sm:$0xff]  ;;  %1462 = vst.msk [vmem:[#allocation2 + $0x68] sm:$0xff] %vm1091_vm1, %v1430_v60  ;;  %v10011_v1 = vpack.c.bf16 %v1576_v62, %v1575_v61  ;;  %2035 = vmatpush.bf16.msrb.mxu3 %v2026_v50  ;;  %vm913_vm8 = vcmp.ge.s32.totalorder %v617_v51, 1 }
  0xe5   : > { %v1553_v3 = vpack.c.bf16 %v1495_v0, %v1526_v58  ;;  %v2217_v4 = vpack.c.bf16 %v1495_v0, %v2189_v59  ;;  %v1341_v5 = vpop.f32.mrf.mxu2  ;;  %v10053_v0 = vsel %vm913_vm8, 1.0, %v13714_v14 }
  0xe6   : > { %v1342_v7 = vadd.f32 %v9912_v35, %v1341_v5  ;;  %v1303_v8 = vpop.f32.mrf.mxu0  ;;  %9189 = vmatmul.msk.bf16.gmra.mxu1 %vm1091_vm1, %v10011_v1  ;;  %13883 = vst [vmem:[#allocation10_spill] sm:$0xff] %v10053_v0 }
  0xe7   : > { %9205 = vmatmul.msk.bf16.gmra.mxu2 %vm1091_vm1, %v1553_v3  ;;  %v1304_v9 = vadd.f32 %v9912_v35, %v1303_v8  ;;  %9238 = vmatmul.msk.bf16.gmra.mxu0 %vm1091_vm1, %v2217_v4 }
  0xe8   : > { %vm1382_vm15 = vcmp.gt.f32.partialorder %v1342_v7, 0.0  ;;  %v1414_v10 = vmul.f32 0.1, %v1342_v7 }
  0xe9   : > { %vm1367_vm2 = vcmp.gt.f32.partialorder %v1304_v9, 0.0  ;;  %v1399_v12 = vmul.f32 0.1, %v1304_v9 }
  0xea   : > { %v1446_v13 = vsel %vm1382_vm15, %v1342_v7, %v1414_v10 }
  0xeb   : > { %1478 = vst.msk [vmem:[#allocation2 + $0xe8] sm:$0xff] %vm1091_vm1, %v1446_v13  ;;  %v1431_v15 = vsel %vm1367_vm2, %v1304_v9, %v1399_v12  ;;  %v1496_v24 = vld [vmem:[#allocation2 + $0x67] sm:$0xff] }
  0xec   : > { %1463 = vst.msk [vmem:[#allocation2 + $0x70] sm:$0xff] %vm1091_vm1, %v1431_v15  ;;  %v1528_v28 = vmul.f32 %v10025_v23, %v1496_v24  ;;  %v2191_v29 = vmul.f32 %v10005_v53, %v1496_v24  ;;  %v1577_v36 = vld [vmem:[#allocation2 + $0x68] sm:$0xff] }
  0xed   : > { %v1343_v16 = vpop.f32.mrf.mxu2 }
  0xee   : > { %v1344_v17 = vadd.f32 %v9912_v35, %v1343_v16  ;;  %v1306_v18 = vpop.f32.mrf.mxu0 }
  0xef   : > { %v1307_v20 = vadd.f32 %v9912_v35, %v1306_v18 }
  0xf0   : > { %vm1383_vm4 = vcmp.gt.f32.partialorder %v1344_v17, 0.0  ;;  %v1415_v22 = vmul.f32 0.1, %v1344_v17 }
  0xf1   : > { %vm1368_vm5 = vcmp.gt.f32.partialorder %v1307_v20, 0.0  ;;  %v1400_v26 = vmul.f32 0.1, %v1307_v20 }
  0xf2   : > { %v1447_v27 = vsel %vm1383_vm4, %v1344_v17, %v1415_v22  ;;  %v499_v17 = vadd.s32 128, %v9894_v25 }
  0xf3   : > { %1479 = vst.msk [vmem:[#allocation2 + $0xf0] sm:$0xff] %vm1091_vm1, %v1447_v27  ;;  %v1432_v34 = vsel %vm1368_vm5, %v1307_v20, %v1400_v26  ;;  %v1578_v37 = vld [vmem:[#allocation2 + $0x70] sm:$0xff] }
  0xf4   : > { %v1497_v38 = vld [vmem:[#allocation2 + $0x6f] sm:$0xff]  ;;  %1464 = vst.msk [vmem:[#allocation2 + $0x78] sm:$0xff] %vm1091_vm1, %v1432_v34  ;;  %v10035_v40 = vpack.c.bf16 %v1578_v37, %v1577_v36  ;;  %v631_v26 = vand.u32 15, %v499_v17 }
  0xf5   : > { %v1554_v41 = vpack.c.bf16 %v1497_v38, %v1528_v28  ;;  %v2218_v42 = vpack.c.bf16 %v1497_v38, %v2191_v29  ;;  %v1346_v43 = vpop.f32.mrf.mxu2  ;;  %v9267_v34 = vld [vmem:[%s13700_s3 + $0x14] sm:$0xf] }
  0xf6   : > { %v1347_v45 = vadd.f32 %v9912_v35, %v1346_v43  ;;  %v1308_v46 = vpop.f32.mrf.mxu0  ;;  %9190 = vmatmul.msk.bf16.gmra.mxu1 %vm1091_vm1, %v10035_v40  ;;  %vm915_vm13 = vcmp.ge.s32.totalorder %v631_v26, 1  ;;  %v2756_v37 = vsel %vm1263_vm0, %v9267_v34, 0 }
  0xf7   : > { %9206 = vmatmul.msk.bf16.gmra.mxu2 %vm1091_vm1, %v1554_v41  ;;  %v1309_v48 = vadd.f32 %v9912_v35, %v1308_v46  ;;  %9239 = vmatmul.msk.bf16.gmra.mxu0 %vm1091_vm1, %v2218_v42  ;;  %v10076_v41 = vsel %vm915_vm13, 1.0, %v13714_v14  ;;  %v501_v46 = vadd.s32 144, %v9894_v25 }
  0xf8   : > { %vm1384_vm6 = vcmp.gt.f32.partialorder %v1347_v45, 0.0  ;;  %v1416_v49 = vmul.f32 0.1, %v1347_v45  ;;  %2765 = vmatpush.bf16.msra.mxu2 %v2756_v37  ;;  %13884 = vst [vmem:[#allocation11_spill] sm:$0xff] %v10076_v41 }
  0xf9   : > { %vm1369_vm7 = vcmp.gt.f32.partialorder %v1309_v48, 0.0  ;;  %v1401_v54 = vmul.f32 0.1, %v1309_v48 }
  0xfa   : > { %v1448_v55 = vsel %vm1384_vm6, %v1347_v45, %v1416_v49 }
  0xfb   : > { %1480 = vst.msk [vmem:[#allocation2 + $0xf8] sm:$0xff] %vm1091_vm1, %v1448_v55  ;;  %v1433_v57 = vsel %vm1369_vm7, %v1309_v48, %v1401_v54  ;;  %v1498_v3 = vld [vmem:[#allocation2 + $0x77] sm:$0xff] }
  0xfc   : > { %1465 = vst.msk [vmem:[#allocation2 + $0x80] sm:$0xff] %vm1091_vm1, %v1433_v57  ;;  %v1530_v6 = vmul.f32 %v10053_v0, %v1498_v3  ;;  %v2193_v7 = vmul.f32 %v10025_v23, %v1498_v3  ;;  %v1579_v9 = vld [vmem:[#allocation2 + $0x78] sm:$0xff]  ;;  %v645_v57 = vand.u32 15, %v501_v46 }
  0xfd   : > { %v1348_v58 = vpop.f32.mrf.mxu2 }
  0xfe   : > { %v1349_v59 = vadd.f32 %v9912_v35, %v1348_v58  ;;  %v1311_v60 = vpop.f32.mrf.mxu0  ;;  %v1677_v58 = vpop.f32.mrf.mxu1  ;;  %vm917_vm15 = vcmp.ge.s32.totalorder %v645_v57, 1  ;;  %v1587_v57 = vld [vmem:[#allocation2 + $0xb8] sm:$0xff] }
  0xff   : > { %v1312_v61 = vadd.f32 %v9912_v35, %v1311_v60 }
 0x100   : > { %vm1385_vm9 = vcmp.gt.f32.partialorder %v1349_v59, 0.0  ;;  %v1417_v62 = vmul.f32 0.1, %v1349_v59 }
 0x101   : > { %vm1370_vm10 = vcmp.gt.f32.partialorder %v1312_v61, 0.0  ;;  %v1402_v4 = vmul.f32 0.1, %v1312_v61 }
 0x102   : > { %v1449_v5 = vsel %vm1385_vm9, %v1349_v59, %v1417_v62 }
 0x103   : > { %1481 = vst.msk [vmem:[#allocation2 + $0x100] sm:$0xff] %vm1091_vm1, %v1449_v5  ;;  %v1434_v8 = vsel %vm1370_vm10, %v1312_v61, %v1402_v4  ;;  %v1580_v10 = vld [vmem:[#allocation2 + $0x80] sm:$0xff]  ;;  %v10095_v61 = vsel %vm917_vm15, 1.0, %v13714_v14  ;;  %v1583_v4 = vld [vmem:[#allocation2 + $0x98] sm:$0xff] }
 0x104   : > { %v1499_v11 = vld [vmem:[#allocation2 + $0x7f] sm:$0xff]  ;;  %1466 = vst.msk [vmem:[#allocation2 + $0x88] sm:$0xff] %vm1091_vm1, %v1434_v8  ;;  %v10059_v12 = vpack.c.bf16 %v1580_v10, %v1579_v9  ;;  %v503_v8 = vadd.s32 160, %v9894_v25 }
 0x105   : > { %v1555_v13 = vpack.c.bf16 %v1499_v11, %v1530_v6  ;;  %v2219_v15 = vpack.c.bf16 %v1499_v11, %v2193_v7  ;;  %v1351_v16 = vpop.f32.mrf.mxu2  ;;  %13885 = vst [vmem:[#allocation12_spill] sm:$0xff] %v10095_v61  ;;  %v1584_v5 = vld [vmem:[#allocation2 + $0xa0] sm:$0xff] }
 0x106   : > { %v1352_v18 = vadd.f32 %v9912_v35, %v1351_v16  ;;  %v1313_v20 = vpop.f32.mrf.mxu0  ;;  %9191 = vmatmul.msk.bf16.gmra.mxu1 %vm1091_vm1, %v10059_v12  ;;  %v1503_v6 = vld [vmem:[#allocation2 + $0x9f] sm:$0xff]  ;;  %v10102_v10 = vpack.c.bf16 %v1584_v5, %v1583_v4 }
 0x107   : > { %9207 = vmatmul.msk.bf16.gmra.mxu2 %vm1091_vm1, %v1555_v13  ;;  %v1314_v22 = vadd.f32 %v9912_v35, %v1313_v20  ;;  %9240 = vmatmul.msk.bf16.gmra.mxu0 %vm1091_vm1, %v2219_v15  ;;  %v659_v15 = vand.u32 15, %v503_v8 }
 0x108   : > { %vm1386_vm11 = vcmp.gt.f32.partialorder %v1352_v18, 0.0  ;;  %v1418_v24 = vmul.f32 0.1, %v1352_v18 }
 0x109   : > { %vm1371_vm12 = vcmp.gt.f32.partialorder %v1314_v22, 0.0  ;;  %v1403_v27 = vmul.f32 0.1, %v1314_v22  ;;  %vm919_vm2 = vcmp.ge.s32.totalorder %v659_v15, 1 }
 0x10a   : > { %v1450_v28 = vsel %vm1386_vm11, %v1352_v18, %v1418_v24  ;;  %v1504_v24 = vld [vmem:[#allocation2 + $0xa7] sm:$0xff] }
 0x10b   : > { %1482 = vst.msk [vmem:[#allocation2 + $0x108] sm:$0xff] %vm1091_vm1, %v1450_v28  ;;  %v1435_v29 = vsel %vm1371_vm12, %v1314_v22, %v1403_v27  ;;  %v1500_v42 = vld [vmem:[#allocation2 + $0x87] sm:$0xff]  ;;  %v10115_v22 = vsel %vm919_vm2, 1.0, %v13714_v14  ;;  %v2199_v34 = vmul.f32 %v10095_v61, %v1504_v24 }
 0x10c   : > { %1467 = vst.msk [vmem:[#allocation2 + $0x90] sm:$0xff] %vm1091_vm1, %v1435_v29  ;;  %v1532_v44 = vmul.f32 %v10076_v41, %v1500_v42  ;;  %v2195_v45 = vmul.f32 %v10053_v0, %v1500_v42  ;;  %v1536_v26 = vmul.f32 %v10115_v22, %v1504_v24  ;;  %v1585_v28 = vld [vmem:[#allocation2 + $0xa8] sm:$0xff]  ;;  %v1586_v29 = vld [vmem:[#allocation2 + $0xb0] sm:$0xff] }
 0x10d   : > { %v1353_v30 = vpop.f32.mrf.mxu2  ;;  %13886 = vst [vmem:[#allocation13_spill] sm:$0xff] %v10115_v22  ;;  %v1508_v24 = vld [vmem:[#allocation2 + $0xc7] sm:$0xff] }
 0x10e   : > { %v1354_v36 = vadd.f32 %v9912_v35, %v1353_v30  ;;  %v1581_v35 = vld [vmem:[#allocation2 + $0x88] sm:$0xff] }
 0x10f   : > { %v1505_v30 = vld [vmem:[#allocation2 + $0xaf] sm:$0xff] }
 0x110   : > { %vm1387_vm14 = vcmp.gt.f32.partialorder %v1354_v36, 0.0  ;;  %v1419_v38 = vmul.f32 0.1, %v1354_v36  ;;  %v1558_v42 = vpack.c.bf16 %v1505_v30, %v1536_v26 }
 0x112   : > { %v1451_v43 = vsel %vm1387_vm14, %v1354_v36, %v1419_v38  ;;  %v505_v36 = vadd.s32 176, %v9894_v25 }
 0x113   : > { %1483 = vst.msk [vmem:[#allocation2 + $0x110] sm:$0xff] %vm1091_vm1, %v1451_v43  ;;  %v1582_v47 = vld [vmem:[#allocation2 + $0x90] sm:$0xff]  ;;  %v2222_v43 = vpack.c.bf16 %v1505_v30, %v2199_v34 }
 0x114   : > { %v1501_v48 = vld [vmem:[#allocation2 + $0x8f] sm:$0xff]  ;;  %v10082_v49 = vpack.c.bf16 %v1582_v47, %v1581_v35  ;;  %v1502_v62 = vld [vmem:[#allocation2 + $0x97] sm:$0xff] }
 0x115   : > { %v1556_v50 = vpack.c.bf16 %v1501_v48, %v1532_v44  ;;  %v2220_v51 = vpack.c.bf16 %v1501_v48, %v2195_v45  ;;  %v1815_v54 = vpop.f32.mrf.mxu2  ;;  %v1534_v3 = vmul.f32 %v10095_v61, %v1502_v62  ;;  %v2197_v7 = vmul.f32 %v10076_v41, %v1502_v62  ;;  %v1509_v30 = vld [vmem:[#allocation2 + $0xcf] sm:$0xff] }
 0x116   : > { %v10084_v55 = vadd.f32 %v1815_v54, %v1675_v39  ;;  %9192 = vmatmul.msk.bf16.vlgmr.msra.gmra.mxu3 %vm1091_vm1, %v10082_v49  ;;  %9251 = vmatmul.msk.bf16.vlgmr.msrb.gmra.mxu1 %vm1091_vm1, %v9931_v2  ;;  %v10124_v39 = vpack.c.bf16 %v1586_v29, %v1585_v28  ;;  %v673_v44 = vand.u32 15, %v505_v36  ;;  %v1589_v28 = vld [vmem:[#allocation2 + $0xc8] sm:$0xff]  ;;  %v1590_v29 = vld [vmem:[#allocation2 + $0xd0] sm:$0xff]  ;;  %v509_v36 = vadd.s32 208, %v9894_v25 }
 0x117   : > { %9208 = vmatmul.msk.bf16.gmra.mxu2 %vm1091_vm1, %v1556_v50  ;;  %9241 = vmatmul.msk.bf16.gmra.mxu0 %vm1091_vm1, %v2220_v51  ;;  %v1557_v11 = vpack.c.bf16 %v1503_v6, %v1534_v3  ;;  %v2221_v13 = vpack.c.bf16 %v1503_v6, %v2197_v7  ;;  %v1506_v50 = vld [vmem:[#allocation2 + $0xb7] sm:$0xff]  ;;  %v507_v3 = vadd.s32 192, %v9894_v25 }
 0x118   : > { %vm921_vm3 = vcmp.ge.s32.totalorder %v673_v44, 1  ;;  %v2201_v62 = vmul.f32 %v10115_v22, %v1506_v50 }
 0x119   : > { %v10137_v48 = vsel %vm921_vm3, 1.0, %v13714_v14 }
 0x11a   : > { %13887 = vst [vmem:[#allocation14_spill] sm:$0xff] %v10137_v48  ;;  %v1538_v51 = vmul.f32 %v10137_v48, %v1506_v50  ;;  %v2203_v34 = vmul.f32 %v10137_v48, %v1508_v24  ;;  %v2625_v48 = vld [vmem:[#allocation2 + $0x19] sm:$0xff] }
 0x11d   : > { %v1817_v59 = vpop.f32.mrf.mxu2 }
 0x11e   : > { %v10092_v60 = vadd.f32 %v1817_v59, %v1677_v58  ;;  %v1588_v58 = vld [vmem:[#allocation2 + $0xc0] sm:$0xff] }
 0x11f   : > { %v1507_v59 = vld [vmem:[#allocation2 + $0xbf] sm:$0xff]  ;;  %v10146_v6 = vpack.c.bf16 %v1588_v58, %v1587_v57 }
 0x120   : > { %v1559_v7 = vpack.c.bf16 %v1507_v59, %v1538_v51  ;;  %v2223_v8 = vpack.c.bf16 %v1507_v59, %v2201_v62  ;;  %v1510_v59 = vld [vmem:[#allocation2 + $0xd7] sm:$0xff] }
 0x123   : > { %v1680_v9 = vpop.f32.mrf.mxu1 }
 0x124   : > { %v10100_v2 = vpop.f32.mrf.mxu0 }
 0x126   : > { %9193 = vmatmul.msk.bf16.gmra.mxu3 %vm1091_vm1, %v10102_v10  ;;  %9252 = vmatmul.msk.bf16.gmra.mxu1 %vm1091_vm1, %v9951_v33 }
 0x127   : > { %9209 = vmatmul.msk.bf16.gmra.mxu2 %vm1091_vm1, %v1557_v11  ;;  %9242 = vmatmul.msk.bf16.gmra.mxu0 %vm1091_vm1, %v2221_v13 }
 0x12a   : > { %v1820_v16 = vpop.f32.mrf.mxu2 }
 0x12b   : > { %v10110_v17 = vadd.f32 %v1820_v16, %v1680_v9  ;;  %v1682_v18 = vpop.f32.mrf.mxu1  ;;  %v687_v9 = vand.u32 15, %v507_v3 }
 0x12c   : > { %v10112_v20 = vpop.f32.mrf.mxu0 }
 0x12d   : > { %vm923_vm4 = vcmp.ge.s32.totalorder %v687_v9, 1 }
 0x132   : > { %v1822_v27 = vpop.f32.mrf.mxu2 }
 0x133   : > { %v10119_v33 = vadd.f32 %v1822_v27, %v1682_v18  ;;  %v1685_v37 = vpop.f32.mrf.mxu1  ;;  %v10159_v18 = vsel %vm923_vm4, 1.0, %v13714_v14 }
 0x134   : > { %v10122_v38 = vpop.f32.mrf.mxu0  ;;  %13888 = vst [vmem:[#allocation15_spill] sm:$0xff] %v10159_v18  ;;  %v1540_v26 = vmul.f32 %v10159_v18, %v1508_v24  ;;  %v2205_v9 = vmul.f32 %v10159_v18, %v1510_v59 }
 0x136   : > { %9194 = vmatmul.msk.bf16.gmra.mxu3 %vm1091_vm1, %v10124_v39  ;;  %9253 = vmatmul.msk.bf16.gmra.mxu1 %vm1091_vm1, %v9971_v63  ;;  %v1560_v44 = vpack.c.bf16 %v1509_v30, %v1540_v26 }
 0x137   : > { %9210 = vmatmul.msk.bf16.gmra.mxu2 %vm1091_vm1, %v1558_v42  ;;  %9243 = vmatmul.msk.bf16.gmra.mxu0 %vm1091_vm1, %v2222_v43  ;;  %v10168_v43 = vpack.c.bf16 %v1590_v29, %v1589_v28 }
 0x13a   : > { %v1825_v45 = vpop.f32.mrf.mxu2 }
 0x13b   : > { %v10132_v46 = vadd.f32 %v1825_v45, %v1685_v37  ;;  %v1687_v35 = vpop.f32.mrf.mxu1  ;;  %v2224_v45 = vpack.c.bf16 %v1509_v30, %v2203_v34 }
 0x13c   : > { %v10134_v47 = vpop.f32.mrf.mxu0 }
 0x142   : > { %v1827_v54 = vpop.f32.mrf.mxu2 }
 0x143   : > { %v10141_v63 = vadd.f32 %v1827_v54, %v1687_v35  ;;  %v1690_v4 = vpop.f32.mrf.mxu1  ;;  %v701_v35 = vand.u32 15, %v509_v36 }
 0x144   : > { %v10144_v5 = vpop.f32.mrf.mxu0 }
 0x145   : > { %vm925_vm5 = vcmp.ge.s32.totalorder %v701_v35, 1 }
 0x146   : > { %9195 = vmatmul.msk.bf16.gmra.mxu3 %vm1091_vm1, %v10146_v6  ;;  %9254 = vmatmul.msk.bf16.gmra.mxu1 %vm1091_vm1, %v9991_v32  ;;  %v10181_v58 = vsel %vm925_vm5, 1.0, %v13714_v14 }
 0x147   : > { %9211 = vmatmul.msk.bf16.gmra.mxu2 %vm1091_vm1, %v1559_v7  ;;  %9244 = vmatmul.msk.bf16.gmra.mxu0 %vm1091_vm1, %v2223_v8  ;;  %13889 = vst [vmem:[#allocation16_spill] sm:$0xff] %v10181_v58  ;;  %v1542_v62 = vmul.f32 %v10181_v58, %v1510_v59  ;;  %v1592_v7 = vld [vmem:[#allocation2 + $0xe0] sm:$0xff]  ;;  %v1594_v59 = vld [vmem:[#allocation2 + $0xf0] sm:$0xff] }
 0x148   : > { %v1511_v8 = vld [vmem:[#allocation2 + $0xdf] sm:$0xff] }
 0x149   : > { %v2225_v28 = vpack.c.bf16 %v1511_v8, %v2205_v9 }
 0x14a   : > { %v1830_v11 = vpop.f32.mrf.mxu2 }
 0x14b   : > { %v10154_v13 = vadd.f32 %v1830_v11, %v1690_v4  ;;  %v1692_v15 = vpop.f32.mrf.mxu1  ;;  %v1591_v4 = vld [vmem:[#allocation2 + $0xd8] sm:$0xff]  ;;  %v511_v11 = vadd.s32 224, %v9894_v25 }
 0x14c   : > { %v10156_v16 = vpop.f32.mrf.mxu0  ;;  %v10190_v26 = vpack.c.bf16 %v1592_v7, %v1591_v4  ;;  %v513_v7 = vadd.s32 240, %v9894_v25 }
 0x14d   : > { %v715_v29 = vand.u32 15, %v511_v11 }
 0x14f   : > { %vm927_vm6 = vcmp.ge.s32.totalorder %v715_v29, 1 }
 0x152   : > { %v1832_v27 = vpop.f32.mrf.mxu2 }
 0x153   : > { %v10163_v32 = vadd.f32 %v1832_v27, %v1692_v15  ;;  %v1695_v37 = vpop.f32.mrf.mxu1  ;;  %v1561_v27 = vpack.c.bf16 %v1511_v8, %v1542_v62  ;;  %v1513_v62 = vld [vmem:[#allocation2 + $0xef] sm:$0xff] }
 0x154   : > { %v10166_v42 = vpop.f32.mrf.mxu0 }
 0x156   : > { %9196 = vmatmul.msk.bf16.gmra.mxu3 %vm1091_vm1, %v10168_v43  ;;  %9255 = vmatmul.msk.bf16.gmra.mxu1 %vm1091_vm1, %v10011_v1 }
 0x157   : > { %9212 = vmatmul.msk.bf16.gmra.mxu2 %vm1091_vm1, %v1560_v44  ;;  %9245 = vmatmul.msk.bf16.gmra.mxu0 %vm1091_vm1, %v2224_v45  ;;  %v1512_v44 = vld [vmem:[#allocation2 + $0xe7] sm:$0xff] }
 0x15a   : > { %v1835_v50 = vpop.f32.mrf.mxu2 }
 0x15b   : > { %v10176_v51 = vadd.f32 %v1835_v50, %v1695_v37  ;;  %v1697_v54 = vpop.f32.mrf.mxu1  ;;  %v10201_v37 = vsel %vm927_vm6, 1.0, %v13714_v14 }
 0x15c   : > { %v10178_v57 = vpop.f32.mrf.mxu0  ;;  %13892 = vst [vmem:[#allocation19_spill] sm:$0xff] %v10201_v37  ;;  %v1544_v35 = vmul.f32 %v10201_v37, %v1512_v44 }
 0x15e   : > { %v1562_v11 = vpack.c.bf16 %v1513_v62, %v1544_v35 }
 0x162   : > { %v1837_v3 = vpop.f32.mrf.mxu2 }
 0x163   : > { %v10185_v1 = vadd.f32 %v1837_v3, %v1697_v54  ;;  %v1700_v15 = vpop.f32.mrf.mxu1  ;;  %v1593_v54 = vld [vmem:[#allocation2 + $0xe8] sm:$0xff]  ;;  %v2207_v3 = vmul.f32 %v10181_v58, %v1512_v44 }
 0x164   : > { %v10188_v24 = vpop.f32.mrf.mxu0  ;;  %v10210_v9 = vpack.c.bf16 %v1594_v59, %v1593_v54  ;;  %v9318_v54 = vld [vmem:[%s13700_s3 + $0x20] sm:$0xf] }
 0x165   : > { %13890 = vst [vmem:[#allocation17_spill] sm:$0xff] %v10185_v1 }
 0x166   : > { %9197 = vmatmul.msk.bf16.gmra.mxu3 %vm1091_vm1, %v10190_v26  ;;  %9256 = vmatmul.msk.bf16.gmra.mxu1 %vm1091_vm1, %v10035_v40 }
 0x167   : > { %9213 = vmatmul.msk.bf16.gmra.mxu2 %vm1091_vm1, %v1561_v27  ;;  %9246 = vmatmul.msk.bf16.gmra.mxu0 %vm1091_vm1, %v2225_v28  ;;  %v729_v27 = vand.u32 15, %v513_v7  ;;  %v9284_v28 = vld [vmem:[%s13700_s3 + $0x18] sm:$0xf]  ;;  %v3486_v7 = vsel %vm1263_vm0, %v9318_v54, 0 }
 0x168   : > { %3495 = vmatpush.bf16.msra.mxu1 %v3486_v7 }
 0x169   : > { %vm929_vm7 = vcmp.ge.s32.totalorder %v729_v27, 1  ;;  %v1596_v27 = vld [vmem:[#allocation2 + $0x100] sm:$0xff] }
 0x16a   : > { %v1840_v30 = vpop.f32.mrf.mxu2  ;;  %v10233_v59 = vsel %vm929_vm7, 1.0, %v13714_v14  ;;  %v484_v14 = vadd.s32 8, %v9894_v25 }
 0x16b   : > { %v10198_v34 = vadd.f32 %v1840_v30, %v1700_v15  ;;  %v1702_v36 = vpop.f32.mrf.mxu1  ;;  %v2226_v15 = vpack.c.bf16 %v1513_v62, %v2207_v3  ;;  %v3010_v30 = vsel %vm1263_vm0, %v9284_v28, 0  ;;  %13897 = vst [vmem:[#allocation24_spill] sm:$0xff] %v10233_v59  ;;  %v1514_v62 = vld [vmem:[#allocation2 + $0xf7] sm:$0xff]  ;;  %v1515_v28 = vld [vmem:[#allocation2 + $0xff] sm:$0xff] }
 0x16c   : > { %v10203_v45 = vpop.f32.mrf.mxu0  ;;  %3019 = vmatpush.bf16.msra.mxu3 %v3010_v30  ;;  %v2209_v30 = vmul.f32 %v10201_v37, %v1514_v62  ;;  %v526_v7 = vand.u32 15, %v484_v14  ;;  %v2179_v37 = vld [vmem:[#allocation2 + $0x107] sm:$0xff] }
 0x16d   : > { %13891 = vst [vmem:[#allocation18_spill] sm:$0xff] %v10198_v34  ;;  %v2211_v18 = vmul.f32 %v10233_v59, %v2179_v37 }
 0x16e   : > { %13893 = vst [vmem:[#allocation20_spill] sm:$0xff] %v10203_v45  ;;  %vm996_vm8 = vcmp.le.s32.totalorder %v526_v7, 14  ;;  %v2180_v7 = vld [vmem:[#allocation2 + $0x10f] sm:$0xff] }
 0x16f   : > { %v2228_v0 = vpack.c.bf16 %v2180_v7, %v2211_v18 }
 0x172   : > { %v1842_v50 = vpop.f32.mrf.mxu2 }
 0x173   : > { %v10207_v4 = vadd.f32 %v1842_v50, %v1702_v36  ;;  %v1705_v8 = vpop.f32.mrf.mxu1  ;;  %v9301_v50 = vld [vmem:[%s13700_s3 + $0x1c] sm:$0xf] }
 0x174   : > { %v10221_v29 = vpop.f32.mrf.mxu0  ;;  %v3232_v3 = vsel %vm1263_vm0, %v9301_v50, 0 }
 0x175   : > { %13894 = vst [vmem:[#allocation21_spill] sm:$0xff] %v10207_v4  ;;  %3241 = vmatpush.bf16.msra.mxu0 %v3232_v3  ;;  %v2227_v3 = vpack.c.bf16 %v1515_v28, %v2209_v30  ;;  %v2626_v30 = vld [vmem:[#allocation2 + $0x21] sm:$0xff] }
 0x176   : > { %9198 = vmatmul.msk.bf16.gmra.mxu3 %vm1091_vm1, %v10210_v9  ;;  %9257 = vmatmul.msk.bf16.gmra.mxu1 %vm1091_vm1, %v10059_v12  ;;  %13895 = vst [vmem:[#allocation22_spill] sm:$0xff] %v10221_v29  ;;  %v3139_v29 = vld [vmem:[#allocation2 + $0x58] sm:$0xff] }
 0x177   : > { %9214 = vmatmul.msk.bf16.gmra.mxu2 %vm1091_vm1, %v1562_v11  ;;  %9247 = vmatmul.msk.bf16.gmra.mxu0 %vm1091_vm1, %v2226_v15  ;;  %v1595_v15 = vld [vmem:[#allocation2 + $0xf8] sm:$0xff] }
 0x178   : > { %v10244_v50 = vpack.c.bf16 %v1596_v27, %v1595_v15 }
 0x17a   : > { %v1845_v36 = vpop.f32.mrf.mxu2 }
 0x17b   : > { %v10224_v44 = vadd.f32 %v1845_v36, %v1705_v8  ;;  %v1707_v35 = vpop.f32.mrf.mxu1  ;;  %v1546_v8 = vmul.f32 %v10233_v59, %v1514_v62 }
 0x17c   : > { %v10239_v36 = vpop.f32.mrf.mxu0 }
 0x17d   : > { %13896 = vst [vmem:[#allocation23_spill] sm:$0xff] %v10224_v44  ;;  %v1563_v54 = vpack.c.bf16 %v1515_v28, %v1546_v8  ;;  %v13902_v8 = vmov 0.0   ;;  %v1896_v28 = vld [vmem:[#allocation2 + $0x11] sm:$0xff] }
 0x17e   : > { %13898 = vst [vmem:[#allocation25_spill] sm:$0xff] %v10239_v36  ;;  %v10257_v27 = vsel %vm996_vm8, 1.0, %v13902_v8  ;;  %v1895_v36 = vld [vmem:[#allocation2 + $0x9] sm:$0xff] }
 0x17f   : > { %13903 = vst [vmem:[#allocation29_spill] sm:$0xff] %v10257_v27  ;;  %v1928_v14 = vmul.f32 %v10257_v27, %v1896_v28 }
 0x181   : > { %v1959_v61 = vpack.c.bf16 %v1928_v14, %v1895_v36  ;;  %v10281_v14 = vld [vmem:[#allocation2 + $0x31] sm:$0xff] }
 0x182   : > { %v1847_v11 = vpop.f32.mrf.mxu2 }
 0x183   : > { %v10241_v58 = vadd.f32 %v1847_v11, %v1707_v35  ;;  %v1710_v45 = vpop.f32.mrf.mxu1 }
 0x184   : > { %v10254_v15 = vpop.f32.mrf.mxu0 }
 0x185   : > { %13899 = vst [vmem:[#allocation26_spill] sm:$0xff] %v10241_v58 }
 0x186   : > { %9199 = vmatmul.msk.bf16.gmra.mxu3 %vm1091_vm1, %v10244_v50  ;;  %9258 = vmatmul.msk.bf16.gmra.mxu1 %vm1091_vm1, %v10082_v49  ;;  %13901 = vst [vmem:[#allocation28_spill] sm:$0xff] %v10254_v15 }
 0x187   : > { %9215 = vmatmul.msk.bf16.gmra.mxu2 %vm1091_vm1, %v1563_v54  ;;  %9248 = vmatmul.msk.bf16.gmra.mxu0 %vm1091_vm1, %v2227_v3  ;;  %v2658_v54 = vmul.f32 %v10257_v27, %v2626_v30 }
 0x189   : > { %v2689_v41 = vpack.c.bf16 %v2658_v54, %v2625_v48 }
 0x18a   : > { %v1850_v35 = vpop.f32.mrf.mxu2 }
 0x18b   : > { %v10252_v62 = vadd.f32 %v1850_v35, %v1710_v45  ;;  %v1712_v11 = vpop.f32.mrf.mxu1  ;;  %v486_v35 = vadd.s32 24, %v9894_v25 }
 0x18c   : > { %v10267_v23 = vpop.f32.mrf.mxu0 }
 0x18d   : > { %13900 = vst [vmem:[#allocation27_spill] sm:$0xff] %v10252_v62  ;;  %v540_v28 = vand.u32 15, %v486_v35  ;;  %v3137_v62 = vld [vmem:[#allocation2 + $0x48] sm:$0xff] }
 0x18e   : > { %13905 = vst [vmem:[#allocation31_spill] sm:$0xff] %v10267_v23 }
 0x18f   : > { %vm998_vm9 = vcmp.le.s32.totalorder %v540_v28, 14  ;;  %v488_v28 = vadd.s32 40, %v9894_v25 }
 0x190   : > { %v10279_v18 = vsel %vm998_vm9, 1.0, %v13902_v8 }
 0x191   : > { %13907 = vst [vmem:[#allocation33_spill] sm:$0xff] %v10279_v18 }
 0x192   : > { %v1852_v3 = vpop.f32.mrf.mxu2 }
 0x193   : > { %v10262_v45 = vadd.f32 %v1852_v3, %v1712_v11  ;;  %v10265_v22 = vpop.f32.mrf.mxu1 }
 0x195   : > { %13904 = vst [vmem:[#allocation30_spill] sm:$0xff] %v10262_v45 }
 0x196   : > { %9217 = vmatmul.msk.bf16.vlgmr.msrb.gmra.mxu3 %vm1091_vm1, %v1959_v61  ;;  %9259 = vmatmul.msk.bf16.gmra.mxu1 %vm1091_vm1, %v10102_v10  ;;  %v10283_v61 = vpop.f32.mrf.mxu0 }
 0x197   : > { %9268 = vmatmul.msk.bf16.vlgmr.msra.gmra.mxu2 %vm1091_vm1, %v2689_v41  ;;  %9249 = vmatmul.msk.bf16.gmra.mxu0 %vm1091_vm1, %v2228_v0  ;;  %13908 = vst [vmem:[#allocation34_spill] sm:$0xff] %v10283_v61  ;;  %v1930_v41 = vmul.f32 %v10279_v18, %v2626_v30  ;;  %v2660_v0 = vmul.f32 %v10279_v18, %v10281_v14  ;;  %v554_v30 = vand.u32 15, %v488_v28  ;;  %v3136_v28 = vld [vmem:[#allocation2 + $0x40] sm:$0xff] }
 0x199   : > { %v1715_v37 = vpop.f32.mrf.mxu3  ;;  %v1960_v23 = vpack.c.bf16 %v1930_v41, %v2625_v48  ;;  %vm1000_vm10 = vcmp.le.s32.totalorder %v554_v30, 14  ;;  %v490_v30 = vadd.s32 56, %v9894_v25 }
 0x19a   : > { %v1855_v11 = vpop.f32.mrf.mxu2 }
 0x19b   : > { %v10274_v3 = vadd.f32 %v1855_v11, %v1715_v37  ;;  %v10276_v36 = vpop.f32.mrf.mxu1  ;;  %v3134_v37 = vld [vmem:[#allocation2 + $0x30] sm:$0xff] }
 0x19c   : > { %v10291_v11 = vld [vmem:[#allocation2 + $0x29] sm:$0xff]  ;;  %v3165_v52 = vpack.c.bf16 %v3134_v37, %v3133_v19  ;;  %v10308_v19 = vsel %vm1000_vm10, 1.0, %v13902_v8 }
 0x19d   : > { %13906 = vst [vmem:[#allocation32_spill] sm:$0xff] %v10274_v3  ;;  %v2690_v53 = vpack.c.bf16 %v2660_v0, %v10291_v11  ;;  %v3135_v3 = vld [vmem:[#allocation2 + $0x38] sm:$0xff] }
 0x19e   : > { %v10301_v21 = vpop.f32.mrf.mxu0  ;;  %13912 = vst [vmem:[#allocation38_spill] sm:$0xff] %v10308_v19  ;;  %v3166_v31 = vpack.c.bf16 %v3136_v28, %v3135_v3  ;;  %v10339_v3 = vld [vmem:[#allocation2 + $0x51] sm:$0xff] }
 0x19f   : > { %13910 = vst [vmem:[#allocation36_spill] sm:$0xff] %v10301_v21 }
 0x1a1   : > { %v1717_v54 = vpop.f32.mrf.mxu3 }
 0x1a2   : > { %v1857_v7 = vpop.f32.mrf.mxu2 }
 0x1a3   : > { %v10288_v35 = vadd.f32 %v1857_v7, %v1717_v54  ;;  %v10293_v59 = vpop.f32.mrf.mxu1 }
 0x1a5   : > { %13909 = vst [vmem:[#allocation35_spill] sm:$0xff] %v10288_v35 }
 0x1a6   : > { %9218 = vmatmul.msk.bf16.gmra.mxu3 %vm1091_vm1, %v1960_v23  ;;  %9260 = vmatmul.msk.bf16.gmra.mxu1 %vm1091_vm1, %v10124_v39  ;;  %v10310_v23 = vld [vmem:[#allocation2 + $0x41] sm:$0xff] }
 0x1a7   : > { %9269 = vmatmul.msk.bf16.gmra.mxu2 %vm1091_vm1, %v2690_v53  ;;  %9302 = vmatmul.msk.bf16.vlgmr.msra.gmra.mxu0 %vm1091_vm1, %v3165_v52  ;;  %v1932_v53 = vmul.f32 %v10308_v19, %v10281_v14  ;;  %v2662_v52 = vmul.f32 %v10308_v19, %v10310_v23 }
 0x1a9   : > { %v1720_v54 = vpop.f32.mrf.mxu3 }
 0x1aa   : > { %v1860_v7 = vpop.f32.mrf.mxu2 }
 0x1ab   : > { %v10303_v56 = vadd.f32 %v1860_v7, %v1720_v54  ;;  %v10305_v48 = vpop.f32.mrf.mxu1  ;;  %v10319_v54 = vld [vmem:[#allocation2 + $0x39] sm:$0xff]  ;;  %v10321_v7 = vpop.f32.mrf.mxu0 }
 0x1ac   : > { %13914 = vst [vmem:[#allocation40_spill] sm:$0xff] %v10321_v7  ;;  %v2691_v35 = vpack.c.bf16 %v2662_v52, %v10319_v54 }
 0x1ad   : > { %13911 = vst [vmem:[#allocation37_spill] sm:$0xff] %v10303_v56  ;;  %v1961_v56 = vpack.c.bf16 %v1932_v53, %v10291_v11 }
 0x1b1   : > { %v1722_v41 = vpop.f32.mrf.mxu3 }
 0x1b2   : > { %v1862_v0 = vpop.f32.mrf.mxu2 }
 0x1b3   : > { %v10316_v37 = vadd.f32 %v1862_v0, %v1722_v41  ;;  %v10323_v21 = vpop.f32.mrf.mxu1  ;;  %v568_v41 = vand.u32 15, %v490_v30 }
 0x1b5   : > { %13913 = vst [vmem:[#allocation39_spill] sm:$0xff] %v10316_v37  ;;  %vm1002_vm11 = vcmp.le.s32.totalorder %v568_v41, 14  ;;  %v3138_v41 = vld [vmem:[#allocation2 + $0x50] sm:$0xff] }
 0x1b6   : > { %9219 = vmatmul.msk.bf16.gmra.mxu3 %vm1091_vm1, %v1961_v56  ;;  %9261 = vmatmul.msk.bf16.gmra.mxu1 %vm1091_vm1, %v10146_v6  ;;  %v10337_v52 = vsel %vm1002_vm11, 1.0, %v13902_v8  ;;  %v10341_v56 = vpop.f32.mrf.mxu0  ;;  %v3167_v58 = vpack.c.bf16 %v3138_v41, %v3137_v62 }
 0x1b7   : > { %9270 = vmatmul.msk.bf16.gmra.mxu2 %vm1091_vm1, %v2691_v35  ;;  %9303 = vmatmul.msk.bf16.gmra.mxu0 %vm1091_vm1, %v3166_v31  ;;  %13916 = vst [vmem:[#allocation42_spill] sm:$0xff] %v10337_v52  ;;  %v1934_v35 = vmul.f32 %v10337_v52, %v10310_v23  ;;  %v2664_v31 = vmul.f32 %v10337_v52, %v10339_v3 }
 0x1b8   : > { %13917 = vst [vmem:[#allocation43_spill] sm:$0xff] %v10341_v56 }
 0x1b9   : > { %v1725_v0 = vpop.f32.mrf.mxu3  ;;  %v1962_v61 = vpack.c.bf16 %v1934_v35, %v10319_v54 }
 0x1ba   : > { %v1865_v37 = vpop.f32.mrf.mxu2 }
 0x1bb   : > { %v10332_v7 = vadd.f32 %v1865_v37, %v1725_v0  ;;  %v10334_v53 = vpop.f32.mrf.mxu1  ;;  %v492_v0 = vadd.s32 72, %v9894_v25 }
 0x1bd   : > { %13915 = vst [vmem:[#allocation41_spill] sm:$0xff] %v10332_v7  ;;  %v10350_v7 = vld [vmem:[#allocation2 + $0x49] sm:$0xff]  ;;  %v582_v15 = vand.u32 15, %v492_v0  ;;  %v494_v0 = vadd.s32 88, %v9894_v25 }
 0x1be   : > { %v2692_v56 = vpack.c.bf16 %v2664_v31, %v10350_v7 }
 0x1bf   : > { %vm1004_vm12 = vcmp.le.s32.totalorder %v582_v15, 14  ;;  %v3140_v15 = vld [vmem:[#allocation2 + $0x60] sm:$0xff] }
 0x1c0   : > { %v10368_v62 = vsel %vm1004_vm12, 1.0, %v13902_v8  ;;  %v3168_v34 = vpack.c.bf16 %v3140_v15, %v3139_v29  ;;  %v10399_v29 = vld [vmem:[#allocation2 + $0x71] sm:$0xff]  ;;  %vm3769_vm12 = vcmask 130048  }
 0x1c1   : > { %v1727_v28 = vpop.f32.mrf.mxu3  ;;  %13921 = vst [vmem:[#allocation47_spill] sm:$0xff] %v10368_v62 }
 0x1c2   : > { %v1867_v30 = vpop.f32.mrf.mxu2 }
 0x1c3   : > { %v10347_v37 = vadd.f32 %v1867_v30, %v1727_v28  ;;  %v10352_v45 = vpop.f32.mrf.mxu1  ;;  %v10361_v28 = vpop.f32.mrf.mxu0 }
 0x1c4   : > { %13919 = vst [vmem:[#allocation45_spill] sm:$0xff] %v10361_v28 }
 0x1c5   : > { %13918 = vst [vmem:[#allocation44_spill] sm:$0xff] %v10347_v37 }
 0x1c6   : > { %9220 = vmatmul.msk.bf16.gmra.mxu3 %vm1091_vm1, %v1962_v61  ;;  %9262 = vmatmul.msk.bf16.gmra.mxu1 %vm1091_vm1, %v10168_v43  ;;  %v10370_v61 = vld [vmem:[#allocation2 + $0x61] sm:$0xff] }
 0x1c7   : > { %9271 = vmatmul.msk.bf16.gmra.mxu2 %vm1091_vm1, %v2692_v56  ;;  %9304 = vmatmul.msk.bf16.gmra.mxu0 %vm1091_vm1, %v3167_v58  ;;  %v1936_v56 = vmul.f32 %v10368_v62, %v10339_v3  ;;  %v2666_v43 = vmul.f32 %v10368_v62, %v10370_v61 }
 0x1c9   : > { %v1730_v30 = vpop.f32.mrf.mxu3  ;;  %v1963_v28 = vpack.c.bf16 %v1936_v56, %v10350_v7 }
 0x1ca   : > { %v1870_v37 = vpop.f32.mrf.mxu2 }
 0x1cb   : > { %v10363_v44 = vadd.f32 %v1870_v37, %v1730_v30  ;;  %v10365_v35 = vpop.f32.mrf.mxu1  ;;  %v10376_v41 = vpop.f32.mrf.mxu0  ;;  %v10381_v30 = vld [vmem:[#allocation2 + $0x59] sm:$0xff] }
 0x1cc   : > { %13922 = vst [vmem:[#allocation48_spill] sm:$0xff] %v10376_v41  ;;  %v2693_v4 = vpack.c.bf16 %v2666_v43, %v10381_v30  ;;  %v596_v41 = vand.u32 15, %v494_v0 }
 0x1cd   : > { %13920 = vst [vmem:[#allocation46_spill] sm:$0xff] %v10363_v44 }
 0x1ce   : > { %vm1006_vm13 = vcmp.le.s32.totalorder %v596_v41, 14  ;;  %v496_v41 = vadd.s32 104, %v9894_v25 }
 0x1cf   : > { %v10397_v43 = vsel %vm1006_vm13, 1.0, %v13902_v8 }
 0x1d0   : > { %13927 = vst [vmem:[#allocation53_spill] sm:$0xff] %v10397_v43 }
 0x1d1   : > { %v1732_v58 = vpop.f32.mrf.mxu3 }
 0x1d2   : > { %v1872_v31 = vpop.f32.mrf.mxu2 }
 0x1d3   : > { %v10378_v37 = vadd.f32 %v1872_v31, %v1732_v58  ;;  %v10383_v44 = vpop.f32.mrf.mxu1  ;;  %v10394_v56 = vpop.f32.mrf.mxu0 }
 0x1d4   : > { %13924 = vst [vmem:[#allocation50_spill] sm:$0xff] %v10383_v44 }
 0x1d5   : > { %13923 = vst [vmem:[#allocation49_spill] sm:$0xff] %v10378_v37 }
 0x1d6   : > { %9221 = vmatmul.msk.bf16.gmra.mxu3 %vm1091_vm1, %v1963_v28  ;;  %9263 = vmatmul.msk.bf16.gmra.mxu1 %vm1091_vm1, %v10190_v26  ;;  %13926 = vst [vmem:[#allocation52_spill] sm:$0xff] %v10394_v56  ;;  %v2668_v26 = vmul.f32 %v10397_v43, %v10399_v29 }
 0x1d7   : > { %9272 = vmatmul.msk.bf16.gmra.mxu2 %vm1091_vm1, %v2693_v4  ;;  %9305 = vmatmul.msk.bf16.gmra.mxu0 %vm1091_vm1, %v3168_v34  ;;  %v1938_v4 = vmul.f32 %v10397_v43, %v10370_v61 }
 0x1d9   : > { %v1735_v58 = vpop.f32.mrf.mxu3 }
 0x1da   : > { %v1875_v31 = vpop.f32.mrf.mxu2 }
 0x1db   : > { %v10392_v37 = vadd.f32 %v1875_v31, %v1735_v58  ;;  %v10401_v28 = vpop.f32.mrf.mxu1  ;;  %v10410_v58 = vld [vmem:[#allocation2 + $0x69] sm:$0xff]  ;;  %v1964_v31 = vpack.c.bf16 %v1938_v4, %v10381_v30  ;;  %v10414_v56 = vpop.f32.mrf.mxu0 }
 0x1dc   : > { %13928 = vst [vmem:[#allocation54_spill] sm:$0xff] %v10401_v28  ;;  %v610_v28 = vand.u32 15, %v496_v41 }
 0x1dd   : > { %13925 = vst [vmem:[#allocation51_spill] sm:$0xff] %v10392_v37  ;;  %v2694_v37 = vpack.c.bf16 %v2668_v26, %v10410_v58 }
 0x1de   : > { %13930 = vst [vmem:[#allocation56_spill] sm:$0xff] %v10414_v56  ;;  %vm1008_vm14 = vcmp.le.s32.totalorder %v610_v28, 14  ;;  %v498_v28 = vadd.s32 120, %v9894_v25 }
 0x1df   : > { %v10427_v26 = vsel %vm1008_vm14, 1.0, %v13902_v8 }
 0x1e0   : > { %13933 = vst [vmem:[#allocation59_spill] sm:$0xff] %v10427_v26  ;;  %v624_v1 = vand.u32 15, %v498_v28 }
 0x1e1   : > { %v1737_v34 = vpop.f32.mrf.mxu3 }
 0x1e2   : > { %v1877_v15 = vpop.f32.mrf.mxu2  ;;  %vm1010_vm15 = vcmp.le.s32.totalorder %v624_v1, 14  ;;  %v500_v1 = vadd.s32 136, %v9894_v25 }
 0x1e3   : > { %v10407_v0 = vadd.f32 %v1877_v15, %v1737_v34  ;;  %v10422_v34 = vpop.f32.mrf.mxu1 }
 0x1e4   : > { %13931 = vst [vmem:[#allocation57_spill] sm:$0xff] %v10422_v34 }
 0x1e5   : > { %13929 = vst [vmem:[#allocation55_spill] sm:$0xff] %v10407_v0 }
 0x1e6   : > { %9222 = vmatmul.msk.bf16.gmra.mxu3 %vm1091_vm1, %v1964_v31  ;;  %9264 = vmatmul.msk.bf16.gmra.mxu1 %vm1091_vm1, %v10210_v9  ;;  %v10429_v31 = vld [vmem:[#allocation2 + $0x81] sm:$0xff]  ;;  %v1940_v9 = vmul.f32 %v10427_v26, %v10399_v29 }
 0x1e7   : > { %9273 = vmatmul.msk.bf16.gmra.mxu2 %vm1091_vm1, %v2694_v37  ;;  %9306 = vmatmul.msk.bf16.gmra.mxu0 %vm1091_vm1, %v10035_v40  ;;  %13934 = vst [vmem:[#allocation60_spill] sm:$0xff] %v10429_v31  ;;  %v10431_v37 = vpop.f32.mrf.mxu0  ;;  %v2670_v40 = vmul.f32 %v10427_v26, %v10429_v31 }
 0x1e8   : > { %13935 = vst [vmem:[#allocation61_spill] sm:$0xff] %v10431_v37 }
 0x1e9   : > { %v1740_v15 = vpop.f32.mrf.mxu3 }
 0x1ea   : > { %v1880_v0 = vpop.f32.mrf.mxu2 }
 0x1eb   : > { %v10424_v4 = vadd.f32 %v1880_v0, %v1740_v15  ;;  %v10437_v34 = vpop.f32.mrf.mxu1  ;;  %v10442_v15 = vld [vmem:[#allocation2 + $0x79] sm:$0xff] }
 0x1ec   : > { %13936 = vst [vmem:[#allocation62_spill] sm:$0xff] %v10437_v34  ;;  %v2695_v37 = vpack.c.bf16 %v2670_v40, %v10442_v15 }
 0x1ed   : > { %13932 = vst [vmem:[#allocation58_spill] sm:$0xff] %v10424_v4  ;;  %v1965_v4 = vpack.c.bf16 %v1940_v9, %v10410_v58 }
 0x1ef   : > { %v10452_v34 = vpop.f32.mrf.mxu0 }
 0x1f0   : > { %13938 = vst [vmem:[#allocation64_spill] sm:$0xff] %v10452_v34  ;;  %v10470_v34 = vld [vmem:[#allocation2 + $0x89] sm:$0xff] }
 0x1f1   : > { %v1742_v41 = vpop.f32.mrf.mxu3 }
 0x1f2   : > { %v1882_v56 = vpop.f32.mrf.mxu2 }
 0x1f3   : > { %v10439_v0 = vadd.f32 %v1882_v56, %v1742_v41  ;;  %v10456_v9 = vpop.f32.mrf.mxu1 }
 0x1f4   : > { %13940 = vst [vmem:[#allocation66_spill] sm:$0xff] %v10456_v9 }
 0x1f5   : > { %13937 = vst [vmem:[#allocation63_spill] sm:$0xff] %v10439_v0 }
 0x1f6   : > { %9223 = vmatmul.msk.bf16.gmra.mxu3 %vm1091_vm1, %v1965_v4  ;;  %9265 = vmatmul.msk.bf16.gmra.mxu1 %vm1091_vm1, %v10244_v50  ;;  %v10459_v4 = vsel %vm1010_vm15, 1.0, %v13902_v8 }
 0x1f7   : > { %9274 = vmatmul.msk.bf16.gmra.mxu2 %vm1091_vm1, %v2695_v37  ;;  %9307 = vmatmul.msk.bf16.gmra.mxu0 %vm1091_vm1, %v10059_v12  ;;  %13941 = vst [vmem:[#allocation67_spill] sm:$0xff] %v10459_v4  ;;  %v10461_v37 = vld [vmem:[#allocation2 + $0x91] sm:$0xff]  ;;  %v1942_v50 = vmul.f32 %v10459_v4, %v10429_v31 }
 0x1f8   : > { %v2672_v12 = vmul.f32 %v10459_v4, %v10461_v37 }
 0x1f9   : > { %v1745_v56 = vpop.f32.mrf.mxu3  ;;  %v1966_v9 = vpack.c.bf16 %v1942_v50, %v10442_v15 }
 0x1fa   : > { %v1885_v41 = vpop.f32.mrf.mxu2  ;;  %v2696_v43 = vpack.c.bf16 %v2672_v12, %v10470_v34 }
 0x1fb   : > { %v10454_v0 = vadd.f32 %v1885_v41, %v1745_v56  ;;  %v2433_v56 = vld [vmem:[#allocation2 + $0x108] sm:$0xff]  ;;  %v2434_v41 = vld [vmem:[#allocation2 + $0x110] sm:$0xff]  ;;  %v10478_v44 = vpop.f32.mrf.mxu1 }
 0x1fc   : > { %v10476_v31 = vpack.c.bf16 %v2434_v41, %v2433_v56  ;;  %13945 = vst [vmem:[#allocation71_spill] sm:$0xff] %v10478_v44  ;;  %v10491_v56 = vld [vmem:[#allocation2 + $0xa1] sm:$0xff]  ;;  %v3388_v44 = vmul.f32 %v10257_v27, %v10281_v14 }
 0x1fd   : > { %13939 = vst [vmem:[#allocation65_spill] sm:$0xff] %v10454_v0  ;;  %v10472_v0 = vpop.f32.mrf.mxu0 }
 0x1fe   : > { %13943 = vst [vmem:[#allocation69_spill] sm:$0xff] %v10472_v0 }
 0x1ff   : > { %13944 = vst [vmem:[#allocation70_spill] sm:$0xff] %v10476_v31 }
 0x201   : > { %v1747_v40 = vpop.f32.mrf.mxu3 }
 0x202   : > { %v1887_v28 = vpop.f32.mrf.mxu2 }
 0x203   : > { %v10467_v26 = vadd.f32 %v1887_v28, %v1747_v40  ;;  %v638_v40 = vand.u32 15, %v500_v1 }
 0x205   : > { %13942 = vst [vmem:[#allocation68_spill] sm:$0xff] %v10467_v26  ;;  %vm1012_vm2 = vcmp.le.s32.totalorder %v638_v40, 14 }
 0x206   : > { %9224 = vmatmul.msk.bf16.gmra.mxu3 %vm1091_vm1, %v1966_v9  ;;  %9266 = vmatmul.msk.bf16.gmra.mxu1 %vm1091_vm1, %v10476_v31  ;;  %v10489_v12 = vsel %vm1012_vm2, 1.0, %v13902_v8  ;;  %v10493_v9 = vpop.f32.mrf.mxu0 }
 0x207   : > { %9275 = vmatmul.msk.bf16.gmra.mxu2 %vm1091_vm1, %v2696_v43  ;;  %9308 = vmatmul.msk.bf16.gmra.mxu0 %vm1091_vm1, %v10082_v49  ;;  %13947 = vst [vmem:[#allocation73_spill] sm:$0xff] %v10489_v12  ;;  %v10495_v43 = vpop.f32.mrf.mxu1  ;;  %v1944_v41 = vmul.f32 %v10489_v12, %v10461_v37  ;;  %v2674_v49 = vmul.f32 %v10489_v12, %v10491_v56 }
 0x208   : > { %13948 = vst [vmem:[#allocation74_spill] sm:$0xff] %v10493_v9 }
 0x209   : > { %v1750_v28 = vpop.f32.mrf.mxu3  ;;  %13949 = vst [vmem:[#allocation75_spill] sm:$0xff] %v10495_v43  ;;  %v1967_v0 = vpack.c.bf16 %v1944_v41, %v10470_v34  ;;  %v3419_v43 = vpack.c.bf16 %v3388_v44, %v10291_v11 }
 0x20a   : > { %v1890_v26 = vpop.f32.mrf.mxu2 }
 0x20b   : > { %v10486_v50 = vadd.f32 %v1890_v26, %v1750_v28  ;;  %v9700_v26 = vld [vmem:[%s13702_s5] sm:$0xff] }
 0x20c   : > { %v10504_v28 = vld [vmem:[#allocation2 + $0x99] sm:$0xff]  ;;  %3825 = vmatpush.bf16.msrb.mxu2 %v9700_v26 }
 0x20d   : > { %13946 = vst [vmem:[#allocation72_spill] sm:$0xff] %v10486_v50  ;;  %v502_v50 = vadd.s32 152, %v9894_v25  ;;  %v2697_v12 = vpack.c.bf16 %v2674_v49, %v10504_v28 }
 0x20e   : > { %v10519_v14 = vpop.f32.mrf.mxu0 }
 0x20f   : > { %v652_v31 = vand.u32 15, %v502_v50 }
 0x211   : > { %v1752_v1 = vpop.f32.mrf.mxu3  ;;  %vm1014_vm3 = vcmp.le.s32.totalorder %v652_v31, 14  ;;  %v10537_v31 = vld [vmem:[#allocation2 + $0xa9] sm:$0xff] }
 0x212   : > { %v1892_v40 = vpop.f32.mrf.mxu2  ;;  %v10526_v11 = vsel %vm1014_vm3, 1.0, %v13902_v8 }
 0x213   : > { %v10508_v9 = vadd.f32 %v1892_v40, %v1752_v1  ;;  %v10521_v40 = vpop.f32.mrf.mxu1  ;;  %13951 = vst [vmem:[#allocation77_spill] sm:$0xff] %v10526_v11 }
 0x214   : > { %13950 = vst [vmem:[#allocation76_spill] sm:$0xff] %v10521_v40 }
 0x216   : > { %9225 = vmatmul.msk.bf16.gmra.mxu3 %vm1091_vm1, %v1967_v0  ;;  %9319 = vmatmul.msk.bf16.vlgmr.msra.gmra.mxu1 %vm1091_vm1, %v3419_v43  ;;  %v10528_v0 = vld [vmem:[#allocation2 + $0xb1] sm:$0xff] }
 0x217   : > { %9276 = vmatmul.msk.bf16.gmra.mxu2 %vm1091_vm1, %v2697_v12  ;;  %9309 = vmatmul.msk.bf16.gmra.mxu0 %vm1091_vm1, %v10102_v10  ;;  %v1946_v12 = vmul.f32 %v10526_v11, %v10491_v56  ;;  %v2676_v43 = vmul.f32 %v10526_v11, %v10528_v0 }
 0x219   : > { %v2037_v1 = vpop.f32.mrf.mxu3  ;;  %v2698_v27 = vpack.c.bf16 %v2676_v43, %v10537_v31 }
 0x21a   : > { %v2767_v26 = vpop.f32.mrf.mxu2  ;;  %v2117_v41 = vadd.f32 %v2037_v1, %v10084_v55  ;;  %v10541_v1 = vpop.f32.mrf.mxu0 }
 0x21b   : > { %13953 = vst [vmem:[#allocation79_spill] sm:$0xff] %v10541_v1 }
 0x21c   : > { %v2371_v44 = vadd.f32 %v10100_v2, %v2117_v41  ;;  %v3390_v2 = vmul.f32 %v10279_v18, %v10310_v23 }
 0x21e   : > { %v2593_v10 = vadd.f32 %v10265_v22, %v2371_v44  ;;  %v504_v22 = vadd.s32 168, %v9894_v25  ;;  %v3420_v40 = vpack.c.bf16 %v3390_v2, %v10319_v54 }
 0x220   : > { %v10531_v50 = vadd.f32 %v2767_v26, %v2593_v10  ;;  %v10545_v26 = vpop.f32.mrf.mxu1  ;;  %v1968_v10 = vpack.c.bf16 %v1946_v12, %v10504_v28  ;;  %v666_v23 = vand.u32 15, %v504_v22  ;;  %v3392_v22 = vmul.f32 %v10308_v19, %v10339_v3 }
 0x221   : > { %v2039_v49 = vpop.f32.mrf.mxu3 }
 0x222   : > { %13952 = vst [vmem:[#allocation78_spill] sm:$0xff] %v10531_v50  ;;  %v2769_v55 = vpop.f32.mrf.mxu2  ;;  %v2118_v41 = vadd.f32 %v2039_v49, %v10092_v60  ;;  %vm1016_vm4 = vcmp.le.s32.totalorder %v666_v23, 14  ;;  %v10560_v54 = vpop.f32.mrf.mxu0 }
 0x223   : > { %v10564_v49 = vsel %vm1016_vm4, 1.0, %v13902_v8 }
 0x224   : > { %v2372_v44 = vadd.f32 %v10112_v20, %v2118_v41  ;;  %13954 = vst [vmem:[#allocation80_spill] sm:$0xff] %v10564_v49 }
 0x226   : > { %v2594_v50 = vadd.f32 %v10276_v36, %v2372_v44  ;;  %9226 = vmatmul.msk.bf16.gmra.mxu3 %vm1091_vm1, %v1968_v10  ;;  %9320 = vmatmul.msk.bf16.gmra.mxu1 %vm1091_vm1, %v3420_v40  ;;  %v506_v10 = vadd.s32 184, %v9894_v25 }
 0x227   : > { %9277 = vmatmul.msk.bf16.gmra.mxu2 %vm1091_vm1, %v2698_v27  ;;  %9310 = vmatmul.msk.bf16.gmra.mxu0 %vm1091_vm1, %v10124_v39  ;;  %v10566_v27 = vld [vmem:[#allocation2 + $0xc1] sm:$0xff] }
 0x228   : > { %v10557_v60 = vadd.f32 %v2769_v55, %v2594_v50  ;;  %v10568_v2 = vpop.f32.mrf.mxu1  ;;  %v1948_v50 = vmul.f32 %v10564_v49, %v10528_v0  ;;  %v680_v3 = vand.u32 15, %v506_v10 }
 0x229   : > { %v2042_v20 = vpop.f32.mrf.mxu3  ;;  %13955 = vst [vmem:[#allocation81_spill] sm:$0xff] %v10568_v2 }
 0x22a   : > { %v2772_v12 = vpop.f32.mrf.mxu2  ;;  %v2119_v43 = vadd.f32 %v2042_v20, %v10110_v17  ;;  %v2678_v17 = vmul.f32 %v10564_v49, %v10566_v27  ;;  %v1969_v23 = vpack.c.bf16 %v1948_v50, %v10537_v31  ;;  %vm1018_vm5 = vcmp.le.s32.totalorder %v680_v3, 14 }
 0x22b   : > { %v508_v3 = vadd.s32 200, %v9894_v25 }
 0x22c   : > { %v2373_v36 = vadd.f32 %v10122_v38, %v2119_v43  ;;  %v10577_v38 = vld [vmem:[#allocation2 + $0xb9] sm:$0xff]  ;;  %v10587_v43 = vpop.f32.mrf.mxu0 }
 0x22d   : > { %v2699_v20 = vpack.c.bf16 %v2678_v17, %v10577_v38  ;;  %13956 = vst [vmem:[#allocation82_spill] sm:$0xff] %v10587_v43  ;;  %v10602_v17 = vsel %vm1018_vm5, 1.0, %v13902_v8 }
 0x22e   : > { %v2595_v39 = vadd.f32 %v10293_v59, %v2373_v36  ;;  %13957 = vst [vmem:[#allocation83_spill] sm:$0xff] %v10602_v17 }
 0x230   : > { %v10571_v40 = vadd.f32 %v2772_v12, %v2595_v39  ;;  %v3421_v12 = vpack.c.bf16 %v3392_v22, %v10350_v7 }
 0x231   : > { %v2044_v55 = vpop.f32.mrf.mxu3 }
 0x232   : > { %v2774_v41 = vpop.f32.mrf.mxu2  ;;  %v2120_v44 = vadd.f32 %v2044_v55, %v10119_v33  ;;  %v10595_v33 = vpop.f32.mrf.mxu1  ;;  %v10604_v55 = vld [vmem:[#allocation2 + $0xd1] sm:$0xff] }
 0x234   : > { %v2374_v59 = vadd.f32 %v10134_v47, %v2120_v44  ;;  %v10607_v22 = vpop.f32.mrf.mxu0 }
 0x236   : > { %v2596_v36 = vadd.f32 %v10305_v48, %v2374_v59  ;;  %9227 = vmatmul.msk.bf16.gmra.mxu3 %vm1091_vm1, %v1969_v23  ;;  %9321 = vmatmul.msk.bf16.gmra.mxu1 %vm1091_vm1, %v3421_v12  ;;  %v3394_v23 = vmul.f32 %v10337_v52, %v10370_v61  ;;  %v3153_v12 = vld [vmem:[#allocation2 + $0xc8] sm:$0xff] }
 0x237   : > { %9278 = vmatmul.msk.bf16.gmra.mxu2 %vm1091_vm1, %v2699_v20  ;;  %9311 = vmatmul.msk.bf16.gmra.mxu0 %vm1091_vm1, %v10146_v6 }
 0x238   : > { %v10597_v47 = vadd.f32 %v2774_v41, %v2596_v36  ;;  %v1950_v41 = vmul.f32 %v10602_v17, %v10566_v27  ;;  %v3154_v36 = vld [vmem:[#allocation2 + $0xd0] sm:$0xff] }
 0x239   : > { %v2047_v39 = vpop.f32.mrf.mxu3 }
 0x23a   : > { %v2777_v7 = vpop.f32.mrf.mxu2  ;;  %v2121_v50 = vadd.f32 %v2047_v39, %v10132_v46  ;;  %v2680_v46 = vmul.f32 %v10602_v17, %v10604_v55  ;;  %v10619_v20 = vpop.f32.mrf.mxu1 }
 0x23b   : > { %13958 = vst [vmem:[#allocation84_spill] sm:$0xff] %v10619_v20 }
 0x23c   : > { %v2375_v48 = vadd.f32 %v10144_v5, %v2121_v50  ;;  %v10615_v5 = vld [vmem:[#allocation2 + $0xc9] sm:$0xff] }
 0x23d   : > { %v2700_v50 = vpack.c.bf16 %v2680_v46, %v10615_v5 }
 0x23e   : > { %v2597_v6 = vadd.f32 %v10323_v21, %v2375_v48  ;;  %v3175_v48 = vpack.c.bf16 %v3154_v36, %v3153_v12 }
 0x240   : > { %v10609_v44 = vadd.f32 %v2777_v7, %v2597_v6  ;;  %v1970_v7 = vpack.c.bf16 %v1950_v41, %v10577_v38  ;;  %v3422_v6 = vpack.c.bf16 %v3394_v23, %v10381_v30 }
 0x241   : > { %v2049_v10 = vpop.f32.mrf.mxu3 }
 0x242   : > { %v2779_v59 = vpop.f32.mrf.mxu2  ;;  %v2122_v21 = vadd.f32 %v2049_v10, %v10141_v63  ;;  %v694_v63 = vand.u32 15, %v508_v3  ;;  %v10634_v10 = vpop.f32.mrf.mxu0 }
 0x243   : > { %13959 = vst [vmem:[#allocation85_spill] sm:$0xff] %v10634_v10  ;;  %v10637_v30 = vpop.f32.mrf.mxu1 }
 0x244   : > { %v2376_v39 = vadd.f32 %v10156_v16, %v2122_v21  ;;  %vm1020_vm6 = vcmp.le.s32.totalorder %v694_v63, 14  ;;  %v10643_v21 = vld [vmem:[#allocation2 + $0xe1] sm:$0xff] }
 0x245   : > { %v10641_v23 = vsel %vm1020_vm6, 1.0, %v13902_v8 }
 0x246   : > { %v2598_v43 = vadd.f32 %v10334_v53, %v2376_v39  ;;  %9228 = vmatmul.msk.bf16.gmra.mxu3 %vm1091_vm1, %v1970_v7  ;;  %9322 = vmatmul.msk.bf16.gmra.mxu1 %vm1091_vm1, %v3422_v6  ;;  %13960 = vst [vmem:[#allocation86_spill] sm:$0xff] %v10641_v23  ;;  %v10652_v39 = vld [vmem:[#allocation2 + $0xd9] sm:$0xff] }
 0x247   : > { %9279 = vmatmul.msk.bf16.gmra.mxu2 %vm1091_vm1, %v2700_v50  ;;  %9312 = vmatmul.msk.bf16.gmra.mxu0 %vm1091_vm1, %v3175_v48  ;;  %v3155_v50 = vld [vmem:[#allocation2 + $0xd8] sm:$0xff]  ;;  %v3156_v48 = vld [vmem:[#allocation2 + $0xe0] sm:$0xff] }
 0x248   : > { %v10632_v61 = vadd.f32 %v2779_v59, %v2598_v43  ;;  %v1952_v59 = vmul.f32 %v10641_v23, %v10604_v55 }
 0x249   : > { %v2052_v16 = vpop.f32.mrf.mxu3 }
 0x24a   : > { %v2782_v41 = vpop.f32.mrf.mxu2  ;;  %v2123_v46 = vadd.f32 %v2052_v16, %v10154_v13  ;;  %v2682_v13 = vmul.f32 %v10641_v23, %v10643_v21  ;;  %v10658_v6 = vpop.f32.mrf.mxu0  ;;  %v1971_v16 = vpack.c.bf16 %v1952_v59, %v10615_v5 }
 0x24c   : > { %v2377_v53 = vadd.f32 %v10166_v42, %v2123_v46  ;;  %v3396_v42 = vmul.f32 %v10368_v62, %v10399_v29  ;;  %v3176_v46 = vpack.c.bf16 %v3156_v48, %v3155_v50  ;;  %v13963_v50 = vld [vmem:[#allocation50_spill] sm:$0xff] }
 0x24e   : > { %v2599_v12 = vadd.f32 %v10352_v45, %v2377_v53  ;;  %v510_v45 = vadd.s32 216, %v9894_v25  ;;  %v3423_v53 = vpack.c.bf16 %v3396_v42, %v10410_v58  ;;  %v10678_v42 = vld [vmem:[#allocation2 + $0xf1] sm:$0xff] }
 0x250   : > { %v10646_v43 = vadd.f32 %v2782_v41, %v2599_v12  ;;  %v2701_v41 = vpack.c.bf16 %v2682_v13, %v10652_v39  ;;  %v10664_v12 = vpop.f32.mrf.mxu1 }
 0x251   : > { %v2054_v36 = vpop.f32.mrf.mxu3  ;;  %13961 = vst [vmem:[#allocation87_spill] sm:$0xff] %v10664_v12 }
 0x252   : > { %v2784_v3 = vpop.f32.mrf.mxu2  ;;  %v2124_v7 = vadd.f32 %v2054_v36, %v10163_v32  ;;  %v708_v32 = vand.u32 15, %v510_v45 }
 0x254   : > { %v2378_v63 = vadd.f32 %v10178_v57, %v2124_v7  ;;  %vm1022_vm7 = vcmp.le.s32.totalorder %v708_v32, 14  ;;  %v10680_v7 = vpop.f32.mrf.mxu0  ;;  %v13966_v32 = vld [vmem:[#allocation17_spill] sm:$0xff] }
 0x256   : > { %v2600_v29 = vadd.f32 %v10365_v35, %v2378_v63  ;;  %9229 = vmatmul.msk.bf16.gmra.mxu3 %vm1091_vm1, %v1971_v16  ;;  %9323 = vmatmul.msk.bf16.gmra.mxu1 %vm1091_vm1, %v3423_v53  ;;  %v10676_v35 = vsel %vm1022_vm7, 1.0, %v13902_v8  ;;  %v13965_v53 = vld [vmem:[#allocation53_spill] sm:$0xff] }
 0x257   : > { %9280 = vmatmul.msk.bf16.gmra.mxu2 %vm1091_vm1, %v2701_v41  ;;  %9313 = vmatmul.msk.bf16.gmra.mxu0 %vm1091_vm1, %v3176_v46  ;;  %13962 = vst [vmem:[#allocation88_spill] sm:$0xff] %v10676_v35  ;;  %v1954_v63 = vmul.f32 %v10676_v35, %v10643_v21  ;;  %v10693_v41 = vld [vmem:[#allocation2 + $0xe9] sm:$0xff]  ;;  %v13964_v46 = vld [vmem:[#allocation60_spill] sm:$0xff] }
 0x258   : > { %v10671_v57 = vadd.f32 %v2784_v3, %v2600_v29  ;;  %v10683_v45 = vpop.f32.mrf.mxu1  ;;  %v3398_v29 = vmul.f32 %v13965_v53, %v13964_v46 }
 0x259   : > { %v2057_v59 = vpop.f32.mrf.mxu3 }
 0x25a   : > { %v2787_v13 = vpop.f32.mrf.mxu2  ;;  %v2125_v36 = vadd.f32 %v2057_v59, %v10176_v51  ;;  %v2684_v51 = vmul.f32 %v10676_v35, %v10678_v42  ;;  %v3424_v62 = vpack.c.bf16 %v3398_v29, %v10442_v15 }
 0x25c   : > { %v2379_v58 = vadd.f32 %v10188_v24, %v2125_v36  ;;  %v3157_v36 = vld [vmem:[#allocation2 + $0xe8] sm:$0xff] }
 0x25e   : > { %v2601_v48 = vadd.f32 %v13963_v50, %v2379_v58  ;;  %v512_v58 = vadd.s32 232, %v9894_v25  ;;  %v1972_v50 = vpack.c.bf16 %v1954_v63, %v10652_v39  ;;  %v13968_v63 = vld [vmem:[#allocation18_spill] sm:$0xff] }
 0x260   : > { %v10685_v3 = vadd.f32 %v2787_v13, %v2601_v48  ;;  %v3158_v13 = vld [vmem:[#allocation2 + $0xf0] sm:$0xff]  ;;  %v2702_v48 = vpack.c.bf16 %v2684_v51, %v10693_v41  ;;  %v722_v52 = vand.u32 15, %v512_v58  ;;  %v10710_v53 = vpop.f32.mrf.mxu1  ;;  %v13971_v58 = vld [vmem:[#allocation57_spill] sm:$0xff] }
 0x261   : > { %v2059_v24 = vpop.f32.mrf.mxu3  ;;  %v3177_v10 = vpack.c.bf16 %v3158_v13, %v3157_v36  ;;  %13967 = vst [vmem:[#allocation50_spill] sm:$0xff] %v10710_v53  ;;  %v13969_v36 = vld [vmem:[#allocation22_spill] sm:$0xff] }
 0x262   : > { %v10691_v16 = vpop.f32.mrf.mxu2  ;;  %v10698_v59 = vadd.f32 %v2059_v24, %v13966_v32  ;;  %v10708_v24 = vpop.f32.mrf.mxu0  ;;  %vm1024_vm8 = vcmp.le.s32.totalorder %v722_v52, 14  ;;  %v10717_v13 = vld [vmem:[#allocation2 + $0x101] sm:$0xff]  ;;  %v10728_v52 = vld [vmem:[#allocation2 + $0xf9] sm:$0xff] }
 0x263   : > { %v10715_v29 = vsel %vm1024_vm8, 1.0, %v13902_v8 }
 0x264   : > { %13970 = vst [vmem:[#allocation60_spill] sm:$0xff] %v10715_v29 }
 0x266   : > { %9230 = vmatmul.msk.bf16.gmra.mxu3 %vm1091_vm1, %v1972_v50  ;;  %9324 = vmatmul.msk.bf16.gmra.mxu1 %vm1091_vm1, %v3424_v62  ;;  %v1956_v62 = vmul.f32 %v10715_v29, %v10678_v42 }
 0x267   : > { %9281 = vmatmul.msk.bf16.gmra.mxu2 %vm1091_vm1, %v2702_v48  ;;  %9314 = vmatmul.msk.bf16.gmra.mxu0 %vm1091_vm1, %v3177_v10  ;;  %v2686_v48 = vmul.f32 %v10715_v29, %v10717_v13 }
 0x268   : > { %v10738_v18 = vpop.f32.mrf.mxu1  ;;  %v1973_v53 = vpack.c.bf16 %v1956_v62, %v10693_v41  ;;  %v13978_v62 = vld [vmem:[#allocation28_spill] sm:$0xff] }
 0x269   : > { %v2062_v46 = vpop.f32.mrf.mxu3  ;;  %v2703_v12 = vpack.c.bf16 %v2686_v48, %v10728_v52 }
 0x26a   : > { %v2792_v32 = vpop.f32.mrf.mxu2  ;;  %v2127_v51 = vadd.f32 %v2062_v46, %v13968_v63  ;;  %v13974_v63 = vld [vmem:[#allocation59_spill] sm:$0xff] }
 0x26c   : > { %v2381_v15 = vadd.f32 %v13969_v36, %v2127_v51  ;;  %v3400_v51 = vmul.f32 %v13974_v63, %v10461_v37  ;;  %v13975_v36 = vld [vmem:[#allocation21_spill] sm:$0xff] }
 0x26e   : > { %v2603_v10 = vadd.f32 %v13971_v58, %v2381_v15  ;;  %v3159_v15 = vld [vmem:[#allocation2 + $0xf8] sm:$0xff]  ;;  %v514_v58 = vadd.s32 248, %v9894_v25  ;;  %v3425_v2 = vpack.c.bf16 %v3400_v51, %v10470_v34  ;;  %v13981_v51 = vld [vmem:[#allocation66_spill] sm:$0xff] }
 0x270   : > { %v10720_v50 = vadd.f32 %v2792_v32, %v2603_v10  ;;  %v3160_v32 = vld [vmem:[#allocation2 + $0x100] sm:$0xff]  ;;  %v10736_v10 = vpop.f32.mrf.mxu0  ;;  %v736_v37 = vand.u32 15, %v514_v58 }
 0x271   : > { %v2064_v1 = vpop.f32.mrf.mxu3  ;;  %v3178_v20 = vpack.c.bf16 %v3160_v32, %v3159_v15 }
 0x272   : > { %13972 = vst [vmem:[#allocation17_spill] sm:$0xff] %v10720_v50  ;;  %v10726_v46 = vpop.f32.mrf.mxu2  ;;  %v10733_v19 = vadd.f32 %v2064_v1, %v13975_v36  ;;  %v13977_v36 = vld [vmem:[#allocation23_spill] sm:$0xff]  ;;  %vm1026_vm9 = vcmp.le.s32.totalorder %v736_v37, 14  ;;  %v13993_v50 = vld [vmem:[#allocation30_spill] sm:$0xff] }
 0x273   : > { %13973 = vst [vmem:[#allocation18_spill] sm:$0xff] %v10726_v46  ;;  %v10752_v34 = vsel %vm1026_vm9, 1.0, %v13902_v8  ;;  %v10767_v37 = vld [vmem:[#allocation2 + $0x109] sm:$0xff]  ;;  %v3402_v8 = vmul.f32 %v10459_v4, %v10491_v56 }
 0x274   : > { %13976 = vst [vmem:[#allocation22_spill] sm:$0xff] %v10733_v19 }
 0x275   : > { %13979 = vst [vmem:[#allocation57_spill] sm:$0xff] %v10752_v34 }
 0x276   : > { %9231 = vmatmul.msk.bf16.gmra.mxu3 %vm1091_vm1, %v1973_v53  ;;  %9325 = vmatmul.msk.bf16.gmra.mxu1 %vm1091_vm1, %v3425_v2  ;;  %v10754_v53 = vld [vmem:[#allocation2 + $0x111] sm:$0xff]  ;;  %v1958_v2 = vmul.f32 %v10752_v34, %v10717_v13 }
 0x277   : > { %9282 = vmatmul.msk.bf16.gmra.mxu2 %vm1091_vm1, %v2703_v12  ;;  %9315 = vmatmul.msk.bf16.gmra.mxu0 %vm1091_vm1, %v3178_v20  ;;  %v10756_v12 = vpop.f32.mrf.mxu1  ;;  %v2688_v32 = vmul.f32 %v10752_v34, %v10754_v53 }
 0x278   : > { %v10749_v48 = vpop.f32.mrf.mxu0  ;;  %13980 = vst [vmem:[#allocation21_spill] sm:$0xff] %v10756_v12 }
 0x279   : > { %v2067_v25 = vpop.f32.mrf.mxu3 }
 0x27a   : > { %v2797_v1 = vpop.f32.mrf.mxu2  ;;  %v2129_v63 = vadd.f32 %v2067_v25, %v13977_v36  ;;  %v13984_v25 = vld [vmem:[#allocation26_spill] sm:$0xff] }
 0x27c   : > { %v2383_v46 = vadd.f32 %v13978_v62, %v2129_v63  ;;  %v3426_v62 = vpack.c.bf16 %v3402_v8, %v10504_v28  ;;  %v13989_v28 = vld [vmem:[#allocation75_spill] sm:$0xff] }
 0x27e   : > { %v2605_v20 = vadd.f32 %v13981_v51, %v2383_v46  ;;  %v1974_v46 = vpack.c.bf16 %v1958_v2, %v10728_v52  ;;  %v13987_v2 = vld [vmem:[#allocation27_spill] sm:$0xff] }
 0x27f   : > { %v10784_v56 = vpop.f32.mrf.mxu1 }
 0x280   : > { %v10759_v15 = vadd.f32 %v2797_v1, %v2605_v20  ;;  %v2704_v1 = vpack.c.bf16 %v2688_v32, %v10767_v37  ;;  %v10779_v51 = vpop.f32.mrf.mxu0  ;;  %v13986_v20 = vld [vmem:[#allocation70_spill] sm:$0xff] }
 0x281   : > { %v2069_v63 = vpop.f32.mrf.mxu3  ;;  %v13988_v32 = vld [vmem:[#allocation34_spill] sm:$0xff] }
 0x282   : > { %13982 = vst [vmem:[#allocation23_spill] sm:$0xff] %v10759_v15  ;;  %v10765_v58 = vpop.f32.mrf.mxu2  ;;  %v10772_v36 = vadd.f32 %v2069_v63, %v13984_v25 }
 0x283   : > { %13983 = vst [vmem:[#allocation28_spill] sm:$0xff] %v10765_v58 }
 0x284   : > { %13985 = vst [vmem:[#allocation66_spill] sm:$0xff] %v10772_v36  ;;  %v2880_v36 = vld [vmem:[#allocation2 + $0x2f] sm:$0xff] }
 0x286   : > { %9232 = vmatmul.msk.bf16.gmra.mxu3 %vm1091_vm1, %v1974_v46  ;;  %9326 = vmatmul.msk.bf16.gmra.mxu1 %vm1091_vm1, %v3426_v62  ;;  %v2879_v46 = vld [vmem:[#allocation2 + $0x27] sm:$0xff] }
 0x287   : > { %9283 = vmatmul.msk.bf16.gmra.mxu2 %vm1091_vm1, %v2704_v1  ;;  %9316 = vmatmul.msk.bf16.gmra.mxu0 %vm1091_vm1, %v13986_v20  ;;  %v13991_v20 = vld [vmem:[#allocation73_spill] sm:$0xff]  ;;  %v10795_v34 = vpop.f32.mrf.mxu1 }
 0x288   : > { %v3404_v62 = vmul.f32 %v13991_v20, %v10528_v0  ;;  %13992 = vst [vmem:[#allocation70_spill] sm:$0xff] %v10795_v34  ;;  %v13996_v0 = vld [vmem:[#allocation40_spill] sm:$0xff] }
 0x289   : > { %v2072_v63 = vpop.f32.mrf.mxu3 }
 0x28a   : > { %v2802_v25 = vpop.f32.mrf.mxu2  ;;  %v2131_v4 = vadd.f32 %v2072_v63, %v13987_v2  ;;  %v13994_v63 = vld [vmem:[#allocation3_spill] sm:$0xff] }
 0x28b   : > { %v2911_v2 = vmul.f32 %v13994_v63, %v2879_v46 }
 0x28c   : > { %v2385_v12 = vadd.f32 %v13988_v32, %v2131_v4 }
 0x28d   : > { %v2943_v4 = vpack.c.bf16 %v2880_v36, %v2911_v2  ;;  %v3406_v2 = vmul.f32 %v10526_v11, %v10566_v27  ;;  %v14001_v27 = vld [vmem:[#allocation37_spill] sm:$0xff] }
 0x28e   : > { %v2607_v8 = vadd.f32 %v13989_v28, %v2385_v12  ;;  %v3427_v12 = vpack.c.bf16 %v3404_v62, %v10537_v31  ;;  %v13995_v28 = vld [vmem:[#allocation32_spill] sm:$0xff]  ;;  %v9355_v31 = vld [vmem:[%s13704_s7 + $0x4] sm:$0xf] }
 0x28f   : > { %v2882_v62 = vld [vmem:[#allocation2 + $0x3f] sm:$0xff] }
 0x290   : > { %v10789_v58 = vadd.f32 %v2802_v25, %v2607_v8 }
 0x291   : > { %v2074_v1 = vpop.f32.mrf.mxu3 }
 0x292   : > { %v10791_v15 = vpop.f32.mrf.mxu2  ;;  %v10798_v19 = vadd.f32 %v2074_v1, %v13993_v50  ;;  %v2881_v1 = vld [vmem:[#allocation2 + $0x37] sm:$0xff] }
 0x293   : > { %13990 = vst [vmem:[#allocation26_spill] sm:$0xff] %v10791_v15  ;;  %v10805_v15 = vpop.f32.mrf.mxu1 }
 0x296   : > { %9285 = vmatmul.msk.bf16.vlgmr.msra.gmra.mxu3 %vm1091_vm1, %v2943_v4  ;;  %9327 = vmatmul.msk.bf16.gmra.mxu1 %vm1091_vm1, %v3427_v12  ;;  %v4215_v4 = vsel %vm1263_vm0, %v9355_v31, 0  ;;  %v13998_v12 = vld [vmem:[#allocation35_spill] sm:$0xff]  ;;  %v14002_v31 = vld [vmem:[#allocation45_spill] sm:$0xff] }
 0x297   : > { %4224 = vmatpush.bf16.msrb.mxu3 %v4215_v4  ;;  %v2884_v4 = vld [vmem:[#allocation2 + $0x4f] sm:$0xff] }
 0x299   : > { %v2077_v25 = vpop.f32.mrf.mxu3 }
 0x29a   : > { %v2807_v32 = vpop.f32.mrf.mxu2  ;;  %v2133_v8 = vadd.f32 %v2077_v25, %v13995_v28  ;;  %v3428_v28 = vpack.c.bf16 %v3406_v2, %v10577_v38 }
 0x29c   : > { %v2387_v20 = vadd.f32 %v13996_v0, %v2133_v8  ;;  %v10824_v8 = vpop.f32.mrf.mxu1 }
 0x29d   : > { %14000 = vst [vmem:[#allocation34_spill] sm:$0xff] %v10824_v8 }
 0x29e   : > { %v2609_v50 = vadd.f32 %v10545_v26, %v2387_v20  ;;  %v13999_v26 = vld [vmem:[#allocation4_spill] sm:$0xff] }
 0x29f   : > { %v2913_v20 = vmul.f32 %v13999_v26, %v2881_v1  ;;  %v14007_v26 = vld [vmem:[#allocation52_spill] sm:$0xff] }
 0x2a0   : > { %v10809_v34 = vadd.f32 %v2807_v32, %v2609_v50 }
 0x2a1   : > { %v2079_v36 = vpop.f32.mrf.mxu3  ;;  %v2944_v32 = vpack.c.bf16 %v2882_v62, %v2913_v20  ;;  %v3408_v20 = vmul.f32 %v10564_v49, %v10604_v55 }
 0x2a2   : > { %v10814_v46 = vpop.f32.mrf.mxu2  ;;  %v10820_v25 = vadd.f32 %v2079_v36, %v13998_v12  ;;  %v2883_v12 = vld [vmem:[#allocation2 + $0x47] sm:$0xff] }
 0x2a3   : > { %13997 = vst [vmem:[#allocation27_spill] sm:$0xff] %v10814_v46 }
 0x2a4   : > { %v10831_v1 = vpop.f32.mrf.mxu1 }
 0x2a6   : > { %9286 = vmatmul.msk.bf16.gmra.mxu3 %vm1091_vm1, %v2944_v32  ;;  %9328 = vmatmul.msk.bf16.gmra.mxu1 %vm1091_vm1, %v3428_v28  ;;  %v14003_v32 = vld [vmem:[#allocation39_spill] sm:$0xff] }
 0x2a9   : > { %v2082_v0 = vpop.f32.mrf.mxu3 }
 0x2aa   : > { %v2812_v50 = vpop.f32.mrf.mxu2  ;;  %v2135_v11 = vadd.f32 %v2082_v0, %v14001_v27  ;;  %v14004_v0 = vld [vmem:[#allocation5_spill] sm:$0xff] }
 0x2ab   : > { %v2915_v27 = vmul.f32 %v14004_v0, %v2883_v12  ;;  %v14015_v0 = vld [vmem:[#allocation69_spill] sm:$0xff] }
 0x2ac   : > { %v2389_v46 = vadd.f32 %v14002_v31, %v2135_v11  ;;  %v10846_v31 = vpop.f32.mrf.mxu1 }
 0x2ad   : > { %v2945_v11 = vpack.c.bf16 %v2884_v4, %v2915_v27  ;;  %14005 = vst [vmem:[#allocation75_spill] sm:$0xff] %v10846_v31  ;;  %v14008_v27 = vld [vmem:[#allocation44_spill] sm:$0xff] }
 0x2ae   : > { %v2611_v36 = vadd.f32 %v10595_v33, %v2389_v46  ;;  %v3429_v33 = vpack.c.bf16 %v3408_v20, %v10615_v5  ;;  %v2886_v5 = vld [vmem:[#allocation2 + $0x5f] sm:$0xff]  ;;  %v3410_v20 = vmul.f32 %v10602_v17, %v10643_v21 }
 0x2b0   : > { %v10833_v62 = vadd.f32 %v2812_v50, %v2611_v36  ;;  %v14006_v36 = vld [vmem:[#allocation41_spill] sm:$0xff] }
 0x2b1   : > { %v2084_v38 = vpop.f32.mrf.mxu3 }
 0x2b2   : > { %v10835_v2 = vpop.f32.mrf.mxu2  ;;  %v10840_v28 = vadd.f32 %v2084_v38, %v14003_v32  ;;  %v2885_v32 = vld [vmem:[#allocation2 + $0x57] sm:$0xff] }
 0x2b6   : > { %9287 = vmatmul.msk.bf16.gmra.mxu3 %vm1091_vm1, %v2945_v11  ;;  %9329 = vmatmul.msk.bf16.gmra.mxu1 %vm1091_vm1, %v3429_v33  ;;  %v14009_v33 = vld [vmem:[#allocation6_spill] sm:$0xff] }
 0x2b7   : > { %v2917_v31 = vmul.f32 %v14009_v33, %v2885_v32  ;;  %v2887_v32 = vld [vmem:[#allocation2 + $0x67] sm:$0xff] }
 0x2b9   : > { %v2087_v46 = vpop.f32.mrf.mxu3 }
 0x2ba   : > { %v2817_v50 = vpop.f32.mrf.mxu2  ;;  %v2137_v8 = vadd.f32 %v2087_v46, %v14006_v36  ;;  %v10861_v46 = vpop.f32.mrf.mxu1  ;;  %v14010_v36 = vld [vmem:[#allocation46_spill] sm:$0xff] }
 0x2bc   : > { %v2391_v55 = vadd.f32 %v14007_v26, %v2137_v8  ;;  %v2946_v26 = vpack.c.bf16 %v2886_v5, %v2917_v31 }
 0x2be   : > { %v2613_v38 = vadd.f32 %v10637_v30, %v2391_v55  ;;  %v3430_v30 = vpack.c.bf16 %v3410_v20, %v10652_v39  ;;  %v2888_v39 = vld [vmem:[#allocation2 + $0x6f] sm:$0xff]  ;;  %v3412_v20 = vmul.f32 %v10641_v23, %v10678_v42 }
 0x2c0   : > { %v10851_v49 = vadd.f32 %v2817_v50, %v2613_v38  ;;  %v14011_v38 = vld [vmem:[#allocation61_spill] sm:$0xff] }
 0x2c1   : > { %v2089_v12 = vpop.f32.mrf.mxu3 }
 0x2c2   : > { %v10853_v4 = vpop.f32.mrf.mxu2  ;;  %v10858_v11 = vadd.f32 %v2089_v12, %v14008_v27  ;;  %v10868_v17 = vpop.f32.mrf.mxu1 }
 0x2c6   : > { %9288 = vmatmul.msk.bf16.gmra.mxu3 %vm1091_vm1, %v2946_v26  ;;  %9330 = vmatmul.msk.bf16.gmra.mxu1 %vm1091_vm1, %v3430_v30  ;;  %v14012_v26 = vld [vmem:[#allocation49_spill] sm:$0xff] }
 0x2c9   : > { %v2092_v8 = vpop.f32.mrf.mxu3 }
 0x2ca   : > { %v2822_v50 = vpop.f32.mrf.mxu2  ;;  %v2139_v55 = vadd.f32 %v2092_v8, %v14010_v36  ;;  %v14013_v8 = vld [vmem:[#allocation7_spill] sm:$0xff] }
 0x2cb   : > { %v2919_v36 = vmul.f32 %v14013_v8, %v2887_v32 }
 0x2cc   : > { %v2393_v21 = vadd.f32 %v14011_v38, %v2139_v55  ;;  %v3431_v38 = vpack.c.bf16 %v3412_v20, %v10693_v41  ;;  %v2890_v41 = vld [vmem:[#allocation2 + $0x7f] sm:$0xff]  ;;  %v3414_v20 = vmul.f32 %v10676_v35, %v10717_v13 }
 0x2cd   : > { %v2947_v55 = vpack.c.bf16 %v2888_v39, %v2919_v36  ;;  %v14016_v36 = vld [vmem:[#allocation55_spill] sm:$0xff] }
 0x2ce   : > { %v2615_v12 = vadd.f32 %v10683_v45, %v2393_v21  ;;  %v10884_v45 = vpop.f32.mrf.mxu1 }
 0x2d0   : > { %v10871_v27 = vadd.f32 %v2822_v50, %v2615_v12  ;;  %v14014_v12 = vld [vmem:[#allocation51_spill] sm:$0xff] }
 0x2d1   : > { %v2094_v31 = vpop.f32.mrf.mxu3 }
 0x2d2   : > { %v10873_v5 = vpop.f32.mrf.mxu2  ;;  %v10878_v30 = vadd.f32 %v2094_v31, %v14012_v26  ;;  %v2889_v26 = vld [vmem:[#allocation2 + $0x77] sm:$0xff] }
 0x2d6   : > { %9289 = vmatmul.msk.bf16.gmra.mxu3 %vm1091_vm1, %v2947_v55  ;;  %9331 = vmatmul.msk.bf16.gmra.mxu1 %vm1091_vm1, %v3431_v38  ;;  %v14017_v38 = vld [vmem:[#allocation8_spill] sm:$0xff] }
 0x2d7   : > { %v2921_v8 = vmul.f32 %v14017_v38, %v2889_v26  ;;  %v2891_v26 = vld [vmem:[#allocation2 + $0x87] sm:$0xff] }
 0x2d9   : > { %v2097_v50 = vpop.f32.mrf.mxu3 }
 0x2da   : > { %v2827_v21 = vpop.f32.mrf.mxu2  ;;  %v2141_v33 = vadd.f32 %v2097_v50, %v14014_v12  ;;  %v10899_v50 = vpop.f32.mrf.mxu1  ;;  %v14018_v12 = vld [vmem:[#allocation58_spill] sm:$0xff] }
 0x2dc   : > { %v2395_v42 = vadd.f32 %v14015_v0, %v2141_v33  ;;  %v2948_v0 = vpack.c.bf16 %v2890_v41, %v2921_v8 }
 0x2de   : > { %v2617_v31 = vadd.f32 %v10738_v18, %v2395_v42  ;;  %v3432_v18 = vpack.c.bf16 %v3414_v20, %v10728_v52  ;;  %v2892_v52 = vld [vmem:[#allocation2 + $0x8f] sm:$0xff]  ;;  %v3416_v20 = vmul.f32 %v10715_v29, %v10754_v53  ;;  %v2893_v29 = vld [vmem:[#allocation2 + $0x97] sm:$0xff] }
 0x2e0   : > { %v10889_v23 = vadd.f32 %v2827_v21, %v2617_v31 }
 0x2e1   : > { %v2099_v32 = vpop.f32.mrf.mxu3 }
 0x2e2   : > { %v10891_v39 = vpop.f32.mrf.mxu2  ;;  %v10896_v55 = vadd.f32 %v2099_v32, %v14016_v36  ;;  %v10906_v31 = vpop.f32.mrf.mxu1 }
 0x2e6   : > { %9290 = vmatmul.msk.bf16.gmra.mxu3 %vm1091_vm1, %v2948_v0  ;;  %9332 = vmatmul.msk.bf16.gmra.mxu1 %vm1091_vm1, %v3432_v18  ;;  %v14019_v0 = vld [vmem:[#allocation63_spill] sm:$0xff] }
 0x2e9   : > { %v2102_v33 = vpop.f32.mrf.mxu3 }
 0x2ea   : > { %v2832_v21 = vpop.f32.mrf.mxu2  ;;  %v2143_v42 = vadd.f32 %v2102_v33, %v14018_v12  ;;  %v14020_v33 = vld [vmem:[#allocation9_spill] sm:$0xff] }
 0x2eb   : > { %v2923_v12 = vmul.f32 %v14020_v33, %v2891_v26  ;;  %v14022_v26 = vld [vmem:[#allocation10_spill] sm:$0xff] }
 0x2ec   : > { %v2397_v13 = vadd.f32 %v10519_v14, %v2143_v42  ;;  %v3433_v42 = vpack.c.bf16 %v3416_v20, %v10767_v37  ;;  %v2894_v20 = vld [vmem:[#allocation2 + $0x9f] sm:$0xff] }
 0x2ed   : > { %v2949_v14 = vpack.c.bf16 %v2892_v52, %v2923_v12  ;;  %v2925_v52 = vmul.f32 %v14022_v26, %v2893_v29  ;;  %v14023_v12 = vld [vmem:[#allocation68_spill] sm:$0xff] }
 0x2ee   : > { %v2619_v32 = vadd.f32 %v10784_v56, %v2397_v13  ;;  %v10921_v56 = vpop.f32.mrf.mxu1  ;;  %v14021_v13 = vld [vmem:[#allocation65_spill] sm:$0xff] }
 0x2ef   : > { %v2950_v33 = vpack.c.bf16 %v2894_v20, %v2925_v52 }
 0x2f0   : > { %v10909_v36 = vadd.f32 %v2832_v21, %v2619_v32 }
 0x2f1   : > { %v2104_v8 = vpop.f32.mrf.mxu3 }
 0x2f2   : > { %v10911_v41 = vpop.f32.mrf.mxu2  ;;  %v10916_v18 = vadd.f32 %v2104_v8, %v14019_v0 }
 0x2f6   : > { %9291 = vmatmul.msk.bf16.gmra.mxu3 %vm1091_vm1, %v2949_v14  ;;  %9333 = vmatmul.msk.bf16.gmra.mxu1 %vm1091_vm1, %v3433_v42 }
 0x2f9   : > { %v2107_v21 = vpop.f32.mrf.mxu3 }
 0x2fa   : > { %v2145_v32 = vadd.f32 %v2107_v21, %v14021_v13  ;;  %v2837_v35 = vpop.f32.mrf.mxu2  ;;  %v14024_v13 = vld [vmem:[#allocation72_spill] sm:$0xff] }
 0x2fc   : > { %v2399_v53 = vadd.f32 %v10560_v54, %v2145_v32 }
 0x2fe   : > { %v2621_v8 = vadd.f32 %v10805_v15, %v2399_v53  ;;  %v2895_v15 = vld [vmem:[#allocation2 + $0xa7] sm:$0xff] }
 0x300   : > { %v10927_v0 = vadd.f32 %v2837_v35, %v2621_v8  ;;  %v14026_v8 = vld [vmem:[#allocation11_spill] sm:$0xff] }
 0x301   : > { %v2109_v37 = vpop.f32.mrf.mxu3  ;;  %v2927_v26 = vmul.f32 %v14026_v8, %v2895_v15 }
 0x302   : > { %v10931_v14 = vadd.f32 %v2109_v37, %v14023_v12  ;;  %v10933_v42 = vpop.f32.mrf.mxu2  ;;  %v2896_v12 = vld [vmem:[#allocation2 + $0xaf] sm:$0xff] }
 0x303   : > { %v2951_v20 = vpack.c.bf16 %v2896_v12, %v2927_v26  ;;  %v14029_v26 = vld [vmem:[#allocation12_spill] sm:$0xff] }
 0x306   : > { %9292 = vmatmul.msk.bf16.gmra.mxu3 %vm1091_vm1, %v2950_v33  ;;  %v10946_v33 = vpop.f32.mrf.mxu0 }
 0x309   : > { %v2112_v21 = vpop.f32.mrf.mxu3 }
 0x30a   : > { %v2147_v54 = vadd.f32 %v2112_v21, %v14024_v13  ;;  %v2842_v53 = vpop.f32.mrf.mxu2 }
 0x30c   : > { %v2401_v32 = vadd.f32 %v10607_v22, %v2147_v54  ;;  %v14028_v22 = vld [vmem:[#allocation78_spill] sm:$0xff]  ;;  %v10949_v54 = vpop.f32.mrf.mxu1 }
 0x30e   : > { %v2623_v35 = vadd.f32 %v10831_v1, %v2401_v32  ;;  %v2897_v32 = vld [vmem:[#allocation2 + $0xb7] sm:$0xff] }
 0x310   : > { %v10939_v29 = vadd.f32 %v2842_v53, %v2623_v35  ;;  %v2929_v35 = vmul.f32 %v14029_v26, %v2897_v32 }
 0x311   : > { %v2114_v37 = vpop.f32.mrf.mxu3 }
 0x312   : > { %14025 = vst [vmem:[#allocation30_spill] sm:$0xff] %v10939_v29  ;;  %v10943_v52 = vadd.f32 %v2114_v37, %v10508_v9  ;;  %v10956_v9 = vld [vmem:[%s13701_s4] ss:$0 sm:$0xff] }
 0x313   : > { %v2898_v37 = vld [vmem:[#allocation2 + $0xbf] sm:$0xff] }
 0x314   : > { %14027 = vst [vmem:[#allocation32_spill] sm:$0xff] %v10943_v52  ;;  %v2900_v52 = vld [vmem:[#allocation2 + $0xcf] sm:$0xff] }
 0x316   : > { %9293 = vmatmul.msk.bf16.gmra.mxu3 %vm1091_vm1, %v2951_v20  ;;  %v10960_v20 = vpop.f32.mrf.mxu0 }
 0x319   : > { %v3021_v21 = vpop.f32.mrf.mxu3 }
 0x31a   : > { %v3101_v13 = vadd.f32 %v3021_v21, %v14028_v22  ;;  %v2952_v22 = vpack.c.bf16 %v2898_v37, %v2929_v35 }
 0x31c   : > { %v3323_v1 = vadd.f32 %v10658_v6, %v3101_v13  ;;  %v10964_v13 = vpop.f32.mrf.mxu1 }
 0x31e   : > { %v3577_v15 = vadd.f32 %v10861_v46, %v3323_v1  ;;  %v10971_v35 = vpop.f32.mrf.mxu0 }
 0x320   : > { %v3613_v21 = vadd.f32 %v10956_v9, %v3577_v15 }
 0x321   : > { %v3023_v53 = vpop.f32.mrf.mxu3 }
 0x322   : > { %v3102_v12 = vadd.f32 %v3023_v53, %v10557_v60  ;;  %v3677_v1 = vmul.f32 0.1, %v3613_v21  ;;  %vm3645_vm10 = vcmp.gt.f32.partialorder %v3613_v21, 0.0 }
 0x324   : > { %v3324_v6 = vadd.f32 %v10680_v7, %v3102_v12  ;;  %v3709_v8 = vsel %vm3645_vm10, %v3613_v21, %v3677_v1  ;;  %v10973_v12 = vpop.f32.mrf.mxu1 }
 0x326   : > { %v3578_v46 = vadd.f32 %v10868_v17, %v3324_v6  ;;  %9294 = vmatmul.msk.bf16.gmra.mxu3 %vm1091_vm1, %v2952_v22  ;;  %v2899_v17 = vld [vmem:[#allocation2 + $0xc7] sm:$0xff] }
 0x327   : > { %v14030_v22 = vld [vmem:[#allocation13_spill] sm:$0xff] }
 0x328   : > { %v3614_v32 = vadd.f32 %v10956_v9, %v3578_v46  ;;  %v2931_v46 = vmul.f32 %v14030_v22, %v2899_v17  ;;  %v2901_v17 = vld [vmem:[#allocation2 + $0xd7] sm:$0xff] }
 0x329   : > { %v3026_v26 = vpop.f32.mrf.mxu3 }
 0x32a   : > { %vm3646_vm11 = vcmp.gt.f32.partialorder %v3614_v32, 0.0  ;;  %v3678_v60 = vmul.f32 0.1, %v3614_v32  ;;  %v3103_v53 = vadd.f32 %v3026_v26, %v10571_v40  ;;  %v2953_v1 = vpack.c.bf16 %v2900_v52, %v2931_v46  ;;  %v14031_v46 = vld [vmem:[#allocation14_spill] sm:$0xff] }
 0x32c   : > { %v3710_v15 = vsel %vm3646_vm11, %v3614_v32, %v3678_v60  ;;  %v3325_v7 = vadd.f32 %v10708_v24, %v3103_v53  ;;  %v4115_v24 = vld [vmem:[%s13704_s7] sm:$0xf]  ;;  %v10987_v32 = vpop.f32.mrf.mxu0 }
 0x32d   : > { %v3741_v37 = vpack.c.bf16 %v3710_v15, %v3709_v8  ;;  %v4355_v26 = vsel %vm1263_vm0, %v4115_v24, 0 }
 0x32e   : > { %v3579_v6 = vadd.f32 %v10884_v45, %v3325_v7  ;;  %4364 = vmatpush.bf16.msrb.mxu0 %v4355_v26 }
 0x32f   : > { %9339 = vmatmul.msk.bf16.vlgmr.msrb.gmra.mxu2 %vm3769_vm12, %v3741_v37 }
 0x330   : > { %v3615_v8 = vadd.f32 %v10956_v9, %v3579_v6 }
 0x331   : > { %v3028_v29 = vpop.f32.mrf.mxu3 }
 0x332   : > { %v3104_v40 = vadd.f32 %v3028_v29, %v10597_v47  ;;  %v3679_v60 = vmul.f32 0.1, %v3615_v8  ;;  %v10990_v29 = vpop.f32.mrf.mxu1  ;;  %vm3647_vm13 = vcmp.gt.f32.partialorder %v3615_v8, 0.0 }
 0x334   : > { %v3326_v21 = vadd.f32 %v10736_v10, %v3104_v40  ;;  %v3711_v52 = vsel %vm3647_vm13, %v3615_v8, %v3679_v60  ;;  %v2933_v40 = vmul.f32 %v14031_v46, %v2901_v17  ;;  %v10997_v24 = vpop.f32.mrf.mxu0 }
 0x336   : > { %v3580_v45 = vadd.f32 %v10899_v50, %v3326_v21  ;;  %9295 = vmatmul.msk.bf16.gmra.mxu3 %vm1091_vm1, %v2953_v1  ;;  %v2902_v21 = vld [vmem:[#allocation2 + $0xdf] sm:$0xff] }
 0x338   : > { %v3616_v47 = vadd.f32 %v10956_v9, %v3580_v45  ;;  %v2954_v45 = vpack.c.bf16 %v2902_v21, %v2933_v40  ;;  %v2904_v21 = vld [vmem:[#allocation2 + $0xef] sm:$0xff] }
 0x339   : > { %v3031_v53 = vpop.f32.mrf.mxu3 }
 0x33a   : > { %v3680_v15 = vmul.f32 0.1, %v3616_v47  ;;  %v3105_v7 = vadd.f32 %v3031_v53, %v10609_v44  ;;  %vm3648_vm14 = vcmp.gt.f32.partialorder %v3616_v47, 0.0  ;;  %v11000_v44 = vpop.f32.mrf.mxu1 }
 0x33c   : > { %v3327_v10 = vadd.f32 %v10749_v48, %v3105_v7  ;;  %v3712_v37 = vsel %vm3648_vm14, %v3616_v47, %v3680_v15 }
 0x33d   : > { %v3742_v50 = vpack.c.bf16 %v3712_v37, %v3711_v52 }
 0x33e   : > { %v3581_v6 = vadd.f32 %v10906_v31, %v3327_v10 }
 0x33f   : > { %9340 = vmatmul.msk.bf16.gmra.mxu2 %vm3769_vm12, %v3742_v50  ;;  %v2903_v50 = vld [vmem:[#allocation2 + $0xe7] sm:$0xff] }
 0x340   : > { %v3617_v48 = vadd.f32 %v10956_v9, %v3581_v6  ;;  %v14032_v6 = vld [vmem:[#allocation15_spill] sm:$0xff] }
 0x341   : > { %v3033_v26 = vpop.f32.mrf.mxu3  ;;  %v2935_v40 = vmul.f32 %v14032_v6, %v2903_v50  ;;  %v2905_v50 = vld [vmem:[#allocation2 + $0xf7] sm:$0xff] }
 0x342   : > { %v3106_v1 = vadd.f32 %v3033_v26, %v10632_v61  ;;  %v3681_v31 = vmul.f32 0.1, %v3617_v48  ;;  %vm3649_vm15 = vcmp.gt.f32.partialorder %v3617_v48, 0.0  ;;  %v11008_v61 = vpop.f32.mrf.mxu0  ;;  %v11011_v37 = vpop.f32.mrf.mxu1 }
 0x344   : > { %v3328_v8 = vadd.f32 %v10779_v51, %v3106_v1  ;;  %v3713_v52 = vsel %vm3649_vm15, %v3617_v48, %v3681_v31  ;;  %v2955_v48 = vpack.c.bf16 %v2904_v21, %v2935_v40 }
 0x346   : > { %v3582_v60 = vadd.f32 %v10921_v56, %v3328_v8  ;;  %9296 = vmatmul.msk.bf16.gmra.mxu3 %vm1091_vm1, %v2954_v45 }
 0x348   : > { %v3618_v47 = vadd.f32 %v10956_v9, %v3582_v60 }
 0x349   : > { %v3036_v53 = vpop.f32.mrf.mxu3 }
 0x34a   : > { %v3682_v15 = vmul.f32 0.1, %v3618_v47  ;;  %v3107_v7 = vadd.f32 %v3036_v53, %v10646_v43  ;;  %vm3650_vm2 = vcmp.gt.f32.partialorder %v3618_v47, 0.0  ;;  %v11019_v8 = vpop.f32.mrf.mxu0  ;;  %v11023_v60 = vpop.f32.mrf.mxu1 }
 0x34c   : > { %v3329_v10 = vadd.f32 %v10946_v33, %v3107_v7  ;;  %v3714_v51 = vsel %vm3650_vm2, %v3618_v47, %v3682_v15  ;;  %v14034_v7 = vld [vmem:[#allocation54_spill] sm:$0xff] }
 0x34d   : > { %v3743_v56 = vpack.c.bf16 %v3714_v51, %v3713_v52 }
 0x34e   : > { %v3583_v17 = vadd.f32 %v10949_v54, %v3329_v10  ;;  %v14033_v54 = vld [vmem:[#allocation20_spill] sm:$0xff] }
 0x34f   : > { %9341 = vmatmul.msk.bf16.gmra.mxu2 %vm3769_vm12, %v3743_v56  ;;  %v2380_v31 = vadd.f32 %v14033_v54, %v10698_v59 }
 0x350   : > { %v3619_v1 = vadd.f32 %v10956_v9, %v3583_v17 }
 0x351   : > { %v3038_v26 = vpop.f32.mrf.mxu3  ;;  %v2602_v10 = vadd.f32 %v14034_v7, %v2380_v31  ;;  %v14036_v31 = vld [vmem:[#allocation22_spill] sm:$0xff]  ;;  %v14038_v7 = vld [vmem:[#allocation17_spill] sm:$0xff] }
 0x352   : > { %v3108_v43 = vadd.f32 %v3038_v26, %v10671_v57  ;;  %v3683_v47 = vmul.f32 0.1, %v3619_v1  ;;  %vm3651_vm3 = vcmp.gt.f32.partialorder %v3619_v1, 0.0  ;;  %v11031_v17 = vpop.f32.mrf.mxu0  ;;  %v14035_v26 = vld [vmem:[#allocation16_spill] sm:$0xff] }
 0x353   : > { %v2856_v59 = vadd.f32 %v10691_v16, %v2602_v10  ;;  %v2937_v21 = vmul.f32 %v14035_v26, %v2905_v50  ;;  %v14037_v16 = vld [vmem:[#allocation25_spill] sm:$0xff] }
 0x354   : > { %v3330_v33 = vadd.f32 %v10960_v20, %v3108_v43  ;;  %v3715_v52 = vsel %vm3651_vm3, %v3619_v1, %v3683_v47  ;;  %v2382_v47 = vadd.f32 %v14037_v16, %v14036_v31  ;;  %v2907_v50 = vld [vmem:[#allocation2 + $0x107] sm:$0xff] }
 0x355   : > { %v14042_v16 = vld [vmem:[#allocation57_spill] sm:$0xff] }
 0x356   : > { %v3584_v45 = vadd.f32 %v10964_v13, %v3330_v33  ;;  %9297 = vmatmul.msk.bf16.gmra.mxu3 %vm1091_vm1, %v2955_v48  ;;  %v2906_v33 = vld [vmem:[#allocation2 + $0xff] sm:$0xff] }
 0x358   : > { %v3620_v53 = vadd.f32 %v10956_v9, %v3584_v45  ;;  %v2956_v45 = vpack.c.bf16 %v2906_v33, %v2937_v21  ;;  %v3164_v33 = vld [vmem:[#allocation2 + $0x120] sm:$0xff] }
 0x359   : > { %v3041_v57 = vpop.f32.mrf.mxu3 }
 0x35a   : > { %v3684_v15 = vmul.f32 0.1, %v3620_v53  ;;  %v3109_v20 = vadd.f32 %v3041_v57, %v10685_v3  ;;  %vm3652_vm4 = vcmp.gt.f32.partialorder %v3620_v53, 0.0  ;;  %v11037_v3 = vpop.f32.mrf.mxu1  ;;  %v11046_v57 = vpop.f32.mrf.mxu0 }
 0x35c   : > { %v3331_v13 = vadd.f32 %v10971_v35, %v3109_v20  ;;  %v3716_v51 = vsel %vm3652_vm4, %v3620_v53, %v3684_v15 }
 0x35d   : > { %v3744_v56 = vpack.c.bf16 %v3716_v51, %v3715_v52 }
 0x35e   : > { %v3585_v40 = vadd.f32 %v10973_v12, %v3331_v13  ;;  %v14039_v13 = vld [vmem:[#allocation62_spill] sm:$0xff] }
 0x35f   : > { %9342 = vmatmul.msk.bf16.gmra.mxu2 %vm3769_vm12, %v3744_v56 }
 0x360   : > { %v3621_v35 = vadd.f32 %v10956_v9, %v3585_v40  ;;  %v14040_v40 = vld [vmem:[#allocation19_spill] sm:$0xff] }
 0x361   : > { %v3043_v43 = vpop.f32.mrf.mxu3  ;;  %v2939_v21 = vmul.f32 %v14040_v40, %v2907_v50 }
 0x362   : > { %v3110_v48 = vadd.f32 %v3043_v43, %v2856_v59  ;;  %v3685_v12 = vmul.f32 0.1, %v3621_v35  ;;  %vm3653_vm5 = vcmp.gt.f32.partialorder %v3621_v35, 0.0  ;;  %v3163_v43 = vld [vmem:[#allocation2 + $0x118] sm:$0xff] }
 0x363   : > { %v3180_v31 = vpack.c.bf16 %v3164_v33, %v3163_v43 }
 0x364   : > { %v3332_v1 = vadd.f32 %v10987_v32, %v3110_v48  ;;  %v11049_v32 = vpop.f32.mrf.mxu1  ;;  %v3717_v51 = vsel %vm3653_vm5, %v3621_v35, %v3685_v12  ;;  %v3386_v48 = vld [vmem:[#allocation2 + $0x121] sm:$0xff]  ;;  %v3385_v35 = vld [vmem:[#allocation2 + $0x119] sm:$0xff] }
 0x365   : > { %9317 = vmatmul.msk.bf16.gmra.mxu0 %vm1091_vm1, %v3180_v31 }
 0x366   : > { %v3586_v54 = vadd.f32 %v10990_v29, %v3332_v1  ;;  %9298 = vmatmul.msk.bf16.gmra.mxu3 %vm1091_vm1, %v2956_v45  ;;  %v2604_v29 = vadd.f32 %v14039_v13, %v2382_v47  ;;  %v14041_v1 = vld [vmem:[#allocation18_spill] sm:$0xff]  ;;  %v3418_v47 = vmul.f32 %v14042_v16, %v3386_v48  ;;  %v14045_v48 = vld [vmem:[#allocation23_spill] sm:$0xff] }
 0x368   : > { %v3622_v53 = vadd.f32 %v10956_v9, %v3586_v54  ;;  %v2858_v45 = vadd.f32 %v14041_v1, %v2604_v29 }
 0x369   : > { %v3046_v15 = vpop.f32.mrf.mxu3 }
 0x36a   : > { %v3686_v20 = vmul.f32 0.1, %v3622_v53  ;;  %v3111_v10 = vadd.f32 %v3046_v15, %v14038_v7  ;;  %vm3654_vm6 = vcmp.gt.f32.partialorder %v3622_v53, 0.0 }
 0x36c   : > { %v3333_v52 = vadd.f32 %v10997_v24, %v3111_v10  ;;  %v3718_v56 = vsel %vm3654_vm6, %v3622_v53, %v3686_v20  ;;  %v2908_v24 = vld [vmem:[#allocation2 + $0x10f] sm:$0xff]  ;;  %v3434_v53 = vpack.c.bf16 %v3418_v47, %v3385_v35  ;;  %v3280_v20 = vpop.f32.mrf.mxu0  ;;  %v3534_v29 = vpop.f32.mrf.mxu1  ;;  %v14047_v35 = vld [vmem:[#allocation28_spill] sm:$0xff] }
 0x36d   : > { %v3745_v59 = vpack.c.bf16 %v3718_v56, %v3717_v51  ;;  %v2957_v13 = vpack.c.bf16 %v2908_v24, %v2939_v21  ;;  %v14044_v51 = vld [vmem:[#allocation31_spill] sm:$0xff] }
 0x36e   : > { %v3587_v54 = vadd.f32 %v11000_v44, %v3333_v52  ;;  %9334 = vmatmul.msk.bf16.gmra.mxu1 %vm1091_vm1, %v3434_v53  ;;  %v14043_v52 = vld [vmem:[#allocation66_spill] sm:$0xff] }
 0x36f   : > { %9343 = vmatmul.msk.bf16.gmra.mxu2 %vm3769_vm12, %v3745_v59  ;;  %v2384_v56 = vadd.f32 %v14044_v51, %v14043_v52  ;;  %v2910_v52 = vld [vmem:[#allocation2 + $0x11f] sm:$0xff] }
 0x370   : > { %v3623_v7 = vadd.f32 %v10956_v9, %v3587_v54 }
 0x371   : > { %v3048_v15 = vpop.f32.mrf.mxu3 }
 0x372   : > { %v3112_v12 = vadd.f32 %v3048_v15, %v2858_v45  ;;  %v3687_v50 = vmul.f32 0.1, %v3623_v7  ;;  %vm3655_vm7 = vcmp.gt.f32.partialorder %v3623_v7, 0.0  ;;  %v2909_v15 = vld [vmem:[#allocation2 + $0x117] sm:$0xff] }
 0x374   : > { %v3334_v10 = vadd.f32 %v11008_v61, %v3112_v12  ;;  %v14046_v61 = vld [vmem:[#allocation71_spill] sm:$0xff]  ;;  %v3719_v54 = vsel %vm3655_vm7, %v3623_v7, %v3687_v50  ;;  %v3283_v31 = vpop.f32.mrf.mxu0  ;;  %v11070_v24 = vpop.f32.mrf.mxu1 }
 0x375   : > { %v2606_v21 = vadd.f32 %v14046_v61, %v2384_v56 }
 0x376   : > { %v3588_v44 = vadd.f32 %v11011_v37, %v3334_v10  ;;  %9299 = vmatmul.msk.bf16.gmra.mxu3 %vm1091_vm1, %v2957_v13  ;;  %v14048_v10 = vld [vmem:[#allocation24_spill] sm:$0xff] }
 0x377   : > { %v2860_v12 = vadd.f32 %v14047_v35, %v2606_v21  ;;  %v2941_v13 = vmul.f32 %v14048_v10, %v2909_v15 }
 0x378   : > { %v3624_v59 = vadd.f32 %v10956_v9, %v3588_v44 }
 0x379   : > { %v3051_v43 = vpop.f32.mrf.mxu3  ;;  %v2958_v56 = vpack.c.bf16 %v2910_v52, %v2941_v13 }
 0x37a   : > { %v3688_v33 = vmul.f32 0.1, %v3624_v59  ;;  %v3113_v1 = vadd.f32 %v3051_v43, %v14045_v48  ;;  %vm3656_vm8 = vcmp.gt.f32.partialorder %v3624_v59, 0.0  ;;  %v14049_v43 = vld [vmem:[#allocation36_spill] sm:$0xff] }
 0x37c   : > { %v3335_v45 = vadd.f32 %v11019_v8, %v3113_v1  ;;  %v3720_v37 = vsel %vm3656_vm8, %v3624_v59, %v3688_v33  ;;  %v3285_v59 = vpop.f32.mrf.mxu0  ;;  %v2386_v33 = vadd.f32 %v14049_v43, %v10798_v19  ;;  %v3539_v1 = vpop.f32.mrf.mxu1  ;;  %v14051_v19 = vld [vmem:[#allocation26_spill] sm:$0xff] }
 0x37d   : > { %v3746_v47 = vpack.c.bf16 %v3720_v37, %v3719_v54 }
 0x37e   : > { %v3589_v53 = vadd.f32 %v11023_v60, %v3335_v45 }
 0x37f   : > { %9344 = vmatmul.msk.bf16.gmra.mxu2 %vm3769_vm12, %v3746_v47 }
 0x380   : > { %v3625_v8 = vadd.f32 %v10956_v9, %v3589_v53 }
 0x381   : > { %v3053_v44 = vpop.f32.mrf.mxu3 }
 0x382   : > { %v3114_v51 = vadd.f32 %v3053_v44, %v2860_v12  ;;  %v3689_v48 = vmul.f32 0.1, %v3625_v8  ;;  %vm3657_vm9 = vcmp.gt.f32.partialorder %v3625_v8, 0.0 }
 0x384   : > { %v3336_v7 = vadd.f32 %v11031_v17, %v3114_v51  ;;  %v14050_v17 = vld [vmem:[#allocation76_spill] sm:$0xff]  ;;  %v3721_v37 = vsel %vm3657_vm9, %v3625_v8, %v3689_v48  ;;  %v3288_v53 = vpop.f32.mrf.mxu0  ;;  %v11089_v52 = vpop.f32.mrf.mxu1  ;;  %v4117_v51 = vld [vmem:[#allocation2 + $0x10] sm:$0xff] }
 0x385   : > { %v2608_v54 = vadd.f32 %v14050_v17, %v2386_v33  ;;  %v4035_v33 = vld [vmem:[#allocation2 + $0x7] sm:$0xff] }
 0x386   : > { %v3590_v50 = vadd.f32 %v11037_v3, %v3336_v7  ;;  %9300 = vmatmul.msk.bf16.gmra.mxu3 %vm1091_vm1, %v2958_v56 }
 0x387   : > { %v2862_v35 = vadd.f32 %v14051_v19, %v2608_v54  ;;  %v14053_v54 = vld [vmem:[#allocation81_spill] sm:$0xff] }
 0x388   : > { %v3626_v60 = vadd.f32 %v10956_v9, %v3590_v50  ;;  %v14052_v50 = vld [vmem:[#allocation43_spill] sm:$0xff] }
 0x389   : > { %v3056_v61 = vpop.f32.mrf.mxu3  ;;  %v2388_v43 = vadd.f32 %v14052_v50, %v10820_v25 }
 0x38a   : > { %v3690_v21 = vmul.f32 0.1, %v3626_v60  ;;  %v3115_v45 = vadd.f32 %v3056_v61, %v10789_v58  ;;  %vm3658_vm10 = vcmp.gt.f32.partialorder %v3626_v60, 0.0  ;;  %v4116_v58 = vld [vmem:[#allocation2 + $0x8] sm:$0xff] }
 0x38b   : > { %v2610_v25 = vadd.f32 %v14053_v54, %v2388_v43 }
 0x38c   : > { %v3337_v3 = vadd.f32 %v11046_v57, %v3115_v45  ;;  %v3722_v47 = vsel %vm3658_vm10, %v3626_v60, %v3690_v21  ;;  %v4148_v57 = vpack.c.bf16 %v4117_v51, %v4116_v58  ;;  %v4067_v60 = vmul.f32 %v13994_v63, %v4035_v33  ;;  %v4036_v21 = vld [vmem:[#allocation2 + $0xf] sm:$0xff] }
 0x38d   : > { %v3747_v15 = vpack.c.bf16 %v3722_v47, %v3721_v37 }
 0x38e   : > { %v3591_v12 = vadd.f32 %v11049_v32, %v3337_v3  ;;  %v3290_v3 = vpop.f32.mrf.mxu0 }
 0x38f   : > { %9345 = vmatmul.msk.bf16.gmra.mxu2 %vm3769_vm12, %v3747_v15 }
 0x390   : > { %v3627_v7 = vadd.f32 %v10956_v9, %v3591_v12 }
 0x391   : > { %v3058_v13 = vpop.f32.mrf.mxu3 }
 0x392   : > { %v3116_v44 = vadd.f32 %v3058_v13, %v2862_v35  ;;  %v3691_v48 = vmul.f32 0.1, %v3627_v7  ;;  %vm3659_vm11 = vcmp.gt.f32.partialorder %v3627_v7, 0.0  ;;  %v3544_v35 = vpop.f32.mrf.mxu1 }
 0x394   : > { %v3338_v56 = vadd.f32 %v3280_v20, %v3116_v44  ;;  %v4099_v20 = vpack.c.bf16 %v4036_v21, %v4067_v60  ;;  %v3723_v15 = vsel %vm3659_vm11, %v3627_v7, %v3691_v48  ;;  %v9388_v7 = vld [vmem:[%s13704_s7 + $0x8] sm:$0xf]  ;;  %v14055_v48 = vld [vmem:[#allocation48_spill] sm:$0xff] }
 0x395   : > { %v4577_v50 = vsel %vm1263_vm0, %v9388_v7, 0  ;;  %v14057_v7 = vld [vmem:[#allocation56_spill] sm:$0xff] }
 0x396   : > { %v3592_v8 = vadd.f32 %v3534_v29, %v3338_v56  ;;  %9356 = vmatmul.msk.bf16.vlgmr.msrb.gmra.mxu3 %vm1091_vm1, %v4148_v57  ;;  %v9405_v29 = vld [vmem:[%s13704_s7 + $0xc] sm:$0xf]  ;;  %9372 = vmatmul.msk.bf16.vlgmr.msrb.gmra.mxu0 %vm1091_vm1, %v4099_v20  ;;  %v9422_v56 = vld [vmem:[%s13704_s7 + $0x10] sm:$0xf]  ;;  %v3293_v43 = vpop.f32.mrf.mxu0  ;;  %v14056_v20 = vld [vmem:[#allocation84_spill] sm:$0xff] }
 0x397   : > { %v4831_v37 = vsel %vm1263_vm0, %v9405_v29, 0  ;;  %4586 = vmatpush.bf16.msrb.mxu1 %v4577_v50 }
 0x398   : > { %v3628_v32 = vadd.f32 %v10956_v9, %v3592_v8  ;;  %4840 = vmatpush.bf16.msra.mxu2 %v4831_v37 }
 0x399   : > { %v3061_v61 = vpop.f32.mrf.mxu3 }
 0x39a   : > { %v3692_v45 = vmul.f32 0.1, %v3628_v32  ;;  %v3117_v17 = vadd.f32 %v3061_v61, %v10809_v34  ;;  %vm3660_vm13 = vcmp.gt.f32.partialorder %v3628_v32, 0.0  ;;  %v14054_v34 = vld [vmem:[#allocation27_spill] sm:$0xff]  ;;  %v3547_v33 = vpop.f32.mrf.mxu1 }
 0x39b   : > { %v2864_v13 = vadd.f32 %v14054_v34, %v2610_v25 }
 0x39c   : > { %v3339_v47 = vadd.f32 %v3283_v31, %v3117_v17  ;;  %v3724_v19 = vsel %vm3660_vm13, %v3628_v32, %v3692_v45  ;;  %v5053_v31 = vsel %vm1263_vm0, %v9422_v56, 0  ;;  %v2390_v32 = vadd.f32 %v14055_v48, %v10840_v28  ;;  %v11119_v45 = vpop.f32.mrf.mxu2  ;;  %v11127_v28 = vld [vmem:[%s13703_s6] ss:$0 sm:$0xff] }
 0x39d   : > { %v3748_v12 = vpack.c.bf16 %v3724_v19, %v3723_v15  ;;  %5062 = vmatpush.bf16.msra.mxu3 %v5053_v31 }
 0x39e   : > { %v3593_v44 = vadd.f32 %v11070_v24, %v3339_v47  ;;  %v2612_v29 = vadd.f32 %v14056_v20, %v2390_v32  ;;  %v3295_v47 = vpop.f32.mrf.mxu0 }
 0x39f   : > { %9346 = vmatmul.msk.bf16.gmra.mxu2 %vm3769_vm12, %v3748_v12 }
 0x3a0   : > { %v3629_v57 = vadd.f32 %v10956_v9, %v3593_v44  ;;  %v2866_v15 = vadd.f32 %v10835_v2, %v2612_v29 }
 0x3a1   : > { %v3063_v58 = vpop.f32.mrf.mxu3 }
 0x3a2   : > { %v3118_v51 = vadd.f32 %v3063_v58, %v2864_v13  ;;  %v3693_v60 = vmul.f32 0.1, %v3629_v57  ;;  %vm3661_vm14 = vcmp.gt.f32.partialorder %v3629_v57, 0.0 }
 0x3a4   : > { %v3340_v8 = vadd.f32 %v3285_v59, %v3118_v51  ;;  %v3725_v25 = vsel %vm3661_vm14, %v3629_v57, %v3693_v60  ;;  %v2392_v57 = vadd.f32 %v14057_v7, %v10858_v11  ;;  %v14058_v60 = vld [vmem:[#allocation87_spill] sm:$0xff] }
 0x3a6   : > { %v3594_v24 = vadd.f32 %v3539_v1, %v3340_v8 }
 0x3a8   : > { %v3630_v61 = vadd.f32 %v10956_v9, %v3594_v24 }
 0x3a9   : > { %v3066_v21 = vpop.f32.mrf.mxu3 }
 0x3aa   : > { %v3694_v17 = vmul.f32 0.1, %v3630_v61  ;;  %v3119_v59 = vadd.f32 %v3066_v21, %v10833_v62  ;;  %vm3662_vm15 = vcmp.gt.f32.partialorder %v3630_v61, 0.0  ;;  %v3549_v62 = vpop.f32.mrf.mxu1 }
 0x3ac   : > { %v3341_v54 = vadd.f32 %v3288_v53, %v3119_v59  ;;  %v3726_v1 = vsel %vm3662_vm15, %v3630_v61, %v3694_v17  ;;  %v2614_v61 = vadd.f32 %v14058_v60, %v2392_v57  ;;  %v14061_v57 = vld [vmem:[#allocation64_spill] sm:$0xff] }
 0x3ad   : > { %v3749_v37 = vpack.c.bf16 %v3726_v1, %v3725_v25 }
 0x3ae   : > { %v3595_v19 = vadd.f32 %v11089_v52, %v3341_v54  ;;  %v3298_v52 = vpop.f32.mrf.mxu0  ;;  %v4446_v54 = vld [vmem:[#allocation2 + $0x9] sm:$0xff] }
 0x3af   : > { %9347 = vmatmul.msk.bf16.gmra.mxu2 %vm3769_vm12, %v3749_v37  ;;  %v14059_v37 = vld [vmem:[#allocation29_spill] sm:$0xff] }
 0x3b0   : > { %v3631_v44 = vadd.f32 %v10956_v9, %v3595_v19 }
 0x3b1   : > { %v3068_v12 = vpop.f32.mrf.mxu3 }
 0x3b2   : > { %v3120_v34 = vadd.f32 %v3068_v12, %v2866_v15  ;;  %v3827_v13 = vpop.f32.mrf.mxu2  ;;  %v3695_v8 = vmul.f32 0.1, %v3631_v44  ;;  %vm3663_vm3 = vcmp.gt.f32.partialorder %v3631_v44, 0.0 }
 0x3b3   : > { %v3828_v53 = vadd.f32 %v11127_v28, %v3827_v13 }
 0x3b4   : > { %v3342_v58 = vadd.f32 %v3290_v3, %v3120_v34  ;;  %v11138_v3 = vpop.f32.mrf.mxu1  ;;  %v3727_v21 = vsel %vm3663_vm3, %v3631_v44, %v3695_v8  ;;  %v2394_v8 = vadd.f32 %v14061_v57, %v10878_v30 }
 0x3b5   : > { %vm3907_vm2 = vcmp.gt.f32.partialorder %v3828_v53, 0.0  ;;  %v3939_v51 = vmul.f32 0.1, %v3828_v53 }
 0x3b6   : > { %v3596_v56 = vadd.f32 %v3544_v35, %v3342_v58  ;;  %v3300_v13 = vpop.f32.mrf.mxu0 }
 0x3b7   : > { %v3971_v31 = vsel %vm3907_vm2, %v3828_v53, %v3939_v51 }
 0x3b8   : > { %v3632_v2 = vadd.f32 %v10956_v9, %v3596_v56  ;;  %4003 = vst.msk [vmem:[#allocation2 + $0x18] sm:$0xff] %vm1091_vm1, %v3971_v31  ;;  %v14060_v31 = vld [vmem:[#allocation4_spill] sm:$0xff] }
 0x3b9   : > { %v3071_v50 = vpop.f32.mrf.mxu3 }
 0x3ba   : > { %v3696_v24 = vmul.f32 0.1, %v3632_v2  ;;  %v3121_v48 = vadd.f32 %v3071_v50, %v10851_v49  ;;  %v3829_v32 = vpop.f32.mrf.mxu2  ;;  %vm3664_vm4 = vcmp.gt.f32.partialorder %v3632_v2, 0.0  ;;  %v2868_v49 = vadd.f32 %v10853_v4, %v2614_v61 }
 0x3bb   : > { %v3830_v35 = vadd.f32 %v11127_v28, %v3829_v32 }
 0x3bc   : > { %v3343_v11 = vadd.f32 %v3293_v43, %v3121_v48  ;;  %v3728_v17 = vsel %vm3664_vm4, %v3632_v2, %v3696_v24  ;;  %v3554_v4 = vpop.f32.mrf.mxu1 }
 0x3bd   : > { %vm3908_vm5 = vcmp.gt.f32.partialorder %v3830_v35, 0.0  ;;  %v3940_v59 = vmul.f32 0.1, %v3830_v35  ;;  %v3750_v20 = vpack.c.bf16 %v3728_v17, %v3727_v21  ;;  %v14062_v17 = vld [vmem:[#allocation50_spill] sm:$0xff] }
 0x3be   : > { %v3597_v1 = vadd.f32 %v3547_v33, %v3343_v11 }
 0x3bf   : > { %v3972_v29 = vsel %vm3908_vm5, %v3830_v35, %v3940_v59  ;;  %9348 = vmatmul.msk.bf16.gmra.mxu2 %vm3769_vm12, %v3750_v20  ;;  %v4447_v25 = vld [vmem:[#allocation2 + $0x11] sm:$0xff]  ;;  %v2616_v59 = vadd.f32 %v14062_v17, %v2394_v8 }
 0x3c0   : > { %4004 = vst.msk [vmem:[#allocation2 + $0x20] sm:$0xff] %vm1091_vm1, %v3972_v29  ;;  %v4479_v15 = vmul.f32 %v14059_v37, %v4447_v25  ;;  %v11147_v44 = vld [vmem:[#allocation2 + $0x17] sm:$0xff]  ;;  %v3633_v58 = vadd.f32 %v10956_v9, %v3597_v1  ;;  %v3303_v25 = vpop.f32.mrf.mxu0 }
 0x3c1   : > { %v3073_v19 = vpop.f32.mrf.mxu3  ;;  %v4069_v7 = vmul.f32 %v14060_v31, %v11147_v44  ;;  %v4118_v50 = vld [vmem:[#allocation2 + $0x18] sm:$0xff] }
 0x3c2   : > { %v3122_v12 = vadd.f32 %v3073_v19, %v2868_v49  ;;  %v3832_v43 = vpop.f32.mrf.mxu2  ;;  %v4510_v34 = vpack.c.bf16 %v4479_v15, %v4446_v54  ;;  %v3697_v32 = vmul.f32 0.1, %v3633_v58  ;;  %vm3665_vm7 = vcmp.gt.f32.partialorder %v3633_v58, 0.0 }
 0x3c3   : > { %v3833_v53 = vadd.f32 %v11127_v28, %v3832_v43 }
 0x3c4   : > { %v3344_v51 = vadd.f32 %v3295_v47, %v3122_v12  ;;  %9389 = vmatmul.msk.bf16.vlgmr.msrb.gmra.mxu1 %vm1091_vm1, %v4510_v34  ;;  %v3729_v29 = vsel %vm3665_vm7, %v3633_v58, %v3697_v32  ;;  %v3557_v15 = vpop.f32.mrf.mxu1  ;;  %v2870_v12 = vadd.f32 %v10873_v5, %v2616_v59  ;;  %v14063_v34 = vld [vmem:[#allocation33_spill] sm:$0xff]  ;;  %v14065_v32 = vld [vmem:[#allocation74_spill] sm:$0xff] }
 0x3c5   : > { %vm3909_vm6 = vcmp.gt.f32.partialorder %v3833_v53, 0.0  ;;  %v3941_v33 = vmul.f32 0.1, %v3833_v53 }
 0x3c6   : > { %v3598_v56 = vadd.f32 %v3549_v62, %v3344_v51 }
 0x3c7   : > { %v3973_v2 = vsel %vm3909_vm6, %v3833_v53, %v3941_v33  ;;  %v4119_v24 = vld [vmem:[#allocation2 + $0x20] sm:$0xff] }
 0x3c8   : > { %v11155_v48 = vld [vmem:[#allocation2 + $0x1f] sm:$0xff]  ;;  %v3634_v47 = vadd.f32 %v10956_v9, %v3598_v56  ;;  %4005 = vst.msk [vmem:[#allocation2 + $0x28] sm:$0xff] %vm1091_vm1, %v3973_v2  ;;  %v4149_v35 = vpack.c.bf16 %v4119_v24, %v4118_v50 }
 0x3c9   : > { %v4100_v60 = vpack.c.bf16 %v11155_v48, %v4069_v7  ;;  %v3076_v62 = vpop.f32.mrf.mxu3  ;;  %v4448_v58 = vld [vmem:[#allocation2 + $0x19] sm:$0xff] }
 0x3ca   : > { %v3698_v61 = vmul.f32 0.1, %v3634_v47  ;;  %v3123_v11 = vadd.f32 %v3076_v62, %v10871_v27  ;;  %v3834_v21 = vpop.f32.mrf.mxu2  ;;  %9357 = vmatmul.msk.bf16.gmra.mxu3 %vm1091_vm1, %v4149_v35  ;;  %vm3666_vm8 = vcmp.gt.f32.partialorder %v3634_v47, 0.0  ;;  %v14064_v50 = vld [vmem:[#allocation5_spill] sm:$0xff]  ;;  %v3305_v35 = vpop.f32.mrf.mxu0 }
 0x3cb   : > { %9373 = vmatmul.msk.bf16.gmra.mxu0 %vm1091_vm1, %v4100_v60  ;;  %v3835_v30 = vadd.f32 %v11127_v28, %v3834_v21 }
 0x3cc   : > { %v3345_v20 = vadd.f32 %v3298_v52, %v3123_v11  ;;  %v3730_v54 = vsel %vm3666_vm8, %v3634_v47, %v3698_v61  ;;  %v2396_v47 = vadd.f32 %v14065_v32, %v10896_v55  ;;  %v3559_v17 = vpop.f32.mrf.mxu1 }
 0x3cd   : > { %vm3910_vm9 = vcmp.gt.f32.partialorder %v3835_v30, 0.0  ;;  %v3942_v49 = vmul.f32 0.1, %v3835_v30  ;;  %v3751_v1 = vpack.c.bf16 %v3730_v54, %v3729_v29 }
 0x3ce   : > { %v3599_v43 = vadd.f32 %v11138_v3, %v3345_v20 }
 0x3cf   : > { %v3974_v19 = vsel %vm3910_vm9, %v3835_v30, %v3942_v49  ;;  %9349 = vmatmul.msk.bf16.gmra.mxu2 %vm3769_vm12, %v3751_v1  ;;  %v4449_v27 = vld [vmem:[#allocation2 + $0x21] sm:$0xff] }
 0x3d0   : > { %4006 = vst.msk [vmem:[#allocation2 + $0x30] sm:$0xff] %vm1091_vm1, %v3974_v19  ;;  %v4481_v53 = vmul.f32 %v14063_v34, %v4449_v27  ;;  %v11171_v57 = vld [vmem:[#allocation2 + $0x27] sm:$0xff]  ;;  %v3635_v8 = vadd.f32 %v10956_v9, %v3599_v43 }
 0x3d1   : > { %v3078_v52 = vpop.f32.mrf.mxu3  ;;  %v4071_v24 = vmul.f32 %v14064_v50, %v11171_v57  ;;  %v4120_v62 = vld [vmem:[#allocation2 + $0x28] sm:$0xff]  ;;  %v14066_v49 = vld [vmem:[#allocation21_spill] sm:$0xff] }
 0x3d2   : > { %v3124_v51 = vadd.f32 %v3078_v52, %v2870_v12  ;;  %v3837_v33 = vpop.f32.mrf.mxu2  ;;  %v4511_v56 = vpack.c.bf16 %v4481_v53, %v4448_v58  ;;  %v3699_v21 = vmul.f32 0.1, %v3635_v8  ;;  %vm3667_vm11 = vcmp.gt.f32.partialorder %v3635_v8, 0.0 }
 0x3d3   : > { %v3838_v7 = vadd.f32 %v11127_v28, %v3837_v33  ;;  %v2618_v1 = vadd.f32 %v14066_v49, %v2396_v47  ;;  %v14067_v33 = vld [vmem:[#allocation38_spill] sm:$0xff] }
 0x3d4   : > { %v3346_v2 = vadd.f32 %v3300_v13, %v3124_v51  ;;  %9390 = vmatmul.msk.bf16.gmra.mxu1 %vm1091_vm1, %v4511_v56  ;;  %v3731_v27 = vsel %vm3667_vm11, %v3635_v8, %v3699_v21 }
 0x3d5   : > { %vm3911_vm10 = vcmp.gt.f32.partialorder %v3838_v7, 0.0  ;;  %v3943_v5 = vmul.f32 0.1, %v3838_v7  ;;  %v2872_v58 = vadd.f32 %v10891_v39, %v2618_v1 }
 0x3d6   : > { %v3600_v3 = vadd.f32 %v3554_v4, %v3346_v2 }
 0x3d7   : > { %v3975_v60 = vsel %vm3911_vm10, %v3838_v7, %v3943_v5  ;;  %v4121_v61 = vld [vmem:[#allocation2 + $0x30] sm:$0xff]  ;;  %v3308_v7 = vpop.f32.mrf.mxu0 }
 0x3d8   : > { %v11179_v11 = vld [vmem:[#allocation2 + $0x2f] sm:$0xff]  ;;  %v3636_v13 = vadd.f32 %v10956_v9, %v3600_v3  ;;  %4007 = vst.msk [vmem:[#allocation2 + $0x38] sm:$0xff] %vm1091_vm1, %v3975_v60  ;;  %v4150_v30 = vpack.c.bf16 %v4121_v61, %v4120_v62 }
 0x3d9   : > { %v4101_v4 = vpack.c.bf16 %v11179_v11, %v4071_v24  ;;  %v3081_v59 = vpop.f32.mrf.mxu3  ;;  %v4450_v5 = vld [vmem:[#allocation2 + $0x29] sm:$0xff]  ;;  %v3562_v24 = vpop.f32.mrf.mxu1 }
 0x3da   : > { %v3700_v20 = vmul.f32 0.1, %v3636_v13  ;;  %v3125_v55 = vadd.f32 %v3081_v59, %v10889_v23  ;;  %v3839_v29 = vpop.f32.mrf.mxu2  ;;  %9358 = vmatmul.msk.bf16.gmra.mxu3 %vm1091_vm1, %v4150_v30  ;;  %vm3668_vm13 = vcmp.gt.f32.partialorder %v3636_v13, 0.0  ;;  %v14068_v61 = vld [vmem:[#allocation6_spill] sm:$0xff] }
 0x3db   : > { %9374 = vmatmul.msk.bf16.gmra.mxu0 %vm1091_vm1, %v4101_v4  ;;  %v3840_v54 = vadd.f32 %v11127_v28, %v3839_v29 }
 0x3dc   : > { %v3347_v19 = vadd.f32 %v3303_v25, %v3125_v55  ;;  %v3732_v12 = vsel %vm3668_vm13, %v3636_v13, %v3700_v20  ;;  %v14069_v13 = vld [vmem:[#allocation79_spill] sm:$0xff] }
 0x3dd   : > { %vm3912_vm14 = vcmp.gt.f32.partialorder %v3840_v54, 0.0  ;;  %v3944_v43 = vmul.f32 0.1, %v3840_v54  ;;  %v3752_v53 = vpack.c.bf16 %v3732_v12, %v3731_v27  ;;  %v2398_v30 = vadd.f32 %v14069_v13, %v10916_v18 }
 0x3de   : > { %v3601_v51 = vadd.f32 %v3557_v15, %v3347_v19 }
 0x3df   : > { %v3976_v52 = vsel %vm3912_vm14, %v3840_v54, %v3944_v43  ;;  %9350 = vmatmul.msk.bf16.gmra.mxu2 %vm3769_vm12, %v3752_v53  ;;  %v4451_v23 = vld [vmem:[#allocation2 + $0x31] sm:$0xff]  ;;  %v3310_v18 = vpop.f32.mrf.mxu0  ;;  %v14070_v43 = vld [vmem:[#allocation70_spill] sm:$0xff] }
 0x3e0   : > { %4008 = vst.msk [vmem:[#allocation2 + $0x40] sm:$0xff] %vm1091_vm1, %v3976_v52  ;;  %v4483_v56 = vmul.f32 %v14067_v33, %v4451_v23  ;;  %v11194_v47 = vld [vmem:[#allocation2 + $0x37] sm:$0xff]  ;;  %v3637_v60 = vadd.f32 %v10956_v9, %v3601_v51  ;;  %v2620_v53 = vadd.f32 %v14070_v43, %v2398_v30 }
 0x3e1   : > { %v3083_v2 = vpop.f32.mrf.mxu3  ;;  %v4073_v21 = vmul.f32 %v14068_v61, %v11194_v47  ;;  %v4122_v59 = vld [vmem:[#allocation2 + $0x38] sm:$0xff]  ;;  %v3564_v51 = vpop.f32.mrf.mxu1 }
 0x3e2   : > { %v3126_v25 = vadd.f32 %v3083_v2, %v2872_v58  ;;  %v3842_v8 = vpop.f32.mrf.mxu2  ;;  %v4512_v3 = vpack.c.bf16 %v4483_v56, %v4450_v5  ;;  %v3701_v29 = vmul.f32 0.1, %v3637_v60  ;;  %vm3669_vm2 = vcmp.gt.f32.partialorder %v3637_v60, 0.0 }
 0x3e3   : > { %v3843_v32 = vadd.f32 %v11127_v28, %v3842_v8 }
 0x3e4   : > { %v3348_v62 = vadd.f32 %v3305_v35, %v3126_v25  ;;  %9391 = vmatmul.msk.bf16.gmra.mxu1 %vm1091_vm1, %v4512_v3  ;;  %v3733_v23 = vsel %vm3669_vm2, %v3637_v60, %v3701_v29  ;;  %v2874_v25 = vadd.f32 %v10911_v41, %v2620_v53  ;;  %v14071_v3 = vld [vmem:[#allocation42_spill] sm:$0xff] }
 0x3e5   : > { %vm3913_vm15 = vcmp.gt.f32.partialorder %v3843_v32, 0.0  ;;  %v3945_v39 = vmul.f32 0.1, %v3843_v32 }
 0x3e6   : > { %v3602_v15 = vadd.f32 %v3559_v17, %v3348_v62 }
 0x3e7   : > { %v3977_v4 = vsel %vm3913_vm15, %v3843_v32, %v3945_v39  ;;  %v4123_v20 = vld [vmem:[#allocation2 + $0x40] sm:$0xff]  ;;  %v3313_v41 = vpop.f32.mrf.mxu0 }
 0x3e8   : > { %v11202_v55 = vld [vmem:[#allocation2 + $0x3f] sm:$0xff]  ;;  %v3638_v54 = vadd.f32 %v10956_v9, %v3602_v15  ;;  %4009 = vst.msk [vmem:[#allocation2 + $0x48] sm:$0xff] %vm1091_vm1, %v3977_v4  ;;  %v4151_v35 = vpack.c.bf16 %v4123_v20, %v4122_v59  ;;  %v14072_v20 = vld [vmem:[#allocation7_spill] sm:$0xff] }
 0x3e9   : > { %v4102_v49 = vpack.c.bf16 %v11202_v55, %v4073_v21  ;;  %v3086_v17 = vpop.f32.mrf.mxu3  ;;  %v4452_v39 = vld [vmem:[#allocation2 + $0x39] sm:$0xff] }
 0x3ea   : > { %v3702_v1 = vmul.f32 0.1, %v3638_v54  ;;  %v3127_v19 = vadd.f32 %v3086_v17, %v10909_v36  ;;  %v3844_v27 = vpop.f32.mrf.mxu2  ;;  %9359 = vmatmul.msk.bf16.gmra.mxu3 %vm1091_vm1, %v4151_v35  ;;  %vm3670_vm3 = vcmp.gt.f32.partialorder %v3638_v54, 0.0 }
 0x3eb   : > { %9375 = vmatmul.msk.bf16.gmra.mxu0 %vm1091_vm1, %v4102_v49  ;;  %v3845_v12 = vadd.f32 %v11127_v28, %v3844_v27  ;;  %v3567_v49 = vpop.f32.mrf.mxu1 }
 0x3ec   : > { %v3349_v52 = vadd.f32 %v3308_v7, %v3127_v19  ;;  %v3734_v58 = vsel %vm3670_vm3, %v3638_v54, %v3702_v1  ;;  %v14073_v54 = vld [vmem:[#allocation82_spill] sm:$0xff] }
 0x3ed   : > { %vm3914_vm4 = vcmp.gt.f32.partialorder %v3845_v12, 0.0  ;;  %v3946_v56 = vmul.f32 0.1, %v3845_v12  ;;  %v3753_v2 = vpack.c.bf16 %v3734_v58, %v3733_v23  ;;  %v2400_v35 = vadd.f32 %v14073_v54, %v10931_v14 }
 0x3ee   : > { %v3603_v8 = vadd.f32 %v3562_v24, %v3349_v52 }
 0x3ef   : > { %v3978_v5 = vsel %vm3914_vm4, %v3845_v12, %v3946_v56  ;;  %9351 = vmatmul.msk.bf16.gmra.mxu2 %vm3769_vm12, %v3753_v2  ;;  %v4453_v36 = vld [vmem:[#allocation2 + $0x41] sm:$0xff] }
 0x3f0   : > { %4010 = vst.msk [vmem:[#allocation2 + $0x50] sm:$0xff] %vm1091_vm1, %v3978_v5  ;;  %v4485_v32 = vmul.f32 %v14071_v3, %v4453_v36  ;;  %v11217_v13 = vld [vmem:[#allocation2 + $0x47] sm:$0xff]  ;;  %v3639_v30 = vadd.f32 %v10956_v9, %v3603_v8 }
 0x3f1   : > { %v3088_v62 = vpop.f32.mrf.mxu3  ;;  %v4075_v29 = vmul.f32 %v14072_v20, %v11217_v13  ;;  %v4124_v1 = vld [vmem:[#allocation2 + $0x48] sm:$0xff] }
 0x3f2   : > { %v3128_v7 = vadd.f32 %v3088_v62, %v2874_v25  ;;  %v3847_v60 = vpop.f32.mrf.mxu2  ;;  %v4513_v15 = vpack.c.bf16 %v4485_v32, %v4452_v39  ;;  %v3703_v12 = vmul.f32 0.1, %v3639_v30  ;;  %vm3671_vm6 = vcmp.gt.f32.partialorder %v3639_v30, 0.0  ;;  %v14074_v56 = vld [vmem:[#allocation34_spill] sm:$0xff]  ;;  %v3315_v32 = vpop.f32.mrf.mxu0 }
 0x3f3   : > { %v3848_v21 = vadd.f32 %v11127_v28, %v3847_v60  ;;  %v14075_v60 = vld [vmem:[#allocation47_spill] sm:$0xff] }
 0x3f4   : > { %v3350_v4 = vadd.f32 %v3310_v18, %v3128_v7  ;;  %9392 = vmatmul.msk.bf16.gmra.mxu1 %vm1091_vm1, %v4513_v15  ;;  %v3735_v5 = vsel %vm3671_vm6, %v3639_v30, %v3703_v12  ;;  %v14076_v12 = vld [vmem:[#allocation32_spill] sm:$0xff] }
 0x3f5   : > { %vm3915_vm5 = vcmp.gt.f32.partialorder %v3848_v21, 0.0  ;;  %v3947_v24 = vmul.f32 0.1, %v3848_v21 }
 0x3f6   : > { %v3604_v59 = vadd.f32 %v3564_v51, %v3350_v4 }
 0x3f7   : > { %v3979_v17 = vsel %vm3915_vm5, %v3848_v21, %v3947_v24  ;;  %v4125_v19 = vld [vmem:[#allocation2 + $0x50] sm:$0xff]  ;;  %v3569_v21 = vpop.f32.mrf.mxu1 }
 0x3f8   : > { %v11225_v27 = vld [vmem:[#allocation2 + $0x4f] sm:$0xff]  ;;  %v3640_v18 = vadd.f32 %v10956_v9, %v3604_v59  ;;  %4011 = vst.msk [vmem:[#allocation2 + $0x58] sm:$0xff] %vm1091_vm1, %v3979_v17  ;;  %v4152_v43 = vpack.c.bf16 %v4125_v19, %v4124_v1  ;;  %v2622_v9 = vadd.f32 %v14074_v56, %v2400_v35  ;;  %v11245_v35 = vld [vmem:[%s13701_s4] ss:$0 sm:$0xff] }
 0x3f9   : > { %v4103_v53 = vpack.c.bf16 %v11225_v27, %v4075_v29  ;;  %v3091_v52 = vpop.f32.mrf.mxu3 }
 0x3fa   : > { %v3704_v23 = vmul.f32 0.1, %v3640_v18  ;;  %v3129_v58 = vadd.f32 %v3091_v52, %v10927_v0  ;;  %v3849_v14 = vpop.f32.mrf.mxu2  ;;  %9360 = vmatmul.msk.bf16.gmra.mxu3 %vm1091_vm1, %v4152_v43  ;;  %vm3672_vm7 = vcmp.gt.f32.partialorder %v3640_v18, 0.0  ;;  %v2876_v39 = vadd.f32 %v10933_v42, %v2622_v9 }
 0x3fb   : > { %9376 = vmatmul.msk.bf16.gmra.mxu0 %vm1091_vm1, %v4103_v53  ;;  %v3850_v51 = vadd.f32 %v11127_v28, %v3849_v14  ;;  %v3318_v14 = vpop.f32.mrf.mxu0 }
 0x3fc   : > { %v3351_v2 = vadd.f32 %v3313_v41, %v3129_v58  ;;  %v3736_v36 = vsel %vm3672_vm7, %v3640_v18, %v3704_v23  ;;  %v4454_v41 = vld [vmem:[#allocation2 + $0x49] sm:$0xff]  ;;  %v14077_v18 = vld [vmem:[#allocation85_spill] sm:$0xff] }
 0x3fd   : > { %vm3916_vm8 = vcmp.gt.f32.partialorder %v3850_v51, 0.0  ;;  %v3948_v25 = vmul.f32 0.1, %v3850_v51  ;;  %v3754_v8 = vpack.c.bf16 %v3736_v36, %v3735_v5  ;;  %v2402_v43 = vadd.f32 %v14077_v18, %v14076_v12 }
 0x3fe   : > { %v3605_v7 = vadd.f32 %v3567_v49, %v3351_v2 }
 0x3ff   : > { %v3980_v62 = vsel %vm3916_vm8, %v3850_v51, %v3948_v25  ;;  %9352 = vmatmul.msk.bf16.gmra.mxu2 %vm3769_vm12, %v3754_v8  ;;  %v4455_v0 = vld [vmem:[#allocation2 + $0x51] sm:$0xff]  ;;  %v3572_v36 = vpop.f32.mrf.mxu1  ;;  %v14078_v8 = vld [vmem:[#allocation30_spill] sm:$0xff] }
 0x400   : > { %4012 = vst.msk [vmem:[#allocation2 + $0x60] sm:$0xff] %vm1091_vm1, %v3980_v62  ;;  %v4487_v15 = vmul.f32 %v14075_v60, %v4455_v0  ;;  %v11240_v54 = vld [vmem:[#allocation2 + $0x57] sm:$0xff]  ;;  %v3641_v42 = vadd.f32 %v11245_v35, %v3605_v7 }
 0x401   : > { %v3093_v4 = vpop.f32.mrf.mxu3  ;;  %v4077_v19 = vmul.f32 %v14017_v38, %v11240_v54  ;;  %v4126_v52 = vld [vmem:[#allocation2 + $0x58] sm:$0xff] }
 0x402   : > { %v3130_v30 = vadd.f32 %v3093_v4, %v2876_v39  ;;  %v3852_v24 = vpop.f32.mrf.mxu2  ;;  %v4514_v59 = vpack.c.bf16 %v4487_v15, %v4454_v41  ;;  %v3705_v51 = vmul.f32 0.1, %v3641_v42  ;;  %vm3673_vm10 = vcmp.gt.f32.partialorder %v3641_v42, 0.0  ;;  %v14079_v39 = vld [vmem:[#allocation75_spill] sm:$0xff] }
 0x403   : > { %v3853_v29 = vadd.f32 %v11127_v28, %v3852_v24  ;;  %v2624_v7 = vadd.f32 %v14079_v39, %v2402_v43  ;;  %v3320_v12 = vpop.f32.mrf.mxu0 }
 0x404   : > { %v3352_v49 = vadd.f32 %v3315_v32, %v3130_v30  ;;  %9393 = vmatmul.msk.bf16.gmra.mxu1 %vm1091_vm1, %v4514_v59 }
 0x405   : > { %vm3917_vm9 = vcmp.gt.f32.partialorder %v3853_v29, 0.0  ;;  %v3949_v17 = vmul.f32 0.1, %v3853_v29 }
 0x406   : > { %v3606_v1 = vadd.f32 %v3569_v21, %v3352_v49  ;;  %v3737_v21 = vsel %vm3673_vm10, %v3641_v42, %v3705_v51 }
 0x407   : > { %v3981_v53 = vsel %vm3917_vm9, %v3853_v29, %v3949_v17  ;;  %v4127_v23 = vld [vmem:[#allocation2 + $0x60] sm:$0xff]  ;;  %v2878_v29 = vadd.f32 %v11119_v45, %v2624_v7 }
 0x408   : > { %v11253_v58 = vld [vmem:[#allocation2 + $0x5f] sm:$0xff]  ;;  %v3642_v56 = vadd.f32 %v11245_v35, %v3606_v1  ;;  %4013 = vst.msk [vmem:[#allocation2 + $0x68] sm:$0xff] %vm1091_vm1, %v3981_v53  ;;  %v4153_v9 = vpack.c.bf16 %v4127_v23, %v4126_v52  ;;  %v3574_v23 = vpop.f32.mrf.mxu1 }
 0x409   : > { %v4104_v2 = vpack.c.bf16 %v11253_v58, %v4077_v19  ;;  %v3096_v5 = vpop.f32.mrf.mxu3  ;;  %v14080_v17 = vld [vmem:[#allocation53_spill] sm:$0xff] }
 0x40a   : > { %v3706_v25 = vmul.f32 0.1, %v3642_v56  ;;  %v3131_v32 = vadd.f32 %v3096_v5, %v14078_v8  ;;  %v3854_v62 = vpop.f32.mrf.mxu2  ;;  %9361 = vmatmul.msk.bf16.gmra.mxu3 %vm1091_vm1, %v4153_v9  ;;  %vm3674_vm11 = vcmp.gt.f32.partialorder %v3642_v56, 0.0  ;;  %v4456_v18 = vld [vmem:[#allocation2 + $0x59] sm:$0xff] }
 0x40b   : > { %9377 = vmatmul.msk.bf16.gmra.mxu0 %vm1091_vm1, %v4104_v2  ;;  %v3855_v0 = vadd.f32 %v11127_v28, %v3854_v62  ;;  %v14081_v2 = vld [vmem:[#allocation9_spill] sm:$0xff] }
 0x40c   : > { %v3353_v15 = vadd.f32 %v3318_v14, %v3131_v32  ;;  %v3738_v4 = vsel %vm3674_vm11, %v3642_v56, %v3706_v25 }
 0x40d   : > { %vm3918_vm13 = vcmp.gt.f32.partialorder %v3855_v0, 0.0  ;;  %v3950_v41 = vmul.f32 0.1, %v3855_v0  ;;  %v3755_v30 = vpack.c.bf16 %v3738_v4, %v3737_v21 }
 0x40e   : > { %v3607_v49 = vadd.f32 %v3572_v36, %v3353_v15 }
 0x40f   : > { %v3982_v24 = vsel %vm3918_vm13, %v3855_v0, %v3950_v41  ;;  %9353 = vmatmul.msk.bf16.gmra.mxu2 %vm3769_vm12, %v3755_v30  ;;  %v4457_v59 = vld [vmem:[#allocation2 + $0x61] sm:$0xff] }
 0x410   : > { %4014 = vst.msk [vmem:[#allocation2 + $0x70] sm:$0xff] %vm1091_vm1, %v3982_v24  ;;  %v4489_v1 = vmul.f32 %v14080_v17, %v4457_v59  ;;  %v11268_v14 = vld [vmem:[#allocation2 + $0x67] sm:$0xff]  ;;  %v3643_v51 = vadd.f32 %v11245_v35, %v3607_v49 }
 0x411   : > { %v3098_v19 = vpop.f32.mrf.mxu3  ;;  %v4079_v5 = vmul.f32 %v14081_v2, %v11268_v14  ;;  %v4128_v25 = vld [vmem:[#allocation2 + $0x68] sm:$0xff] }
 0x412   : > { %v3132_v43 = vadd.f32 %v3098_v19, %v2878_v29  ;;  %v3857_v42 = vpop.f32.mrf.mxu2  ;;  %v4515_v53 = vpack.c.bf16 %v4489_v1, %v4456_v18  ;;  %v3707_v62 = vmul.f32 0.1, %v3643_v51  ;;  %vm3675_vm15 = vcmp.gt.f32.partialorder %v3643_v51, 0.0 }
 0x413   : > { %v3858_v52 = vadd.f32 %v11127_v28, %v3857_v42  ;;  %v4366_v21 = vpop.f32.mrf.mxu0 }
 0x414   : > { %v3354_v56 = vadd.f32 %v3320_v12, %v3132_v43  ;;  %9394 = vmatmul.msk.bf16.gmra.mxu1 %vm1091_vm1, %v4515_v53  ;;  %v3739_v59 = vsel %vm3675_vm15, %v3643_v51, %v3707_v62  ;;  %v14082_v12 = vld [vmem:[#allocation59_spill] sm:$0xff] }
 0x415   : > { %vm3919_vm14 = vcmp.gt.f32.partialorder %v3858_v52, 0.0  ;;  %v3951_v45 = vmul.f32 0.1, %v3858_v52 }
 0x416   : > { %v3608_v9 = vadd.f32 %v3574_v23, %v3354_v56  ;;  %v14083_v56 = vld [vmem:[#allocation10_spill] sm:$0xff] }
 0x417   : > { %v3983_v36 = vsel %vm3919_vm14, %v3858_v52, %v3951_v45  ;;  %v4129_v8 = vld [vmem:[#allocation2 + $0x70] sm:$0xff] }
 0x418   : > { %v11274_v32 = vld [vmem:[#allocation2 + $0x6f] sm:$0xff]  ;;  %4015 = vst.msk [vmem:[#allocation2 + $0x78] sm:$0xff] %vm1091_vm1, %v3983_v36  ;;  %v3644_v0 = vadd.f32 %v11245_v35, %v3608_v9  ;;  %v4154_v39 = vpack.c.bf16 %v4129_v8, %v4128_v25 }
 0x419   : > { %v4105_v7 = vpack.c.bf16 %v11274_v32, %v4079_v5  ;;  %v4226_v15 = vpop.f32.mrf.mxu3  ;;  %v4458_v43 = vld [vmem:[#allocation2 + $0x69] sm:$0xff] }
 0x41a   : > { %vm3676_vm2 = vcmp.gt.f32.partialorder %v3644_v0, 0.0  ;;  %v3708_v4 = vmul.f32 0.1, %v3644_v0  ;;  %v3859_v41 = vpop.f32.mrf.mxu2  ;;  %9362 = vmatmul.msk.bf16.gmra.mxu3 %vm1091_vm1, %v4154_v39  ;;  %v11281_v30 = vadd.f32 %v4366_v21, %v4226_v15 }
 0x41b   : > { %9378 = vmatmul.msk.bf16.gmra.mxu0 %vm1091_vm1, %v4105_v7  ;;  %v3860_v24 = vadd.f32 %v11127_v28, %v3859_v41  ;;  %v4732_v7 = vmul.f32 %v13994_v63, %v11147_v44 }
 0x41c   : > { %v3740_v29 = vsel %vm3676_vm2, %v3644_v0, %v3708_v4 }
 0x41d   : > { %vm3920_vm3 = vcmp.gt.f32.partialorder %v3860_v24, 0.0  ;;  %v3952_v35 = vmul.f32 0.1, %v3860_v24  ;;  %v3756_v49 = vpack.c.bf16 %v3740_v29, %v3739_v59  ;;  %v4764_v21 = vpack.c.bf16 %v11155_v48, %v4732_v7  ;;  %v9439_v29 = vld [vmem:[%s13704_s7 + $0x14] sm:$0xf] }
 0x41f   : > { %v3984_v1 = vsel %vm3920_vm3, %v3860_v24, %v3952_v35  ;;  %9354 = vmatmul.msk.bf16.gmra.mxu2 %vm3769_vm12, %v3756_v49  ;;  %v4459_v19 = vld [vmem:[#allocation2 + $0x71] sm:$0xff]  ;;  %v5307_v49 = vsel %vm1263_vm0, %v9439_v29, 0 }
 0x420   : > { %4016 = vst.msk [vmem:[#allocation2 + $0x80] sm:$0xff] %vm1091_vm1, %v3984_v1  ;;  %v4491_v18 = vmul.f32 %v14082_v12, %v4459_v19  ;;  %v11288_v23 = vld [vmem:[#allocation2 + $0x77] sm:$0xff]  ;;  %5316 = vmatpush.bf16.msra.mxu0 %v5307_v49 }
 0x421   : > { %v4081_v45 = vmul.f32 %v14083_v56, %v11288_v23  ;;  %v4130_v5 = vld [vmem:[#allocation2 + $0x78] sm:$0xff]  ;;  %v14084_v24 = vld [vmem:[#allocation67_spill] sm:$0xff] }
 0x422   : > { %v3862_v42 = vpop.f32.mrf.mxu2  ;;  %v4516_v53 = vpack.c.bf16 %v4491_v18, %v4458_v43  ;;  %v14085_v43 = vld [vmem:[#allocation11_spill] sm:$0xff] }
 0x423   : > { %v3863_v52 = vadd.f32 %v11127_v28, %v3862_v42 }
 0x424   : > { %9395 = vmatmul.msk.bf16.gmra.mxu1 %vm1091_vm1, %v4516_v53 }
 0x425   : > { %vm3921_vm4 = vcmp.gt.f32.partialorder %v3863_v52, 0.0  ;;  %v3953_v51 = vmul.f32 0.1, %v3863_v52 }
 0x427   : > { %v3985_v9 = vsel %vm3921_vm4, %v3863_v52, %v3953_v51  ;;  %v4131_v36 = vld [vmem:[#allocation2 + $0x80] sm:$0xff] }
 0x428   : > { %v11293_v25 = vld [vmem:[#allocation2 + $0x7f] sm:$0xff]  ;;  %4017 = vst.msk [vmem:[#allocation2 + $0x88] sm:$0xff] %vm1091_vm1, %v3985_v9  ;;  %v4155_v8 = vpack.c.bf16 %v4131_v36, %v4130_v5 }
 0x429   : > { %v4106_v62 = vpack.c.bf16 %v11293_v25, %v4081_v45  ;;  %v4460_v35 = vld [vmem:[#allocation2 + $0x79] sm:$0xff] }
 0x42a   : > { %v3864_v0 = vpop.f32.mrf.mxu2  ;;  %9363 = vmatmul.msk.bf16.gmra.mxu3 %vm1091_vm1, %v4155_v8 }
 0x42b   : > { %9379 = vmatmul.msk.bf16.gmra.mxu0 %vm1091_vm1, %v4106_v62  ;;  %v3865_v39 = vadd.f32 %v11127_v28, %v3864_v0  ;;  %v4734_v62 = vmul.f32 %v14060_v31, %v11171_v57 }
 0x42d   : > { %vm3922_vm5 = vcmp.gt.f32.partialorder %v3865_v39, 0.0  ;;  %v3954_v15 = vmul.f32 0.1, %v3865_v39 }
 0x42f   : > { %v3986_v4 = vsel %vm3922_vm5, %v3865_v39, %v3954_v15  ;;  %9406 = vmatmul.msk.bf16.vlgmr.msra.gmra.mxu2 %vm1091_vm1, %v4764_v21  ;;  %v4461_v41 = vld [vmem:[#allocation2 + $0x81] sm:$0xff]  ;;  %v4765_v39 = vpack.c.bf16 %v11179_v11, %v4734_v62  ;;  %v11326_v15 = vpop.f32.mrf.mxu0 }
 0x430   : > { %4018 = vst.msk [vmem:[#allocation2 + $0x90] sm:$0xff] %vm1091_vm1, %v3986_v4  ;;  %v4493_v59 = vmul.f32 %v14084_v24, %v4461_v41  ;;  %v11311_v19 = vld [vmem:[#allocation2 + $0x87] sm:$0xff] }
 0x431   : > { %v4083_v42 = vmul.f32 %v14085_v43, %v11311_v19  ;;  %v4132_v52 = vld [vmem:[#allocation2 + $0x88] sm:$0xff]  ;;  %v14086_v4 = vld [vmem:[#allocation73_spill] sm:$0xff] }
 0x432   : > { %v3867_v44 = vpop.f32.mrf.mxu2  ;;  %v4517_v1 = vpack.c.bf16 %v4493_v59, %v4460_v35 }
 0x433   : > { %v3868_v48 = vadd.f32 %v11127_v28, %v3867_v44 }
 0x434   : > { %9396 = vmatmul.msk.bf16.gmra.mxu1 %vm1091_vm1, %v4517_v1  ;;  %v11338_v1 = vpop.f32.mrf.mxu3 }
 0x435   : > { %vm3923_vm6 = vcmp.gt.f32.partialorder %v3868_v48, 0.0  ;;  %v3955_v18 = vmul.f32 0.1, %v3868_v48 }
 0x437   : > { %v3987_v53 = vsel %vm3923_vm6, %v3868_v48, %v3955_v18  ;;  %v4133_v51 = vld [vmem:[#allocation2 + $0x90] sm:$0xff]  ;;  %v14087_v18 = vld [vmem:[#allocation12_spill] sm:$0xff] }
 0x438   : > { %v11316_v45 = vld [vmem:[#allocation2 + $0x8f] sm:$0xff]  ;;  %4019 = vst.msk [vmem:[#allocation2 + $0x98] sm:$0xff] %vm1091_vm1, %v3987_v53  ;;  %v4156_v9 = vpack.c.bf16 %v4133_v51, %v4132_v52 }
 0x439   : > { %v4107_v5 = vpack.c.bf16 %v11316_v45, %v4083_v42  ;;  %v4462_v29 = vld [vmem:[#allocation2 + $0x89] sm:$0xff] }
 0x43a   : > { %v3869_v36 = vpop.f32.mrf.mxu2  ;;  %9364 = vmatmul.msk.bf16.gmra.mxu3 %vm1091_vm1, %v4156_v9 }
 0x43b   : > { %9380 = vmatmul.msk.bf16.gmra.mxu0 %vm1091_vm1, %v4107_v5  ;;  %v3870_v8 = vadd.f32 %v11127_v28, %v3869_v36 }
 0x43d   : > { %vm3924_vm7 = vcmp.gt.f32.partialorder %v3870_v8, 0.0  ;;  %v3956_v0 = vmul.f32 0.1, %v3870_v8 }
 0x43f   : > { %v3988_v7 = vsel %vm3924_vm7, %v3870_v8, %v3956_v0  ;;  %9407 = vmatmul.msk.bf16.gmra.mxu2 %vm1091_vm1, %v4765_v39  ;;  %v4463_v21 = vld [vmem:[#allocation2 + $0x91] sm:$0xff]  ;;  %v4736_v39 = vmul.f32 %v14064_v50, %v11194_v47 }
 0x440   : > { %4020 = vst.msk [vmem:[#allocation2 + $0xa0] sm:$0xff] %vm1091_vm1, %v3988_v7  ;;  %v4495_v41 = vmul.f32 %v14086_v4, %v4463_v21  ;;  %v11335_v11 = vld [vmem:[#allocation2 + $0x97] sm:$0xff] }
 0x441   : > { %v4588_v59 = vpop.f32.mrf.mxu1  ;;  %v4085_v42 = vmul.f32 %v14087_v18, %v11335_v11  ;;  %v4134_v51 = vld [vmem:[#allocation2 + $0x98] sm:$0xff] }
 0x442   : > { %v11332_v35 = vadd.f32 %v4588_v59, %v11281_v30  ;;  %v3872_v57 = vpop.f32.mrf.mxu2  ;;  %v4518_v49 = vpack.c.bf16 %v4495_v41, %v4462_v29  ;;  %v4766_v41 = vpack.c.bf16 %v11202_v55, %v4736_v39 }
 0x443   : > { %v3873_v44 = vadd.f32 %v11127_v28, %v3872_v57 }
 0x444   : > { %9397 = vmatmul.msk.bf16.gmra.mxu1 %vm1091_vm1, %v4518_v49 }
 0x445   : > { %vm3925_vm8 = vcmp.gt.f32.partialorder %v3873_v44, 0.0  ;;  %v3957_v48 = vmul.f32 0.1, %v3873_v44 }
 0x447   : > { %v3989_v53 = vsel %vm3925_vm8, %v3873_v44, %v3957_v48  ;;  %v4135_v30 = vld [vmem:[#allocation2 + $0xa0] sm:$0xff] }
 0x448   : > { %v4371_v52 = vpop.f32.mrf.mxu0  ;;  %v11342_v9 = vld [vmem:[#allocation2 + $0x9f] sm:$0xff]  ;;  %4021 = vst.msk [vmem:[#allocation2 + $0xa8] sm:$0xff] %vm1091_vm1, %v3989_v53  ;;  %v4157_v5 = vpack.c.bf16 %v4135_v30, %v4134_v51 }
 0x449   : > { %v4108_v36 = vpack.c.bf16 %v11342_v9, %v4085_v42  ;;  %v11346_v8 = vpop.f32.mrf.mxu1  ;;  %v14088_v44 = vld [vmem:[#allocation77_spill] sm:$0xff] }
 0x44a   : > { %v3874_v62 = vpop.f32.mrf.mxu2  ;;  %9365 = vmatmul.msk.bf16.gmra.mxu3 %vm1091_vm1, %v4157_v5  ;;  %v4464_v53 = vld [vmem:[#allocation2 + $0x99] sm:$0xff] }
 0x44b   : > { %9381 = vmatmul.msk.bf16.gmra.mxu0 %vm1091_vm1, %v4108_v36  ;;  %v3875_v0 = vadd.f32 %v11127_v28, %v3874_v62 }
 0x44d   : > { %vm3926_vm9 = vcmp.gt.f32.partialorder %v3875_v0, 0.0  ;;  %v3958_v7 = vmul.f32 0.1, %v3875_v0  ;;  %v4231_v21 = vpop.f32.mrf.mxu3 }
 0x44e   : > { %v4372_v59 = vadd.f32 %v4371_v52, %v4231_v21 }
 0x44f   : > { %v3990_v29 = vsel %vm3926_vm9, %v3875_v0, %v3958_v7  ;;  %9408 = vmatmul.msk.bf16.gmra.mxu2 %vm1091_vm1, %v4766_v41  ;;  %v4465_v49 = vld [vmem:[#allocation2 + $0xa1] sm:$0xff] }
 0x450   : > { %v4373_v57 = vpop.f32.mrf.mxu0  ;;  %4022 = vst.msk [vmem:[#allocation2 + $0xb0] sm:$0xff] %vm1091_vm1, %v3990_v29  ;;  %v4497_v48 = vmul.f32 %v14088_v44, %v4465_v49  ;;  %v11360_v36 = vld [vmem:[#allocation2 + $0xa7] sm:$0xff] }
 0x451   : > { %v4593_v42 = vpop.f32.mrf.mxu1  ;;  %v4087_v0 = vmul.f32 %v14030_v22, %v11360_v36  ;;  %v4136_v21 = vld [vmem:[#allocation2 + $0xa8] sm:$0xff] }
 0x452   : > { %v11357_v51 = vadd.f32 %v4593_v42, %v4372_v59  ;;  %v3877_v47 = vpop.f32.mrf.mxu2  ;;  %v4519_v30 = vpack.c.bf16 %v4497_v48, %v4464_v53 }
 0x453   : > { %v3878_v5 = vadd.f32 %v11127_v28, %v3877_v47  ;;  %v4738_v47 = vmul.f32 %v14068_v61, %v11217_v13 }
 0x454   : > { %9398 = vmatmul.msk.bf16.gmra.mxu1 %vm1091_vm1, %v4519_v30 }
 0x455   : > { %vm3927_vm10 = vcmp.gt.f32.partialorder %v3878_v5, 0.0  ;;  %v3959_v55 = vmul.f32 0.1, %v3878_v5  ;;  %v4233_v52 = vpop.f32.mrf.mxu3 }
 0x456   : > { %v4374_v62 = vadd.f32 %v4373_v57, %v4233_v52 }
 0x457   : > { %v3991_v39 = vsel %vm3927_vm10, %v3878_v5, %v3959_v55  ;;  %v4137_v41 = vld [vmem:[#allocation2 + $0xb0] sm:$0xff]  ;;  %v4767_v55 = vpack.c.bf16 %v11225_v27, %v4738_v47 }
 0x458   : > { %v4376_v7 = vpop.f32.mrf.mxu0  ;;  %v11365_v59 = vld [vmem:[#allocation2 + $0xaf] sm:$0xff]  ;;  %4023 = vst.msk [vmem:[#allocation2 + $0xb8] sm:$0xff] %vm1091_vm1, %v3991_v39  ;;  %v4158_v29 = vpack.c.bf16 %v4137_v41, %v4136_v21  ;;  %v14089_v21 = vld [vmem:[#allocation80_spill] sm:$0xff] }
 0x459   : > { %v4109_v49 = vpack.c.bf16 %v11365_v59, %v4087_v0  ;;  %v4595_v48 = vpop.f32.mrf.mxu1 }
 0x45a   : > { %v11369_v42 = vadd.f32 %v4595_v48, %v4374_v62  ;;  %v3879_v53 = vpop.f32.mrf.mxu2  ;;  %9366 = vmatmul.msk.bf16.gmra.mxu3 %vm1091_vm1, %v4158_v29 }
 0x45b   : > { %9382 = vmatmul.msk.bf16.gmra.mxu0 %vm1091_vm1, %v4109_v49  ;;  %v3880_v57 = vadd.f32 %v11127_v28, %v3879_v53  ;;  %v4466_v49 = vld [vmem:[#allocation2 + $0xa9] sm:$0xff] }
 0x45d   : > { %vm3928_vm11 = vcmp.gt.f32.partialorder %v3880_v57, 0.0  ;;  %v3960_v30 = vmul.f32 0.1, %v3880_v57  ;;  %v4236_v5 = vpop.f32.mrf.mxu3 }
 0x45e   : > { %v4377_v52 = vadd.f32 %v4376_v7, %v4236_v5 }
 0x45f   : > { %v3992_v0 = vsel %vm3928_vm11, %v3880_v57, %v3960_v30  ;;  %9409 = vmatmul.msk.bf16.gmra.mxu2 %vm1091_vm1, %v4767_v55  ;;  %v4467_v62 = vld [vmem:[#allocation2 + $0xb1] sm:$0xff] }
 0x460   : > { %v4378_v39 = vpop.f32.mrf.mxu0  ;;  %4024 = vst.msk [vmem:[#allocation2 + $0xc0] sm:$0xff] %vm1091_vm1, %v3992_v0  ;;  %v4499_v41 = vmul.f32 %v14089_v21, %v4467_v62  ;;  %v11383_v4 = vld [vmem:[#allocation2 + $0xb7] sm:$0xff] }
 0x461   : > { %v4598_v29 = vpop.f32.mrf.mxu1  ;;  %v4089_v47 = vmul.f32 %v14031_v46, %v11383_v4  ;;  %v4138_v55 = vld [vmem:[#allocation2 + $0xb8] sm:$0xff] }
 0x462   : > { %v11380_v48 = vadd.f32 %v4598_v29, %v4377_v52  ;;  %v3882_v13 = vpop.f32.mrf.mxu2  ;;  %v4520_v53 = vpack.c.bf16 %v4499_v41, %v4466_v49 }
 0x463   : > { %v3883_v44 = vadd.f32 %v11127_v28, %v3882_v13 }
 0x464   : > { %9399 = vmatmul.msk.bf16.gmra.mxu1 %vm1091_vm1, %v4520_v53 }
 0x465   : > { %vm3929_vm13 = vcmp.gt.f32.partialorder %v3883_v44, 0.0  ;;  %v3961_v27 = vmul.f32 0.1, %v3883_v44  ;;  %v4238_v7 = vpop.f32.mrf.mxu3 }
 0x466   : > { %v4379_v57 = vadd.f32 %v4378_v39, %v4238_v7  ;;  %v4740_v39 = vmul.f32 %v14072_v20, %v11240_v54 }
 0x467   : > { %v3993_v30 = vsel %vm3929_vm13, %v3883_v44, %v3961_v27  ;;  %v4139_v52 = vld [vmem:[#allocation2 + $0xc0] sm:$0xff] }
 0x468   : > { %v4381_v5 = vpop.f32.mrf.mxu0  ;;  %v11388_v0 = vld [vmem:[#allocation2 + $0xbf] sm:$0xff]  ;;  %4025 = vst.msk [vmem:[#allocation2 + $0xc8] sm:$0xff] %vm1091_vm1, %v3993_v30  ;;  %v4159_v62 = vpack.c.bf16 %v4139_v52, %v4138_v55  ;;  %v4768_v7 = vpack.c.bf16 %v11253_v58, %v4740_v39  ;;  %v14090_v52 = vld [vmem:[#allocation83_spill] sm:$0xff] }
 0x469   : > { %v4110_v41 = vpack.c.bf16 %v11388_v0, %v4089_v47  ;;  %v4600_v29 = vpop.f32.mrf.mxu1  ;;  %v11408_v58 = vld [vmem:[%s13703_s6] ss:$0 sm:$0xff] }
 0x46a   : > { %v11392_v49 = vadd.f32 %v4600_v29, %v4379_v57  ;;  %v3884_v13 = vpop.f32.mrf.mxu2  ;;  %9367 = vmatmul.msk.bf16.gmra.mxu3 %vm1091_vm1, %v4159_v62 }
 0x46b   : > { %9383 = vmatmul.msk.bf16.gmra.mxu0 %vm1091_vm1, %v4110_v41  ;;  %v3885_v44 = vadd.f32 %v11127_v28, %v3884_v13  ;;  %v4468_v28 = vld [vmem:[#allocation2 + $0xb9] sm:$0xff] }
 0x46d   : > { %vm3930_vm14 = vcmp.gt.f32.partialorder %v3885_v44, 0.0  ;;  %v3962_v53 = vmul.f32 0.1, %v3885_v44  ;;  %v4241_v27 = vpop.f32.mrf.mxu3 }
 0x46e   : > { %v4382_v30 = vadd.f32 %v4381_v5, %v4241_v27 }
 0x46f   : > { %v3994_v47 = vsel %vm3930_vm14, %v3885_v44, %v3962_v53  ;;  %9410 = vmatmul.msk.bf16.gmra.mxu2 %vm1091_vm1, %v4768_v7  ;;  %v4469_v57 = vld [vmem:[#allocation2 + $0xc1] sm:$0xff] }
 0x470   : > { %v4383_v55 = vpop.f32.mrf.mxu0  ;;  %4026 = vst.msk [vmem:[#allocation2 + $0xd0] sm:$0xff] %vm1091_vm1, %v3994_v47  ;;  %v4501_v62 = vmul.f32 %v14090_v52, %v4469_v57  ;;  %v11411_v44 = vld [vmem:[#allocation2 + $0xc7] sm:$0xff] }
 0x471   : > { %v4603_v41 = vpop.f32.mrf.mxu1  ;;  %v4091_v7 = vmul.f32 %v14032_v6, %v11411_v44  ;;  %v4140_v57 = vld [vmem:[#allocation2 + $0xc8] sm:$0xff] }
 0x472   : > { %v11403_v29 = vadd.f32 %v4603_v41, %v4382_v30  ;;  %v3887_v54 = vpop.f32.mrf.mxu2  ;;  %v4521_v13 = vpack.c.bf16 %v4501_v62, %v4468_v28 }
 0x473   : > { %v3888_v5 = vadd.f32 %v11408_v58, %v3887_v54 }
 0x474   : > { %9400 = vmatmul.msk.bf16.gmra.mxu1 %vm1091_vm1, %v4521_v13 }
 0x475   : > { %vm3931_vm15 = vcmp.gt.f32.partialorder %v3888_v5, 0.0  ;;  %v3963_v39 = vmul.f32 0.1, %v3888_v5  ;;  %v4243_v53 = vpop.f32.mrf.mxu3 }
 0x476   : > { %v4384_v27 = vadd.f32 %v4383_v55, %v4243_v53 }
 0x477   : > { %v3995_v30 = vsel %vm3931_vm15, %v3888_v5, %v3963_v39  ;;  %v4141_v62 = vld [vmem:[#allocation2 + $0xd0] sm:$0xff]  ;;  %v4742_v5 = vmul.f32 %v14017_v38, %v11268_v14 }
 0x478   : > { %v4386_v47 = vpop.f32.mrf.mxu0  ;;  %v11416_v41 = vld [vmem:[#allocation2 + $0xcf] sm:$0xff]  ;;  %4027 = vst.msk [vmem:[#allocation2 + $0xd8] sm:$0xff] %vm1091_vm1, %v3995_v30  ;;  %v4160_v28 = vpack.c.bf16 %v4141_v62, %v4140_v57 }
 0x479   : > { %v4111_v54 = vpack.c.bf16 %v11416_v41, %v4091_v7  ;;  %v4605_v52 = vpop.f32.mrf.mxu1  ;;  %v4769_v30 = vpack.c.bf16 %v11274_v32, %v4742_v5 }
 0x47a   : > { %v11420_v13 = vadd.f32 %v4605_v52, %v4384_v27  ;;  %v3889_v21 = vpop.f32.mrf.mxu2  ;;  %9368 = vmatmul.msk.bf16.gmra.mxu3 %vm1091_vm1, %v4160_v28  ;;  %v14091_v27 = vld [vmem:[#allocation86_spill] sm:$0xff] }
 0x47b   : > { %9384 = vmatmul.msk.bf16.gmra.mxu0 %vm1091_vm1, %v4111_v54  ;;  %v3890_v55 = vadd.f32 %v11408_v58, %v3889_v21  ;;  %v4470_v21 = vld [vmem:[#allocation2 + $0xc9] sm:$0xff] }
 0x47d   : > { %vm3932_vm2 = vcmp.gt.f32.partialorder %v3890_v55, 0.0  ;;  %v3964_v39 = vmul.f32 0.1, %v3890_v55  ;;  %v4246_v53 = vpop.f32.mrf.mxu3 }
 0x47e   : > { %v4387_v57 = vadd.f32 %v4386_v47, %v4246_v53 }
 0x47f   : > { %v3996_v7 = vsel %vm3932_vm2, %v3890_v55, %v3964_v39  ;;  %9411 = vmatmul.msk.bf16.gmra.mxu2 %vm1091_vm1, %v4769_v30  ;;  %v4471_v52 = vld [vmem:[#allocation2 + $0xd1] sm:$0xff] }
 0x480   : > { %v4388_v62 = vpop.f32.mrf.mxu0  ;;  %4028 = vst.msk [vmem:[#allocation2 + $0xe0] sm:$0xff] %vm1091_vm1, %v3996_v7  ;;  %v4503_v28 = vmul.f32 %v14091_v27, %v4471_v52  ;;  %v11434_v17 = vld [vmem:[#allocation2 + $0xd7] sm:$0xff] }
 0x481   : > { %v4608_v54 = vpop.f32.mrf.mxu1  ;;  %v4093_v5 = vmul.f32 %v14035_v26, %v11434_v17  ;;  %v4142_v30 = vld [vmem:[#allocation2 + $0xd8] sm:$0xff] }
 0x482   : > { %v11431_v24 = vadd.f32 %v4608_v54, %v4387_v57  ;;  %v3892_v14 = vpop.f32.mrf.mxu2  ;;  %v4522_v12 = vpack.c.bf16 %v4503_v28, %v4470_v21 }
 0x483   : > { %v3893_v38 = vadd.f32 %v11408_v58, %v3892_v14 }
 0x484   : > { %9401 = vmatmul.msk.bf16.gmra.mxu1 %vm1091_vm1, %v4522_v12 }
 0x485   : > { %vm3933_vm3 = vcmp.gt.f32.partialorder %v3893_v38, 0.0  ;;  %v3965_v32 = vmul.f32 0.1, %v3893_v38  ;;  %v4248_v47 = vpop.f32.mrf.mxu3 }
 0x486   : > { %v4389_v55 = vadd.f32 %v4388_v62, %v4248_v47  ;;  %v4744_v62 = vmul.f32 %v14081_v2, %v11288_v23 }
 0x487   : > { %v3997_v39 = vsel %vm3933_vm3, %v3893_v38, %v3965_v32  ;;  %v4143_v57 = vld [vmem:[#allocation2 + $0xe0] sm:$0xff] }
 0x488   : > { %v4391_v53 = vpop.f32.mrf.mxu0  ;;  %v11439_v7 = vld [vmem:[#allocation2 + $0xdf] sm:$0xff]  ;;  %4029 = vst.msk [vmem:[#allocation2 + $0xe8] sm:$0xff] %vm1091_vm1, %v3997_v39  ;;  %v4161_v52 = vpack.c.bf16 %v4143_v57, %v4142_v30  ;;  %v4770_v47 = vpack.c.bf16 %v11293_v25, %v4744_v62 }
 0x489   : > { %v4112_v28 = vpack.c.bf16 %v11439_v7, %v4093_v5  ;;  %v4610_v54 = vpop.f32.mrf.mxu1  ;;  %v14093_v57 = vld [vmem:[#allocation88_spill] sm:$0xff] }
 0x48a   : > { %v11443_v12 = vadd.f32 %v4610_v54, %v4389_v55  ;;  %v3894_v21 = vpop.f32.mrf.mxu2  ;;  %9369 = vmatmul.msk.bf16.gmra.mxu3 %vm1091_vm1, %v4161_v52  ;;  %v11457_v54 = vld [vmem:[#allocation2 + $0xd9] sm:$0xff] }
 0x48b   : > { %9385 = vmatmul.msk.bf16.gmra.mxu0 %vm1091_vm1, %v4112_v28  ;;  %v3895_v38 = vadd.f32 %v11408_v58, %v3894_v21  ;;  %14094 = vst [vmem:[#allocation35_spill] sm:$0xff] %v11457_v54 }
 0x48d   : > { %vm3934_vm4 = vcmp.gt.f32.partialorder %v3895_v38, 0.0  ;;  %v3966_v14 = vmul.f32 0.1, %v3895_v38  ;;  %v4251_v32 = vpop.f32.mrf.mxu3 }
 0x48e   : > { %v4392_v39 = vadd.f32 %v4391_v53, %v4251_v32 }
 0x48f   : > { %v3998_v5 = vsel %vm3934_vm4, %v3895_v38, %v3966_v14  ;;  %9412 = vmatmul.msk.bf16.gmra.mxu2 %vm1091_vm1, %v4770_v47  ;;  %v11452_v55 = vld [vmem:[#allocation2 + $0xe1] sm:$0xff] }
 0x490   : > { %v4393_v30 = vpop.f32.mrf.mxu0  ;;  %14092 = vst [vmem:[#allocation40_spill] sm:$0xff] %v11452_v55  ;;  %v4505_v52 = vmul.f32 %v14093_v57, %v11452_v55  ;;  %v11463_v38 = vld [vmem:[#allocation2 + $0xe7] sm:$0xff] }
 0x491   : > { %4030 = vst.msk [vmem:[#allocation2 + $0xf0] sm:$0xff] %vm1091_vm1, %v3998_v5  ;;  %v4613_v28 = vpop.f32.mrf.mxu1  ;;  %v4095_v47 = vmul.f32 %v14040_v40, %v11463_v38 }
 0x492   : > { %v11459_v23 = vadd.f32 %v4613_v28, %v4392_v39  ;;  %v3897_v21 = vpop.f32.mrf.mxu2  ;;  %v4523_v25 = vpack.c.bf16 %v4505_v52, %v11457_v54  ;;  %v4144_v39 = vld [vmem:[#allocation2 + $0xe8] sm:$0xff] }
 0x493   : > { %v3898_v53 = vadd.f32 %v11408_v58, %v3897_v21 }
 0x494   : > { %9402 = vmatmul.msk.bf16.gmra.mxu1 %vm1091_vm1, %v4523_v25  ;;  %v9473_v25 = vld [vmem:[%s13704_s7 + $0x1c] sm:$0xf] }
 0x495   : > { %vm3935_vm5 = vcmp.gt.f32.partialorder %v3898_v53, 0.0  ;;  %v3967_v62 = vmul.f32 0.1, %v3898_v53  ;;  %v4253_v14 = vpop.f32.mrf.mxu3 }
 0x496   : > { %v4394_v32 = vadd.f32 %v4393_v30, %v4253_v14  ;;  %v5783_v30 = vsel %vm1263_vm0, %v9473_v25, 0 }
 0x497   : > { %v3999_v5 = vsel %vm3935_vm5, %v3898_v53, %v3967_v62  ;;  %5792 = vmatpush.bf16.msrb.mxu2 %v5783_v30 }
 0x498   : > { %v4396_v57 = vpop.f32.mrf.mxu0  ;;  %v4145_v28 = vld [vmem:[#allocation2 + $0xf0] sm:$0xff]  ;;  %4031 = vst.msk [vmem:[#allocation2 + $0xf8] sm:$0xff] %vm1091_vm1, %v3999_v5  ;;  %v4746_v5 = vmul.f32 %v14083_v56, %v11311_v19 }
 0x499   : > { %v11468_v27 = vld [vmem:[#allocation2 + $0xef] sm:$0xff]  ;;  %v4162_v52 = vpack.c.bf16 %v4145_v28, %v4144_v39  ;;  %v4615_v54 = vpop.f32.mrf.mxu1 }
 0x49a   : > { %v4113_v21 = vpack.c.bf16 %v11468_v27, %v4095_v47  ;;  %v11476_v14 = vadd.f32 %v4615_v54, %v4394_v32  ;;  %v3899_v53 = vpop.f32.mrf.mxu2  ;;  %v9490_v47 = vld [vmem:[%s13704_s7 + $0x20] sm:$0xf]  ;;  %v9456_v54 = vld [vmem:[%s13704_s7 + $0x18] sm:$0xf]  ;;  %v11498_v56 = vld [vmem:[#allocation2 + $0xe9] sm:$0xff] }
 0x49b   : > { %9370 = vmatmul.msk.bf16.gmra.mxu3 %vm1091_vm1, %v4162_v52  ;;  %v3900_v62 = vadd.f32 %v11408_v58, %v3899_v53  ;;  %v6037_v32 = vsel %vm1263_vm0, %v9490_v47, 0  ;;  %v5561_v39 = vsel %vm1263_vm0, %v9456_v54, 0  ;;  %v14096_v47 = vld [vmem:[#allocation60_spill] sm:$0xff]  ;;  %14097 = vst [vmem:[#allocation45_spill] sm:$0xff] %v11498_v56 }
 0x49c   : > { %9386 = vmatmul.msk.bf16.gmra.mxu0 %vm1091_vm1, %v4113_v21  ;;  %v4771_v21 = vpack.c.bf16 %v11316_v45, %v4746_v5  ;;  %6046 = vmatpush.bf16.msrb.mxu3 %v6037_v32 }
 0x49d   : > { %vm3936_vm6 = vcmp.gt.f32.partialorder %v3900_v62, 0.0  ;;  %v3968_v28 = vmul.f32 0.1, %v3900_v62  ;;  %v4256_v52 = vpop.f32.mrf.mxu3  ;;  %5570 = vmatpush.bf16.msra.mxu1 %v5561_v39 }
 0x49e   : > { %v4397_v19 = vadd.f32 %v4396_v57, %v4256_v52 }
 0x49f   : > { %v4000_v25 = vsel %vm3936_vm6, %v3900_v62, %v3968_v28  ;;  %9413 = vmatmul.msk.bf16.gmra.mxu2 %vm1091_vm1, %v4771_v21  ;;  %v11493_v53 = vld [vmem:[#allocation2 + $0xf1] sm:$0xff] }
 0x4a0   : > { %v4398_v30 = vpop.f32.mrf.mxu0  ;;  %14095 = vst [vmem:[#allocation37_spill] sm:$0xff] %v11493_v53  ;;  %v4507_v55 = vmul.f32 %v14096_v47, %v11493_v53  ;;  %v11504_v62 = vld [vmem:[#allocation2 + $0xf7] sm:$0xff] }
 0x4a1   : > { %4032 = vst.msk [vmem:[#allocation2 + $0x100] sm:$0xff] %vm1091_vm1, %v4000_v25  ;;  %v4618_v54 = vpop.f32.mrf.mxu1  ;;  %v4097_v52 = vmul.f32 %v14048_v10, %v11504_v62 }
 0x4a2   : > { %v11500_v2 = vadd.f32 %v4618_v54, %v4397_v19  ;;  %v3902_v45 = vpop.f32.mrf.mxu2  ;;  %v4524_v5 = vpack.c.bf16 %v4507_v55, %v11498_v56  ;;  %v4146_v19 = vld [vmem:[#allocation2 + $0xf8] sm:$0xff] }
 0x4a3   : > { %v3903_v57 = vadd.f32 %v11408_v58, %v3902_v45 }
 0x4a4   : > { %9403 = vmatmul.msk.bf16.gmra.mxu1 %vm1091_vm1, %v4524_v5 }
 0x4a5   : > { %vm3937_vm7 = vcmp.gt.f32.partialorder %v3903_v57, 0.0  ;;  %v3969_v32 = vmul.f32 0.1, %v3903_v57  ;;  %v4258_v39 = vpop.f32.mrf.mxu3 }
 0x4a6   : > { %v4399_v28 = vadd.f32 %v4398_v30, %v4258_v39 }
 0x4a7   : > { %v4001_v21 = vsel %vm3937_vm7, %v3903_v57, %v3969_v32  ;;  %v4748_v57 = vmul.f32 %v14085_v43, %v11335_v11  ;;  %v5177_v11 = vld [vmem:[#allocation2 + $0x21] sm:$0xff] }
 0x4a8   : > { %v4401_v25 = vpop.f32.mrf.mxu0  ;;  %v4147_v54 = vld [vmem:[#allocation2 + $0x100] sm:$0xff]  ;;  %4033 = vst.msk [vmem:[#allocation2 + $0x108] sm:$0xff] %vm1091_vm1, %v4001_v21 }
 0x4a9   : > { %v11509_v47 = vld [vmem:[#allocation2 + $0xff] sm:$0xff]  ;;  %v4163_v55 = vpack.c.bf16 %v4147_v54, %v4146_v19  ;;  %v4620_v56 = vpop.f32.mrf.mxu1  ;;  %v4772_v21 = vpack.c.bf16 %v11342_v9, %v4748_v57 }
 0x4aa   : > { %v4114_v45 = vpack.c.bf16 %v11509_v47, %v4097_v52  ;;  %v11513_v5 = vadd.f32 %v4620_v56, %v4399_v28  ;;  %v3904_v53 = vpop.f32.mrf.mxu2  ;;  %v11527_v28 = vld [vmem:[#allocation2 + $0xf9] sm:$0xff] }
 0x4ab   : > { %9371 = vmatmul.msk.bf16.gmra.mxu3 %vm1091_vm1, %v4163_v55  ;;  %v3905_v30 = vadd.f32 %v11408_v58, %v3904_v53  ;;  %14099 = vst [vmem:[#allocation41_spill] sm:$0xff] %v11527_v28 }
 0x4ac   : > { %9387 = vmatmul.msk.bf16.gmra.mxu0 %vm1091_vm1, %v4114_v45 }
 0x4ad   : > { %vm3938_vm8 = vcmp.gt.f32.partialorder %v3905_v30, 0.0  ;;  %v3970_v32 = vmul.f32 0.1, %v3905_v30  ;;  %v4261_v39 = vpop.f32.mrf.mxu3 }
 0x4ae   : > { %v4402_v19 = vadd.f32 %v4401_v25, %v4261_v39 }
 0x4af   : > { %v4002_v52 = vsel %vm3938_vm8, %v3905_v30, %v3970_v32  ;;  %9414 = vmatmul.msk.bf16.gmra.mxu2 %vm1091_vm1, %v4772_v21  ;;  %v11522_v56 = vld [vmem:[#allocation2 + $0x101] sm:$0xff]  ;;  %v5209_v30 = vmul.f32 %v14059_v37, %v5177_v11  ;;  %v4369_v21 = vadd.f32 %v11326_v15, %v11338_v1  ;;  %v4750_v15 = vmul.f32 %v14087_v18, %v11360_v36 }
 0x4b0   : > { %v4403_v54 = vpop.f32.mrf.mxu0  ;;  %14098 = vst [vmem:[#allocation39_spill] sm:$0xff] %v11522_v56  ;;  %v4509_v58 = vmul.f32 %v14042_v16, %v11522_v56  ;;  %v4955_v32 = vld [vmem:[#allocation2 + $0x20] sm:$0xff]  ;;  %v4954_v16 = vld [vmem:[#allocation2 + $0x18] sm:$0xff] }
 0x4b1   : > { %4034 = vst.msk [vmem:[#allocation2 + $0x110] sm:$0xff] %vm1091_vm1, %v4002_v52  ;;  %v4623_v53 = vpop.f32.mrf.mxu1 }
 0x4b2   : > { %v11529_v55 = vadd.f32 %v4623_v53, %v4402_v19  ;;  %v4842_v45 = vpop.f32.mrf.mxu2  ;;  %v4525_v9 = vpack.c.bf16 %v4509_v58, %v11527_v28  ;;  %v5176_v19 = vld [vmem:[#allocation2 + $0x19] sm:$0xff]  ;;  %v4986_v53 = vpack.c.bf16 %v4955_v32, %v4954_v16  ;;  %v4669_v58 = vadd.f32 %v11346_v8, %v4369_v21  ;;  %v5430_v16 = vld [vmem:[#allocation2 + $0x27] sm:$0xff]  ;;  %v5431_v8 = vld [vmem:[#allocation2 + $0x2f] sm:$0xff] }
 0x4b3   : > { %v11533_v25 = vadd.f32 %v4842_v45, %v11332_v35  ;;  %v5240_v56 = vpack.c.bf16 %v5209_v30, %v5176_v19  ;;  %v11551_v32 = vld [vmem:[#allocation2 + $0x31] sm:$0xff] }
 0x4b4   : > { %9404 = vmatmul.msk.bf16.gmra.mxu1 %vm1091_vm1, %v4525_v9  ;;  %14100 = vst [vmem:[#allocation52_spill] sm:$0xff] %v11551_v32  ;;  %v4957_v19 = vld [vmem:[#allocation2 + $0x30] sm:$0xff] }
 0x4b5   : > { %v4263_v57 = vpop.f32.mrf.mxu3 }
 0x4b6   : > { %v4404_v39 = vadd.f32 %v4403_v54, %v4263_v57  ;;  %v4773_v54 = vpack.c.bf16 %v11365_v59, %v4750_v15  ;;  %v5211_v59 = vmul.f32 %v14063_v34, %v11551_v32  ;;  %v11561_v15 = vld [vmem:[#allocation2 + $0x29] sm:$0xff] }
 0x4b7   : > { %14101 = vst [vmem:[#allocation44_spill] sm:$0xff] %v11561_v15 }
 0x4b8   : > { %v4406_v52 = vpop.f32.mrf.mxu0 }
 0x4b9   : > { %v4625_v28 = vpop.f32.mrf.mxu1 }
 0x4ba   : > { %v11540_v35 = vadd.f32 %v4625_v28, %v4404_v39  ;;  %v4844_v45 = vpop.f32.mrf.mxu2  ;;  %v5462_v28 = vmul.f32 %v13994_v63, %v5430_v16  ;;  %v11607_v63 = vld [vmem:[#allocation2 + $0x51] sm:$0xff] }
 0x4bb   : > { %9423 = vmatmul.msk.bf16.vlgmr.msra.gmra.mxu3 %vm1091_vm1, %v4986_v53  ;;  %v11544_v11 = vadd.f32 %v4844_v45, %v4669_v58  ;;  %v4956_v45 = vld [vmem:[#allocation2 + $0x28] sm:$0xff]  ;;  %14104 = vst [vmem:[#allocation49_spill] sm:$0xff] %v11607_v63 }
 0x4bc   : > { %9440 = vmatmul.msk.bf16.vlgmr.msra.gmra.mxu0 %vm1091_vm1, %v5240_v56  ;;  %v5494_v21 = vpack.c.bf16 %v5431_v8, %v5462_v28 }
 0x4bd   : > { %v4266_v1 = vpop.f32.mrf.mxu3 }
 0x4be   : > { %v4407_v9 = vadd.f32 %v4406_v52, %v4266_v1  ;;  %v11563_v1 = vpack.c.bf16 %v4957_v19, %v4956_v45  ;;  %v11579_v45 = vld [vmem:[#allocation2 + $0x41] sm:$0xff] }
 0x4bf   : > { %9415 = vmatmul.msk.bf16.gmra.mxu2 %vm1091_vm1, %v4773_v54  ;;  %v5241_v54 = vpack.c.bf16 %v5211_v59, %v11561_v15  ;;  %14102 = vst [vmem:[#allocation46_spill] sm:$0xff] %v11579_v45 }
 0x4c0   : > { %v4408_v30 = vpop.f32.mrf.mxu0 }
 0x4c1   : > { %v4628_v57 = vpop.f32.mrf.mxu1 }
 0x4c2   : > { %v11553_v56 = vadd.f32 %v4628_v57, %v4407_v9  ;;  %v4847_v39 = vpop.f32.mrf.mxu2 }
 0x4c3   : > { %v11556_v36 = vadd.f32 %v4847_v39, %v11357_v51  ;;  %v5432_v39 = vld [vmem:[#allocation2 + $0x37] sm:$0xff] }
 0x4c4   : > { %9457 = vmatmul.msk.bf16.vlgmr.msra.gmra.mxu1 %vm1091_vm1, %v5494_v21  ;;  %v5464_v19 = vmul.f32 %v14060_v31, %v5432_v39  ;;  %v11589_v39 = vld [vmem:[#allocation2 + $0x39] sm:$0xff] }
 0x4c5   : > { %v4268_v52 = vpop.f32.mrf.mxu3  ;;  %14103 = vst [vmem:[#allocation61_spill] sm:$0xff] %v11589_v39 }
 0x4c6   : > { %v4409_v53 = vadd.f32 %v4408_v30, %v4268_v52  ;;  %v4752_v30 = vmul.f32 %v14030_v22, %v11383_v4  ;;  %v5433_v52 = vld [vmem:[#allocation2 + $0x3f] sm:$0xff] }
 0x4c8   : > { %v4411_v58 = vpop.f32.mrf.mxu0  ;;  %v4774_v57 = vpack.c.bf16 %v11388_v0, %v4752_v30  ;;  %v5213_v0 = vmul.f32 %v14067_v33, %v11579_v45 }
 0x4c9   : > { %v4630_v16 = vpop.f32.mrf.mxu1 }
 0x4ca   : > { %v11566_v9 = vadd.f32 %v4630_v16, %v4409_v53  ;;  %v4849_v51 = vpop.f32.mrf.mxu2  ;;  %v5495_v16 = vpack.c.bf16 %v5433_v52, %v5464_v19 }
 0x4cb   : > { %9424 = vmatmul.msk.bf16.gmra.mxu3 %vm1091_vm1, %v11563_v1  ;;  %v11572_v8 = vadd.f32 %v4849_v51, %v11369_v42  ;;  %v4959_v51 = vld [vmem:[#allocation2 + $0x40] sm:$0xff] }
 0x4cc   : > { %9441 = vmatmul.msk.bf16.gmra.mxu0 %vm1091_vm1, %v5241_v54 }
 0x4cd   : > { %v4271_v28 = vpop.f32.mrf.mxu3 }
 0x4ce   : > { %v4412_v21 = vadd.f32 %v4411_v58, %v4271_v28 }
 0x4cf   : > { %9416 = vmatmul.msk.bf16.gmra.mxu2 %vm1091_vm1, %v4774_v57  ;;  %v4958_v57 = vld [vmem:[#allocation2 + $0x38] sm:$0xff] }
 0x4d0   : > { %v4413_v59 = vpop.f32.mrf.mxu0  ;;  %v11591_v31 = vpack.c.bf16 %v4959_v51, %v4958_v57 }
 0x4d1   : > { %v4633_v53 = vpop.f32.mrf.mxu1 }
 0x4d2   : > { %v11581_v54 = vadd.f32 %v4633_v53, %v4412_v21  ;;  %v4852_v42 = vpop.f32.mrf.mxu2  ;;  %v5242_v21 = vpack.c.bf16 %v5213_v0, %v11589_v39 }
 0x4d3   : > { %v11584_v4 = vadd.f32 %v4852_v42, %v11380_v48 }
 0x4d4   : > { %9458 = vmatmul.msk.bf16.gmra.mxu1 %vm1091_vm1, %v5495_v16 }
 0x4d5   : > { %v4273_v58 = vpop.f32.mrf.mxu3 }
 0x4d6   : > { %v4414_v30 = vadd.f32 %v4413_v59, %v4273_v58  ;;  %v4754_v59 = vmul.f32 %v14031_v46, %v11411_v44  ;;  %v5434_v58 = vld [vmem:[#allocation2 + $0x47] sm:$0xff] }
 0x4d7   : > { %v5466_v57 = vmul.f32 %v14064_v50, %v5434_v58  ;;  %v4960_v58 = vld [vmem:[#allocation2 + $0x48] sm:$0xff] }
 0x4d8   : > { %v4416_v28 = vpop.f32.mrf.mxu0  ;;  %v4775_v16 = vpack.c.bf16 %v11416_v41, %v4754_v59  ;;  %v5215_v41 = vmul.f32 %v14071_v3, %v11607_v63  ;;  %v4961_v59 = vld [vmem:[#allocation2 + $0x50] sm:$0xff]  ;;  %v11635_v3 = vld [vmem:[#allocation2 + $0x61] sm:$0xff] }
 0x4d9   : > { %v4635_v52 = vpop.f32.mrf.mxu1  ;;  %v11617_v50 = vld [vmem:[#allocation2 + $0x49] sm:$0xff]  ;;  %v11619_v33 = vpack.c.bf16 %v4961_v59, %v4960_v58  ;;  %14106 = vst [vmem:[#allocation69_spill] sm:$0xff] %v11635_v3 }
 0x4da   : > { %v11594_v19 = vadd.f32 %v4635_v52, %v4414_v30  ;;  %v4854_v48 = vpop.f32.mrf.mxu2  ;;  %v5435_v30 = vld [vmem:[#allocation2 + $0x4f] sm:$0xff]  ;;  %14105 = vst [vmem:[#allocation51_spill] sm:$0xff] %v11617_v50 }
 0x4db   : > { %9425 = vmatmul.msk.bf16.gmra.mxu3 %vm1091_vm1, %v11591_v31  ;;  %v11600_v53 = vadd.f32 %v4854_v48, %v11392_v49  ;;  %v5496_v48 = vpack.c.bf16 %v5435_v30, %v5466_v57 }
 0x4dc   : > { %9442 = vmatmul.msk.bf16.gmra.mxu0 %vm1091_vm1, %v5242_v21 }
 0x4dd   : > { %v4276_v42 = vpop.f32.mrf.mxu3 }
 0x4de   : > { %v4417_v0 = vadd.f32 %v4416_v28, %v4276_v42 }
 0x4df   : > { %9417 = vmatmul.msk.bf16.gmra.mxu2 %vm1091_vm1, %v4775_v16 }
 0x4e0   : > { %v4418_v51 = vpop.f32.mrf.mxu0 }
 0x4e1   : > { %v4638_v52 = vpop.f32.mrf.mxu1 }
 0x4e2   : > { %v11609_v21 = vadd.f32 %v4638_v52, %v4417_v0  ;;  %v4857_v49 = vpop.f32.mrf.mxu2  ;;  %v5243_v0 = vpack.c.bf16 %v5215_v41, %v11617_v50 }
 0x4e3   : > { %v11612_v44 = vadd.f32 %v4857_v49, %v11403_v29 }
 0x4e4   : > { %9459 = vmatmul.msk.bf16.gmra.mxu1 %vm1091_vm1, %v5496_v48 }
 0x4e5   : > { %v4278_v28 = vpop.f32.mrf.mxu3 }
 0x4e6   : > { %v4419_v42 = vadd.f32 %v4418_v51, %v4278_v28  ;;  %v4756_v51 = vmul.f32 %v14032_v6, %v11434_v17  ;;  %v5436_v28 = vld [vmem:[#allocation2 + $0x57] sm:$0xff] }
 0x4e7   : > { %v5468_v58 = vmul.f32 %v14068_v61, %v5436_v28  ;;  %v4962_v28 = vld [vmem:[#allocation2 + $0x58] sm:$0xff] }
 0x4e8   : > { %v4421_v16 = vpop.f32.mrf.mxu0  ;;  %v4776_v48 = vpack.c.bf16 %v11439_v7, %v4756_v51  ;;  %v11645_v61 = vld [vmem:[#allocation2 + $0x59] sm:$0xff] }
 0x4e9   : > { %v4640_v30 = vpop.f32.mrf.mxu1  ;;  %14107 = vst [vmem:[#allocation55_spill] sm:$0xff] %v11645_v61 }
 0x4ea   : > { %v11622_v57 = vadd.f32 %v4640_v30, %v4419_v42  ;;  %v4859_v29 = vpop.f32.mrf.mxu2  ;;  %v5437_v42 = vld [vmem:[#allocation2 + $0x5f] sm:$0xff] }
 0x4eb   : > { %9426 = vmatmul.msk.bf16.gmra.mxu3 %vm1091_vm1, %v11619_v33  ;;  %v11628_v52 = vadd.f32 %v4859_v29, %v11420_v13  ;;  %v5497_v29 = vpack.c.bf16 %v5437_v42, %v5468_v58 }
 0x4ec   : > { %9443 = vmatmul.msk.bf16.gmra.mxu0 %vm1091_vm1, %v5243_v0 }
 0x4ed   : > { %v4281_v49 = vpop.f32.mrf.mxu3 }
 0x4ee   : > { %v4422_v41 = vadd.f32 %v4421_v16, %v4281_v49  ;;  %v5217_v16 = vmul.f32 %v14075_v60, %v11635_v3  ;;  %v4963_v49 = vld [vmem:[#allocation2 + $0x60] sm:$0xff]  ;;  %v11663_v60 = vld [vmem:[#allocation2 + $0x71] sm:$0xff] }
 0x4ef   : > { %9418 = vmatmul.msk.bf16.gmra.mxu2 %vm1091_vm1, %v4776_v48  ;;  %v11647_v39 = vpack.c.bf16 %v4963_v49, %v4962_v28  ;;  %14108 = vst [vmem:[#allocation58_spill] sm:$0xff] %v11663_v60 }
 0x4f0   : > { %v4423_v59 = vpop.f32.mrf.mxu0 }
 0x4f1   : > { %v4643_v30 = vpop.f32.mrf.mxu1 }
 0x4f2   : > { %v11637_v0 = vadd.f32 %v4643_v30, %v4422_v41  ;;  %v4862_v13 = vpop.f32.mrf.mxu2  ;;  %v5244_v41 = vpack.c.bf16 %v5217_v16, %v11645_v61 }
 0x4f3   : > { %v11640_v50 = vadd.f32 %v4862_v13, %v11431_v24 }
 0x4f4   : > { %9460 = vmatmul.msk.bf16.gmra.mxu1 %vm1091_vm1, %v5497_v29 }
 0x4f5   : > { %v4283_v51 = vpop.f32.mrf.mxu3 }
 0x4f6   : > { %v4424_v48 = vadd.f32 %v4423_v59, %v4283_v51  ;;  %v4758_v59 = vmul.f32 %v14035_v26, %v11463_v38  ;;  %v5438_v51 = vld [vmem:[#allocation2 + $0x67] sm:$0xff] }
 0x4f7   : > { %v5470_v28 = vmul.f32 %v14072_v20, %v5438_v51  ;;  %v4964_v51 = vld [vmem:[#allocation2 + $0x68] sm:$0xff] }
 0x4f8   : > { %v4426_v63 = vpop.f32.mrf.mxu0  ;;  %v4777_v29 = vpack.c.bf16 %v11468_v27, %v4758_v59  ;;  %v11673_v20 = vld [vmem:[#allocation2 + $0x69] sm:$0xff] }
 0x4f9   : > { %v4645_v42 = vpop.f32.mrf.mxu1  ;;  %14110 = vst [vmem:[#allocation63_spill] sm:$0xff] %v11673_v20 }
 0x4fa   : > { %v11650_v58 = vadd.f32 %v4645_v42, %v4424_v48  ;;  %v4864_v24 = vpop.f32.mrf.mxu2  ;;  %v5439_v48 = vld [vmem:[#allocation2 + $0x6f] sm:$0xff] }
 0x4fb   : > { %9427 = vmatmul.msk.bf16.gmra.mxu3 %vm1091_vm1, %v11647_v39  ;;  %v11656_v30 = vadd.f32 %v4864_v24, %v11443_v12  ;;  %v5498_v24 = vpack.c.bf16 %v5439_v48, %v5470_v28 }
 0x4fc   : > { %9444 = vmatmul.msk.bf16.gmra.mxu0 %vm1091_vm1, %v5244_v41 }
 0x4fd   : > { %v4286_v13 = vpop.f32.mrf.mxu3 }
 0x4fe   : > { %v4427_v16 = vadd.f32 %v4426_v63, %v4286_v13  ;;  %v14109_v63 = vld [vmem:[#allocation53_spill] sm:$0xff] }
 0x4ff   : > { %9419 = vmatmul.msk.bf16.gmra.mxu2 %vm1091_vm1, %v4777_v29  ;;  %v5219_v59 = vmul.f32 %v14109_v63, %v11663_v60  ;;  %v4965_v29 = vld [vmem:[#allocation2 + $0x70] sm:$0xff] }
 0x500   : > { %v4428_v49 = vpop.f32.mrf.mxu0  ;;  %v11675_v45 = vpack.c.bf16 %v4965_v29, %v4964_v51  ;;  %v14111_v51 = vld [vmem:[#allocation8_spill] sm:$0xff] }
 0x501   : > { %v4648_v42 = vpop.f32.mrf.mxu1 }
 0x502   : > { %v11665_v41 = vadd.f32 %v4648_v42, %v4427_v16  ;;  %v4867_v12 = vpop.f32.mrf.mxu2  ;;  %v5245_v16 = vpack.c.bf16 %v5219_v59, %v11673_v20  ;;  %v11691_v20 = vld [vmem:[#allocation2 + $0x81] sm:$0xff] }
 0x503   : > { %v11668_v61 = vadd.f32 %v4867_v12, %v11459_v23  ;;  %14112 = vst [vmem:[#allocation65_spill] sm:$0xff] %v11691_v20 }
 0x504   : > { %9461 = vmatmul.msk.bf16.gmra.mxu1 %vm1091_vm1, %v5498_v24 }
 0x505   : > { %v4288_v13 = vpop.f32.mrf.mxu3 }
 0x506   : > { %v4429_v3 = vadd.f32 %v4428_v49, %v4288_v13  ;;  %v4760_v49 = vmul.f32 %v14040_v40, %v11504_v62  ;;  %v5440_v13 = vld [vmem:[#allocation2 + $0x77] sm:$0xff] }
 0x508   : > { %v4431_v34 = vpop.f32.mrf.mxu0  ;;  %v4778_v24 = vpack.c.bf16 %v11509_v47, %v4760_v49 }
 0x509   : > { %v4650_v48 = vpop.f32.mrf.mxu1 }
 0x50a   : > { %v11678_v28 = vadd.f32 %v4650_v48, %v4429_v3  ;;  %v4869_v23 = vpop.f32.mrf.mxu2  ;;  %v5441_v3 = vld [vmem:[#allocation2 + $0x7f] sm:$0xff]  ;;  %v5472_v48 = vmul.f32 %v14111_v51, %v5440_v13 }
 0x50b   : > { %9428 = vmatmul.msk.bf16.gmra.mxu3 %vm1091_vm1, %v11675_v45  ;;  %v11684_v42 = vadd.f32 %v4869_v23, %v11476_v14  ;;  %v4966_v13 = vld [vmem:[#allocation2 + $0x78] sm:$0xff] }
 0x50c   : > { %9445 = vmatmul.msk.bf16.gmra.mxu0 %vm1091_vm1, %v5245_v16  ;;  %v5499_v23 = vpack.c.bf16 %v5441_v3, %v5472_v48  ;;  %v11701_v51 = vld [vmem:[#allocation2 + $0x79] sm:$0xff] }
 0x50d   : > { %v4291_v12 = vpop.f32.mrf.mxu3  ;;  %14114 = vst [vmem:[#allocation68_spill] sm:$0xff] %v11701_v51 }
 0x50e   : > { %v4432_v59 = vadd.f32 %v4431_v34, %v4291_v12  ;;  %v14113_v34 = vld [vmem:[#allocation59_spill] sm:$0xff] }
 0x50f   : > { %9420 = vmatmul.msk.bf16.gmra.mxu2 %vm1091_vm1, %v4778_v24  ;;  %v5221_v49 = vmul.f32 %v14113_v34, %v11691_v20  ;;  %v4967_v24 = vld [vmem:[#allocation2 + $0x80] sm:$0xff]  ;;  %v11723_v20 = vld [vmem:[#allocation2 + $0x91] sm:$0xff] }
 0x510   : > { %v4433_v29 = vpop.f32.mrf.mxu0  ;;  %v11703_v32 = vpack.c.bf16 %v4967_v24, %v4966_v13  ;;  %v5442_v24 = vld [vmem:[#allocation2 + $0x87] sm:$0xff]  ;;  %14119 = vst [vmem:[#allocation54_spill] sm:$0xff] %v11723_v20 }
 0x511   : > { %v4653_v63 = vpop.f32.mrf.mxu1  ;;  %v14118_v34 = vld [vmem:[#allocation9_spill] sm:$0xff] }
 0x512   : > { %v11693_v16 = vadd.f32 %v4653_v63, %v4432_v59  ;;  %v4872_v14 = vpop.f32.mrf.mxu2  ;;  %v5246_v63 = vpack.c.bf16 %v5221_v49, %v11701_v51  ;;  %v11706_v59 = vld [vmem:[#allocation2 + $0x107] sm:$0xff]  ;;  %v5474_v51 = vmul.f32 %v14118_v34, %v5442_v24 }
 0x513   : > { %v11696_v60 = vadd.f32 %v4872_v14, %v11500_v2  ;;  %14115 = vst [vmem:[#allocation72_spill] sm:$0xff] %v11706_v59  ;;  %v4968_v24 = vld [vmem:[#allocation2 + $0x88] sm:$0xff] }
 0x514   : > { %9462 = vmatmul.msk.bf16.gmra.mxu1 %vm1091_vm1, %v5499_v23  ;;  %v4762_v23 = vmul.f32 %v14048_v10, %v11706_v59  ;;  %v11733_v34 = vld [vmem:[#allocation2 + $0x89] sm:$0xff] }
 0x515   : > { %v4293_v12 = vpop.f32.mrf.mxu3  ;;  %14122 = vst [vmem:[#allocation25_spill] sm:$0xff] %v11733_v34 }
 0x516   : > { %v4434_v15 = vadd.f32 %v4433_v29, %v4293_v12  ;;  %v11713_v29 = vld [vmem:[#allocation2 + $0x10f] sm:$0xff] }
 0x517   : > { %14116 = vst [vmem:[#allocation78_spill] sm:$0xff] %v11713_v29  ;;  %v4779_v12 = vpack.c.bf16 %v11713_v29, %v4762_v23 }
 0x519   : > { %v4436_v37 = vpop.f32.mrf.mxu0  ;;  %v4655_v2 = vpop.f32.mrf.mxu1 }
 0x51a   : > { %v11708_v3 = vadd.f32 %v4655_v2, %v4434_v15  ;;  %v4874_v48 = vpop.f32.mrf.mxu2  ;;  %v5443_v2 = vld [vmem:[#allocation2 + $0x8f] sm:$0xff] }
 0x51b   : > { %9429 = vmatmul.msk.bf16.gmra.mxu3 %vm1091_vm1, %v11703_v32  ;;  %v11716_v14 = vadd.f32 %v4874_v48, %v11513_v5  ;;  %v5500_v48 = vpack.c.bf16 %v5443_v2, %v5474_v51 }
 0x51c   : > { %9446 = vmatmul.msk.bf16.gmra.mxu0 %vm1091_vm1, %v5246_v63 }
 0x51d   : > { %14117 = vst [vmem:[#allocation20_spill] sm:$0xff] %v11716_v14 }
 0x51e   : > { %v4296_v49 = vpop.f32.mrf.mxu3 }
 0x51f   : > { %v4437_v15 = vadd.f32 %v4436_v37, %v4296_v49  ;;  %9421 = vmatmul.msk.bf16.gmra.mxu2 %vm1091_vm1, %v4779_v12  ;;  %v14121_v37 = vld [vmem:[#allocation67_spill] sm:$0xff] }
 0x520   : > { %v5223_v23 = vmul.f32 %v14121_v37, %v11723_v20  ;;  %v4969_v12 = vld [vmem:[#allocation2 + $0x90] sm:$0xff]  ;;  %v11752_v37 = vld [vmem:[#allocation2 + $0xa1] sm:$0xff] }
 0x521   : > { %v4438_v13 = vpop.f32.mrf.mxu0  ;;  %v4658_v63 = vpop.f32.mrf.mxu1  ;;  %v11735_v59 = vpack.c.bf16 %v4969_v12, %v4968_v24  ;;  %v14124_v12 = vld [vmem:[#allocation10_spill] sm:$0xff]  ;;  %v4971_v20 = vld [vmem:[#allocation2 + $0xa0] sm:$0xff] }
 0x522   : > { %v11725_v40 = vadd.f32 %v4658_v63, %v4437_v15  ;;  %v4877_v5 = vpop.f32.mrf.mxu2  ;;  %v5247_v15 = vpack.c.bf16 %v5223_v23, %v11733_v34  ;;  %v5445_v23 = vld [vmem:[#allocation2 + $0x9f] sm:$0xff] }
 0x523   : > { %v11728_v10 = vadd.f32 %v4877_v5, %v11529_v55  ;;  %v5444_v5 = vld [vmem:[#allocation2 + $0x97] sm:$0xff] }
 0x524   : > { %9463 = vmatmul.msk.bf16.gmra.mxu1 %vm1091_vm1, %v5500_v48  ;;  %v5476_v24 = vmul.f32 %v14124_v12, %v5444_v5  ;;  %v4970_v12 = vld [vmem:[#allocation2 + $0x98] sm:$0xff] }
 0x525   : > { %14120 = vst [vmem:[#allocation22_spill] sm:$0xff] %v11728_v10  ;;  %v11762_v10 = vld [vmem:[#allocation2 + $0x99] sm:$0xff] }
 0x526   : > { %v4298_v49 = vpop.f32.mrf.mxu3  ;;  %14126 = vst [vmem:[#allocation62_spill] sm:$0xff] %v11762_v10 }
 0x527   : > { %v4439_v14 = vadd.f32 %v4438_v13, %v4298_v49 }
 0x529   : > { %v4441_v29 = vpop.f32.mrf.mxu0  ;;  %v4660_v51 = vpop.f32.mrf.mxu1 }
 0x52a   : > { %v11738_v2 = vadd.f32 %v4660_v51, %v4439_v14  ;;  %v4879_v55 = vpop.f32.mrf.mxu2  ;;  %v9701_v14 = vld [vmem:[%s13706_s9] sm:$0xff] }
 0x52b   : > { %9430 = vmatmul.msk.bf16.gmra.mxu3 %vm1091_vm1, %v11735_v59  ;;  %v11744_v63 = vadd.f32 %v4879_v55, %v11540_v35  ;;  %6375 = vmatpush.bf16.msrb.mxu0 %v9701_v14  ;;  %v5501_v55 = vpack.c.bf16 %v5445_v23, %v5476_v24  ;;  %v11764_v14 = vpack.c.bf16 %v4971_v20, %v4970_v12  ;;  %v5447_v12 = vld [vmem:[#allocation2 + $0xaf] sm:$0xff] }
 0x52c   : > { %9447 = vmatmul.msk.bf16.gmra.mxu0 %vm1091_vm1, %v5247_v15 }
 0x52d   : > { %14123 = vst [vmem:[#allocation17_spill] sm:$0xff] %v11744_v63 }
 0x52e   : > { %v4301_v13 = vpop.f32.mrf.mxu3 }
 0x52f   : > { %v4442_v48 = vadd.f32 %v4441_v29, %v4301_v13  ;;  %9474 = vmatmul.msk.bf16.vlgmr.msrb.gmra.mxu2 %vm1091_vm1, %v11563_v1  ;;  %v14125_v1 = vld [vmem:[#allocation73_spill] sm:$0xff] }
 0x530   : > { %v5225_v13 = vmul.f32 %v14125_v1, %v11752_v37 }
 0x531   : > { %v4443_v49 = vpop.f32.mrf.mxu0  ;;  %v4663_v51 = vpop.f32.mrf.mxu1 }
 0x532   : > { %v11754_v35 = vadd.f32 %v4663_v51, %v4442_v48  ;;  %v4882_v15 = vpop.f32.mrf.mxu2  ;;  %v5248_v48 = vpack.c.bf16 %v5225_v13, %v11762_v10  ;;  %v4973_v10 = vld [vmem:[#allocation2 + $0xb0] sm:$0xff] }
 0x533   : > { %v11757_v29 = vadd.f32 %v4882_v15, %v11553_v56 }
 0x534   : > { %9464 = vmatmul.msk.bf16.gmra.mxu1 %vm1091_vm1, %v5501_v55 }
 0x536   : > { %v4303_v34 = vpop.f32.mrf.mxu3 }
 0x537   : > { %v4444_v63 = vadd.f32 %v4443_v49, %v4303_v34  ;;  %v5446_v49 = vld [vmem:[#allocation2 + $0xa7] sm:$0xff] }
 0x538   : > { %v5478_v55 = vmul.f32 %v14085_v43, %v5446_v49  ;;  %v11790_v43 = vld [vmem:[#allocation2 + $0xa9] sm:$0xff] }
 0x539   : > { %v5318_v5 = vpop.f32.mrf.mxu0  ;;  %v4665_v23 = vpop.f32.mrf.mxu1  ;;  %14128 = vst [vmem:[#allocation18_spill] sm:$0xff] %v11790_v43 }
 0x53a   : > { %v11767_v24 = vadd.f32 %v4665_v23, %v4444_v63  ;;  %v4884_v56 = vpop.f32.mrf.mxu2  ;;  %v11779_v23 = vld [vmem:[#allocation2 + $0xb1] sm:$0xff] }
 0x53b   : > { %9431 = vmatmul.msk.bf16.gmra.mxu3 %vm1091_vm1, %v11764_v14  ;;  %v11773_v51 = vadd.f32 %v4884_v56, %v11566_v9  ;;  %v5502_v9 = vpack.c.bf16 %v5447_v12, %v5478_v55 }
 0x53c   : > { %9448 = vmatmul.msk.bf16.gmra.mxu0 %vm1091_vm1, %v5248_v48 }
 0x53e   : > { %v5064_v34 = vpop.f32.mrf.mxu3 }
 0x53f   : > { %v5144_v15 = vadd.f32 %v5064_v34, %v11533_v25  ;;  %9475 = vmatmul.msk.bf16.gmra.mxu2 %vm1091_vm1, %v11591_v31  ;;  %v14127_v25 = vld [vmem:[#allocation77_spill] sm:$0xff] }
 0x540   : > { %v5227_v34 = vmul.f32 %v14127_v25, %v11779_v23 }
 0x541   : > { %v5320_v20 = vpop.f32.mrf.mxu0  ;;  %v5398_v63 = vadd.f32 %v5318_v5, %v5144_v15  ;;  %v5572_v13 = vpop.f32.mrf.mxu1  ;;  %v4972_v15 = vld [vmem:[#allocation2 + $0xa8] sm:$0xff] }
 0x542   : > { %v4887_v48 = vpop.f32.mrf.mxu2  ;;  %v5249_v12 = vpack.c.bf16 %v5227_v34, %v11790_v43  ;;  %v5449_v34 = vld [vmem:[#allocation2 + $0xbf] sm:$0xff] }
 0x543   : > { %v11781_v1 = vadd.f32 %v5572_v13, %v5398_v63  ;;  %v11784_v56 = vadd.f32 %v4887_v48, %v11581_v54  ;;  %v11792_v13 = vpack.c.bf16 %v4973_v10, %v4972_v15  ;;  %v4975_v43 = vld [vmem:[#allocation2 + $0xc0] sm:$0xff] }
 0x544   : > { %9465 = vmatmul.msk.bf16.gmra.mxu1 %vm1091_vm1, %v5502_v9 }
 0x546   : > { %v5066_v31 = vpop.f32.mrf.mxu3 }
 0x547   : > { %v5145_v5 = vadd.f32 %v5066_v31, %v11544_v11  ;;  %v5448_v31 = vld [vmem:[#allocation2 + $0xb7] sm:$0xff] }
 0x548   : > { %v5480_v15 = vmul.f32 %v14087_v18, %v5448_v31  ;;  %v11818_v18 = vld [vmem:[#allocation2 + $0xb9] sm:$0xff] }
 0x549   : > { %v5323_v49 = vpop.f32.mrf.mxu0  ;;  %v5399_v63 = vadd.f32 %v5320_v20, %v5145_v5  ;;  %v5574_v54 = vpop.f32.mrf.mxu1  ;;  %14130 = vst [vmem:[#allocation66_spill] sm:$0xff] %v11818_v18 }
 0x54a   : > { %v4889_v48 = vpop.f32.mrf.mxu2 }
 0x54b   : > { %v11795_v55 = vadd.f32 %v5574_v54, %v5399_v63  ;;  %9432 = vmatmul.msk.bf16.gmra.mxu3 %vm1091_vm1, %v11792_v13  ;;  %v11801_v11 = vadd.f32 %v4889_v48, %v11594_v19  ;;  %v11807_v54 = vld [vmem:[#allocation2 + $0xc1] sm:$0xff]  ;;  %v5503_v19 = vpack.c.bf16 %v5449_v34, %v5480_v15 }
 0x54c   : > { %9449 = vmatmul.msk.bf16.gmra.mxu0 %vm1091_vm1, %v5249_v12 }
 0x54e   : > { %v5069_v9 = vpop.f32.mrf.mxu3 }
 0x54f   : > { %v5146_v20 = vadd.f32 %v5069_v9, %v11556_v36  ;;  %9476 = vmatmul.msk.bf16.gmra.mxu2 %vm1091_vm1, %v11619_v33  ;;  %v14129_v36 = vld [vmem:[#allocation80_spill] sm:$0xff] }
 0x550   : > { %v5229_v9 = vmul.f32 %v14129_v36, %v11807_v54 }
 0x551   : > { %v5325_v10 = vpop.f32.mrf.mxu0  ;;  %v5400_v5 = vadd.f32 %v5323_v49, %v5146_v20  ;;  %v5577_v63 = vpop.f32.mrf.mxu1  ;;  %v4974_v20 = vld [vmem:[#allocation2 + $0xb8] sm:$0xff] }
 0x552   : > { %v4892_v12 = vpop.f32.mrf.mxu2  ;;  %v5250_v34 = vpack.c.bf16 %v5229_v9, %v11818_v18  ;;  %v5451_v9 = vld [vmem:[#allocation2 + $0xcf] sm:$0xff] }
 0x553   : > { %v11809_v25 = vadd.f32 %v5577_v63, %v5400_v5  ;;  %v11812_v48 = vadd.f32 %v4892_v12, %v11609_v21  ;;  %v11820_v63 = vpack.c.bf16 %v4975_v43, %v4974_v20  ;;  %v4977_v18 = vld [vmem:[#allocation2 + $0xd0] sm:$0xff] }
 0x554   : > { %9466 = vmatmul.msk.bf16.gmra.mxu1 %vm1091_vm1, %v5503_v19 }
 0x556   : > { %v5071_v33 = vpop.f32.mrf.mxu3 }
 0x557   : > { %v5147_v49 = vadd.f32 %v5071_v33, %v11572_v8  ;;  %v5450_v33 = vld [vmem:[#allocation2 + $0xc7] sm:$0xff] }
 0x558   : > { %v5482_v20 = vmul.f32 %v14030_v22, %v5450_v33  ;;  %v11846_v22 = vld [vmem:[#allocation2 + $0xc9] sm:$0xff] }
 0x559   : > { %v5328_v31 = vpop.f32.mrf.mxu0  ;;  %v5401_v5 = vadd.f32 %v5325_v10, %v5147_v49  ;;  %v5579_v21 = vpop.f32.mrf.mxu1 }
 0x55a   : > { %v4894_v12 = vpop.f32.mrf.mxu2 }
 0x55b   : > { %v11823_v15 = vadd.f32 %v5579_v21, %v5401_v5  ;;  %9433 = vmatmul.msk.bf16.gmra.mxu3 %vm1091_vm1, %v11820_v63  ;;  %v11829_v8 = vadd.f32 %v4894_v12, %v11622_v57  ;;  %v11835_v21 = vld [vmem:[#allocation2 + $0xd1] sm:$0xff]  ;;  %v5504_v57 = vpack.c.bf16 %v5451_v9, %v5482_v20 }
 0x55c   : > { %9450 = vmatmul.msk.bf16.gmra.mxu0 %vm1091_vm1, %v5250_v34 }
 0x55e   : > { %v5074_v19 = vpop.f32.mrf.mxu3 }
 0x55f   : > { %v5148_v10 = vadd.f32 %v5074_v19, %v11584_v4  ;;  %9477 = vmatmul.msk.bf16.gmra.mxu2 %vm1091_vm1, %v11647_v39  ;;  %v14131_v4 = vld [vmem:[#allocation83_spill] sm:$0xff] }
 0x560   : > { %v5231_v19 = vmul.f32 %v14131_v4, %v11835_v21 }
 0x561   : > { %v5330_v43 = vpop.f32.mrf.mxu0  ;;  %v5402_v49 = vadd.f32 %v5328_v31, %v5148_v10  ;;  %v5582_v5 = vpop.f32.mrf.mxu1  ;;  %v4976_v10 = vld [vmem:[#allocation2 + $0xc8] sm:$0xff] }
 0x562   : > { %v4897_v34 = vpop.f32.mrf.mxu2  ;;  %v5251_v9 = vpack.c.bf16 %v5231_v19, %v11846_v22  ;;  %v5484_v19 = vmul.f32 %v14031_v46, %v11434_v17  ;;  %v4978_v17 = vld [vmem:[#allocation2 + $0xd8] sm:$0xff] }
 0x563   : > { %v11837_v36 = vadd.f32 %v5582_v5, %v5402_v49  ;;  %v11840_v12 = vadd.f32 %v4897_v34, %v11637_v0  ;;  %v11848_v5 = vpack.c.bf16 %v4977_v18, %v4976_v10 }
 0x564   : > { %9467 = vmatmul.msk.bf16.gmra.mxu1 %vm1091_vm1, %v5504_v57 }
 0x566   : > { %v5076_v39 = vpop.f32.mrf.mxu3 }
 0x567   : > { %v5149_v31 = vadd.f32 %v5076_v39, %v11600_v53 }
 0x569   : > { %v5333_v33 = vpop.f32.mrf.mxu0  ;;  %v5403_v49 = vadd.f32 %v5330_v43, %v5149_v31  ;;  %v5584_v0 = vpop.f32.mrf.mxu1 }
 0x56a   : > { %v4899_v34 = vpop.f32.mrf.mxu2 }
 0x56b   : > { %v11851_v20 = vadd.f32 %v5584_v0, %v5403_v49  ;;  %9434 = vmatmul.msk.bf16.gmra.mxu3 %vm1091_vm1, %v11848_v5  ;;  %v11857_v53 = vadd.f32 %v4899_v34, %v11650_v58  ;;  %v14133_v0 = vld [vmem:[#allocation86_spill] sm:$0xff] }
 0x56c   : > { %9451 = vmatmul.msk.bf16.gmra.mxu0 %vm1091_vm1, %v5251_v9  ;;  %v5505_v9 = vpack.c.bf16 %v11439_v7, %v5484_v19 }
 0x56e   : > { %v5079_v57 = vpop.f32.mrf.mxu3 }
 0x56f   : > { %v5150_v39 = vadd.f32 %v5079_v57, %v11612_v44  ;;  %9478 = vmatmul.msk.bf16.gmra.mxu2 %vm1091_vm1, %v11675_v45  ;;  %v14132_v44 = vld [vmem:[#allocation40_spill] sm:$0xff]  ;;  %v4979_v45 = vld [vmem:[#allocation2 + $0xe0] sm:$0xff] }
 0x570   : > { %v5233_v34 = vmul.f32 %v14133_v0, %v14132_v44 }
 0x571   : > { %v5335_v43 = vpop.f32.mrf.mxu0  ;;  %v5404_v18 = vadd.f32 %v5333_v33, %v5150_v39  ;;  %v5587_v31 = vpop.f32.mrf.mxu1 }
 0x572   : > { %v4902_v49 = vpop.f32.mrf.mxu2 }
 0x573   : > { %v11864_v10 = vadd.f32 %v5587_v31, %v5404_v18  ;;  %v11868_v58 = vadd.f32 %v4902_v49, %v11665_v41  ;;  %v11874_v18 = vpack.c.bf16 %v4979_v45, %v4978_v17  ;;  %v14134_v31 = vld [vmem:[#allocation35_spill] sm:$0xff] }
 0x574   : > { %9468 = vmatmul.msk.bf16.gmra.mxu1 %vm1091_vm1, %v5505_v9  ;;  %v5252_v4 = vpack.c.bf16 %v5233_v34, %v14134_v31  ;;  %v4981_v17 = vld [vmem:[#allocation2 + $0xf0] sm:$0xff]  ;;  %v4980_v31 = vld [vmem:[#allocation2 + $0xe8] sm:$0xff] }
 0x576   : > { %v5081_v57 = vpop.f32.mrf.mxu3 }
 0x577   : > { %v5151_v33 = vadd.f32 %v5081_v57, %v11628_v52 }
 0x579   : > { %v5338_v39 = vpop.f32.mrf.mxu0  ;;  %v5405_v46 = vadd.f32 %v5335_v43, %v5151_v33  ;;  %v5589_v7 = vpop.f32.mrf.mxu1 }
 0x57a   : > { %v4904_v41 = vpop.f32.mrf.mxu2 }
 0x57b   : > { %v11877_v19 = vadd.f32 %v5589_v7, %v5405_v46  ;;  %9435 = vmatmul.msk.bf16.gmra.mxu3 %vm1091_vm1, %v11874_v18  ;;  %v11883_v49 = vadd.f32 %v4904_v41, %v11678_v28  ;;  %v5486_v46 = vmul.f32 %v14032_v6, %v11463_v38  ;;  %v14135_v28 = vld [vmem:[#allocation37_spill] sm:$0xff]  ;;  %v11904_v7 = vpack.c.bf16 %v4981_v17, %v4980_v31 }
 0x57c   : > { %9452 = vmatmul.msk.bf16.gmra.mxu0 %vm1091_vm1, %v5252_v4  ;;  %v14137_v38 = vld [vmem:[#allocation45_spill] sm:$0xff] }
 0x57d   : > { %v5506_v57 = vpack.c.bf16 %v11468_v27, %v5486_v46  ;;  %v4983_v31 = vld [vmem:[#allocation2 + $0x100] sm:$0xff] }
 0x57e   : > { %v5084_v52 = vpop.f32.mrf.mxu3 }
 0x57f   : > { %v5152_v9 = vadd.f32 %v5084_v52, %v11640_v50  ;;  %9479 = vmatmul.msk.bf16.gmra.mxu2 %vm1091_vm1, %v11703_v32  ;;  %v14136_v50 = vld [vmem:[#allocation88_spill] sm:$0xff] }
 0x580   : > { %v5235_v45 = vmul.f32 %v14136_v50, %v14135_v28 }
 0x581   : > { %v11886_v43 = vpop.f32.mrf.mxu0  ;;  %v11890_v44 = vadd.f32 %v5338_v39, %v5152_v9 }
 0x582   : > { %v4907_v34 = vpop.f32.mrf.mxu2  ;;  %v5253_v41 = vpack.c.bf16 %v5235_v45, %v14137_v38  ;;  %v4982_v38 = vld [vmem:[#allocation2 + $0xf8] sm:$0xff] }
 0x583   : > { %v11896_v4 = vadd.f32 %v4907_v34, %v11693_v16  ;;  %v5488_v34 = vmul.f32 %v14035_v26, %v11504_v62  ;;  %v14140_v62 = vld [vmem:[#allocation41_spill] sm:$0xff]  ;;  %v14148_v26 = vld [vmem:[#allocation24_spill] sm:$0xff] }
 0x584   : > { %9469 = vmatmul.msk.bf16.gmra.mxu1 %vm1091_vm1, %v5506_v57 }
 0x585   : > { %v5507_v28 = vpack.c.bf16 %v11509_v47, %v5488_v34 }
 0x586   : > { %v5086_v33 = vpop.f32.mrf.mxu3 }
 0x587   : > { %v11902_v32 = vadd.f32 %v5086_v33, %v11656_v30 }
 0x589   : > { %v5343_v39 = vpop.f32.mrf.mxu0 }
 0x58a   : > { %v4909_v27 = vpop.f32.mrf.mxu2 }
 0x58b   : > { %9436 = vmatmul.msk.bf16.gmra.mxu3 %vm1091_vm1, %v11904_v7  ;;  %v11911_v16 = vadd.f32 %v4909_v27, %v11708_v3  ;;  %v14138_v3 = vld [vmem:[#allocation39_spill] sm:$0xff] }
 0x58c   : > { %9453 = vmatmul.msk.bf16.gmra.mxu0 %vm1091_vm1, %v5253_v41  ;;  %v11932_v41 = vpack.c.bf16 %v4983_v31, %v4982_v38  ;;  %v14144_v31 = vld [vmem:[#allocation78_spill] sm:$0xff] }
 0x58e   : > { %v5089_v52 = vpop.f32.mrf.mxu3 }
 0x58f   : > { %v5154_v9 = vadd.f32 %v5089_v52, %v11668_v61  ;;  %9480 = vmatmul.msk.bf16.gmra.mxu2 %vm1091_vm1, %v11735_v59  ;;  %v14139_v61 = vld [vmem:[#allocation60_spill] sm:$0xff] }
 0x590   : > { %v5237_v33 = vmul.f32 %v14139_v61, %v14138_v3 }
 0x591   : > { %v11914_v30 = vpop.f32.mrf.mxu0  ;;  %v11918_v46 = vadd.f32 %v5343_v39, %v5154_v9 }
 0x592   : > { %v4912_v57 = vpop.f32.mrf.mxu2  ;;  %v5254_v27 = vpack.c.bf16 %v5237_v33, %v14140_v62  ;;  %v11950_v33 = vld [vmem:[#allocation2 + $0x111] sm:$0xff] }
 0x593   : > { %v11924_v45 = vadd.f32 %v4912_v57, %v11725_v40  ;;  %v14142_v57 = vld [vmem:[#allocation72_spill] sm:$0xff] }
 0x594   : > { %9470 = vmatmul.msk.bf16.gmra.mxu1 %vm1091_vm1, %v5507_v28  ;;  %v14143_v28 = vld [vmem:[#allocation19_spill] sm:$0xff] }
 0x595   : > { %v5490_v3 = vmul.f32 %v14143_v28, %v14142_v57  ;;  %v11962_v57 = vld [vmem:[#allocation2 + $0x109] sm:$0xff] }
 0x596   : > { %v5091_v17 = vpop.f32.mrf.mxu3 }
 0x597   : > { %v11930_v59 = vadd.f32 %v5091_v17, %v11684_v42  ;;  %v5508_v38 = vpack.c.bf16 %v14144_v31, %v5490_v3  ;;  %v5460_v31 = vld [vmem:[#allocation2 + $0x117] sm:$0xff] }
 0x598   : > { %v5492_v6 = vmul.f32 %v14148_v26, %v5460_v31  ;;  %v14151_v31 = vld [vmem:[#allocation29_spill] sm:$0xff] }
 0x599   : > { %v5348_v39 = vpop.f32.mrf.mxu0 }
 0x59a   : > { %v4914_v47 = vpop.f32.mrf.mxu2 }
 0x59b   : > { %9437 = vmatmul.msk.bf16.gmra.mxu3 %vm1091_vm1, %v11932_v41  ;;  %v11939_v40 = vadd.f32 %v4914_v47, %v11738_v2 }
 0x59c   : > { %9454 = vmatmul.msk.bf16.gmra.mxu0 %vm1091_vm1, %v5254_v27 }
 0x59e   : > { %v5094_v52 = vpop.f32.mrf.mxu3 }
 0x59f   : > { %v5156_v9 = vadd.f32 %v5094_v52, %v11696_v60  ;;  %9481 = vmatmul.msk.bf16.gmra.mxu2 %vm1091_vm1, %v11764_v14  ;;  %v14145_v60 = vld [vmem:[#allocation57_spill] sm:$0xff]  ;;  %v4985_v14 = vld [vmem:[#allocation2 + $0x110] sm:$0xff] }
 0x5a0   : > { %v5239_v62 = vmul.f32 %v14145_v60, %v11950_v33 }
 0x5a1   : > { %v11942_v42 = vpop.f32.mrf.mxu0  ;;  %v11946_v34 = vadd.f32 %v5348_v39, %v5156_v9  ;;  %v14146_v39 = vld [vmem:[#allocation20_spill] sm:$0xff]  ;;  %v4984_v9 = vld [vmem:[#allocation2 + $0x108] sm:$0xff] }
 0x5a2   : > { %14141 = vst [vmem:[#allocation31_spill] sm:$0xff] %v11942_v42  ;;  %v4917_v17 = vpop.f32.mrf.mxu2  ;;  %v11964_v28 = vpack.c.bf16 %v4985_v14, %v4984_v9  ;;  %v5255_v3 = vpack.c.bf16 %v5239_v62, %v11962_v57  ;;  %v5461_v62 = vld [vmem:[#allocation2 + $0x11f] sm:$0xff] }
 0x5a3   : > { %v11954_v2 = vadd.f32 %v4917_v17, %v11754_v35  ;;  %v5509_v42 = vpack.c.bf16 %v5461_v62, %v5492_v6  ;;  %v14153_v62 = vld [vmem:[#allocation44_spill] sm:$0xff] }
 0x5a4   : > { %9471 = vmatmul.msk.bf16.gmra.mxu1 %vm1091_vm1, %v5508_v38 }
 0x5a6   : > { %v5096_v27 = vpop.f32.mrf.mxu3 }
 0x5a7   : > { %v11960_v47 = vadd.f32 %v5096_v27, %v14146_v39  ;;  %v14147_v27 = vld [vmem:[#allocation22_spill] sm:$0xff] }
 0x5a9   : > { %v5353_v52 = vpop.f32.mrf.mxu0 }
 0x5aa   : > { %v4919_v35 = vpop.f32.mrf.mxu2 }
 0x5ab   : > { %9438 = vmatmul.msk.bf16.gmra.mxu3 %vm1091_vm1, %v11964_v28  ;;  %v11971_v17 = vadd.f32 %v4919_v35, %v11767_v24  ;;  %v9527_v24 = vld [vmem:[%s13708_s11 + $0x4] sm:$0xf]  ;;  %v14150_v35 = vld [vmem:[#allocation52_spill] sm:$0xff] }
 0x5ac   : > { %9455 = vmatmul.msk.bf16.gmra.mxu0 %vm1091_vm1, %v5255_v3 }
 0x5ae   : > { %v5099_v38 = vpop.f32.mrf.mxu3 }
 0x5af   : > { %v5158_v39 = vadd.f32 %v5099_v38, %v14147_v27  ;;  %9482 = vmatmul.msk.bf16.gmra.mxu2 %vm1091_vm1, %v11792_v13  ;;  %v5939_v38 = vmul.f32 %v14151_v31, %v14150_v35  ;;  %v6830_v27 = vsel %vm1263_vm0, %v9527_v24, 0 }
 0x5b0   : > { %6839 = vmatpush.bf16.msrb.mxu1 %v6830_v27 }
 0x5b1   : > { %v11975_v60 = vpop.f32.mrf.mxu0  ;;  %v11979_v14 = vadd.f32 %v5353_v52, %v5158_v39  ;;  %v14152_v52 = vld [vmem:[#allocation17_spill] sm:$0xff] }
 0x5b2   : > { %14149 = vst [vmem:[#allocation23_spill] sm:$0xff] %v11975_v60  ;;  %v5794_v9 = vpop.f32.mrf.mxu2 }
 0x5b3   : > { %v11982_v3 = vadd.f32 %v5794_v9, %v11781_v1  ;;  %v5970_v1 = vpack.c.bf16 %v5939_v38, %v14153_v62  ;;  %v14154_v38 = vld [vmem:[#allocation46_spill] sm:$0xff] }
 0x5b4   : > { %9472 = vmatmul.msk.bf16.gmra.mxu1 %vm1091_vm1, %v5509_v42 }
 0x5b6   : > { %v5101_v13 = vpop.f32.mrf.mxu3 }
 0x5b7   : > { %v11992_v39 = vadd.f32 %v5101_v13, %v14152_v52  ;;  %v14155_v52 = vld [vmem:[#allocation33_spill] sm:$0xff] }
 0x5b8   : > { %v5941_v62 = vmul.f32 %v14155_v52, %v14154_v38 }
 0x5b9   : > { %v5358_v6 = vpop.f32.mrf.mxu0 }
 0x5ba   : > { %v5796_v9 = vpop.f32.mrf.mxu2 }
 0x5bb   : > { %9491 = vmatmul.msk.bf16.vlgmr.msrb.gmra.mxu3 %vm1091_vm1, %v5970_v1  ;;  %v11997_v26 = vadd.f32 %v5796_v9, %v11795_v55 }
 0x5be   : > { %v5104_v42 = vpop.f32.mrf.mxu3 }
 0x5bf   : > { %v5160_v60 = vadd.f32 %v5104_v42, %v11757_v29  ;;  %9483 = vmatmul.msk.bf16.gmra.mxu2 %vm1091_vm1, %v11820_v63  ;;  %v14156_v29 = vld [vmem:[#allocation61_spill] sm:$0xff] }
 0x5c0   : > { %v5971_v42 = vpack.c.bf16 %v5941_v62, %v14156_v29  ;;  %v14157_v62 = vld [vmem:[#allocation49_spill] sm:$0xff] }
 0x5c1   : > { %v12000_v35 = vpop.f32.mrf.mxu0  ;;  %v12004_v24 = vadd.f32 %v5358_v6, %v5160_v60 }
 0x5c2   : > { %v5799_v27 = vpop.f32.mrf.mxu2 }
 0x5c3   : > { %v12007_v13 = vadd.f32 %v5799_v27, %v11809_v25 }
 0x5c6   : > { %v5106_v1 = vpop.f32.mrf.mxu3 }
 0x5c7   : > { %v12012_v55 = vadd.f32 %v5106_v1, %v11773_v51  ;;  %v14158_v1 = vld [vmem:[#allocation38_spill] sm:$0xff] }
 0x5c8   : > { %v5943_v29 = vmul.f32 %v14158_v1, %v14157_v62 }
 0x5c9   : > { %v5363_v9 = vpop.f32.mrf.mxu0 }
 0x5ca   : > { %v5801_v31 = vpop.f32.mrf.mxu2 }
 0x5cb   : > { %9492 = vmatmul.msk.bf16.gmra.mxu3 %vm1091_vm1, %v5971_v42  ;;  %v12017_v63 = vadd.f32 %v5801_v31, %v11823_v15 }
 0x5ce   : > { %v5109_v60 = vpop.f32.mrf.mxu3 }
 0x5cf   : > { %v5162_v25 = vadd.f32 %v5109_v60, %v11784_v56  ;;  %9484 = vmatmul.msk.bf16.gmra.mxu2 %vm1091_vm1, %v11848_v5  ;;  %v14159_v56 = vld [vmem:[#allocation51_spill] sm:$0xff] }
 0x5d0   : > { %v5972_v60 = vpack.c.bf16 %v5943_v29, %v14159_v56  ;;  %v14160_v29 = vld [vmem:[#allocation69_spill] sm:$0xff] }
 0x5d1   : > { %v12020_v6 = vpop.f32.mrf.mxu0  ;;  %v12024_v27 = vadd.f32 %v5363_v9, %v5162_v25 }
 0x5d2   : > { %v5804_v51 = vpop.f32.mrf.mxu2 }
 0x5d3   : > { %v12027_v38 = vadd.f32 %v5804_v51, %v11837_v36 }
 0x5d6   : > { %v5111_v42 = vpop.f32.mrf.mxu3 }
 0x5d7   : > { %v12032_v15 = vadd.f32 %v5111_v42, %v11801_v11  ;;  %v14161_v42 = vld [vmem:[#allocation42_spill] sm:$0xff] }
 0x5d8   : > { %v5945_v56 = vmul.f32 %v14161_v42, %v14160_v29  ;;  %v14164_v29 = vld [vmem:[#allocation47_spill] sm:$0xff] }
 0x5d9   : > { %v5368_v31 = vpop.f32.mrf.mxu0 }
 0x5da   : > { %v5806_v52 = vpop.f32.mrf.mxu2 }
 0x5db   : > { %9493 = vmatmul.msk.bf16.gmra.mxu3 %vm1091_vm1, %v5972_v60  ;;  %v12037_v5 = vadd.f32 %v5806_v52, %v11851_v20 }
 0x5de   : > { %v5114_v9 = vpop.f32.mrf.mxu3 }
 0x5df   : > { %v5164_v36 = vadd.f32 %v5114_v9, %v11812_v48  ;;  %9485 = vmatmul.msk.bf16.gmra.mxu2 %vm1091_vm1, %v11874_v18  ;;  %v14162_v48 = vld [vmem:[#allocation55_spill] sm:$0xff] }
 0x5e0   : > { %v5973_v9 = vpack.c.bf16 %v5945_v56, %v14162_v48 }
 0x5e1   : > { %v12040_v25 = vpop.f32.mrf.mxu0  ;;  %v12044_v51 = vadd.f32 %v5368_v31, %v5164_v36 }
 0x5e2   : > { %v5809_v11 = vpop.f32.mrf.mxu2 }
 0x5e3   : > { %v12047_v62 = vadd.f32 %v5809_v11, %v11864_v10 }
 0x5e6   : > { %v5116_v60 = vpop.f32.mrf.mxu3 }
 0x5e7   : > { %v12052_v20 = vadd.f32 %v5116_v60, %v11829_v8  ;;  %v14163_v8 = vld [vmem:[#allocation58_spill] sm:$0xff] }
 0x5e8   : > { %v5947_v60 = vmul.f32 %v14164_v29, %v14163_v8  ;;  %v5715_v29 = vld [vmem:[#allocation2 + $0x120] sm:$0xff] }
 0x5e9   : > { %v5373_v52 = vpop.f32.mrf.mxu0 }
 0x5ea   : > { %v5811_v1 = vpop.f32.mrf.mxu2 }
 0x5eb   : > { %9494 = vmatmul.msk.bf16.gmra.mxu3 %vm1091_vm1, %v5973_v9  ;;  %v12057_v18 = vadd.f32 %v5811_v1, %v11877_v19  ;;  %v14165_v19 = vld [vmem:[#allocation63_spill] sm:$0xff] }
 0x5ec   : > { %v5974_v1 = vpack.c.bf16 %v5947_v60, %v14165_v19  ;;  %v14168_v19 = vld [vmem:[#allocation68_spill] sm:$0xff] }
 0x5ee   : > { %v5119_v31 = vpop.f32.mrf.mxu3 }
 0x5ef   : > { %v5166_v10 = vadd.f32 %v5119_v31, %v11840_v12  ;;  %9486 = vmatmul.msk.bf16.gmra.mxu2 %vm1091_vm1, %v11904_v7 }
 0x5f1   : > { %v12060_v36 = vpop.f32.mrf.mxu0  ;;  %v12064_v11 = vadd.f32 %v5373_v52, %v5166_v10  ;;  %v14166_v52 = vld [vmem:[#allocation65_spill] sm:$0xff] }
 0x5f2   : > { %v14167_v10 = vld [vmem:[#allocation53_spill] sm:$0xff] }
 0x5f3   : > { %v5949_v8 = vmul.f32 %v14167_v10, %v14166_v52  ;;  %v14170_v52 = vld [vmem:[#allocation59_spill] sm:$0xff] }
 0x5f6   : > { %v5121_v56 = vpop.f32.mrf.mxu3 }
 0x5f7   : > { %v12069_v48 = vadd.f32 %v5121_v56, %v11857_v53 }
 0x5f9   : > { %v5378_v9 = vpop.f32.mrf.mxu0 }
 0x5fb   : > { %9495 = vmatmul.msk.bf16.gmra.mxu3 %vm1091_vm1, %v5974_v1  ;;  %v5975_v1 = vpack.c.bf16 %v5949_v8, %v14168_v19  ;;  %v14171_v8 = vld [vmem:[#allocation25_spill] sm:$0xff] }
 0x5fe   : > { %v5124_v12 = vpop.f32.mrf.mxu3 }
 0x5ff   : > { %v5168_v31 = vadd.f32 %v5124_v12, %v11868_v58  ;;  %9487 = vmatmul.msk.bf16.gmra.mxu2 %vm1091_vm1, %v11932_v41 }
 0x601   : > { %v12074_v42 = vpop.f32.mrf.mxu0  ;;  %v12078_v7 = vadd.f32 %v5378_v9, %v5168_v31  ;;  %v14169_v31 = vld [vmem:[#allocation54_spill] sm:$0xff] }
 0x602   : > { %v5951_v10 = vmul.f32 %v14170_v52, %v14169_v31  ;;  %v14172_v31 = vld [vmem:[#allocation67_spill] sm:$0xff] }
 0x603   : > { %v5953_v52 = vmul.f32 %v14172_v31, %v11752_v37  ;;  %v14178_v31 = vld [vmem:[#allocation18_spill] sm:$0xff] }
 0x604   : > { %v5976_v19 = vpack.c.bf16 %v5951_v10, %v14171_v8  ;;  %v14174_v8 = vld [vmem:[#allocation62_spill] sm:$0xff] }
 0x606   : > { %v5126_v53 = vpop.f32.mrf.mxu3 }
 0x607   : > { %v12083_v56 = vadd.f32 %v5126_v53, %v11883_v49 }
 0x609   : > { %v5383_v60 = vpop.f32.mrf.mxu0 }
 0x60b   : > { %9496 = vmatmul.msk.bf16.gmra.mxu3 %vm1091_vm1, %v5975_v1  ;;  %v5714_v1 = vld [vmem:[#allocation2 + $0x118] sm:$0xff] }
 0x60e   : > { %v5129_v58 = vpop.f32.mrf.mxu3 }
 0x60f   : > { %v5170_v12 = vadd.f32 %v5129_v58, %v11896_v4  ;;  %9488 = vmatmul.msk.bf16.gmra.mxu2 %vm1091_vm1, %v11964_v28  ;;  %v5731_v58 = vpack.c.bf16 %v5715_v29, %v5714_v1 }
 0x611   : > { %v12090_v41 = vadd.f32 %v5383_v60, %v5170_v12  ;;  %v12092_v9 = vpop.f32.mrf.mxu0 }
 0x616   : > { %v5131_v49 = vpop.f32.mrf.mxu3 }
 0x617   : > { %v12097_v53 = vadd.f32 %v5131_v49, %v11911_v16 }
 0x619   : > { %v5388_v4 = vpop.f32.mrf.mxu0 }
 0x61b   : > { %9497 = vmatmul.msk.bf16.gmra.mxu3 %vm1091_vm1, %v5976_v19  ;;  %v5977_v19 = vpack.c.bf16 %v5953_v52, %v14174_v8  ;;  %v12126_v8 = vpop.f32.mrf.mxu2 }
 0x61e   : > { %v5134_v28 = vpop.f32.mrf.mxu3 }
 0x61f   : > { %v5172_v60 = vadd.f32 %v5134_v28, %v11924_v45  ;;  %9489 = vmatmul.msk.bf16.gmra.mxu2 %vm1091_vm1, %v5731_v58 }
 0x621   : > { %v12103_v12 = vadd.f32 %v5388_v4, %v5172_v60  ;;  %v12107_v16 = vpop.f32.mrf.mxu0  ;;  %v14176_v4 = vld [vmem:[#allocation73_spill] sm:$0xff] }
 0x622   : > { %14173 = vst [vmem:[#allocation71_spill] sm:$0xff] %v12107_v16  ;;  %v5955_v28 = vmul.f32 %v14176_v4, %v11779_v23 }
 0x626   : > { %v5136_v49 = vpop.f32.mrf.mxu3 }
 0x627   : > { %v12110_v10 = vadd.f32 %v5136_v49, %v11939_v40  ;;  %v5978_v40 = vpack.c.bf16 %v5955_v28, %v14178_v31  ;;  %v12124_v49 = vpop.f32.mrf.mxu1 }
 0x629   : > { %v5393_v1 = vpop.f32.mrf.mxu0 }
 0x62b   : > { %9498 = vmatmul.msk.bf16.gmra.mxu3 %vm1091_vm1, %v5977_v19  ;;  %v12132_v19 = vld [vmem:[%s13705_s8] ss:$0 sm:$0xff] }
 0x62e   : > { %v5139_v29 = vpop.f32.mrf.mxu3 }
 0x62f   : > { %v5174_v45 = vadd.f32 %v5139_v29, %v11954_v2  ;;  %v12140_v4 = vpop.f32.mrf.mxu1 }
 0x631   : > { %v12115_v58 = vadd.f32 %v5393_v1, %v5174_v45 }
 0x633   : > { %14175 = vst [vmem:[#allocation28_spill] sm:$0xff] %v12115_v58 }
 0x636   : > { %v5141_v37 = vpop.f32.mrf.mxu3 }
 0x637   : > { %v12120_v60 = vadd.f32 %v5141_v37, %v11971_v17  ;;  %v14179_v17 = vld [vmem:[#allocation77_spill] sm:$0xff]  ;;  %v14180_v37 = vld [vmem:[#allocation66_spill] sm:$0xff] }
 0x638   : > { %v5957_v29 = vmul.f32 %v14179_v17, %v11807_v54 }
 0x639   : > { %14177 = vst [vmem:[#allocation36_spill] sm:$0xff] %v12120_v60 }
 0x63b   : > { %9499 = vmatmul.msk.bf16.gmra.mxu3 %vm1091_vm1, %v5978_v40  ;;  %v5979_v40 = vpack.c.bf16 %v5957_v29, %v14180_v37  ;;  %v14181_v37 = vld [vmem:[#allocation80_spill] sm:$0xff] }
 0x63c   : > { %v5959_v58 = vmul.f32 %v14181_v37, %v11835_v21 }
 0x63e   : > { %v6048_v52 = vpop.f32.mrf.mxu3 }
 0x63f   : > { %v6128_v2 = vadd.f32 %v6048_v52, %v11982_v3  ;;  %v12142_v3 = vpop.f32.mrf.mxu2 }
 0x641   : > { %v6164_v23 = vadd.f32 %v12132_v19, %v6128_v2 }
 0x643   : > { %v6228_v1 = vmul.f32 0.1, %v6164_v23  ;;  %vm6196_vm9 = vcmp.gt.f32.partialorder %v6164_v23, 0.0 }
 0x645   : > { %v6260_v2 = vsel %vm6196_vm9, %v6164_v23, %v6228_v1  ;;  %v5980_v1 = vpack.c.bf16 %v5959_v58, %v11846_v22  ;;  %v14182_v58 = vld [vmem:[#allocation83_spill] sm:$0xff] }
 0x646   : > { %v6050_v31 = vpop.f32.mrf.mxu3 }
 0x647   : > { %v6129_v45 = vadd.f32 %v6050_v31, %v11997_v26  ;;  %v12147_v31 = vpop.f32.mrf.mxu1  ;;  %v12149_v29 = vpop.f32.mrf.mxu2 }
 0x649   : > { %v6165_v28 = vadd.f32 %v12132_v19, %v6129_v45 }
 0x64b   : > { %vm6197_vm10 = vcmp.gt.f32.partialorder %v6165_v28, 0.0  ;;  %v6229_v52 = vmul.f32 0.1, %v6165_v28  ;;  %9500 = vmatmul.msk.bf16.gmra.mxu3 %vm1091_vm1, %v5979_v40 }
 0x64d   : > { %v6261_v60 = vsel %vm6197_vm10, %v6165_v28, %v6229_v52 }
 0x64e   : > { %v6292_v54 = vpack.c.bf16 %v6261_v60, %v6260_v2  ;;  %v6053_v17 = vpop.f32.mrf.mxu3 }
 0x64f   : > { %v6130_v26 = vadd.f32 %v6053_v17, %v12007_v13  ;;  %v12158_v52 = vpop.f32.mrf.mxu1  ;;  %v12160_v21 = vpop.f32.mrf.mxu2 }
 0x650   : > { %9511 = vmatmul.msk.bf16.vlgmr.msrb.gmra.mxu0 %vm3769_vm12, %v6292_v54 }
 0x651   : > { %v6166_v45 = vadd.f32 %v12132_v19, %v6130_v26 }
 0x653   : > { %v6230_v23 = vmul.f32 0.1, %v6166_v45  ;;  %vm6198_vm11 = vcmp.gt.f32.partialorder %v6166_v45, 0.0 }
 0x655   : > { %v6262_v17 = vsel %vm6198_vm11, %v6166_v45, %v6230_v23  ;;  %v5928_v23 = vld [vmem:[#allocation2 + $0xd9] sm:$0xff] }
 0x656   : > { %v6055_v16 = vpop.f32.mrf.mxu3 }
 0x657   : > { %v6131_v40 = vadd.f32 %v6055_v16, %v12017_v63  ;;  %v5929_v16 = vld [vmem:[#allocation2 + $0xe1] sm:$0xff]  ;;  %v12167_v45 = vpop.f32.mrf.mxu1 }
 0x658   : > { %v5961_v26 = vmul.f32 %v14182_v58, %v5929_v16  ;;  %v5931_v58 = vld [vmem:[#allocation2 + $0xf1] sm:$0xff] }
 0x659   : > { %v6167_v60 = vadd.f32 %v12132_v19, %v6131_v40 }
 0x65b   : > { %vm6199_vm13 = vcmp.gt.f32.partialorder %v6167_v60, 0.0  ;;  %v6231_v13 = vmul.f32 0.1, %v6167_v60  ;;  %9501 = vmatmul.msk.bf16.gmra.mxu3 %vm1091_vm1, %v5980_v1 }
 0x65d   : > { %v6263_v28 = vsel %vm6199_vm13, %v6167_v60, %v6231_v13  ;;  %v12169_v60 = vpop.f32.mrf.mxu2 }
 0x65e   : > { %v6058_v2 = vpop.f32.mrf.mxu3  ;;  %v6293_v54 = vpack.c.bf16 %v6263_v28, %v6262_v17  ;;  %v5981_v28 = vpack.c.bf16 %v5961_v26, %v5928_v23 }
 0x65f   : > { %v6132_v63 = vadd.f32 %v6058_v2, %v12027_v38 }
 0x660   : > { %9512 = vmatmul.msk.bf16.gmra.mxu0 %vm3769_vm12, %v6293_v54 }
 0x661   : > { %v6168_v22 = vadd.f32 %v12132_v19, %v6132_v63 }
 0x663   : > { %v6232_v13 = vmul.f32 0.1, %v6168_v22  ;;  %vm6200_vm14 = vcmp.gt.f32.partialorder %v6168_v22, 0.0 }
 0x665   : > { %v6264_v2 = vsel %vm6200_vm14, %v6168_v22, %v6232_v13  ;;  %v12177_v37 = vpop.f32.mrf.mxu2  ;;  %v5930_v22 = vld [vmem:[#allocation2 + $0xe9] sm:$0xff] }
 0x666   : > { %v6060_v40 = vpop.f32.mrf.mxu3 }
 0x667   : > { %v6133_v1 = vadd.f32 %v6060_v40, %v12037_v5  ;;  %v12175_v40 = vpop.f32.mrf.mxu1 }
 0x669   : > { %v6169_v17 = vadd.f32 %v12132_v19, %v6133_v1  ;;  %v5963_v1 = vmul.f32 %v14133_v0, %v5931_v58 }
 0x66b   : > { %vm6201_vm15 = vcmp.gt.f32.partialorder %v6169_v17, 0.0  ;;  %v6233_v38 = vmul.f32 0.1, %v6169_v17  ;;  %9502 = vmatmul.msk.bf16.gmra.mxu3 %vm1091_vm1, %v5981_v28 }
 0x66d   : > { %v6265_v54 = vsel %vm6201_vm15, %v6169_v17, %v6233_v38  ;;  %v5982_v38 = vpack.c.bf16 %v5963_v1, %v5930_v22  ;;  %v5933_v22 = vld [vmem:[#allocation2 + $0x101] sm:$0xff] }
 0x66e   : > { %v6063_v63 = vpop.f32.mrf.mxu3  ;;  %v6294_v16 = vpack.c.bf16 %v6265_v54, %v6264_v2  ;;  %v5660_v54 = vadd.f32 %v12124_v49, %v11890_v44  ;;  %v5965_v49 = vmul.f32 %v14136_v50, %v5933_v22 }
 0x66f   : > { %v6134_v5 = vadd.f32 %v6063_v63, %v12047_v62  ;;  %v12184_v2 = vpop.f32.mrf.mxu1  ;;  %v12188_v63 = vpop.f32.mrf.mxu2 }
 0x670   : > { %9513 = vmatmul.msk.bf16.gmra.mxu0 %vm3769_vm12, %v6294_v16  ;;  %v5882_v1 = vadd.f32 %v12126_v8, %v5660_v54 }
 0x671   : > { %v6170_v26 = vadd.f32 %v12132_v19, %v6134_v5 }
 0x673   : > { %v6234_v13 = vmul.f32 0.1, %v6170_v26  ;;  %vm6202_vm2 = vcmp.gt.f32.partialorder %v6170_v26, 0.0 }
 0x675   : > { %v6266_v58 = vsel %vm6202_vm2, %v6170_v26, %v6234_v13  ;;  %vm6585_vm2 = vcmask 60416  }
 0x676   : > { %v6065_v23 = vpop.f32.mrf.mxu3 }
 0x677   : > { %v6135_v28 = vadd.f32 %v6065_v23, %v12057_v18  ;;  %v5407_v23 = vadd.f32 %v11886_v43, %v11902_v32  ;;  %v12198_v26 = vpop.f32.mrf.mxu1  ;;  %v5932_v32 = vld [vmem:[#allocation2 + $0xf9] sm:$0xff] }
 0x678   : > { %v5983_v54 = vpack.c.bf16 %v5965_v49, %v5932_v32 }
 0x679   : > { %v6171_v17 = vadd.f32 %v12132_v19, %v6135_v28 }
 0x67b   : > { %vm6203_vm3 = vcmp.gt.f32.partialorder %v6171_v17, 0.0  ;;  %v6235_v62 = vmul.f32 0.1, %v6171_v17  ;;  %9503 = vmatmul.msk.bf16.gmra.mxu3 %vm1091_vm1, %v5982_v38  ;;  %v5661_v38 = vadd.f32 %v12140_v4, %v5407_v23 }
 0x67d   : > { %v6267_v16 = vsel %vm6203_vm3, %v6171_v17, %v6235_v62  ;;  %v5883_v0 = vadd.f32 %v12142_v3, %v5661_v38  ;;  %v12200_v17 = vpop.f32.mrf.mxu2  ;;  %v5662_v3 = vadd.f32 %v12147_v31, %v11918_v46 }
 0x67e   : > { %v6068_v18 = vpop.f32.mrf.mxu3  ;;  %v6295_v5 = vpack.c.bf16 %v6267_v16, %v6266_v58 }
 0x67f   : > { %v6136_v28 = vadd.f32 %v6068_v18, %v5882_v1  ;;  %v5884_v23 = vadd.f32 %v12149_v29, %v5662_v3  ;;  %v12209_v1 = vpop.f32.mrf.mxu1 }
 0x680   : > { %9514 = vmatmul.msk.bf16.gmra.mxu0 %vm3769_vm12, %v6295_v5 }
 0x681   : > { %v6172_v44 = vadd.f32 %v12132_v19, %v6136_v28 }
 0x683   : > { %v6236_v8 = vmul.f32 0.1, %v6172_v44  ;;  %vm6204_vm4 = vcmp.gt.f32.partialorder %v6172_v44, 0.0 }
 0x685   : > { %v6268_v58 = vsel %vm6204_vm4, %v6172_v44, %v6236_v8  ;;  %v12212_v28 = vpop.f32.mrf.mxu2  ;;  %v5967_v44 = vmul.f32 %v14139_v61, %v11950_v33 }
 0x686   : > { %v6070_v13 = vpop.f32.mrf.mxu3 }
 0x687   : > { %v6137_v43 = vadd.f32 %v6070_v13, %v5883_v0  ;;  %v5409_v0 = vadd.f32 %v11914_v30, %v11930_v59  ;;  %v5984_v13 = vpack.c.bf16 %v5967_v44, %v11962_v57 }
 0x689   : > { %v6173_v62 = vadd.f32 %v12132_v19, %v6137_v43  ;;  %v5663_v38 = vadd.f32 %v12158_v52, %v5409_v0  ;;  %v12221_v43 = vpop.f32.mrf.mxu1 }
 0x68b   : > { %vm6205_vm5 = vcmp.gt.f32.partialorder %v6173_v62, 0.0  ;;  %v6237_v4 = vmul.f32 0.1, %v6173_v62  ;;  %9504 = vmatmul.msk.bf16.gmra.mxu3 %vm1091_vm1, %v5983_v54  ;;  %v5885_v46 = vadd.f32 %v12160_v21, %v5663_v38  ;;  %v5664_v21 = vadd.f32 %v12167_v45, %v11946_v34  ;;  %v5936_v34 = vld [vmem:[#allocation2 + $0x119] sm:$0xff] }
 0x68d   : > { %v6269_v16 = vsel %vm6205_vm5, %v6173_v62, %v6237_v4  ;;  %v12223_v32 = vpop.f32.mrf.mxu2  ;;  %v14183_v4 = vld [vmem:[#allocation31_spill] sm:$0xff]  ;;  %v5886_v57 = vadd.f32 %v12169_v60, %v5664_v21  ;;  %v5666_v21 = vadd.f32 %v12184_v2, %v11979_v14 }
 0x68e   : > { %v6073_v18 = vpop.f32.mrf.mxu3  ;;  %v6296_v5 = vpack.c.bf16 %v6269_v16, %v6268_v58  ;;  %v5411_v3 = vadd.f32 %v14183_v4, %v11960_v47  ;;  %v5937_v58 = vld [vmem:[#allocation2 + $0x121] sm:$0xff] }
 0x68f   : > { %v6138_v22 = vadd.f32 %v6073_v18, %v5884_v23  ;;  %v6730_v47 = vld [vmem:[%s13708_s11] sm:$0xf] }
 0x690   : > { %9515 = vmatmul.msk.bf16.gmra.mxu0 %vm3769_vm12, %v6296_v5  ;;  %v5665_v18 = vadd.f32 %v12175_v40, %v5411_v3  ;;  %v14184_v5 = vld [vmem:[#allocation57_spill] sm:$0xff] }
 0x691   : > { %v6174_v31 = vadd.f32 %v12132_v19, %v6138_v22  ;;  %v5969_v0 = vmul.f32 %v14184_v5, %v5937_v58  ;;  %v12234_v23 = vpop.f32.mrf.mxu1  ;;  %v6731_v58 = vld [vmem:[#allocation2 + $0x8] sm:$0xff] }
 0x692   : > { %v5887_v45 = vadd.f32 %v12177_v37, %v5665_v18  ;;  %v14186_v18 = vld [vmem:[#allocation23_spill] sm:$0xff] }
 0x693   : > { %v6238_v59 = vmul.f32 0.1, %v6174_v31  ;;  %vm6206_vm6 = vcmp.gt.f32.partialorder %v6174_v31, 0.0  ;;  %v5985_v44 = vpack.c.bf16 %v5969_v0, %v5936_v34  ;;  %v5413_v0 = vadd.f32 %v14186_v18, %v11992_v39  ;;  %v9577_v39 = vld [vmem:[%s13708_s11 + $0xc] sm:$0xf] }
 0x694   : > { %v5888_v34 = vadd.f32 %v12188_v63, %v5666_v21 }
 0x695   : > { %v6270_v33 = vsel %vm6206_vm6, %v6174_v31, %v6238_v59  ;;  %v12237_v22 = vpop.f32.mrf.mxu2  ;;  %v6650_v31 = vld [vmem:[#allocation2 + $0x7] sm:$0xff]  ;;  %v6651_v59 = vld [vmem:[#allocation2 + $0xf] sm:$0xff] }
 0x696   : > { %v6075_v49 = vpop.f32.mrf.mxu3 }
 0x697   : > { %v6139_v30 = vadd.f32 %v6075_v49, %v5885_v46  ;;  %v6970_v46 = vsel %vm1263_vm0, %v6730_v47, 0  ;;  %v14185_v49 = vld [vmem:[#allocation3_spill] sm:$0xff] }
 0x698   : > { %6979 = vmatpush.bf16.msra.mxu2 %v6970_v46  ;;  %v7446_v46 = vsel %vm1263_vm0, %v9577_v39, 0 }
 0x699   : > { %v6175_v29 = vadd.f32 %v12132_v19, %v6139_v30  ;;  %v6682_v30 = vmul.f32 %v14185_v49, %v6650_v31  ;;  %7455 = vmatpush.bf16.msra.mxu0 %v7446_v46  ;;  %v5417_v46 = vadd.f32 %v12020_v6, %v12032_v15 }
 0x69b   : > { %vm6207_vm7 = vcmp.gt.f32.partialorder %v6175_v29, 0.0  ;;  %v6239_v52 = vmul.f32 0.1, %v6175_v29  ;;  %9505 = vmatmul.msk.bf16.gmra.mxu3 %vm1091_vm1, %v5984_v13  ;;  %v6714_v13 = vpack.c.bf16 %v6651_v59, %v6682_v30  ;;  %v5668_v59 = vadd.f32 %v12209_v1, %v12004_v24 }
 0x69d   : > { %v6271_v8 = vsel %vm6207_vm7, %v6175_v29, %v6239_v52  ;;  %9544 = vmatmul.msk.bf16.vlgmr.msra.gmra.mxu2 %vm1091_vm1, %v6714_v13  ;;  %v12259_v14 = vpop.f32.mrf.mxu2  ;;  %v9594_v13 = vld [vmem:[%s13708_s11 + $0x10] sm:$0xf] }
 0x69e   : > { %v6078_v62 = vpop.f32.mrf.mxu3  ;;  %v6297_v54 = vpack.c.bf16 %v6271_v8, %v6270_v33 }
 0x69f   : > { %v6140_v16 = vadd.f32 %v6078_v62, %v5886_v57  ;;  %v9560_v62 = vld [vmem:[%s13708_s11 + $0x8] sm:$0xf] }
 0x6a0   : > { %9516 = vmatmul.msk.bf16.gmra.mxu0 %vm3769_vm12, %v6297_v54  ;;  %v12253_v54 = vpop.f32.mrf.mxu1  ;;  %v7192_v57 = vsel %vm1263_vm0, %v9560_v62, 0  ;;  %v5890_v62 = vadd.f32 %v12212_v28, %v5668_v59 }
 0x6a1   : > { %v6176_v38 = vadd.f32 %v12132_v19, %v6140_v16  ;;  %v6732_v16 = vld [vmem:[#allocation2 + $0x10] sm:$0xff]  ;;  %7201 = vmatpush.bf16.msra.mxu3 %v7192_v57  ;;  %v12290_v57 = vpop.f32.mrf.mxu0 }
 0x6a2   : > { %v6763_v2 = vpack.c.bf16 %v6732_v16, %v6731_v58 }
 0x6a3   : > { %v6240_v29 = vmul.f32 0.1, %v6176_v38  ;;  %vm6208_vm8 = vcmp.gt.f32.partialorder %v6176_v38, 0.0 }
 0x6a4   : > { %9528 = vmatmul.msk.bf16.vlgmr.msrb.gmra.mxu1 %vm1091_vm1, %v6763_v2 }
 0x6a5   : > { %v6272_v33 = vsel %vm6208_vm8, %v6176_v38, %v6240_v29  ;;  %v5667_v38 = vadd.f32 %v12198_v26, %v5413_v0  ;;  %v12298_v0 = vld [vmem:[%s13707_s10] ss:$0 sm:$0xff] }
 0x6a6   : > { %v6080_v60 = vpop.f32.mrf.mxu3 }
 0x6a7   : > { %v6141_v40 = vadd.f32 %v6080_v60, %v5887_v45  ;;  %v5889_v47 = vadd.f32 %v12200_v17, %v5667_v38 }
 0x6a9   : > { %v6177_v37 = vadd.f32 %v12132_v19, %v6141_v40  ;;  %v12270_v40 = vpop.f32.mrf.mxu1 }
 0x6ab   : > { %vm6209_vm9 = vcmp.gt.f32.partialorder %v6177_v37, 0.0  ;;  %v6241_v52 = vmul.f32 0.1, %v6177_v37  ;;  %9506 = vmatmul.msk.bf16.gmra.mxu3 %vm1091_vm1, %v5985_v44  ;;  %v12272_v44 = vpop.f32.mrf.mxu2 }
 0x6ad   : > { %v6273_v8 = vsel %vm6209_vm9, %v6177_v37, %v6241_v52 }
 0x6ae   : > { %v6083_v4 = vpop.f32.mrf.mxu3  ;;  %v6298_v3 = vpack.c.bf16 %v6273_v8, %v6272_v33  ;;  %v7668_v33 = vsel %vm1263_vm0, %v9594_v13, 0  ;;  %v5415_v8 = vadd.f32 %v12000_v35, %v12012_v55 }
 0x6af   : > { %v6142_v45 = vadd.f32 %v6083_v4, %v5888_v34  ;;  %7677 = vmatpush.bf16.msra.mxu1 %v7668_v33 }
 0x6b0   : > { %9517 = vmatmul.msk.bf16.gmra.mxu0 %vm3769_vm12, %v6298_v3  ;;  %v5669_v1 = vadd.f32 %v12221_v43, %v5415_v8  ;;  %v7061_v8 = vld [vmem:[#allocation2 + $0x9] sm:$0xff] }
 0x6b1   : > { %v6178_v60 = vadd.f32 %v12132_v19, %v6142_v45  ;;  %v12285_v24 = vpop.f32.mrf.mxu1 }
 0x6b2   : > { %v5891_v58 = vadd.f32 %v12223_v32, %v5669_v1  ;;  %v5670_v32 = vadd.f32 %v12234_v23, %v12024_v27  ;;  %v5671_v23 = vadd.f32 %v12253_v54, %v5417_v46 }
 0x6b3   : > { %v6242_v30 = vmul.f32 0.1, %v6178_v60  ;;  %vm6210_vm10 = vcmp.gt.f32.partialorder %v6178_v60, 0.0  ;;  %v12288_v3 = vpop.f32.mrf.mxu2 }
 0x6b4   : > { %v5893_v6 = vadd.f32 %v12259_v14, %v5671_v23 }
 0x6b5   : > { %v6274_v29 = vsel %vm6210_vm10, %v6178_v60, %v6242_v30 }
 0x6b6   : > { %v6085_v63 = vpop.f32.mrf.mxu3 }
 0x6b7   : > { %v6143_v31 = vadd.f32 %v6085_v63, %v5889_v47 }
 0x6b9   : > { %v6179_v26 = vadd.f32 %v12132_v19, %v6143_v31  ;;  %v12300_v34 = vpop.f32.mrf.mxu1  ;;  %v5892_v31 = vadd.f32 %v12237_v22, %v5670_v32 }
 0x6bb   : > { %vm6211_vm11 = vcmp.gt.f32.partialorder %v6179_v26, 0.0  ;;  %v6243_v17 = vmul.f32 0.1, %v6179_v26  ;;  %v12304_v2 = vpop.f32.mrf.mxu2 }
 0x6bd   : > { %v6275_v37 = vsel %vm6211_vm11, %v6179_v26, %v6243_v17 }
 0x6be   : > { %v6088_v52 = vpop.f32.mrf.mxu3  ;;  %v6299_v21 = vpack.c.bf16 %v6275_v37, %v6274_v29 }
 0x6bf   : > { %v6144_v4 = vadd.f32 %v6088_v52, %v5890_v62 }
 0x6c0   : > { %9518 = vmatmul.msk.bf16.gmra.mxu0 %vm3769_vm12, %v6299_v21 }
 0x6c1   : > { %v6180_v16 = vadd.f32 %v12132_v19, %v6144_v4  ;;  %v12323_v59 = vpop.f32.mrf.mxu1 }
 0x6c3   : > { %v6244_v55 = vmul.f32 0.1, %v6180_v16  ;;  %vm6212_vm13 = vcmp.gt.f32.partialorder %v6180_v16, 0.0  ;;  %v12326_v13 = vpop.f32.mrf.mxu2 }
 0x6c5   : > { %v6276_v45 = vsel %vm6212_vm13, %v6180_v16, %v6244_v55 }
 0x6c6   : > { %v6090_v18 = vpop.f32.mrf.mxu3 }
 0x6c7   : > { %v6145_v35 = vadd.f32 %v6090_v18, %v5891_v58  ;;  %v14187_v58 = vld [vmem:[#allocation29_spill] sm:$0xff]  ;;  %v5672_v18 = vadd.f32 %v12270_v40, %v12044_v51 }
 0x6c9   : > { %v6181_v28 = vadd.f32 %v12132_v19, %v6145_v35 }
 0x6cb   : > { %vm6213_vm14 = vcmp.gt.f32.partialorder %v6181_v28, 0.0  ;;  %v6245_v43 = vmul.f32 0.1, %v6181_v28  ;;  %v12343_v40 = vpop.f32.mrf.mxu2 }
 0x6cd   : > { %v6277_v38 = vsel %vm6213_vm14, %v6181_v28, %v6245_v43  ;;  %v6377_v47 = vpop.f32.mrf.mxu0 }
 0x6ce   : > { %v6378_v60 = vadd.f32 %v12298_v0, %v6377_v47  ;;  %v6093_v39 = vpop.f32.mrf.mxu3  ;;  %v6300_v63 = vpack.c.bf16 %v6277_v38, %v6276_v45  ;;  %v5419_v47 = vadd.f32 %v12040_v25, %v12052_v20  ;;  %v14188_v25 = vld [vmem:[#allocation4_spill] sm:$0xff] }
 0x6cf   : > { %v6146_v26 = vadd.f32 %v6093_v39, %v5892_v31 }
 0x6d0   : > { %vm6457_vm15 = vcmp.gt.f32.partialorder %v6378_v60, 0.0  ;;  %v6489_v30 = vmul.f32 0.1, %v6378_v60  ;;  %9519 = vmatmul.msk.bf16.gmra.mxu0 %vm3769_vm12, %v6300_v63  ;;  %v12340_v63 = vpop.f32.mrf.mxu1  ;;  %v5673_v23 = vadd.f32 %v12285_v24, %v5419_v47 }
 0x6d1   : > { %v6182_v15 = vadd.f32 %v12132_v19, %v6146_v26 }
 0x6d2   : > { %v6521_v27 = vsel %vm6457_vm15, %v6378_v60, %v6489_v30  ;;  %v5894_v60 = vadd.f32 %v12272_v44, %v5672_v18 }
 0x6d3   : > { %v6553_v17 = vpack.c.bf16 %v6521_v27, %v6521_v27  ;;  %6618 = vst.msk [vmem:[#allocation2 + $0x18] sm:$0xff] %vm1091_vm1, %v6521_v27  ;;  %v6246_v21 = vmul.f32 0.1, %v6182_v15  ;;  %vm6214_vm4 = vcmp.gt.f32.partialorder %v6182_v15, 0.0 }
 0x6d5   : > { %6586 = vst.msk [vmem:[%s12315_s16] sm:$0xf] %vm6585_vm2, %v6553_v17  ;;  %v6379_v22 = vpop.f32.mrf.mxu0  ;;  %v6278_v35 = vsel %vm6214_vm4, %v6182_v15, %v6246_v21 }
 0x6d6   : > { %v6380_v29 = vadd.f32 %v12298_v0, %v6379_v22  ;;  %v6095_v37 = vpop.f32.mrf.mxu3 }
 0x6d7   : > { %v6147_v52 = vadd.f32 %v6095_v37, %v5893_v6 }
 0x6d8   : > { %vm6458_vm3 = vcmp.gt.f32.partialorder %v6380_v29, 0.0  ;;  %v6490_v54 = vmul.f32 0.1, %v6380_v29 }
 0x6d9   : > { %v6183_v33 = vadd.f32 %v12132_v19, %v6147_v52 }
 0x6da   : > { %v6522_v14 = vsel %vm6458_vm3, %v6380_v29, %v6490_v54  ;;  %v7062_v62 = vld [vmem:[#allocation2 + $0x11] sm:$0xff]  ;;  %v5895_v29 = vadd.f32 %v12288_v3, %v5673_v23  ;;  %v12364_v3 = vpop.f32.mrf.mxu1 }
 0x6db   : > { %v6554_v4 = vpack.c.bf16 %v6522_v14, %v6522_v14  ;;  %6619 = vst.msk [vmem:[#allocation2 + $0x20] sm:$0xff] %vm1091_vm1, %v6522_v14  ;;  %vm6215_vm5 = vcmp.gt.f32.partialorder %v6183_v33, 0.0  ;;  %v6247_v1 = vmul.f32 0.1, %v6183_v33  ;;  %v7094_v16 = vmul.f32 %v14187_v58, %v7062_v62  ;;  %v6652_v39 = vld [vmem:[#allocation2 + $0x17] sm:$0xff] }
 0x6dc   : > { %v6733_v30 = vld [vmem:[#allocation2 + $0x18] sm:$0xff]  ;;  %v6684_v20 = vmul.f32 %v14188_v25, %v6652_v39  ;;  %v12349_v44 = vmul.f32 %v14185_v49, %v6652_v39 }
 0x6dd   : > { %6587 = vst.msk [vmem:[%s12315_s16 + $0x4] sm:$0xf] %vm6585_vm2, %v6554_v4  ;;  %v6279_v55 = vsel %vm6215_vm5, %v6183_v33, %v6247_v1  ;;  %v6382_v28 = vpop.f32.mrf.mxu0  ;;  %v7125_v43 = vpack.c.bf16 %v7094_v16, %v7061_v8  ;;  %v12366_v1 = vpop.f32.mrf.mxu2 }
 0x6de   : > { %v6383_v32 = vadd.f32 %v12298_v0, %v6382_v28  ;;  %v6098_v45 = vpop.f32.mrf.mxu3  ;;  %v6301_v38 = vpack.c.bf16 %v6279_v55, %v6278_v35  ;;  %v14189_v35 = vld [vmem:[#allocation33_spill] sm:$0xff] }
 0x6df   : > { %9561 = vmatmul.msk.bf16.vlgmr.msra.gmra.mxu3 %vm1091_vm1, %v7125_v43  ;;  %v6148_v46 = vadd.f32 %v6098_v45, %v5894_v60  ;;  %v5674_v43 = vadd.f32 %v12300_v34, %v12064_v11 }
 0x6e0   : > { %vm6459_vm6 = vcmp.gt.f32.partialorder %v6383_v32, 0.0  ;;  %v6491_v51 = vmul.f32 0.1, %v6383_v32  ;;  %9520 = vmatmul.msk.bf16.gmra.mxu0 %vm3769_vm12, %v6301_v38 }
 0x6e1   : > { %v6184_v37 = vadd.f32 %v12132_v19, %v6148_v46  ;;  %v5421_v46 = vadd.f32 %v12060_v36, %v12069_v48 }
 0x6e2   : > { %v6523_v31 = vsel %vm6459_vm6, %v6383_v32, %v6491_v51  ;;  %v6734_v26 = vld [vmem:[#allocation2 + $0x20] sm:$0xff] }
 0x6e3   : > { %v12345_v27 = vld [vmem:[#allocation2 + $0x1f] sm:$0xff]  ;;  %v6555_v17 = vpack.c.bf16 %v6523_v31, %v6523_v31  ;;  %6620 = vst.msk [vmem:[#allocation2 + $0x28] sm:$0xff] %vm1091_vm1, %v6523_v31  ;;  %v6764_v6 = vpack.c.bf16 %v6734_v26, %v6733_v30  ;;  %v6248_v14 = vmul.f32 0.1, %v6184_v37  ;;  %vm6216_vm8 = vcmp.gt.f32.partialorder %v6184_v37, 0.0 }
 0x6e4   : > { %v6715_v15 = vpack.c.bf16 %v12345_v27, %v6684_v20  ;;  %v7379_v22 = vpack.c.bf16 %v12345_v27, %v12349_v44  ;;  %v7063_v28 = vld [vmem:[#allocation2 + $0x19] sm:$0xff]  ;;  %v5896_v31 = vadd.f32 %v12304_v2, %v5674_v43  ;;  %v5675_v48 = vadd.f32 %v12323_v59, %v5421_v46 }
 0x6e5   : > { %6588 = vst.msk [vmem:[%s12315_s16 + $0x8] sm:$0xf] %vm6585_vm2, %v6555_v17  ;;  %v6384_v52 = vpop.f32.mrf.mxu0  ;;  %9529 = vmatmul.msk.bf16.gmra.mxu1 %vm1091_vm1, %v6764_v6  ;;  %v6280_v32 = vsel %vm6216_vm8, %v6184_v37, %v6248_v14  ;;  %v14190_v6 = vld [vmem:[#allocation5_spill] sm:$0xff]  ;;  %v12388_v37 = vpop.f32.mrf.mxu1 }
 0x6e6   : > { %v6385_v24 = vadd.f32 %v12298_v0, %v6384_v52  ;;  %9545 = vmatmul.msk.bf16.gmra.mxu2 %vm1091_vm1, %v6715_v15  ;;  %v6100_v54 = vpop.f32.mrf.mxu3 }
 0x6e7   : > { %v6149_v21 = vadd.f32 %v6100_v54, %v5895_v29  ;;  %v5897_v54 = vadd.f32 %v12326_v13, %v5675_v48 }
 0x6e8   : > { %vm6460_vm7 = vcmp.gt.f32.partialorder %v6385_v24, 0.0  ;;  %v6492_v33 = vmul.f32 0.1, %v6385_v24 }
 0x6e9   : > { %v6185_v8 = vadd.f32 %v12132_v19, %v6149_v21  ;;  %v12394_v21 = vpop.f32.mrf.mxu2 }
 0x6ea   : > { %v6524_v62 = vsel %vm6460_vm7, %v6385_v24, %v6492_v33  ;;  %v7064_v4 = vld [vmem:[#allocation2 + $0x21] sm:$0xff] }
 0x6eb   : > { %v6556_v16 = vpack.c.bf16 %v6524_v62, %v6524_v62  ;;  %6621 = vst.msk [vmem:[#allocation2 + $0x30] sm:$0xff] %vm1091_vm1, %v6524_v62  ;;  %vm6217_vm9 = vcmp.gt.f32.partialorder %v6185_v8, 0.0  ;;  %v6249_v18 = vmul.f32 0.1, %v6185_v8  ;;  %v7096_v55 = vmul.f32 %v14189_v35, %v7064_v4  ;;  %v6654_v30 = vld [vmem:[#allocation2 + $0x27] sm:$0xff] }
 0x6ec   : > { %v6735_v20 = vld [vmem:[#allocation2 + $0x28] sm:$0xff]  ;;  %v6686_v15 = vmul.f32 %v14190_v6, %v6654_v30  ;;  %v12384_v36 = vmul.f32 %v14188_v25, %v6654_v30 }
 0x6ed   : > { %6589 = vst.msk [vmem:[%s12315_s16 + $0xc] sm:$0xf] %vm6585_vm2, %v6556_v16  ;;  %v6281_v45 = vsel %vm6217_vm9, %v6185_v8, %v6249_v18  ;;  %v6387_v38 = vpop.f32.mrf.mxu0  ;;  %v7126_v47 = vpack.c.bf16 %v7096_v55, %v7063_v28 }
 0x6ee   : > { %v6388_v60 = vadd.f32 %v12298_v0, %v6387_v38  ;;  %v6103_v39 = vpop.f32.mrf.mxu3  ;;  %v6302_v51 = vpack.c.bf16 %v6281_v45, %v6280_v32  ;;  %v14191_v32 = vld [vmem:[#allocation38_spill] sm:$0xff] }
 0x6ef   : > { %9562 = vmatmul.msk.bf16.gmra.mxu3 %vm1091_vm1, %v7126_v47  ;;  %v6150_v34 = vadd.f32 %v6103_v39, %v5896_v31  ;;  %v5676_v47 = vadd.f32 %v12340_v63, %v12078_v7  ;;  %v5423_v7 = vadd.f32 %v12074_v42, %v12083_v56  ;;  %v14194_v56 = vld [vmem:[#allocation6_spill] sm:$0xff] }
 0x6f0   : > { %vm6461_vm10 = vcmp.gt.f32.partialorder %v6388_v60, 0.0  ;;  %v6493_v11 = vmul.f32 0.1, %v6388_v60  ;;  %9521 = vmatmul.msk.bf16.gmra.mxu0 %vm3769_vm12, %v6302_v51 }
 0x6f1   : > { %v6186_v33 = vadd.f32 %v12132_v19, %v6150_v34  ;;  %v5898_v63 = vadd.f32 %v12343_v40, %v5676_v47 }
 0x6f2   : > { %v6525_v26 = vsel %vm6461_vm10, %v6388_v60, %v6493_v11  ;;  %v6736_v23 = vld [vmem:[#allocation2 + $0x30] sm:$0xff]  ;;  %v12412_v11 = vpop.f32.mrf.mxu1 }
 0x6f3   : > { %v12380_v17 = vld [vmem:[#allocation2 + $0x2f] sm:$0xff]  ;;  %v6557_v2 = vpack.c.bf16 %v6525_v26, %v6525_v26  ;;  %6622 = vst.msk [vmem:[#allocation2 + $0x38] sm:$0xff] %vm1091_vm1, %v6525_v26  ;;  %v6765_v29 = vpack.c.bf16 %v6736_v23, %v6735_v20  ;;  %v6250_v16 = vmul.f32 0.1, %v6186_v33  ;;  %vm6218_vm13 = vcmp.gt.f32.partialorder %v6186_v33, 0.0 }
 0x6f4   : > { %v6716_v52 = vpack.c.bf16 %v12380_v17, %v6686_v15  ;;  %v7380_v24 = vpack.c.bf16 %v12380_v17, %v12384_v36  ;;  %v7065_v60 = vld [vmem:[#allocation2 + $0x29] sm:$0xff]  ;;  %v12420_v15 = vpop.f32.mrf.mxu2 }
 0x6f5   : > { %6590 = vst.msk [vmem:[%s12315_s16 + $0x10] sm:$0xf] %vm6585_vm2, %v6557_v2  ;;  %v6389_v59 = vpop.f32.mrf.mxu0  ;;  %9530 = vmatmul.msk.bf16.gmra.mxu1 %vm1091_vm1, %v6765_v29  ;;  %v6282_v39 = vsel %vm6218_vm13, %v6186_v33, %v6250_v16  ;;  %v12415_v23 = vld [vmem:[#allocation2 + $0x29] sm:$0xff] }
 0x6f6   : > { %v6390_v14 = vadd.f32 %v12298_v0, %v6389_v59  ;;  %9546 = vmatmul.msk.bf16.gmra.mxu2 %vm1091_vm1, %v6716_v52  ;;  %v6105_v8 = vpop.f32.mrf.mxu3  ;;  %14193 = vst [vmem:[#allocation26_spill] sm:$0xff] %v12415_v23 }
 0x6f7   : > { %v6151_v62 = vadd.f32 %v6105_v8, %v5897_v54  ;;  %v5677_v8 = vadd.f32 %v12364_v3, %v5423_v7 }
 0x6f8   : > { %vm6462_vm11 = vcmp.gt.f32.partialorder %v6390_v14, 0.0  ;;  %v6494_v4 = vmul.f32 0.1, %v6390_v14 }
 0x6f9   : > { %v6187_v13 = vadd.f32 %v12132_v19, %v6151_v62 }
 0x6fa   : > { %v6526_v18 = vsel %vm6462_vm11, %v6390_v14, %v6494_v4  ;;  %v7066_v55 = vld [vmem:[#allocation2 + $0x31] sm:$0xff] }
 0x6fb   : > { %v6558_v28 = vpack.c.bf16 %v6526_v18, %v6526_v18  ;;  %6623 = vst.msk [vmem:[#allocation2 + $0x40] sm:$0xff] %vm1091_vm1, %v6526_v18  ;;  %vm6219_vm14 = vcmp.gt.f32.partialorder %v6187_v13, 0.0  ;;  %v6251_v43 = vmul.f32 0.1, %v6187_v13  ;;  %v7098_v45 = vmul.f32 %v14191_v32, %v7066_v55  ;;  %v7794_v38 = vld [vmem:[#allocation2 + $0x31] sm:$0xff] }
 0x6fc   : > { %v12410_v30 = vmul.f32 %v14187_v58, %v7794_v38  ;;  %v6656_v48 = vld [vmem:[#allocation2 + $0x37] sm:$0xff]  ;;  %v5899_v18 = vadd.f32 %v12366_v1, %v5677_v8  ;;  %v12444_v38 = vpop.f32.mrf.mxu1 }
 0x6fd   : > { %6591 = vst.msk [vmem:[%s12315_s16 + $0x14] sm:$0xf] %vm6585_vm2, %v6558_v28  ;;  %v6283_v51 = vsel %vm6219_vm14, %v6187_v13, %v6251_v43  ;;  %v6392_v46 = vpop.f32.mrf.mxu0  ;;  %v7127_v31 = vpack.c.bf16 %v7098_v45, %v7065_v60  ;;  %v6737_v33 = vld [vmem:[#allocation2 + $0x38] sm:$0xff]  ;;  %v6688_v40 = vmul.f32 %v14194_v56, %v6656_v48  ;;  %v12430_v14 = vmul.f32 %v14190_v6, %v6656_v48  ;;  %v12446_v60 = vpop.f32.mrf.mxu2 }
 0x6fe   : > { %14192 = vst [vmem:[#allocation76_spill] sm:$0xff] %v12410_v30  ;;  %v6393_v34 = vadd.f32 %v12298_v0, %v6392_v46  ;;  %v6108_v26 = vpop.f32.mrf.mxu3  ;;  %v6303_v20 = vpack.c.bf16 %v6283_v51, %v6282_v39 }
 0x6ff   : > { %9563 = vmatmul.msk.bf16.gmra.mxu3 %vm1091_vm1, %v7127_v31  ;;  %v6152_v52 = vadd.f32 %v6108_v26, %v5898_v63  ;;  %v14195_v26 = vld [vmem:[#allocation42_spill] sm:$0xff]  ;;  %v5678_v63 = vadd.f32 %v12388_v37, %v12090_v41 }
 0x700   : > { %vm6463_vm15 = vcmp.gt.f32.partialorder %v6393_v34, 0.0  ;;  %v6495_v29 = vmul.f32 0.1, %v6393_v34  ;;  %9522 = vmatmul.msk.bf16.gmra.mxu0 %vm3769_vm12, %v6303_v20 }
 0x701   : > { %v6188_v55 = vadd.f32 %v12132_v19, %v6152_v52  ;;  %v5900_v41 = vadd.f32 %v12394_v21, %v5678_v63 }
 0x702   : > { %v6527_v54 = vsel %vm6463_vm15, %v6393_v34, %v6495_v29  ;;  %v6738_v59 = vld [vmem:[#allocation2 + $0x40] sm:$0xff] }
 0x703   : > { %v12426_v42 = vld [vmem:[#allocation2 + $0x3f] sm:$0xff]  ;;  %v6559_v62 = vpack.c.bf16 %v6527_v54, %v6527_v54  ;;  %6624 = vst.msk [vmem:[#allocation2 + $0x48] sm:$0xff] %vm1091_vm1, %v6527_v54  ;;  %v6766_v4 = vpack.c.bf16 %v6738_v59, %v6737_v33  ;;  %v6252_v1 = vmul.f32 0.1, %v6188_v55  ;;  %vm6220_vm4 = vcmp.gt.f32.partialorder %v6188_v55, 0.0 }
 0x704   : > { %v6717_v16 = vpack.c.bf16 %v12426_v42, %v6688_v40  ;;  %v7067_v48 = vld [vmem:[#allocation2 + $0x39] sm:$0xff] }
 0x705   : > { %6592 = vst.msk [vmem:[%s12315_s16 + $0x18] sm:$0xf] %vm6585_vm2, %v6559_v62  ;;  %v6394_v28 = vpop.f32.mrf.mxu0  ;;  %9531 = vmatmul.msk.bf16.gmra.mxu1 %vm1091_vm1, %v6766_v4  ;;  %v6284_v29 = vsel %vm6220_vm4, %v6188_v55, %v6252_v1  ;;  %v12459_v4 = vld [vmem:[#allocation2 + $0x39] sm:$0xff] }
 0x706   : > { %v6395_v3 = vadd.f32 %v12298_v0, %v6394_v28  ;;  %9547 = vmatmul.msk.bf16.gmra.mxu2 %vm1091_vm1, %v6717_v16  ;;  %v6110_v43 = vpop.f32.mrf.mxu3  ;;  %14197 = vst [vmem:[#allocation81_spill] sm:$0xff] %v12459_v4  ;;  %v5425_v16 = vadd.f32 %v12092_v9, %v12097_v53  ;;  %v14198_v53 = vld [vmem:[#allocation7_spill] sm:$0xff] }
 0x707   : > { %v6153_v45 = vadd.f32 %v6110_v43, %v5899_v18 }
 0x708   : > { %vm6464_vm3 = vcmp.gt.f32.partialorder %v6395_v3, 0.0  ;;  %v6496_v47 = vmul.f32 0.1, %v6395_v3 }
 0x709   : > { %v6189_v39 = vadd.f32 %v12132_v19, %v6153_v45 }
 0x70a   : > { %v6528_v51 = vsel %vm6464_vm3, %v6395_v3, %v6496_v47  ;;  %v7068_v46 = vld [vmem:[#allocation2 + $0x41] sm:$0xff]  ;;  %v12468_v3 = vpop.f32.mrf.mxu1 }
 0x70b   : > { %v6560_v31 = vpack.c.bf16 %v6528_v51, %v6528_v51  ;;  %6625 = vst.msk [vmem:[#allocation2 + $0x50] sm:$0xff] %vm1091_vm1, %v6528_v51  ;;  %vm6221_vm5 = vcmp.gt.f32.partialorder %v6189_v39, 0.0  ;;  %v6253_v34 = vmul.f32 0.1, %v6189_v39  ;;  %v7100_v20 = vmul.f32 %v14195_v26, %v7068_v46  ;;  %v7796_v7 = vld [vmem:[#allocation2 + $0x41] sm:$0xff]  ;;  %v12477_v51 = vpop.f32.mrf.mxu2 }
 0x70c   : > { %v12456_v59 = vmul.f32 %v14189_v35, %v7796_v7  ;;  %v6658_v37 = vld [vmem:[#allocation2 + $0x47] sm:$0xff] }
 0x70d   : > { %6593 = vst.msk [vmem:[%s12315_s16 + $0x1c] sm:$0xf] %vm6585_vm2, %v6560_v31  ;;  %v6285_v52 = vsel %vm6221_vm5, %v6189_v39, %v6253_v34  ;;  %v6397_v54 = vpop.f32.mrf.mxu0  ;;  %v7128_v33 = vpack.c.bf16 %v7100_v20, %v7067_v48  ;;  %v6739_v45 = vld [vmem:[#allocation2 + $0x48] sm:$0xff]  ;;  %v6690_v21 = vmul.f32 %v14198_v53, %v6658_v37  ;;  %v12474_v1 = vmul.f32 %v14194_v56, %v6658_v37 }
 0x70e   : > { %14196 = vst [vmem:[#allocation43_spill] sm:$0xff] %v12456_v59  ;;  %v6398_v40 = vadd.f32 %v12298_v0, %v6397_v54  ;;  %v6113_v8 = vpop.f32.mrf.mxu3  ;;  %v6304_v62 = vpack.c.bf16 %v6285_v52, %v6284_v29  ;;  %v5679_v39 = vadd.f32 %v12412_v11, %v5425_v16 }
 0x70f   : > { %9564 = vmatmul.msk.bf16.gmra.mxu3 %vm1091_vm1, %v7128_v33  ;;  %v6154_v28 = vadd.f32 %v6113_v8, %v5900_v41  ;;  %v14199_v41 = vld [vmem:[#allocation47_spill] sm:$0xff] }
 0x710   : > { %vm6465_vm6 = vcmp.gt.f32.partialorder %v6398_v40, 0.0  ;;  %v6497_v55 = vmul.f32 0.1, %v6398_v40  ;;  %9523 = vmatmul.msk.bf16.gmra.mxu0 %vm3769_vm12, %v6304_v62  ;;  %v5901_v7 = vadd.f32 %v12420_v15, %v5679_v39 }
 0x711   : > { %v6190_v63 = vadd.f32 %v12132_v19, %v6154_v28  ;;  %v5680_v28 = vadd.f32 %v12444_v38, %v12103_v12  ;;  %v14202_v12 = vld [vmem:[#allocation71_spill] sm:$0xff] }
 0x712   : > { %v6529_v43 = vsel %vm6465_vm6, %v6398_v40, %v6497_v55  ;;  %v6740_v47 = vld [vmem:[#allocation2 + $0x50] sm:$0xff]  ;;  %v5427_v38 = vadd.f32 %v14202_v12, %v12110_v10  ;;  %v14203_v10 = vld [vmem:[#allocation8_spill] sm:$0xff] }
 0x713   : > { %v12470_v9 = vld [vmem:[#allocation2 + $0x4f] sm:$0xff]  ;;  %v6561_v46 = vpack.c.bf16 %v6529_v43, %v6529_v43  ;;  %6626 = vst.msk [vmem:[#allocation2 + $0x58] sm:$0xff] %vm1091_vm1, %v6529_v43  ;;  %v6767_v31 = vpack.c.bf16 %v6740_v47, %v6739_v45  ;;  %v6254_v33 = vmul.f32 0.1, %v6190_v63  ;;  %vm6222_vm8 = vcmp.gt.f32.partialorder %v6190_v63, 0.0  ;;  %v5647_v43 = vpop.f32.mrf.mxu1  ;;  %v12495_v47 = vpop.f32.mrf.mxu2 }
 0x714   : > { %v6718_v34 = vpack.c.bf16 %v12470_v9, %v6690_v21  ;;  %v7069_v45 = vld [vmem:[#allocation2 + $0x49] sm:$0xff] }
 0x715   : > { %6594 = vst.msk [vmem:[%s12315_s16 + $0x20] sm:$0xf] %vm6585_vm2, %v6561_v46  ;;  %v6399_v48 = vpop.f32.mrf.mxu0  ;;  %9532 = vmatmul.msk.bf16.gmra.mxu1 %vm1091_vm1, %v6767_v31  ;;  %v6286_v21 = vsel %vm6222_vm8, %v6190_v63, %v6254_v33 }
 0x716   : > { %v6400_v11 = vadd.f32 %v12298_v0, %v6399_v48  ;;  %9548 = vmatmul.msk.bf16.gmra.mxu2 %vm1091_vm1, %v6718_v34  ;;  %v6115_v29 = vpop.f32.mrf.mxu3 }
 0x717   : > { %v6155_v52 = vadd.f32 %v6115_v29, %v5901_v7  ;;  %v5902_v29 = vadd.f32 %v12446_v60, %v5680_v28 }
 0x718   : > { %vm6466_vm7 = vcmp.gt.f32.partialorder %v6400_v11, 0.0  ;;  %v6498_v54 = vmul.f32 0.1, %v6400_v11 }
 0x719   : > { %v6191_v40 = vadd.f32 %v12132_v19, %v6155_v52 }
 0x71a   : > { %v6530_v15 = vsel %vm6466_vm7, %v6400_v11, %v6498_v54  ;;  %v7070_v8 = vld [vmem:[#allocation2 + $0x51] sm:$0xff]  ;;  %v12503_v11 = vld [vmem:[#allocation2 + $0x49] sm:$0xff] }
 0x71b   : > { %v6562_v62 = vpack.c.bf16 %v6530_v15, %v6530_v15  ;;  %6627 = vst.msk [vmem:[#allocation2 + $0x60] sm:$0xff] %vm1091_vm1, %v6530_v15  ;;  %vm6223_vm9 = vcmp.gt.f32.partialorder %v6191_v40, 0.0  ;;  %v6255_v16 = vmul.f32 0.1, %v6191_v40  ;;  %v7102_v37 = vmul.f32 %v14199_v41, %v7070_v8  ;;  %v7798_v55 = vld [vmem:[#allocation2 + $0x51] sm:$0xff]  ;;  %v5871_v12 = vpop.f32.mrf.mxu2 }
 0x71c   : > { %v12500_v31 = vmul.f32 %v14191_v32, %v7798_v55  ;;  %14201 = vst [vmem:[#allocation48_spill] sm:$0xff] %v12503_v11  ;;  %v6660_v63 = vld [vmem:[#allocation2 + $0x57] sm:$0xff] }
 0x71d   : > { %6595 = vst.msk [vmem:[%s12315_s16 + $0x24] sm:$0xf] %vm6585_vm2, %v6562_v62  ;;  %v6287_v19 = vsel %vm6223_vm9, %v6191_v40, %v6255_v16  ;;  %v6402_v39 = vpop.f32.mrf.mxu0  ;;  %v7129_v46 = vpack.c.bf16 %v7102_v37, %v7069_v45  ;;  %v6741_v15 = vld [vmem:[#allocation2 + $0x58] sm:$0xff]  ;;  %v6692_v16 = vmul.f32 %v14203_v10, %v6660_v63  ;;  %v12516_v60 = vmul.f32 %v14198_v53, %v6660_v63 }
 0x71e   : > { %14200 = vst [vmem:[#allocation27_spill] sm:$0xff] %v12500_v31  ;;  %v6403_v34 = vadd.f32 %v12298_v0, %v6402_v39  ;;  %v6118_v7 = vpop.f32.mrf.mxu3  ;;  %v6305_v48 = vpack.c.bf16 %v6287_v19, %v6286_v21  ;;  %v5681_v37 = vadd.f32 %v12468_v3, %v5427_v38  ;;  %v12529_v39 = vld [vmem:[%s13705_s8] ss:$0 sm:$0xff] }
 0x71f   : > { %9565 = vmatmul.msk.bf16.gmra.mxu3 %vm1091_vm1, %v7129_v46  ;;  %v6156_v33 = vadd.f32 %v6118_v7, %v5902_v29 }
 0x720   : > { %vm6467_vm10 = vcmp.gt.f32.partialorder %v6403_v34, 0.0  ;;  %v6499_v54 = vmul.f32 0.1, %v6403_v34  ;;  %9524 = vmatmul.msk.bf16.gmra.mxu0 %vm3769_vm12, %v6305_v48  ;;  %v5903_v19 = vadd.f32 %v12477_v51, %v5681_v37  ;;  %v5649_v48 = vpop.f32.mrf.mxu1 }
 0x721   : > { %v6192_v3 = vadd.f32 %v12529_v39, %v6156_v33 }
 0x722   : > { %v6531_v40 = vsel %vm6467_vm10, %v6403_v34, %v6499_v54  ;;  %v6742_v8 = vld [vmem:[#allocation2 + $0x60] sm:$0xff] }
 0x723   : > { %v12512_v62 = vld [vmem:[#allocation2 + $0x5f] sm:$0xff]  ;;  %v6563_v55 = vpack.c.bf16 %v6531_v40, %v6531_v40  ;;  %6628 = vst.msk [vmem:[#allocation2 + $0x68] sm:$0xff] %vm1091_vm1, %v6531_v40  ;;  %v6768_v28 = vpack.c.bf16 %v6742_v8, %v6741_v15  ;;  %v6256_v29 = vmul.f32 0.1, %v6192_v3  ;;  %vm6224_vm13 = vcmp.gt.f32.partialorder %v6192_v3, 0.0 }
 0x724   : > { %v6719_v45 = vpack.c.bf16 %v12512_v62, %v6692_v16  ;;  %v14204_v8 = vld [vmem:[#allocation53_spill] sm:$0xff] }
 0x725   : > { %6596 = vst.msk [vmem:[%s12315_s16 + $0x28] sm:$0xf] %vm6585_vm2, %v6563_v55  ;;  %v6404_v46 = vpop.f32.mrf.mxu0  ;;  %9533 = vmatmul.msk.bf16.gmra.mxu1 %vm1091_vm1, %v6768_v28  ;;  %v14205_v55 = vld [vmem:[#allocation28_spill] sm:$0xff] }
 0x726   : > { %v6405_v34 = vadd.f32 %v12298_v0, %v6404_v46  ;;  %9549 = vmatmul.msk.bf16.gmra.mxu2 %vm1091_vm1, %v6719_v45  ;;  %v6120_v7 = vpop.f32.mrf.mxu3  ;;  %v5682_v28 = vadd.f32 %v5647_v43, %v14205_v55  ;;  %v7071_v45 = vld [vmem:[#allocation2 + $0x59] sm:$0xff] }
 0x727   : > { %v6157_v51 = vadd.f32 %v6120_v7, %v5903_v19  ;;  %v6288_v19 = vsel %vm6224_vm13, %v6192_v3, %v6256_v29  ;;  %v12545_v18 = vld [vmem:[#allocation2 + $0x59] sm:$0xff] }
 0x728   : > { %vm6468_vm11 = vcmp.gt.f32.partialorder %v6405_v34, 0.0  ;;  %v6500_v38 = vmul.f32 0.1, %v6405_v34  ;;  %14207 = vst [vmem:[#allocation56_spill] sm:$0xff] %v12545_v18  ;;  %v5904_v43 = vadd.f32 %v12495_v47, %v5682_v28  ;;  %v6841_v29 = vpop.f32.mrf.mxu1  ;;  %v14209_v28 = vld [vmem:[#allocation9_spill] sm:$0xff] }
 0x729   : > { %v6193_v63 = vadd.f32 %v12529_v39, %v6157_v51 }
 0x72a   : > { %v6532_v54 = vsel %vm6468_vm11, %v6405_v34, %v6500_v38  ;;  %v7072_v33 = vld [vmem:[#allocation2 + $0x61] sm:$0xff] }
 0x72b   : > { %v6564_v40 = vpack.c.bf16 %v6532_v54, %v6532_v54  ;;  %6629 = vst.msk [vmem:[#allocation2 + $0x70] sm:$0xff] %vm1091_vm1, %v6532_v54  ;;  %vm6225_vm14 = vcmp.gt.f32.partialorder %v6193_v63, 0.0  ;;  %v6257_v15 = vmul.f32 0.1, %v6193_v63  ;;  %v7104_v16 = vmul.f32 %v14204_v8, %v7072_v33  ;;  %v7800_v37 = vld [vmem:[#allocation2 + $0x61] sm:$0xff]  ;;  %v14208_v33 = vld [vmem:[#allocation36_spill] sm:$0xff] }
 0x72c   : > { %v12542_v34 = vmul.f32 %v14195_v26, %v7800_v37  ;;  %v5429_v2 = vadd.f32 %v12290_v57, %v14208_v33  ;;  %v6662_v3 = vld [vmem:[#allocation2 + $0x67] sm:$0xff] }
 0x72d   : > { %6597 = vst.msk [vmem:[%s12315_s16 + $0x2c] sm:$0xf] %vm6585_vm2, %v6564_v40  ;;  %v6289_v46 = vsel %vm6225_vm14, %v6193_v63, %v6257_v15  ;;  %v6407_v7 = vpop.f32.mrf.mxu0  ;;  %v7130_v51 = vpack.c.bf16 %v7104_v16, %v7071_v45  ;;  %v6981_v63 = vpop.f32.mrf.mxu2  ;;  %v6743_v57 = vld [vmem:[#allocation2 + $0x68] sm:$0xff] }
 0x72e   : > { %14206 = vst [vmem:[#allocation84_spill] sm:$0xff] %v12542_v34  ;;  %v6408_v38 = vadd.f32 %v12298_v0, %v6407_v7  ;;  %v6123_v54 = vpop.f32.mrf.mxu3  ;;  %v6306_v52 = vpack.c.bf16 %v6289_v46, %v6288_v19  ;;  %v12554_v16 = vadd.f32 %v6981_v63, %v6841_v29  ;;  %v6694_v19 = vmul.f32 %v14209_v28, %v6662_v3 }
 0x72f   : > { %9566 = vmatmul.msk.bf16.gmra.mxu3 %vm1091_vm1, %v7130_v51  ;;  %v6158_v37 = vadd.f32 %v6123_v54, %v5904_v43  ;;  %v12560_v46 = vmul.f32 %v14203_v10, %v6662_v3  ;;  %v5683_v7 = vadd.f32 %v5649_v48, %v5429_v2 }
 0x730   : > { %vm6469_vm15 = vcmp.gt.f32.partialorder %v6408_v38, 0.0  ;;  %v6501_v15 = vmul.f32 0.1, %v6408_v38  ;;  %9525 = vmatmul.msk.bf16.gmra.mxu0 %vm3769_vm12, %v6306_v52 }
 0x731   : > { %v6194_v43 = vadd.f32 %v12529_v39, %v6158_v37 }
 0x732   : > { %v6533_v55 = vsel %vm6469_vm15, %v6408_v38, %v6501_v15  ;;  %v6744_v45 = vld [vmem:[#allocation2 + $0x70] sm:$0xff]  ;;  %v5905_v38 = vadd.f32 %v5871_v12, %v5683_v7 }
 0x733   : > { %v12556_v47 = vld [vmem:[#allocation2 + $0x6f] sm:$0xff]  ;;  %v6565_v51 = vpack.c.bf16 %v6533_v55, %v6533_v55  ;;  %6630 = vst.msk [vmem:[#allocation2 + $0x78] sm:$0xff] %vm1091_vm1, %v6533_v55  ;;  %v6769_v33 = vpack.c.bf16 %v6744_v45, %v6743_v57  ;;  %v6258_v15 = vmul.f32 0.1, %v6194_v43  ;;  %vm6226_vm4 = vcmp.gt.f32.partialorder %v6194_v43, 0.0 }
 0x734   : > { %v6720_v52 = vpack.c.bf16 %v12556_v47, %v6694_v19  ;;  %v14210_v19 = vld [vmem:[#allocation59_spill] sm:$0xff] }
 0x735   : > { %6598 = vst.msk [vmem:[%s12315_s16 + $0x30] sm:$0xf] %vm6585_vm2, %v6565_v51  ;;  %v6409_v29 = vpop.f32.mrf.mxu0  ;;  %9534 = vmatmul.msk.bf16.gmra.mxu1 %vm1091_vm1, %v6769_v33  ;;  %v7073_v33 = vld [vmem:[#allocation2 + $0x69] sm:$0xff] }
 0x736   : > { %v6410_v3 = vadd.f32 %v12298_v0, %v6409_v29  ;;  %9550 = vmatmul.msk.bf16.gmra.mxu2 %vm1091_vm1, %v6720_v52  ;;  %v6125_v2 = vpop.f32.mrf.mxu3  ;;  %v6290_v52 = vsel %vm6226_vm4, %v6194_v43, %v6258_v15 }
 0x737   : > { %v6159_v48 = vadd.f32 %v6125_v2, %v5905_v38 }
 0x738   : > { %vm6470_vm3 = vcmp.gt.f32.partialorder %v6410_v3, 0.0  ;;  %v6502_v63 = vmul.f32 0.1, %v6410_v3 }
 0x739   : > { %v6195_v55 = vadd.f32 %v12529_v39, %v6159_v48 }
 0x73a   : > { %v6534_v12 = vsel %vm6470_vm3, %v6410_v3, %v6502_v63  ;;  %v7074_v57 = vld [vmem:[#allocation2 + $0x71] sm:$0xff] }
 0x73b   : > { %v6566_v45 = vpack.c.bf16 %v6534_v12, %v6534_v12  ;;  %6631 = vst.msk [vmem:[#allocation2 + $0x80] sm:$0xff] %vm1091_vm1, %v6534_v12  ;;  %vm6227_vm5 = vcmp.gt.f32.partialorder %v6195_v55, 0.0  ;;  %v6259_v37 = vmul.f32 0.1, %v6195_v55  ;;  %v7106_v7 = vmul.f32 %v14210_v19, %v7074_v57  ;;  %v7802_v51 = vld [vmem:[#allocation2 + $0x71] sm:$0xff]  ;;  %v12581_v12 = vld [vmem:[#allocation2 + $0x69] sm:$0xff] }
 0x73c   : > { %v12578_v39 = vmul.f32 %v14199_v41, %v7802_v51  ;;  %v6664_v63 = vld [vmem:[#allocation2 + $0x77] sm:$0xff]  ;;  %14212 = vst [vmem:[#allocation64_spill] sm:$0xff] %v12581_v12 }
 0x73d   : > { %6599 = vst.msk [vmem:[%s12315_s16 + $0x34] sm:$0xf] %vm6585_vm2, %v6566_v45  ;;  %v6291_v38 = vsel %vm6227_vm5, %v6195_v55, %v6259_v37  ;;  %v6412_v29 = vpop.f32.mrf.mxu0  ;;  %v7131_v2 = vpack.c.bf16 %v7106_v7, %v7073_v33  ;;  %v14213_v55 = vld [vmem:[#allocation10_spill] sm:$0xff]  ;;  %v12589_v45 = vmul.f32 %v14209_v28, %v6664_v63  ;;  %v6745_v7 = vld [vmem:[#allocation2 + $0x78] sm:$0xff] }
 0x73e   : > { %14211 = vst [vmem:[#allocation87_spill] sm:$0xff] %v12578_v39  ;;  %v6413_v3 = vadd.f32 %v12298_v0, %v6412_v29  ;;  %v6307_v48 = vpack.c.bf16 %v6291_v38, %v6290_v52  ;;  %v6696_v57 = vmul.f32 %v14213_v55, %v6664_v63 }
 0x73f   : > { %9567 = vmatmul.msk.bf16.gmra.mxu3 %vm1091_vm1, %v7131_v2 }
 0x740   : > { %vm6471_vm6 = vcmp.gt.f32.partialorder %v6413_v3, 0.0  ;;  %v6503_v15 = vmul.f32 0.1, %v6413_v3  ;;  %9526 = vmatmul.msk.bf16.gmra.mxu0 %vm3769_vm12, %v6307_v48 }
 0x742   : > { %v6535_v37 = vsel %vm6471_vm6, %v6413_v3, %v6503_v15  ;;  %v6746_v51 = vld [vmem:[#allocation2 + $0x80] sm:$0xff] }
 0x743   : > { %v12591_v33 = vld [vmem:[#allocation2 + $0x7f] sm:$0xff]  ;;  %v6567_v52 = vpack.c.bf16 %v6535_v37, %v6535_v37  ;;  %6632 = vst.msk [vmem:[#allocation2 + $0x88] sm:$0xff] %vm1091_vm1, %v6535_v37  ;;  %v6770_v38 = vpack.c.bf16 %v6746_v51, %v6745_v7 }
 0x744   : > { %v6721_v29 = vpack.c.bf16 %v12591_v33, %v6696_v57  ;;  %v14214_v57 = vld [vmem:[#allocation67_spill] sm:$0xff]  ;;  %v7075_v40 = vld [vmem:[#allocation2 + $0x79] sm:$0xff] }
 0x745   : > { %6600 = vst.msk [vmem:[%s12315_s16 + $0x38] sm:$0xf] %vm6585_vm2, %v6567_v52  ;;  %v6414_v48 = vpop.f32.mrf.mxu0  ;;  %9535 = vmatmul.msk.bf16.gmra.mxu1 %vm1091_vm1, %v6770_v38  ;;  %v12609_v2 = vld [vmem:[#allocation2 + $0x79] sm:$0xff] }
 0x746   : > { %v6415_v3 = vadd.f32 %v12298_v0, %v6414_v48  ;;  %9551 = vmatmul.msk.bf16.gmra.mxu2 %vm1091_vm1, %v6721_v29  ;;  %14216 = vst [vmem:[#allocation74_spill] sm:$0xff] %v12609_v2 }
 0x748   : > { %vm6472_vm12 = vcmp.gt.f32.partialorder %v6415_v3, 0.0  ;;  %v6504_v63 = vmul.f32 0.1, %v6415_v3 }
 0x74a   : > { %v6536_v15 = vsel %vm6472_vm12, %v6415_v3, %v6504_v63  ;;  %v7076_v37 = vld [vmem:[#allocation2 + $0x81] sm:$0xff] }
 0x74b   : > { %v6568_v7 = vpack.c.bf16 %v6536_v15, %v6536_v15  ;;  %6633 = vst.msk [vmem:[#allocation2 + $0x90] sm:$0xff] %vm1091_vm1, %v6536_v15  ;;  %v7108_v51 = vmul.f32 %v14214_v57, %v7076_v37  ;;  %v7804_v43 = vld [vmem:[#allocation2 + $0x81] sm:$0xff] }
 0x74c   : > { %v12605_v52 = vmul.f32 %v14204_v8, %v7804_v43  ;;  %v6666_v3 = vld [vmem:[#allocation2 + $0x87] sm:$0xff]  ;;  %v14217_v43 = vld [vmem:[#allocation11_spill] sm:$0xff] }
 0x74d   : > { %6601 = vst.msk [vmem:[%s12315_s16 + $0x3c] sm:$0xf] %vm6585_vm2, %v6568_v7  ;;  %v6417_v38 = vpop.f32.mrf.mxu0  ;;  %v7132_v48 = vpack.c.bf16 %v7108_v51, %v7075_v40  ;;  %v6698_v40 = vmul.f32 %v14217_v43, %v6666_v3  ;;  %v12621_v37 = vmul.f32 %v14213_v55, %v6666_v3  ;;  %v6747_v51 = vld [vmem:[#allocation2 + $0x88] sm:$0xff]  ;;  %v12634_v3 = vpop.f32.mrf.mxu1 }
 0x74e   : > { %14215 = vst [vmem:[#allocation50_spill] sm:$0xff] %v12605_v52  ;;  %v6418_v29 = vadd.f32 %v12298_v0, %v6417_v38 }
 0x74f   : > { %9568 = vmatmul.msk.bf16.gmra.mxu3 %vm1091_vm1, %v7132_v48 }
 0x750   : > { %vm6473_vm7 = vcmp.gt.f32.partialorder %v6418_v29, 0.0  ;;  %v6505_v15 = vmul.f32 0.1, %v6418_v29  ;;  %9578 = vmatmul.msk.bf16.vlgmr.msra.gmra.mxu0 %vm1091_vm1, %v7379_v22 }
 0x752   : > { %v6537_v7 = vsel %vm6473_vm7, %v6418_v29, %v6505_v15  ;;  %v6748_v38 = vld [vmem:[#allocation2 + $0x90] sm:$0xff] }
 0x753   : > { %v12623_v54 = vld [vmem:[#allocation2 + $0x8f] sm:$0xff]  ;;  %v6569_v63 = vpack.c.bf16 %v6537_v7, %v6537_v7  ;;  %6634 = vst.msk [vmem:[#allocation2 + $0x98] sm:$0xff] %vm1091_vm1, %v6537_v7  ;;  %v6771_v48 = vpack.c.bf16 %v6748_v38, %v6747_v51  ;;  %v14218_v51 = vld [vmem:[#allocation73_spill] sm:$0xff] }
 0x754   : > { %v6722_v21 = vpack.c.bf16 %v12623_v54, %v6698_v40  ;;  %v7077_v27 = vld [vmem:[#allocation2 + $0x89] sm:$0xff] }
 0x755   : > { %6602 = vst.msk [vmem:[%s12315_s16 + $0x40] sm:$0xf] %vm6585_vm2, %v6569_v63  ;;  %v6419_v44 = vpop.f32.mrf.mxu0  ;;  %9536 = vmatmul.msk.bf16.gmra.mxu1 %vm1091_vm1, %v6771_v48 }
 0x756   : > { %v6420_v22 = vadd.f32 %v12298_v0, %v6419_v44  ;;  %9552 = vmatmul.msk.bf16.gmra.mxu2 %vm1091_vm1, %v6722_v21  ;;  %v12643_v44 = vld [vmem:[#allocation2 + $0x89] sm:$0xff] }
 0x757   : > { %14220 = vst [vmem:[#allocation79_spill] sm:$0xff] %v12643_v44 }
 0x758   : > { %vm6474_vm8 = vcmp.gt.f32.partialorder %v6420_v22, 0.0  ;;  %v6506_v29 = vmul.f32 0.1, %v6420_v22 }
 0x75a   : > { %v6538_v15 = vsel %vm6474_vm8, %v6420_v22, %v6506_v29  ;;  %v7078_v7 = vld [vmem:[#allocation2 + $0x91] sm:$0xff] }
 0x75b   : > { %v6570_v40 = vpack.c.bf16 %v6538_v15, %v6538_v15  ;;  %6635 = vst.msk [vmem:[#allocation2 + $0xa0] sm:$0xff] %vm1091_vm1, %v6538_v15  ;;  %v7110_v38 = vmul.f32 %v14218_v51, %v7078_v7  ;;  %v7806_v63 = vld [vmem:[#allocation2 + $0x91] sm:$0xff]  ;;  %v12653_v7 = vpop.f32.mrf.mxu2 }
 0x75c   : > { %v12639_v20 = vmul.f32 %v14210_v19, %v7806_v63  ;;  %v6668_v22 = vld [vmem:[#allocation2 + $0x97] sm:$0xff] }
 0x75d   : > { %6603 = vst.msk [vmem:[%s12315_s16 + $0x44] sm:$0xf] %vm6585_vm2, %v6570_v40  ;;  %v6422_v48 = vpop.f32.mrf.mxu0  ;;  %v7133_v21 = vpack.c.bf16 %v7110_v38, %v7077_v27  ;;  %v14221_v27 = vld [vmem:[#allocation12_spill] sm:$0xff] }
 0x75e   : > { %14219 = vst [vmem:[#allocation21_spill] sm:$0xff] %v12639_v20  ;;  %v6423_v13 = vadd.f32 %v12298_v0, %v6422_v48  ;;  %v6700_v40 = vmul.f32 %v14221_v27, %v6668_v22  ;;  %v6749_v2 = vld [vmem:[#allocation2 + $0x98] sm:$0xff] }
 0x75f   : > { %9569 = vmatmul.msk.bf16.gmra.mxu3 %vm1091_vm1, %v7133_v21  ;;  %v12659_v21 = vmul.f32 %v14217_v43, %v6668_v22 }
 0x760   : > { %vm6475_vm9 = vcmp.gt.f32.partialorder %v6423_v13, 0.0  ;;  %v6507_v15 = vmul.f32 0.1, %v6423_v13  ;;  %9579 = vmatmul.msk.bf16.gmra.mxu0 %vm1091_vm1, %v7380_v24 }
 0x762   : > { %v6539_v38 = vsel %vm6475_vm9, %v6423_v13, %v6507_v15  ;;  %v6846_v63 = vpop.f32.mrf.mxu1  ;;  %v7203_v48 = vpop.f32.mrf.mxu3  ;;  %v6750_v52 = vld [vmem:[#allocation2 + $0xa0] sm:$0xff]  ;;  %vm8939_vm9 = vcmask 125952  }
 0x763   : > { %v12656_v29 = vld [vmem:[#allocation2 + $0x9f] sm:$0xff]  ;;  %v6571_v44 = vpack.c.bf16 %v6539_v38, %v6539_v38  ;;  %6636 = vst.msk [vmem:[#allocation2 + $0xa8] sm:$0xff] %vm1091_vm1, %v6539_v38  ;;  %v12663_v17 = vadd.f32 %v7203_v48, %v12554_v16  ;;  %v6772_v36 = vpack.c.bf16 %v6750_v52, %v6749_v2 }
 0x764   : > { %v6723_v24 = vpack.c.bf16 %v12656_v29, %v6700_v40  ;;  %v7079_v39 = vld [vmem:[#allocation2 + $0x99] sm:$0xff] }
 0x765   : > { %6604 = vst.msk [vmem:[%s12315_s16 + $0x48] sm:$0xf] %vm6585_vm2, %v6571_v44  ;;  %v6424_v15 = vpop.f32.mrf.mxu0  ;;  %9537 = vmatmul.msk.bf16.gmra.mxu1 %vm1091_vm1, %v6772_v36  ;;  %v14222_v44 = vld [vmem:[#allocation77_spill] sm:$0xff] }
 0x766   : > { %v6425_v22 = vadd.f32 %v12298_v0, %v6424_v15  ;;  %9553 = vmatmul.msk.bf16.gmra.mxu2 %vm1091_vm1, %v6723_v24 }
 0x768   : > { %vm6476_vm10 = vcmp.gt.f32.partialorder %v6425_v22, 0.0  ;;  %v6508_v38 = vmul.f32 0.1, %v6425_v22 }
 0x769   : > { %v6986_v16 = vpop.f32.mrf.mxu2 }
 0x76a   : > { %v6540_v48 = vsel %vm6476_vm10, %v6425_v22, %v6508_v38  ;;  %v6987_v2 = vadd.f32 %v6986_v16, %v6846_v63  ;;  %v6848_v52 = vpop.f32.mrf.mxu1  ;;  %v12673_v40 = vpop.f32.mrf.mxu3  ;;  %v7080_v20 = vld [vmem:[#allocation2 + $0xa1] sm:$0xff]  ;;  %v12682_v22 = vld [vmem:[#allocation2 + $0x99] sm:$0xff] }
 0x76b   : > { %v6572_v13 = vpack.c.bf16 %v6540_v48, %v6540_v48  ;;  %6637 = vst.msk [vmem:[#allocation2 + $0xb0] sm:$0xff] %vm1091_vm1, %v6540_v48  ;;  %v7112_v12 = vmul.f32 %v14222_v44, %v7080_v20  ;;  %v7808_v36 = vld [vmem:[#allocation2 + $0xa1] sm:$0xff]  ;;  %v12687_v63 = vld [vmem:[%s13707_s10] ss:$0 sm:$0xff] }
 0x76c   : > { %v12678_v0 = vmul.f32 %v14214_v57, %v7808_v36  ;;  %14224 = vst [vmem:[#allocation82_spill] sm:$0xff] %v12682_v22  ;;  %v6670_v16 = vld [vmem:[#allocation2 + $0xa7] sm:$0xff] }
 0x76d   : > { %6605 = vst.msk [vmem:[%s12315_s16 + $0x4c] sm:$0xf] %vm6585_vm2, %v6572_v13  ;;  %v6427_v24 = vpop.f32.mrf.mxu0  ;;  %v7134_v15 = vpack.c.bf16 %v7112_v12, %v7079_v39  ;;  %v14225_v39 = vpack.c.bf16 %v12426_v42, %v12430_v14  ;;  %v14226_v13 = vld [vmem:[#allocation13_spill] sm:$0xff]  ;;  %v6751_v31 = vld [vmem:[#allocation2 + $0xa8] sm:$0xff] }
 0x76e   : > { %14223 = vst [vmem:[#allocation70_spill] sm:$0xff] %v12678_v0  ;;  %v6428_v38 = vadd.f32 %v12687_v63, %v6427_v24  ;;  %v6702_v36 = vmul.f32 %v14226_v13, %v6670_v16 }
 0x76f   : > { %9570 = vmatmul.msk.bf16.gmra.mxu3 %vm1091_vm1, %v7134_v15  ;;  %v12701_v15 = vmul.f32 %v14221_v27, %v6670_v16 }
 0x770   : > { %vm6477_vm11 = vcmp.gt.f32.partialorder %v6428_v38, 0.0  ;;  %v6509_v48 = vmul.f32 0.1, %v6428_v38  ;;  %9580 = vmatmul.msk.bf16.gmra.mxu0 %vm1091_vm1, %v14225_v39 }
 0x771   : > { %v6988_v12 = vpop.f32.mrf.mxu2 }
 0x772   : > { %v6541_v18 = vsel %vm6477_vm11, %v6428_v38, %v6509_v48  ;;  %v6989_v34 = vadd.f32 %v6988_v12, %v6848_v52  ;;  %v6851_v24 = vpop.f32.mrf.mxu1  ;;  %v7208_v11 = vpop.f32.mrf.mxu3  ;;  %v6752_v4 = vld [vmem:[#allocation2 + $0xb0] sm:$0xff]  ;;  %v14227_v52 = vld [vmem:[#allocation80_spill] sm:$0xff] }
 0x773   : > { %v12698_v20 = vld [vmem:[#allocation2 + $0xaf] sm:$0xff]  ;;  %v6573_v22 = vpack.c.bf16 %v6541_v18, %v6541_v18  ;;  %6638 = vst.msk [vmem:[#allocation2 + $0xb8] sm:$0xff] %vm1091_vm1, %v6541_v18  ;;  %v12704_v42 = vadd.f32 %v7208_v11, %v6987_v2  ;;  %v6773_v14 = vpack.c.bf16 %v6752_v4, %v6751_v31 }
 0x774   : > { %v6724_v39 = vpack.c.bf16 %v12698_v20, %v6702_v36 }
 0x775   : > { %6606 = vst.msk [vmem:[%s12315_s16 + $0x50] sm:$0xf] %vm6585_vm2, %v6573_v22  ;;  %v6429_v38 = vpop.f32.mrf.mxu0  ;;  %9538 = vmatmul.msk.bf16.gmra.mxu1 %vm1091_vm1, %v6773_v14 }
 0x776   : > { %v6430_v48 = vadd.f32 %v12687_v63, %v6429_v38  ;;  %9554 = vmatmul.msk.bf16.gmra.mxu2 %vm1091_vm1, %v6724_v39  ;;  %v7081_v38 = vld [vmem:[#allocation2 + $0xa9] sm:$0xff] }
 0x778   : > { %vm6478_vm13 = vcmp.gt.f32.partialorder %v6430_v48, 0.0  ;;  %v6510_v18 = vmul.f32 0.1, %v6430_v48 }
 0x779   : > { %v6991_v11 = vpop.f32.mrf.mxu2 }
 0x77a   : > { %v6542_v2 = vsel %vm6478_vm13, %v6430_v48, %v6510_v18  ;;  %v6992_v4 = vadd.f32 %v6991_v11, %v6851_v24  ;;  %v6853_v31 = vpop.f32.mrf.mxu1  ;;  %v7210_v16 = vpop.f32.mrf.mxu3  ;;  %v7082_v12 = vld [vmem:[#allocation2 + $0xb1] sm:$0xff]  ;;  %v12723_v24 = vld [vmem:[#allocation2 + $0xa9] sm:$0xff] }
 0x77b   : > { %v6574_v36 = vpack.c.bf16 %v6542_v2, %v6542_v2  ;;  %6639 = vst.msk [vmem:[#allocation2 + $0xc0] sm:$0xff] %vm1091_vm1, %v6542_v2  ;;  %v12715_v22 = vadd.f32 %v7210_v16, %v6989_v34  ;;  %v7114_v14 = vmul.f32 %v14227_v52, %v7082_v12  ;;  %v7810_v0 = vld [vmem:[#allocation2 + $0xb1] sm:$0xff]  ;;  %v14231_v12 = vld [vmem:[#allocation14_spill] sm:$0xff] }
 0x77c   : > { %v12719_v39 = vmul.f32 %v14218_v51, %v7810_v0  ;;  %14229 = vst [vmem:[#allocation32_spill] sm:$0xff] %v12723_v24  ;;  %v6672_v11 = vld [vmem:[#allocation2 + $0xb7] sm:$0xff]  ;;  %v14230_v0 = vpack.c.bf16 %v12470_v9, %v12474_v1 }
 0x77d   : > { %6607 = vst.msk [vmem:[%s12315_s16 + $0x54] sm:$0xf] %vm6585_vm2, %v6574_v36  ;;  %v6432_v59 = vpop.f32.mrf.mxu0  ;;  %v7135_v48 = vpack.c.bf16 %v7114_v14, %v7081_v38  ;;  %v6704_v36 = vmul.f32 %v14231_v12, %v6672_v11  ;;  %v6753_v30 = vld [vmem:[#allocation2 + $0xb8] sm:$0xff] }
 0x77e   : > { %14228 = vst [vmem:[#allocation34_spill] sm:$0xff] %v12719_v39  ;;  %v6433_v18 = vadd.f32 %v12687_v63, %v6432_v59 }
 0x77f   : > { %9571 = vmatmul.msk.bf16.gmra.mxu3 %vm1091_vm1, %v7135_v48  ;;  %v12737_v48 = vmul.f32 %v14226_v13, %v6672_v11  ;;  %v14237_v13 = vld [vmem:[#allocation15_spill] sm:$0xff] }
 0x780   : > { %vm6479_vm14 = vcmp.gt.f32.partialorder %v6433_v18, 0.0  ;;  %v6511_v2 = vmul.f32 0.1, %v6433_v18  ;;  %9581 = vmatmul.msk.bf16.gmra.mxu0 %vm1091_vm1, %v14230_v0 }
 0x781   : > { %v6993_v16 = vpop.f32.mrf.mxu2 }
 0x782   : > { %v6543_v14 = vsel %vm6479_vm14, %v6433_v18, %v6511_v2  ;;  %v6994_v38 = vadd.f32 %v6993_v16, %v6853_v31  ;;  %v6856_v59 = vpop.f32.mrf.mxu1  ;;  %v7213_v23 = vpop.f32.mrf.mxu3  ;;  %v6754_v27 = vld [vmem:[#allocation2 + $0xc0] sm:$0xff]  ;;  %v14232_v31 = vld [vmem:[#allocation83_spill] sm:$0xff] }
 0x783   : > { %v12734_v34 = vld [vmem:[#allocation2 + $0xbf] sm:$0xff]  ;;  %v6575_v24 = vpack.c.bf16 %v6543_v14, %v6543_v14  ;;  %6640 = vst.msk [vmem:[#allocation2 + $0xc8] sm:$0xff] %vm1091_vm1, %v6543_v14  ;;  %v12740_v9 = vadd.f32 %v7213_v23, %v6992_v4  ;;  %v6774_v1 = vpack.c.bf16 %v6754_v27, %v6753_v30 }
 0x784   : > { %v6725_v0 = vpack.c.bf16 %v12734_v34, %v6704_v36 }
 0x785   : > { %6608 = vst.msk [vmem:[%s12315_s16 + $0x58] sm:$0xf] %vm6585_vm2, %v6575_v24  ;;  %v6434_v18 = vpop.f32.mrf.mxu0  ;;  %9539 = vmatmul.msk.bf16.gmra.mxu1 %vm1091_vm1, %v6774_v1 }
 0x786   : > { %v6435_v2 = vadd.f32 %v12687_v63, %v6434_v18  ;;  %9555 = vmatmul.msk.bf16.gmra.mxu2 %vm1091_vm1, %v6725_v0  ;;  %v7083_v18 = vld [vmem:[#allocation2 + $0xb9] sm:$0xff] }
 0x788   : > { %vm6480_vm15 = vcmp.gt.f32.partialorder %v6435_v2, 0.0  ;;  %v6512_v11 = vmul.f32 0.1, %v6435_v2 }
 0x789   : > { %v6996_v23 = vpop.f32.mrf.mxu2 }
 0x78a   : > { %v6544_v4 = vsel %vm6480_vm15, %v6435_v2, %v6512_v11  ;;  %v6997_v30 = vadd.f32 %v6996_v23, %v6856_v59  ;;  %v6858_v27 = vpop.f32.mrf.mxu1  ;;  %v7215_v16 = vpop.f32.mrf.mxu3  ;;  %v7084_v36 = vld [vmem:[#allocation2 + $0xc1] sm:$0xff]  ;;  %v12762_v11 = vld [vmem:[#allocation2 + $0xb9] sm:$0xff] }
 0x78b   : > { %v6576_v14 = vpack.c.bf16 %v6544_v4, %v6544_v4  ;;  %6641 = vst.msk [vmem:[#allocation2 + $0xd0] sm:$0xff] %vm1091_vm1, %v6544_v4  ;;  %v12751_v24 = vadd.f32 %v7215_v16, %v6994_v38  ;;  %v7116_v1 = vmul.f32 %v14232_v31, %v7084_v36  ;;  %v12754_v39 = vld [vmem:[#allocation2 + $0xc1] sm:$0xff]  ;;  %v14236_v36 = vpack.c.bf16 %v12512_v62, %v12516_v60 }
 0x78c   : > { %14233 = vst [vmem:[#allocation85_spill] sm:$0xff] %v12754_v39  ;;  %v12758_v0 = vmul.f32 %v14222_v44, %v12754_v39  ;;  %v6674_v4 = vld [vmem:[#allocation2 + $0xc7] sm:$0xff] }
 0x78d   : > { %6609 = vst.msk [vmem:[%s12315_s16 + $0x5c] sm:$0xf] %vm6585_vm2, %v6576_v14  ;;  %v6437_v59 = vpop.f32.mrf.mxu0  ;;  %v7136_v2 = vpack.c.bf16 %v7116_v1, %v7083_v18  ;;  %v6706_v1 = vmul.f32 %v14237_v13, %v6674_v4  ;;  %v6755_v43 = vld [vmem:[#allocation2 + $0xc8] sm:$0xff] }
 0x78e   : > { %14234 = vst [vmem:[#allocation30_spill] sm:$0xff] %v12758_v0  ;;  %v6438_v23 = vadd.f32 %v12687_v63, %v6437_v59 }
 0x78f   : > { %14235 = vst [vmem:[#allocation75_spill] sm:$0xff] %v12762_v11  ;;  %9572 = vmatmul.msk.bf16.gmra.mxu3 %vm1091_vm1, %v7136_v2  ;;  %v12776_v2 = vmul.f32 %v14231_v12, %v6674_v4 }
 0x790   : > { %vm6481_vm3 = vcmp.gt.f32.partialorder %v6438_v23, 0.0  ;;  %v6513_v16 = vmul.f32 0.1, %v6438_v23  ;;  %9582 = vmatmul.msk.bf16.gmra.mxu0 %vm1091_vm1, %v14236_v36 }
 0x791   : > { %v6998_v14 = vpop.f32.mrf.mxu2 }
 0x792   : > { %v6545_v18 = vsel %vm6481_vm3, %v6438_v23, %v6513_v16  ;;  %v6999_v39 = vadd.f32 %v6998_v14, %v6858_v27  ;;  %v6861_v59 = vpop.f32.mrf.mxu1  ;;  %v7218_v44 = vpop.f32.mrf.mxu3  ;;  %v6756_v51 = vld [vmem:[#allocation2 + $0xd0] sm:$0xff]  ;;  %v14238_v27 = vld [vmem:[#allocation86_spill] sm:$0xff] }
 0x793   : > { %v12773_v38 = vld [vmem:[#allocation2 + $0xcf] sm:$0xff]  ;;  %v6577_v0 = vpack.c.bf16 %v6545_v18, %v6545_v18  ;;  %6642 = vst.msk [vmem:[#allocation2 + $0xd8] sm:$0xff] %vm1091_vm1, %v6545_v18  ;;  %v12779_v62 = vadd.f32 %v7218_v44, %v6997_v30  ;;  %v6775_v60 = vpack.c.bf16 %v6756_v51, %v6755_v43 }
 0x794   : > { %v6726_v36 = vpack.c.bf16 %v12773_v38, %v6706_v1 }
 0x795   : > { %6610 = vst.msk [vmem:[%s12315_s16 + $0x60] sm:$0xf] %vm6585_vm2, %v6577_v0  ;;  %v6439_v23 = vpop.f32.mrf.mxu0  ;;  %9540 = vmatmul.msk.bf16.gmra.mxu1 %vm1091_vm1, %v6775_v60 }
 0x796   : > { %v6440_v16 = vadd.f32 %v12687_v63, %v6439_v23  ;;  %9556 = vmatmul.msk.bf16.gmra.mxu2 %vm1091_vm1, %v6726_v36  ;;  %v7085_v23 = vld [vmem:[#allocation2 + $0xc9] sm:$0xff] }
 0x798   : > { %vm6482_vm4 = vcmp.gt.f32.partialorder %v6440_v16, 0.0  ;;  %v6514_v4 = vmul.f32 0.1, %v6440_v16 }
 0x799   : > { %v7001_v44 = vpop.f32.mrf.mxu2 }
 0x79a   : > { %v6546_v30 = vsel %vm6482_vm4, %v6440_v16, %v6514_v4  ;;  %v7002_v43 = vadd.f32 %v7001_v44, %v6861_v59  ;;  %v6863_v51 = vpop.f32.mrf.mxu1  ;;  %v7220_v14 = vpop.f32.mrf.mxu3  ;;  %v7086_v1 = vld [vmem:[#allocation2 + $0xd1] sm:$0xff]  ;;  %v12801_v4 = vld [vmem:[#allocation2 + $0xc9] sm:$0xff] }
 0x79b   : > { %v6578_v18 = vpack.c.bf16 %v6546_v30, %v6546_v30  ;;  %6643 = vst.msk [vmem:[#allocation2 + $0xe0] sm:$0xff] %vm1091_vm1, %v6546_v30  ;;  %v12790_v0 = vadd.f32 %v7220_v14, %v6999_v39  ;;  %v7118_v60 = vmul.f32 %v14238_v27, %v7086_v1  ;;  %v12793_v12 = vld [vmem:[#allocation2 + $0xd1] sm:$0xff]  ;;  %v14242_v1 = vpack.c.bf16 %v12556_v47, %v12560_v46 }
 0x79c   : > { %14239 = vst [vmem:[#allocation40_spill] sm:$0xff] %v12793_v12  ;;  %v12797_v36 = vmul.f32 %v14227_v52, %v12793_v12  ;;  %v6676_v30 = vld [vmem:[#allocation2 + $0xd7] sm:$0xff] }
 0x79d   : > { %6611 = vst.msk [vmem:[%s12315_s16 + $0x64] sm:$0xf] %vm6585_vm2, %v6578_v18  ;;  %v6442_v59 = vpop.f32.mrf.mxu0  ;;  %v7137_v16 = vpack.c.bf16 %v7118_v60, %v7085_v23  ;;  %v14243_v27 = vld [vmem:[#allocation16_spill] sm:$0xff] }
 0x79e   : > { %14240 = vst [vmem:[#allocation35_spill] sm:$0xff] %v12797_v36  ;;  %v6443_v44 = vadd.f32 %v12687_v63, %v6442_v59  ;;  %v6708_v60 = vmul.f32 %v14243_v27, %v6676_v30  ;;  %v6757_v52 = vld [vmem:[#allocation2 + $0xd8] sm:$0xff] }
 0x79f   : > { %14241 = vst [vmem:[#allocation37_spill] sm:$0xff] %v12801_v4  ;;  %9573 = vmatmul.msk.bf16.gmra.mxu3 %vm1091_vm1, %v7137_v16  ;;  %v12815_v16 = vmul.f32 %v14237_v13, %v6676_v30 }
 0x7a0   : > { %vm6483_vm5 = vcmp.gt.f32.partialorder %v6443_v44, 0.0  ;;  %v6515_v14 = vmul.f32 0.1, %v6443_v44  ;;  %9583 = vmatmul.msk.bf16.gmra.mxu0 %vm1091_vm1, %v14242_v1 }
 0x7a1   : > { %v7003_v18 = vpop.f32.mrf.mxu2 }
 0x7a2   : > { %v6547_v23 = vsel %vm6483_vm5, %v6443_v44, %v6515_v14  ;;  %v7004_v12 = vadd.f32 %v7003_v18, %v6863_v51  ;;  %v6866_v59 = vpop.f32.mrf.mxu1  ;;  %v7223_v11 = vpop.f32.mrf.mxu3  ;;  %v6758_v55 = vld [vmem:[#allocation2 + $0xe0] sm:$0xff] }
 0x7a3   : > { %v12812_v39 = vld [vmem:[#allocation2 + $0xdf] sm:$0xff]  ;;  %v6579_v36 = vpack.c.bf16 %v6547_v23, %v6547_v23  ;;  %6644 = vst.msk [vmem:[#allocation2 + $0xe8] sm:$0xff] %vm1091_vm1, %v6547_v23  ;;  %v12818_v47 = vadd.f32 %v7223_v11, %v7002_v43  ;;  %v6776_v46 = vpack.c.bf16 %v6758_v55, %v6757_v52 }
 0x7a4   : > { %v6727_v1 = vpack.c.bf16 %v12812_v39, %v6708_v60 }
 0x7a5   : > { %6612 = vst.msk [vmem:[%s12315_s16 + $0x68] sm:$0xf] %vm6585_vm2, %v6579_v36  ;;  %v6444_v44 = vpop.f32.mrf.mxu0  ;;  %9541 = vmatmul.msk.bf16.gmra.mxu1 %vm1091_vm1, %v6776_v46 }
 0x7a6   : > { %v6445_v14 = vadd.f32 %v12687_v63, %v6444_v44  ;;  %9557 = vmatmul.msk.bf16.gmra.mxu2 %vm1091_vm1, %v6727_v1  ;;  %v7087_v44 = vld [vmem:[#allocation2 + $0xd9] sm:$0xff] }
 0x7a8   : > { %vm6484_vm6 = vcmp.gt.f32.partialorder %v6445_v14, 0.0  ;;  %v6516_v30 = vmul.f32 0.1, %v6445_v14 }
 0x7a9   : > { %v7006_v11 = vpop.f32.mrf.mxu2 }
 0x7aa   : > { %v6548_v43 = vsel %vm6484_vm6, %v6445_v14, %v6516_v30  ;;  %v7007_v55 = vadd.f32 %v7006_v11, %v6866_v59  ;;  %v6868_v52 = vpop.f32.mrf.mxu1  ;;  %v7225_v18 = vpop.f32.mrf.mxu3  ;;  %v7088_v60 = vld [vmem:[#allocation2 + $0xe1] sm:$0xff]  ;;  %v9611_v30 = vld [vmem:[%s13708_s11 + $0x14] sm:$0xf] }
 0x7ab   : > { %v6580_v23 = vpack.c.bf16 %v6548_v43, %v6548_v43  ;;  %6645 = vst.msk [vmem:[#allocation2 + $0xf0] sm:$0xff] %vm1091_vm1, %v6548_v43  ;;  %v12829_v36 = vadd.f32 %v7225_v18, %v7004_v12  ;;  %v7120_v46 = vmul.f32 %v14136_v50, %v7088_v60  ;;  %v12832_v51 = vld [vmem:[#allocation2 + $0xe1] sm:$0xff]  ;;  %v9628_v12 = vld [vmem:[%s13708_s11 + $0x18] sm:$0xf]  ;;  %v7922_v18 = vsel %vm1263_vm0, %v9611_v30, 0  ;;  %v14248_v30 = vld [vmem:[#allocation19_spill] sm:$0xff] }
 0x7ac   : > { %14244 = vst [vmem:[#allocation45_spill] sm:$0xff] %v12832_v51  ;;  %v12836_v1 = vmul.f32 %v14232_v31, %v12832_v51  ;;  %v6678_v43 = vld [vmem:[#allocation2 + $0xe7] sm:$0xff]  ;;  %v8176_v60 = vsel %vm1263_vm0, %v9628_v12, 0  ;;  %v12849_v51 = vld [vmem:[#allocation2 + $0xd9] sm:$0xff]  ;;  %7931 = vmatpush.bf16.msrb.mxu2 %v7922_v18 }
 0x7ad   : > { %6613 = vst.msk [vmem:[%s12315_s16 + $0x6c] sm:$0xf] %vm6585_vm2, %v6580_v23  ;;  %v6447_v59 = vpop.f32.mrf.mxu0  ;;  %v7138_v14 = vpack.c.bf16 %v7120_v46, %v7087_v44  ;;  %v14247_v44 = vpack.c.bf16 %v12591_v33, %v12589_v45  ;;  %8185 = vmatpush.bf16.msrb.mxu3 %v8176_v60  ;;  %v6710_v4 = vmul.f32 %v14248_v30, %v6678_v43  ;;  %v6759_v18 = vld [vmem:[#allocation2 + $0xe8] sm:$0xff] }
 0x7ae   : > { %14245 = vst [vmem:[#allocation39_spill] sm:$0xff] %v12836_v1  ;;  %v6448_v11 = vadd.f32 %v12687_v63, %v6447_v59  ;;  %v12862_v23 = vmul.f32 %v14243_v27, %v6678_v43  ;;  %v12865_v45 = vmul.f32 %v14237_v13, %v6678_v43 }
 0x7af   : > { %14246 = vst [vmem:[#allocation60_spill] sm:$0xff] %v12849_v51  ;;  %9574 = vmatmul.msk.bf16.gmra.mxu3 %vm1091_vm1, %v7138_v14 }
 0x7b0   : > { %vm6485_vm12 = vcmp.gt.f32.partialorder %v6448_v11, 0.0  ;;  %v6517_v46 = vmul.f32 0.1, %v6448_v11  ;;  %9584 = vmatmul.msk.bf16.gmra.mxu0 %vm1091_vm1, %v14247_v44  ;;  %14249 = vst [vmem:[#allocation41_spill] sm:$0xff] %v12865_v45 }
 0x7b1   : > { %v7008_v59 = vpop.f32.mrf.mxu2 }
 0x7b2   : > { %v6549_v12 = vsel %vm6485_vm12, %v6448_v11, %v6517_v46  ;;  %v7009_v31 = vadd.f32 %v7008_v59, %v6868_v52  ;;  %v6871_v57 = vpop.f32.mrf.mxu1  ;;  %v7228_v14 = vpop.f32.mrf.mxu3  ;;  %v6760_v28 = vld [vmem:[#allocation2 + $0xf0] sm:$0xff]  ;;  %v9645_v46 = vld [vmem:[%s13708_s11 + $0x1c] sm:$0xf] }
 0x7b3   : > { %v12859_v19 = vld [vmem:[#allocation2 + $0xef] sm:$0xff]  ;;  %v6581_v33 = vpack.c.bf16 %v6549_v12, %v6549_v12  ;;  %6646 = vst.msk [vmem:[#allocation2 + $0xf8] sm:$0xff] %vm1091_vm1, %v6549_v12  ;;  %v12868_v60 = vadd.f32 %v7228_v14, %v7007_v55  ;;  %v6777_v11 = vpack.c.bf16 %v6760_v28, %v6759_v18  ;;  %v8398_v44 = vsel %vm1263_vm0, %v9645_v46, 0 }
 0x7b4   : > { %v6728_v52 = vpack.c.bf16 %v12859_v19, %v6710_v4  ;;  %8407 = vmatpush.bf16.msrb.mxu0 %v8398_v44  ;;  %v9662_v4 = vld [vmem:[%s13708_s11 + $0x20] sm:$0xf]  ;;  %v12892_v59 = vld [vmem:[#allocation2 + $0xe9] sm:$0xff] }
 0x7b5   : > { %6614 = vst.msk [vmem:[%s12315_s16 + $0x70] sm:$0xf] %vm6585_vm2, %v6581_v33  ;;  %v6449_v43 = vpop.f32.mrf.mxu0  ;;  %9542 = vmatmul.msk.bf16.gmra.mxu1 %vm1091_vm1, %v6777_v11  ;;  %v8652_v55 = vsel %vm1263_vm0, %v9662_v4, 0 }
 0x7b6   : > { %v6450_v28 = vadd.f32 %v12687_v63, %v6449_v43  ;;  %9558 = vmatmul.msk.bf16.gmra.mxu2 %vm1091_vm1, %v6728_v52  ;;  %8661 = vmatpush.bf16.msrb.mxu1 %v8652_v55  ;;  %14250 = vst [vmem:[#allocation72_spill] sm:$0xff] %v12892_v59 }
 0x7b8   : > { %vm6486_vm7 = vcmp.gt.f32.partialorder %v6450_v28, 0.0  ;;  %v6518_v12 = vmul.f32 0.1, %v6450_v28 }
 0x7b9   : > { %v7011_v14 = vpop.f32.mrf.mxu2 }
 0x7ba   : > { %v6550_v18 = vsel %vm6486_vm7, %v6450_v28, %v6518_v12  ;;  %v7012_v33 = vadd.f32 %v7011_v14, %v6871_v57  ;;  %v6873_v46 = vpop.f32.mrf.mxu1  ;;  %v7230_v11 = vpop.f32.mrf.mxu3  ;;  %v7090_v44 = vld [vmem:[#allocation2 + $0xf1] sm:$0xff] }
 0x7bb   : > { %v6582_v13 = vpack.c.bf16 %v6550_v18, %v6550_v18  ;;  %6647 = vst.msk [vmem:[#allocation2 + $0x100] sm:$0xff] %vm1091_vm1, %v6550_v18  ;;  %v12889_v52 = vadd.f32 %v7230_v11, %v7009_v31  ;;  %v7122_v43 = vmul.f32 %v14139_v61, %v7090_v44  ;;  %v12895_v4 = vmul.f32 %v14136_v50, %v7090_v44  ;;  %v6680_v12 = vld [vmem:[#allocation2 + $0xf7] sm:$0xff] }
 0x7bc   : > { %v14251_v18 = vpack.c.bf16 %v12623_v54, %v12621_v37  ;;  %v6761_v45 = vld [vmem:[#allocation2 + $0xf8] sm:$0xff] }
 0x7bd   : > { %6615 = vst.msk [vmem:[%s12315_s16 + $0x74] sm:$0xf] %vm6585_vm2, %v6582_v13  ;;  %v6452_v55 = vpop.f32.mrf.mxu0  ;;  %v7139_v57 = vpack.c.bf16 %v7122_v43, %v12892_v59  ;;  %v14252_v13 = vld [vmem:[#allocation24_spill] sm:$0xff]  ;;  %v12915_v59 = vmul.f32 %v14243_v27, %v6680_v12 }
 0x7be   : > { %v6453_v28 = vadd.f32 %v12687_v63, %v6452_v55  ;;  %v6712_v44 = vmul.f32 %v14252_v13, %v6680_v12 }
 0x7bf   : > { %9575 = vmatmul.msk.bf16.gmra.mxu3 %vm1091_vm1, %v7139_v57  ;;  %v12912_v57 = vmul.f32 %v14248_v30, %v6680_v12 }
 0x7c0   : > { %vm6487_vm0 = vcmp.gt.f32.partialorder %v6453_v28, 0.0  ;;  %v6519_v31 = vmul.f32 0.1, %v6453_v28  ;;  %9585 = vmatmul.msk.bf16.gmra.mxu0 %vm1091_vm1, %v14251_v18 }
 0x7c1   : > { %v7013_v11 = vpop.f32.mrf.mxu2 }
 0x7c2   : > { %v6551_v50 = vsel %vm6487_vm0, %v6453_v28, %v6519_v31  ;;  %v7014_v43 = vadd.f32 %v7013_v11, %v6873_v46  ;;  %v6876_v55 = vpop.f32.mrf.mxu1  ;;  %v7233_v1 = vpop.f32.mrf.mxu3  ;;  %v6762_v51 = vld [vmem:[#allocation2 + $0x100] sm:$0xff] }
 0x7c3   : > { %v12909_v14 = vld [vmem:[#allocation2 + $0xff] sm:$0xff]  ;;  %v6583_v54 = vpack.c.bf16 %v6551_v50, %v6551_v50  ;;  %6648 = vst.msk [vmem:[#allocation2 + $0x108] sm:$0xff] %vm1091_vm1, %v6551_v50  ;;  %v12918_v37 = vadd.f32 %v7233_v1, %v7012_v33  ;;  %v6778_v28 = vpack.c.bf16 %v6762_v51, %v6761_v45 }
 0x7c4   : > { %v6729_v46 = vpack.c.bf16 %v12909_v14, %v6712_v44  ;;  %v12934_v18 = vld [vmem:[#allocation2 + $0xf9] sm:$0xff] }
 0x7c5   : > { %6616 = vst.msk [vmem:[%s12315_s16 + $0x78] sm:$0xf] %vm6585_vm2, %v6583_v54  ;;  %v6454_v11 = vpop.f32.mrf.mxu0  ;;  %9543 = vmatmul.msk.bf16.gmra.mxu1 %vm1091_vm1, %v6778_v28 }
 0x7c6   : > { %v6455_v27 = vadd.f32 %v12687_v63, %v6454_v11  ;;  %9559 = vmatmul.msk.bf16.gmra.mxu2 %vm1091_vm1, %v6729_v46  ;;  %14253 = vst [vmem:[#allocation78_spill] sm:$0xff] %v12934_v18  ;;  %v7792_v11 = vld [vmem:[#allocation2 + $0x21] sm:$0xff] }
 0x7c8   : > { %vm6488_vm8 = vcmp.gt.f32.partialorder %v6455_v27, 0.0  ;;  %v6520_v50 = vmul.f32 0.1, %v6455_v27 }
 0x7c9   : > { %v7016_v51 = vpop.f32.mrf.mxu2 }
 0x7ca   : > { %v6552_v1 = vsel %vm6488_vm8, %v6455_v27, %v6520_v50  ;;  %v7017_v45 = vadd.f32 %v7016_v51, %v6876_v55  ;;  %v6878_v33 = vpop.f32.mrf.mxu1  ;;  %v7235_v12 = vpop.f32.mrf.mxu3  ;;  %v7092_v44 = vld [vmem:[#allocation2 + $0x101] sm:$0xff]  ;;  %v14254_v51 = vpack.c.bf16 %v12656_v29, %v12659_v21 }
 0x7cb   : > { %v6584_v31 = vpack.c.bf16 %v6552_v1, %v6552_v1  ;;  %6649 = vst.msk [vmem:[#allocation2 + $0x110] sm:$0xff] %vm1091_vm1, %v6552_v1  ;;  %v12931_v54 = vadd.f32 %v7235_v12, %v7014_v43  ;;  %v7124_v28 = vmul.f32 %v14184_v5, %v7092_v44  ;;  %v12937_v63 = vmul.f32 %v14139_v61, %v7092_v44  ;;  %v12945_v50 = vld [vmem:[#allocation2 + $0x107] sm:$0xff] }
 0x7cc   : > { %v7824_v1 = vmul.f32 %v14187_v58, %v7792_v11  ;;  %v6984_v44 = vadd.f32 %v12653_v7, %v12634_v3 }
 0x7cd   : > { %6617 = vst.msk [vmem:[%s12315_s16 + $0x7c] sm:$0xf] %vm6585_vm2, %v6584_v31  ;;  %v7457_v46 = vpop.f32.mrf.mxu0  ;;  %v7140_v55 = vpack.c.bf16 %v7124_v28, %v12934_v18  ;;  %v7570_v31 = vld [vmem:[#allocation2 + $0x20] sm:$0xff] }
 0x7ce   : > { %v12943_v27 = vadd.f32 %v7457_v46, %v12663_v17  ;;  %v12957_v17 = vmul.f32 %v14248_v30, %v12945_v50  ;;  %v7284_v30 = vadd.f32 %v12673_v40, %v6984_v44 }
 0x7cf   : > { %9576 = vmatmul.msk.bf16.gmra.mxu3 %vm1091_vm1, %v7140_v55  ;;  %v7569_v55 = vld [vmem:[#allocation2 + $0x18] sm:$0xff] }
 0x7d0   : > { %9586 = vmatmul.msk.bf16.gmra.mxu0 %vm1091_vm1, %v14254_v51  ;;  %v7601_v21 = vpack.c.bf16 %v7570_v31, %v7569_v55  ;;  %v7791_v51 = vld [vmem:[#allocation2 + $0x19] sm:$0xff]  ;;  %v8045_v31 = vld [vmem:[#allocation2 + $0x27] sm:$0xff]  ;;  %v8046_v55 = vld [vmem:[#allocation2 + $0x2f] sm:$0xff] }
 0x7d1   : > { %v7018_v12 = vpop.f32.mrf.mxu2  ;;  %v7855_v18 = vpack.c.bf16 %v7824_v1, %v7791_v51  ;;  %v8077_v51 = vmul.f32 %v14185_v49, %v8045_v31  ;;  %v7571_v31 = vld [vmem:[#allocation2 + $0x28] sm:$0xff] }
 0x7d2   : > { %v7019_v28 = vadd.f32 %v7018_v12, %v6878_v33  ;;  %v6881_v46 = vpop.f32.mrf.mxu1  ;;  %v7238_v43 = vpop.f32.mrf.mxu3  ;;  %v12961_v5 = vld [vmem:[#allocation2 + $0x10f] sm:$0xff] }
 0x7d3   : > { %v12963_v29 = vadd.f32 %v7238_v43, %v7017_v45  ;;  %v12967_v11 = vld [vmem:[#allocation2 + $0x111] sm:$0xff]  ;;  %v12975_v33 = vld [vmem:[#allocation2 + $0x109] sm:$0xff]  ;;  %v8109_v58 = vpack.c.bf16 %v8046_v55, %v8077_v51 }
 0x7d4   : > { %v12972_v3 = vmul.f32 %v14139_v61, %v12967_v11  ;;  %v9724_v51 = vld [vmem:[#allocation2 + $0x29] sm:$0xff] }
 0x7d5   : > { %v7459_v7 = vpop.f32.mrf.mxu0  ;;  %9595 = vmatmul.msk.bf16.vlgmr.msra.gmra.mxu1 %vm1091_vm1, %v7601_v21 }
 0x7d6   : > { %14255 = vst [vmem:[#allocation20_spill] sm:$0xff] %v12972_v3  ;;  %v12977_v45 = vadd.f32 %v7459_v7, %v7284_v30  ;;  %9612 = vmatmul.msk.bf16.vlgmr.msrb.gmra.mxu2 %vm1091_vm1, %v7855_v18  ;;  %v14256_v18 = vpack.c.bf16 %v12698_v20, %v12701_v15  ;;  %v9723_v7 = vld [vmem:[#allocation2 + $0x31] sm:$0xff] }
 0x7d9   : > { %v7021_v12 = vpop.f32.mrf.mxu2 }
 0x7da   : > { %v7022_v40 = vadd.f32 %v7021_v12, %v6881_v46  ;;  %v6883_v1 = vpop.f32.mrf.mxu1  ;;  %v7240_v44 = vpop.f32.mrf.mxu3  ;;  %v7572_v46 = vld [vmem:[#allocation2 + $0x30] sm:$0xff]  ;;  %v7826_v12 = vmul.f32 %v9723_v7, %v14189_v35 }
 0x7db   : > { %v12982_v61 = vadd.f32 %v7240_v44, %v7019_v28  ;;  %v8047_v35 = vld [vmem:[#allocation2 + $0x37] sm:$0xff] }
 0x7dd   : > { %v7462_v21 = vpop.f32.mrf.mxu0 }
 0x7de   : > { %v12986_v30 = vadd.f32 %v7462_v21, %v12704_v42  ;;  %v12996_v42 = vpack.c.bf16 %v7572_v46, %v7571_v31  ;;  %v8079_v46 = vmul.f32 %v14188_v25, %v8047_v35  ;;  %v7573_v35 = vld [vmem:[#allocation2 + $0x38] sm:$0xff] }
 0x7df   : > { %9629 = vmatmul.msk.bf16.vlgmr.msrb.gmra.mxu3 %vm1091_vm1, %v8109_v58  ;;  %v7856_v58 = vpack.c.bf16 %v7826_v12, %v9724_v51  ;;  %v9725_v51 = vld [vmem:[#allocation2 + $0x41] sm:$0xff] }
 0x7e0   : > { %9587 = vmatmul.msk.bf16.gmra.mxu0 %vm1091_vm1, %v14256_v18 }
 0x7e1   : > { %v7023_v28 = vpop.f32.mrf.mxu2 }
 0x7e2   : > { %v7024_v44 = vadd.f32 %v7023_v28, %v6883_v1  ;;  %v6886_v43 = vpop.f32.mrf.mxu1  ;;  %v7243_v49 = vpop.f32.mrf.mxu3 }
 0x7e3   : > { %v12994_v55 = vadd.f32 %v7243_v49, %v7022_v40  ;;  %v8048_v40 = vld [vmem:[#allocation2 + $0x3f] sm:$0xff] }
 0x7e4   : > { %v8110_v49 = vpack.c.bf16 %v8048_v40, %v8079_v46  ;;  %v9726_v40 = vld [vmem:[#allocation2 + $0x39] sm:$0xff] }
 0x7e5   : > { %v7464_v21 = vpop.f32.mrf.mxu0  ;;  %9596 = vmatmul.msk.bf16.gmra.mxu1 %vm1091_vm1, %v12996_v42 }
 0x7e6   : > { %v13001_v20 = vadd.f32 %v7464_v21, %v12715_v22  ;;  %9613 = vmatmul.msk.bf16.gmra.mxu2 %vm1091_vm1, %v7856_v58  ;;  %v14257_v22 = vpack.c.bf16 %v12734_v34, %v12737_v48  ;;  %v7828_v58 = vmul.f32 %v9725_v51, %v14191_v32  ;;  %v8049_v32 = vld [vmem:[#allocation2 + $0x47] sm:$0xff] }
 0x7e8   : > { %v7857_v46 = vpack.c.bf16 %v7828_v58, %v9726_v40 }
 0x7e9   : > { %v7026_v15 = vpop.f32.mrf.mxu2 }
 0x7ea   : > { %v7027_v1 = vadd.f32 %v7026_v15, %v6886_v43  ;;  %v6888_v18 = vpop.f32.mrf.mxu1  ;;  %v7245_v7 = vpop.f32.mrf.mxu3  ;;  %v7574_v43 = vld [vmem:[#allocation2 + $0x40] sm:$0xff] }
 0x7eb   : > { %v13004_v28 = vadd.f32 %v7245_v7, %v7024_v44 }
 0x7ed   : > { %v7467_v12 = vpop.f32.mrf.mxu0 }
 0x7ee   : > { %v13008_v31 = vadd.f32 %v7467_v12, %v12740_v9  ;;  %v13018_v9 = vpack.c.bf16 %v7574_v43, %v7573_v35  ;;  %v8081_v43 = vmul.f32 %v14190_v6, %v8049_v32  ;;  %v9727_v35 = vld [vmem:[#allocation2 + $0x51] sm:$0xff]  ;;  %v7575_v32 = vld [vmem:[#allocation2 + $0x48] sm:$0xff] }
 0x7ef   : > { %9630 = vmatmul.msk.bf16.gmra.mxu3 %vm1091_vm1, %v8110_v49  ;;  %v7830_v40 = vmul.f32 %v9727_v35, %v14195_v26  ;;  %v8051_v26 = vld [vmem:[#allocation2 + $0x57] sm:$0xff] }
 0x7f0   : > { %9588 = vmatmul.msk.bf16.gmra.mxu0 %vm1091_vm1, %v14257_v22 }
 0x7f1   : > { %v7028_v44 = vpop.f32.mrf.mxu2 }
 0x7f2   : > { %v7029_v21 = vadd.f32 %v7028_v44, %v6888_v18  ;;  %v6891_v15 = vpop.f32.mrf.mxu1  ;;  %v7248_v25 = vpop.f32.mrf.mxu3 }
 0x7f3   : > { %v13016_v7 = vadd.f32 %v7248_v25, %v7027_v1  ;;  %v8050_v1 = vld [vmem:[#allocation2 + $0x4f] sm:$0xff] }
 0x7f4   : > { %v8111_v44 = vpack.c.bf16 %v8050_v1, %v8081_v43 }
 0x7f5   : > { %v7469_v12 = vpop.f32.mrf.mxu0  ;;  %9597 = vmatmul.msk.bf16.gmra.mxu1 %vm1091_vm1, %v13018_v9 }
 0x7f6   : > { %v13023_v34 = vadd.f32 %v7469_v12, %v12751_v24  ;;  %9614 = vmatmul.msk.bf16.gmra.mxu2 %vm1091_vm1, %v7857_v46  ;;  %v14258_v24 = vpack.c.bf16 %v12773_v38, %v12776_v2 }
 0x7f9   : > { %v7031_v48 = vpop.f32.mrf.mxu2 }
 0x7fa   : > { %v7032_v18 = vadd.f32 %v7031_v48, %v6891_v15  ;;  %v6893_v49 = vpop.f32.mrf.mxu1  ;;  %v7250_v22 = vpop.f32.mrf.mxu3  ;;  %v7576_v15 = vld [vmem:[#allocation2 + $0x50] sm:$0xff] }
 0x7fb   : > { %v13026_v51 = vadd.f32 %v7250_v22, %v7029_v21  ;;  %v9728_v22 = vld [vmem:[#allocation2 + $0x49] sm:$0xff] }
 0x7fc   : > { %v7858_v1 = vpack.c.bf16 %v7830_v40, %v9728_v22 }
 0x7fd   : > { %v7472_v58 = vpop.f32.mrf.mxu0 }
 0x7fe   : > { %v13030_v25 = vadd.f32 %v7472_v58, %v12779_v62  ;;  %v13040_v62 = vpack.c.bf16 %v7576_v15, %v7575_v32  ;;  %v8083_v15 = vmul.f32 %v14194_v56, %v8051_v26 }
 0x7ff   : > { %9631 = vmatmul.msk.bf16.gmra.mxu3 %vm1091_vm1, %v8111_v44 }
 0x800   : > { %9589 = vmatmul.msk.bf16.gmra.mxu0 %vm1091_vm1, %v14258_v24 }
 0x801   : > { %v7033_v21 = vpop.f32.mrf.mxu2 }
 0x802   : > { %v7034_v46 = vadd.f32 %v7033_v21, %v6893_v49  ;;  %v6896_v12 = vpop.f32.mrf.mxu1  ;;  %v7253_v6 = vpop.f32.mrf.mxu3 }
 0x803   : > { %v13038_v48 = vadd.f32 %v7253_v6, %v7032_v18  ;;  %v8052_v18 = vld [vmem:[#allocation2 + $0x5f] sm:$0xff] }
 0x804   : > { %v8112_v40 = vpack.c.bf16 %v8052_v18, %v8083_v15  ;;  %v9729_v6 = vld [vmem:[#allocation2 + $0x61] sm:$0xff] }
 0x805   : > { %v7474_v43 = vpop.f32.mrf.mxu0  ;;  %9598 = vmatmul.msk.bf16.gmra.mxu1 %vm1091_vm1, %v13040_v62  ;;  %v7832_v32 = vmul.f32 %v9729_v6, %v14199_v41  ;;  %v8053_v41 = vld [vmem:[#allocation2 + $0x67] sm:$0xff] }
 0x806   : > { %v13045_v38 = vadd.f32 %v7474_v43, %v12790_v0  ;;  %9615 = vmatmul.msk.bf16.gmra.mxu2 %vm1091_vm1, %v7858_v1  ;;  %v14259_v0 = vpack.c.bf16 %v12812_v39, %v12815_v16  ;;  %v7577_v43 = vld [vmem:[#allocation2 + $0x58] sm:$0xff] }
 0x809   : > { %v7036_v2 = vpop.f32.mrf.mxu2 }
 0x80a   : > { %v7037_v49 = vadd.f32 %v7036_v2, %v6896_v12  ;;  %v6898_v58 = vpop.f32.mrf.mxu1  ;;  %v7255_v44 = vpop.f32.mrf.mxu3  ;;  %v7578_v12 = vld [vmem:[#allocation2 + $0x60] sm:$0xff] }
 0x80b   : > { %v13048_v24 = vadd.f32 %v7255_v44, %v7034_v46  ;;  %v9730_v2 = vld [vmem:[#allocation2 + $0x59] sm:$0xff] }
 0x80c   : > { %v7859_v44 = vpack.c.bf16 %v7832_v32, %v9730_v2 }
 0x80d   : > { %v7477_v35 = vpop.f32.mrf.mxu0 }
 0x80e   : > { %v13052_v21 = vadd.f32 %v7477_v35, %v12818_v47  ;;  %v13062_v47 = vpack.c.bf16 %v7578_v12, %v7577_v43 }
 0x80f   : > { %9632 = vmatmul.msk.bf16.gmra.mxu3 %vm1091_vm1, %v8112_v40 }
 0x810   : > { %9590 = vmatmul.msk.bf16.gmra.mxu0 %vm1091_vm1, %v14259_v0  ;;  %v8085_v0 = vmul.f32 %v14198_v53, %v8053_v41  ;;  %v9732_v41 = vld [vmem:[#allocation2 + $0x69] sm:$0xff] }
 0x811   : > { %v7038_v46 = vpop.f32.mrf.mxu2 }
 0x812   : > { %v7039_v22 = vadd.f32 %v7038_v46, %v6898_v58  ;;  %v6901_v1 = vpop.f32.mrf.mxu1  ;;  %v7258_v56 = vpop.f32.mrf.mxu3  ;;  %v7580_v46 = vld [vmem:[#allocation2 + $0x70] sm:$0xff] }
 0x813   : > { %v13060_v26 = vadd.f32 %v7258_v56, %v7037_v49  ;;  %v8054_v49 = vld [vmem:[#allocation2 + $0x6f] sm:$0xff] }
 0x814   : > { %v8113_v6 = vpack.c.bf16 %v8054_v49, %v8085_v0 }
 0x815   : > { %v7479_v18 = vpop.f32.mrf.mxu0  ;;  %9599 = vmatmul.msk.bf16.gmra.mxu1 %vm1091_vm1, %v13062_v47 }
 0x816   : > { %v13067_v39 = vadd.f32 %v7479_v18, %v12829_v36  ;;  %9616 = vmatmul.msk.bf16.gmra.mxu2 %vm1091_vm1, %v7859_v44  ;;  %v14260_v36 = vpack.c.bf16 %v12859_v19, %v12862_v23  ;;  %v7579_v44 = vld [vmem:[#allocation2 + $0x68] sm:$0xff] }
 0x819   : > { %v7041_v16 = vpop.f32.mrf.mxu2 }
 0x81a   : > { %v7042_v58 = vadd.f32 %v7041_v16, %v6901_v1  ;;  %v6903_v15 = vpop.f32.mrf.mxu1  ;;  %v7260_v35 = vpop.f32.mrf.mxu3  ;;  %v9731_v1 = vld [vmem:[#allocation2 + $0x71] sm:$0xff] }
 0x81b   : > { %v13070_v40 = vadd.f32 %v7260_v35, %v7039_v22  ;;  %v7834_v56 = vmul.f32 %v9731_v1, %v14204_v8  ;;  %v8055_v8 = vld [vmem:[#allocation2 + $0x77] sm:$0xff] }
 0x81d   : > { %v7482_v12 = vpop.f32.mrf.mxu0  ;;  %v7860_v16 = vpack.c.bf16 %v7834_v56, %v9732_v41 }
 0x81e   : > { %v13074_v32 = vadd.f32 %v7482_v12, %v12868_v60  ;;  %v13084_v60 = vpack.c.bf16 %v7580_v46, %v7579_v44 }
 0x81f   : > { %9633 = vmatmul.msk.bf16.gmra.mxu3 %vm1091_vm1, %v8113_v6 }
 0x820   : > { %9591 = vmatmul.msk.bf16.gmra.mxu0 %vm1091_vm1, %v14260_v36  ;;  %v8087_v36 = vmul.f32 %v14203_v10, %v8055_v8 }
 0x821   : > { %v7043_v22 = vpop.f32.mrf.mxu2 }
 0x822   : > { %v7044_v43 = vadd.f32 %v7043_v22, %v6903_v15  ;;  %v6906_v2 = vpop.f32.mrf.mxu1  ;;  %v7263_v53 = vpop.f32.mrf.mxu3  ;;  %v7582_v22 = vld [vmem:[#allocation2 + $0x80] sm:$0xff] }
 0x823   : > { %v13082_v18 = vadd.f32 %v7263_v53, %v7042_v58  ;;  %v8056_v58 = vld [vmem:[#allocation2 + $0x7f] sm:$0xff]  ;;  %v14262_v53 = vld [vmem:[#allocation59_spill] sm:$0xff] }
 0x824   : > { %v8114_v1 = vpack.c.bf16 %v8056_v58, %v8087_v36  ;;  %v8057_v36 = vld [vmem:[#allocation2 + $0x87] sm:$0xff] }
 0x825   : > { %v7484_v35 = vpop.f32.mrf.mxu0  ;;  %9600 = vmatmul.msk.bf16.gmra.mxu1 %vm1091_vm1, %v13084_v60 }
 0x826   : > { %v13089_v23 = vadd.f32 %v7484_v35, %v12889_v52  ;;  %9617 = vmatmul.msk.bf16.gmra.mxu2 %vm1091_vm1, %v7860_v16  ;;  %v14261_v52 = vpack.c.bf16 %v12909_v14, %v12912_v57  ;;  %v7581_v35 = vld [vmem:[#allocation2 + $0x78] sm:$0xff] }
 0x829   : > { %v7046_v15 = vpop.f32.mrf.mxu2 }
 0x82a   : > { %v7047_v49 = vadd.f32 %v7046_v15, %v6906_v2  ;;  %v6908_v0 = vpop.f32.mrf.mxu1  ;;  %v7265_v12 = vpop.f32.mrf.mxu3  ;;  %v9733_v2 = vld [vmem:[#allocation2 + $0x81] sm:$0xff]  ;;  %v9734_v15 = vld [vmem:[#allocation2 + $0x79] sm:$0xff] }
 0x82b   : > { %v13092_v6 = vadd.f32 %v7265_v12, %v7044_v43  ;;  %v7836_v44 = vmul.f32 %v9733_v2, %v14262_v53 }
 0x82d   : > { %v7487_v46 = vpop.f32.mrf.mxu0  ;;  %v7861_v12 = vpack.c.bf16 %v7836_v44, %v9734_v15  ;;  %v7377_v44 = vmul.f32 %v14252_v13, %v12945_v50  ;;  %v9735_v15 = vld [vmem:[#allocation2 + $0x91] sm:$0xff]  ;;  %v7583_v50 = vld [vmem:[#allocation2 + $0x88] sm:$0xff] }
 0x82e   : > { %v13096_v56 = vadd.f32 %v7487_v46, %v12918_v37  ;;  %v13106_v37 = vpack.c.bf16 %v7582_v22, %v7581_v35  ;;  %v14263_v22 = vld [vmem:[#allocation9_spill] sm:$0xff] }
 0x82f   : > { %9634 = vmatmul.msk.bf16.gmra.mxu3 %vm1091_vm1, %v8114_v1  ;;  %v8089_v53 = vmul.f32 %v14263_v22, %v8057_v36  ;;  %v7394_v35 = vpack.c.bf16 %v12961_v5, %v7377_v44 }
 0x830   : > { %9592 = vmatmul.msk.bf16.gmra.mxu0 %vm1091_vm1, %v14261_v52 }
 0x831   : > { %v7048_v43 = vpop.f32.mrf.mxu2 }
 0x832   : > { %v7049_v41 = vadd.f32 %v7048_v43, %v6908_v0  ;;  %v6911_v16 = vpop.f32.mrf.mxu1  ;;  %v7268_v10 = vpop.f32.mrf.mxu3 }
 0x833   : > { %v13104_v8 = vadd.f32 %v7268_v10, %v7047_v49  ;;  %v8058_v49 = vld [vmem:[#allocation2 + $0x8f] sm:$0xff] }
 0x834   : > { %v8115_v10 = vpack.c.bf16 %v8058_v49, %v8089_v53 }
 0x835   : > { %v7489_v58 = vpop.f32.mrf.mxu0  ;;  %9601 = vmatmul.msk.bf16.gmra.mxu1 %vm1091_vm1, %v13106_v37 }
 0x836   : > { %v13111_v57 = vadd.f32 %v7489_v58, %v12931_v54  ;;  %9618 = vmatmul.msk.bf16.gmra.mxu2 %vm1091_vm1, %v7861_v12 }
 0x839   : > { %v7051_v0 = vpop.f32.mrf.mxu2 }
 0x83a   : > { %v7052_v46 = vadd.f32 %v7051_v0, %v6911_v16  ;;  %v6913_v1 = vpop.f32.mrf.mxu1  ;;  %v7270_v52 = vpop.f32.mrf.mxu3  ;;  %v7584_v16 = vld [vmem:[#allocation2 + $0x90] sm:$0xff] }
 0x83b   : > { %v13114_v2 = vadd.f32 %v7270_v52, %v7049_v41  ;;  %v14264_v41 = vld [vmem:[#allocation67_spill] sm:$0xff]  ;;  %v13128_v49 = vpack.c.bf16 %v7584_v16, %v7583_v50  ;;  %v14266_v16 = vld [vmem:[#allocation10_spill] sm:$0xff] }
 0x83c   : > { %v7838_v12 = vmul.f32 %v9735_v15, %v14264_v41 }
 0x83d   : > { %v7492_v43 = vpop.f32.mrf.mxu0 }
 0x83e   : > { %v13120_v54 = vadd.f32 %v7492_v43, %v12963_v29  ;;  %v9736_v29 = vld [vmem:[#allocation2 + $0x89] sm:$0xff] }
 0x83f   : > { %9635 = vmatmul.msk.bf16.gmra.mxu3 %vm1091_vm1, %v8115_v10  ;;  %v7862_v53 = vpack.c.bf16 %v7838_v12, %v9736_v29  ;;  %v8059_v10 = vld [vmem:[#allocation2 + $0x97] sm:$0xff] }
 0x840   : > { %9593 = vmatmul.msk.bf16.gmra.mxu0 %vm1091_vm1, %v7394_v35 }
 0x841   : > { %v7053_v58 = vpop.f32.mrf.mxu2 }
 0x842   : > { %v7054_v36 = vadd.f32 %v7053_v58, %v6913_v1  ;;  %v6916_v0 = vpop.f32.mrf.mxu1  ;;  %v7273_v52 = vpop.f32.mrf.mxu3 }
 0x843   : > { %v13126_v22 = vadd.f32 %v7273_v52, %v7052_v46  ;;  %v8060_v46 = vld [vmem:[#allocation2 + $0x9f] sm:$0xff]  ;;  %v8091_v52 = vmul.f32 %v14266_v16, %v8059_v10 }
 0x844   : > { %v9738_v16 = vld [vmem:[#allocation2 + $0x99] sm:$0xff] }
 0x845   : > { %v7494_v44 = vpop.f32.mrf.mxu0  ;;  %9602 = vmatmul.msk.bf16.gmra.mxu1 %vm1091_vm1, %v13128_v49  ;;  %v8116_v50 = vpack.c.bf16 %v8060_v46, %v8091_v52 }
 0x846   : > { %v13133_v43 = vadd.f32 %v7494_v44, %v12982_v61  ;;  %9619 = vmatmul.msk.bf16.gmra.mxu2 %vm1091_vm1, %v7862_v53  ;;  %v7586_v61 = vld [vmem:[#allocation2 + $0xa0] sm:$0xff] }
 0x847   : > { %v9737_v53 = vld [vmem:[#allocation2 + $0xa1] sm:$0xff] }
 0x848   : > { %14265 = vst [vmem:[#allocation22_spill] sm:$0xff] %v13133_v43  ;;  %v7585_v43 = vld [vmem:[#allocation2 + $0x98] sm:$0xff] }
 0x849   : > { %v7056_v1 = vpop.f32.mrf.mxu2 }
 0x84a   : > { %v7057_v35 = vadd.f32 %v7056_v1, %v6916_v0  ;;  %v6918_v15 = vpop.f32.mrf.mxu1  ;;  %v7275_v41 = vpop.f32.mrf.mxu3  ;;  %v14267_v0 = vld [vmem:[#allocation73_spill] sm:$0xff] }
 0x84b   : > { %v13136_v58 = vadd.f32 %v7275_v41, %v7054_v36  ;;  %v7840_v44 = vmul.f32 %v9737_v53, %v14267_v0 }
 0x84d   : > { %v7497_v12 = vpop.f32.mrf.mxu0  ;;  %v7863_v52 = vpack.c.bf16 %v7840_v44, %v9738_v16 }
 0x84e   : > { %v13140_v29 = vadd.f32 %v7497_v12, %v12994_v55  ;;  %v13149_v55 = vpack.c.bf16 %v7586_v61, %v7585_v43  ;;  %v14268_v61 = vld [vmem:[#allocation11_spill] sm:$0xff] }
 0x84f   : > { %9636 = vmatmul.msk.bf16.gmra.mxu3 %vm1091_vm1, %v8116_v50 }
 0x850   : > { %9646 = vmatmul.msk.bf16.vlgmr.msrb.gmra.mxu0 %vm1091_vm1, %v12996_v42 }
 0x851   : > { %v7058_v1 = vpop.f32.mrf.mxu2 }
 0x852   : > { %v7059_v3 = vadd.f32 %v7058_v1, %v6918_v15  ;;  %v7278_v36 = vpop.f32.mrf.mxu3  ;;  %v7679_v41 = vpop.f32.mrf.mxu1  ;;  %v8061_v15 = vld [vmem:[#allocation2 + $0xa7] sm:$0xff]  ;;  %v8062_v1 = vld [vmem:[#allocation2 + $0xaf] sm:$0xff] }
 0x853   : > { %v13146_v10 = vadd.f32 %v7278_v36, %v7057_v35  ;;  %v7759_v46 = vadd.f32 %v7679_v41, %v12943_v27  ;;  %v8093_v44 = vmul.f32 %v14268_v61, %v8061_v15  ;;  %v9740_v61 = vld [vmem:[#allocation2 + $0xa9] sm:$0xff] }
 0x855   : > { %v7499_v12 = vpop.f32.mrf.mxu0  ;;  %9603 = vmatmul.msk.bf16.gmra.mxu1 %vm1091_vm1, %v13149_v55  ;;  %v8117_v41 = vpack.c.bf16 %v8062_v1, %v8093_v44 }
 0x856   : > { %v13154_v42 = vadd.f32 %v7499_v12, %v13004_v28  ;;  %9620 = vmatmul.msk.bf16.gmra.mxu2 %vm1091_vm1, %v7863_v52  ;;  %v7588_v28 = vld [vmem:[#allocation2 + $0xb0] sm:$0xff]  ;;  %v14269_v52 = vld [vmem:[#allocation77_spill] sm:$0xff] }
 0x859   : > { %v7933_v50 = vpop.f32.mrf.mxu2 }
 0x85a   : > { %v8013_v53 = vadd.f32 %v7933_v50, %v7759_v46  ;;  %v7280_v35 = vpop.f32.mrf.mxu3  ;;  %v7681_v0 = vpop.f32.mrf.mxu1  ;;  %v9739_v46 = vld [vmem:[#allocation2 + $0xb1] sm:$0xff] }
 0x85b   : > { %v13157_v27 = vadd.f32 %v7280_v35, %v7059_v3  ;;  %v7760_v43 = vadd.f32 %v7681_v0, %v12977_v45  ;;  %v7842_v12 = vmul.f32 %v9739_v46, %v14269_v52  ;;  %v7587_v0 = vld [vmem:[#allocation2 + $0xa8] sm:$0xff] }
 0x85d   : > { %v7502_v36 = vpop.f32.mrf.mxu0  ;;  %v7864_v44 = vpack.c.bf16 %v7842_v12, %v9740_v61  ;;  %v14270_v12 = vld [vmem:[#allocation12_spill] sm:$0xff] }
 0x85e   : > { %v13162_v16 = vadd.f32 %v7502_v36, %v13016_v7  ;;  %v13171_v7 = vpack.c.bf16 %v7588_v28, %v7587_v0 }
 0x85f   : > { %9637 = vmatmul.msk.bf16.gmra.mxu3 %vm1091_vm1, %v8117_v41 }
 0x860   : > { %9647 = vmatmul.msk.bf16.gmra.mxu0 %vm1091_vm1, %v13018_v9 }
 0x861   : > { %v7935_v3 = vpop.f32.mrf.mxu2 }
 0x862   : > { %v8014_v50 = vadd.f32 %v7935_v3, %v7760_v43  ;;  %v7684_v35 = vpop.f32.mrf.mxu1  ;;  %v8187_v45 = vpop.f32.mrf.mxu3  ;;  %v8063_v43 = vld [vmem:[#allocation2 + $0xb7] sm:$0xff] }
 0x863   : > { %v7761_v15 = vadd.f32 %v7684_v35, %v12986_v30  ;;  %v13169_v1 = vadd.f32 %v8187_v45, %v8013_v53  ;;  %v8064_v53 = vld [vmem:[#allocation2 + $0xbf] sm:$0xff]  ;;  %v8095_v35 = vmul.f32 %v14270_v12, %v8063_v43  ;;  %v14273_v12 = vld [vmem:[#allocation75_spill] sm:$0xff] }
 0x865   : > { %v7504_v36 = vpop.f32.mrf.mxu0  ;;  %9604 = vmatmul.msk.bf16.gmra.mxu1 %vm1091_vm1, %v13171_v7  ;;  %v8118_v0 = vpack.c.bf16 %v8064_v53, %v8095_v35 }
 0x866   : > { %v13176_v9 = vadd.f32 %v7504_v36, %v13026_v51  ;;  %9621 = vmatmul.msk.bf16.gmra.mxu2 %vm1091_vm1, %v7864_v44  ;;  %v7590_v51 = vld [vmem:[#allocation2 + $0xc0] sm:$0xff]  ;;  %v14272_v44 = vld [vmem:[#allocation80_spill] sm:$0xff] }
 0x869   : > { %v7938_v41 = vpop.f32.mrf.mxu2 }
 0x86a   : > { %v8015_v46 = vadd.f32 %v7938_v41, %v7761_v15  ;;  %v7686_v52 = vpop.f32.mrf.mxu1  ;;  %v8189_v30 = vpop.f32.mrf.mxu3  ;;  %v14271_v15 = vld [vmem:[#allocation85_spill] sm:$0xff] }
 0x86b   : > { %v7762_v28 = vadd.f32 %v7686_v52, %v13001_v20  ;;  %v13180_v3 = vadd.f32 %v8189_v30, %v8014_v50  ;;  %v7844_v36 = vmul.f32 %v14272_v44, %v14271_v15  ;;  %v7589_v30 = vld [vmem:[#allocation2 + $0xb8] sm:$0xff] }
 0x86d   : > { %v7507_v45 = vpop.f32.mrf.mxu0  ;;  %v7865_v35 = vpack.c.bf16 %v7844_v36, %v14273_v12  ;;  %v14274_v36 = vld [vmem:[#allocation13_spill] sm:$0xff] }
 0x86e   : > { %v13184_v61 = vadd.f32 %v7507_v45, %v13038_v48  ;;  %v13194_v48 = vpack.c.bf16 %v7590_v51, %v7589_v30 }
 0x86f   : > { %9638 = vmatmul.msk.bf16.gmra.mxu3 %vm1091_vm1, %v8118_v0 }
 0x870   : > { %9648 = vmatmul.msk.bf16.gmra.mxu0 %vm1091_vm1, %v13040_v62 }
 0x871   : > { %v7940_v41 = vpop.f32.mrf.mxu2 }
 0x872   : > { %v8016_v20 = vadd.f32 %v7940_v41, %v7762_v28  ;;  %v7689_v50 = vpop.f32.mrf.mxu1  ;;  %v8192_v52 = vpop.f32.mrf.mxu3  ;;  %v8065_v28 = vld [vmem:[#allocation2 + $0xc7] sm:$0xff] }
 0x873   : > { %v7763_v43 = vadd.f32 %v7689_v50, %v13008_v31  ;;  %v13192_v53 = vadd.f32 %v8192_v52, %v8015_v46  ;;  %v8066_v46 = vld [vmem:[#allocation2 + $0xcf] sm:$0xff]  ;;  %v8097_v50 = vmul.f32 %v14274_v36, %v8065_v28  ;;  %v14277_v36 = vld [vmem:[#allocation37_spill] sm:$0xff] }
 0x875   : > { %v7509_v45 = vpop.f32.mrf.mxu0  ;;  %9605 = vmatmul.msk.bf16.gmra.mxu1 %vm1091_vm1, %v13194_v48  ;;  %v8119_v30 = vpack.c.bf16 %v8066_v46, %v8097_v50 }
 0x876   : > { %v13200_v62 = vadd.f32 %v7509_v45, %v13048_v24  ;;  %9622 = vmatmul.msk.bf16.gmra.mxu2 %vm1091_vm1, %v7865_v35  ;;  %v7592_v24 = vld [vmem:[#allocation2 + $0xd0] sm:$0xff] }
 0x877   : > { %v14276_v35 = vld [vmem:[#allocation83_spill] sm:$0xff] }
 0x879   : > { %v7943_v0 = vpop.f32.mrf.mxu2 }
 0x87a   : > { %v8017_v15 = vadd.f32 %v7943_v0, %v7763_v43  ;;  %v7691_v44 = vpop.f32.mrf.mxu1  ;;  %v8194_v31 = vpop.f32.mrf.mxu3  ;;  %v14275_v43 = vld [vmem:[#allocation40_spill] sm:$0xff] }
 0x87b   : > { %v7764_v51 = vadd.f32 %v7691_v44, %v13023_v34  ;;  %v13204_v41 = vadd.f32 %v8194_v31, %v8016_v20  ;;  %v7846_v45 = vmul.f32 %v14276_v35, %v14275_v43  ;;  %v7591_v31 = vld [vmem:[#allocation2 + $0xc8] sm:$0xff] }
 0x87d   : > { %v7512_v52 = vpop.f32.mrf.mxu0  ;;  %v7866_v50 = vpack.c.bf16 %v7846_v45, %v14277_v36  ;;  %v14278_v45 = vld [vmem:[#allocation14_spill] sm:$0xff] }
 0x87e   : > { %v13208_v12 = vadd.f32 %v7512_v52, %v13060_v26  ;;  %v13218_v26 = vpack.c.bf16 %v7592_v24, %v7591_v31 }
 0x87f   : > { %9639 = vmatmul.msk.bf16.gmra.mxu3 %vm1091_vm1, %v8119_v30 }
 0x880   : > { %9649 = vmatmul.msk.bf16.gmra.mxu0 %vm1091_vm1, %v13062_v47 }
 0x881   : > { %v7945_v0 = vpop.f32.mrf.mxu2 }
 0x882   : > { %v8018_v34 = vadd.f32 %v7945_v0, %v7764_v51  ;;  %v7694_v20 = vpop.f32.mrf.mxu1  ;;  %v8197_v44 = vpop.f32.mrf.mxu3  ;;  %v8067_v51 = vld [vmem:[#allocation2 + $0xd7] sm:$0xff] }
 0x883   : > { %v7765_v28 = vadd.f32 %v7694_v20, %v13030_v25  ;;  %v13216_v46 = vadd.f32 %v8197_v44, %v8017_v15  ;;  %v8068_v15 = vld [vmem:[#allocation2 + $0xdf] sm:$0xff]  ;;  %v8099_v20 = vmul.f32 %v14278_v45, %v8067_v51 }
 0x884   : > { %v14281_v45 = vld [vmem:[#allocation60_spill] sm:$0xff] }
 0x885   : > { %v7514_v52 = vpop.f32.mrf.mxu0  ;;  %9606 = vmatmul.msk.bf16.gmra.mxu1 %vm1091_vm1, %v13218_v26  ;;  %v8120_v31 = vpack.c.bf16 %v8068_v15, %v8099_v20 }
 0x886   : > { %v13224_v47 = vadd.f32 %v7514_v52, %v13070_v40  ;;  %9623 = vmatmul.msk.bf16.gmra.mxu2 %vm1091_vm1, %v7866_v50  ;;  %v7594_v40 = vld [vmem:[#allocation2 + $0xe0] sm:$0xff]  ;;  %v14280_v50 = vld [vmem:[#allocation86_spill] sm:$0xff] }
 0x889   : > { %v7948_v30 = vpop.f32.mrf.mxu2 }
 0x88a   : > { %v8019_v43 = vadd.f32 %v7948_v30, %v7765_v28  ;;  %v7696_v35 = vpop.f32.mrf.mxu1  ;;  %v8199_v25 = vpop.f32.mrf.mxu3  ;;  %v14279_v28 = vld [vmem:[#allocation45_spill] sm:$0xff] }
 0x88b   : > { %v7766_v24 = vadd.f32 %v7696_v35, %v13045_v38  ;;  %v13228_v0 = vadd.f32 %v8199_v25, %v8018_v34  ;;  %v7848_v52 = vmul.f32 %v14280_v50, %v14279_v28  ;;  %v7593_v25 = vld [vmem:[#allocation2 + $0xd8] sm:$0xff] }
 0x88d   : > { %v7517_v44 = vpop.f32.mrf.mxu0  ;;  %v7867_v20 = vpack.c.bf16 %v7848_v52, %v14281_v45  ;;  %v14282_v52 = vld [vmem:[#allocation41_spill] sm:$0xff] }
 0x88e   : > { %v13232_v36 = vadd.f32 %v7517_v44, %v13082_v18  ;;  %v13244_v18 = vpack.c.bf16 %v7594_v40, %v7593_v25 }
 0x88f   : > { %9640 = vmatmul.msk.bf16.gmra.mxu3 %vm1091_vm1, %v8120_v31 }
 0x890   : > { %9650 = vmatmul.msk.bf16.gmra.mxu0 %vm1091_vm1, %v13084_v60 }
 0x891   : > { %v7950_v30 = vpop.f32.mrf.mxu2 }
 0x892   : > { %v8020_v38 = vadd.f32 %v7950_v30, %v7766_v24  ;;  %v7699_v34 = vpop.f32.mrf.mxu1  ;;  %v8202_v35 = vpop.f32.mrf.mxu3  ;;  %v14283_v30 = vpack.c.bf16 %v12859_v19, %v14282_v52  ;;  %v14284_v19 = vld [vmem:[#allocation72_spill] sm:$0xff] }
 0x893   : > { %v13240_v51 = vadd.f32 %v7699_v34, %v13052_v21  ;;  %v13242_v15 = vadd.f32 %v8202_v35, %v8019_v43  ;;  %v7595_v35 = vld [vmem:[#allocation2 + $0xe8] sm:$0xff] }
 0x895   : > { %v7519_v44 = vpop.f32.mrf.mxu0  ;;  %9607 = vmatmul.msk.bf16.gmra.mxu1 %vm1091_vm1, %v13244_v18 }
 0x896   : > { %v13250_v60 = vadd.f32 %v7519_v44, %v13092_v6  ;;  %9624 = vmatmul.msk.bf16.gmra.mxu2 %vm1091_vm1, %v7867_v20  ;;  %v7596_v6 = vld [vmem:[#allocation2 + $0xf0] sm:$0xff]  ;;  %v14285_v20 = vpack.c.bf16 %v12895_v4, %v14284_v19 }
 0x89a   : > { %v7701_v24 = vpop.f32.mrf.mxu1  ;;  %v8204_v31 = vpop.f32.mrf.mxu3 }
 0x89b   : > { %v13254_v21 = vadd.f32 %v7701_v24, %v13067_v39  ;;  %v13256_v43 = vadd.f32 %v8204_v31, %v8020_v38  ;;  %v13270_v38 = vpack.c.bf16 %v7596_v6, %v7595_v35  ;;  %v14286_v31 = vpack.c.bf16 %v12909_v14, %v12915_v59  ;;  %v14287_v59 = vld [vmem:[#allocation78_spill] sm:$0xff] }
 0x89c   : > { %v14288_v14 = vpack.c.bf16 %v12937_v63, %v14287_v59  ;;  %v14289_v35 = vpack.c.bf16 %v12961_v5, %v12957_v17  ;;  %v14290_v63 = vld [vmem:[#allocation57_spill] sm:$0xff]  ;;  %v8075_v17 = vld [vmem:[#allocation2 + $0x117] sm:$0xff] }
 0x89d   : > { %v7522_v40 = vpop.f32.mrf.mxu0 }
 0x89e   : > { %v13259_v28 = vadd.f32 %v7522_v40, %v13104_v8  ;;  %v7597_v40 = vld [vmem:[#allocation2 + $0xf8] sm:$0xff] }
 0x89f   : > { %9641 = vmatmul.msk.bf16.gmra.mxu3 %vm1091_vm1, %v14283_v30 }
 0x8a0   : > { %9651 = vmatmul.msk.bf16.gmra.mxu0 %vm1091_vm1, %v13106_v37 }
 0x8a2   : > { %v7704_v34 = vpop.f32.mrf.mxu1 }
 0x8a3   : > { %v13268_v39 = vadd.f32 %v7704_v34, %v13074_v32 }
 0x8a5   : > { %v7524_v25 = vpop.f32.mrf.mxu0  ;;  %9608 = vmatmul.msk.bf16.gmra.mxu1 %vm1091_vm1, %v13270_v38 }
 0x8a6   : > { %v13275_v8 = vadd.f32 %v7524_v25, %v13114_v2  ;;  %9625 = vmatmul.msk.bf16.gmra.mxu2 %vm1091_vm1, %v14285_v20  ;;  %v7598_v2 = vld [vmem:[#allocation2 + $0x100] sm:$0xff]  ;;  %v7854_v25 = vmul.f32 %v14290_v63, %v12967_v11  ;;  %v7599_v20 = vld [vmem:[#allocation2 + $0x108] sm:$0xff]  ;;  %v8107_v11 = vmul.f32 %v14252_v13, %v8075_v17 }
 0x8aa   : > { %v7706_v37 = vpop.f32.mrf.mxu1 }
 0x8ab   : > { %v13282_v44 = vadd.f32 %v7706_v37, %v13089_v23  ;;  %v13296_v23 = vpack.c.bf16 %v7598_v2, %v7597_v40 }
 0x8ad   : > { %v7527_v32 = vpop.f32.mrf.mxu0 }
 0x8ae   : > { %v13285_v24 = vadd.f32 %v7527_v32, %v13126_v22 }
 0x8af   : > { %9642 = vmatmul.msk.bf16.gmra.mxu3 %vm1091_vm1, %v14286_v31  ;;  %v8076_v31 = vld [vmem:[#allocation2 + $0x11f] sm:$0xff] }
 0x8b0   : > { %9652 = vmatmul.msk.bf16.gmra.mxu0 %vm1091_vm1, %v13128_v49  ;;  %v8124_v40 = vpack.c.bf16 %v8076_v31, %v8107_v11 }
 0x8b2   : > { %v7709_v4 = vpop.f32.mrf.mxu1 }
 0x8b3   : > { %v13294_v52 = vadd.f32 %v7709_v4, %v13096_v56 }
 0x8b5   : > { %v7529_v30 = vpop.f32.mrf.mxu0  ;;  %9609 = vmatmul.msk.bf16.gmra.mxu1 %vm1091_vm1, %v13296_v23 }
 0x8b6   : > { %v13301_v22 = vadd.f32 %v7529_v30, %v13136_v58  ;;  %9626 = vmatmul.msk.bf16.gmra.mxu2 %vm1091_vm1, %v14288_v14  ;;  %v7600_v58 = vld [vmem:[#allocation2 + $0x110] sm:$0xff]  ;;  %v14292_v14 = vld [vmem:[#allocation76_spill] sm:$0xff] }
 0x8b7   : > { %v13324_v37 = vpack.c.bf16 %v7600_v58, %v7599_v20 }
 0x8ba   : > { %v7711_v49 = vpop.f32.mrf.mxu1 }
 0x8bb   : > { %v13308_v6 = vadd.f32 %v7711_v49, %v13111_v57  ;;  %v14293_v49 = vld [vmem:[#allocation26_spill] sm:$0xff] }
 0x8bd   : > { %v7532_v56 = vpop.f32.mrf.mxu0 }
 0x8be   : > { %v13311_v34 = vadd.f32 %v7532_v56, %v13146_v10  ;;  %v7870_v10 = vpack.c.bf16 %v7854_v25, %v12975_v33  ;;  %v14294_v56 = vpack.c.bf16 %v14292_v14, %v14293_v49  ;;  %v14301_v49 = vld [vmem:[#allocation84_spill] sm:$0xff] }
 0x8bf   : > { %9643 = vmatmul.msk.bf16.gmra.mxu3 %vm1091_vm1, %v14289_v35 }
 0x8c0   : > { %9653 = vmatmul.msk.bf16.gmra.mxu0 %vm1091_vm1, %v13149_v55 }
 0x8c2   : > { %v7714_v19 = vpop.f32.mrf.mxu1 }
 0x8c3   : > { %v13322_v57 = vadd.f32 %v7714_v19, %v13120_v54  ;;  %v14291_v54 = vld [vmem:[#allocation22_spill] sm:$0xff] }
 0x8c5   : > { %v7534_v32 = vpop.f32.mrf.mxu0  ;;  %9610 = vmatmul.msk.bf16.gmra.mxu1 %vm1091_vm1, %v13324_v37 }
 0x8c6   : > { %v13330_v5 = vadd.f32 %v7534_v32, %v13157_v27  ;;  %9627 = vmatmul.msk.bf16.gmra.mxu2 %vm1091_vm1, %v7870_v10  ;;  %v14295_v10 = vld [vmem:[#allocation43_spill] sm:$0xff]  ;;  %v14296_v32 = vld [vmem:[#allocation81_spill] sm:$0xff] }
 0x8ca   : > { %v7716_v55 = vpop.f32.mrf.mxu1 }
 0x8cb   : > { %v13335_v2 = vadd.f32 %v7716_v55, %v14291_v54  ;;  %v14298_v54 = vld [vmem:[#allocation27_spill] sm:$0xff] }
 0x8cd   : > { %v8409_v4 = vpop.f32.mrf.mxu0 }
 0x8ce   : > { %v13338_v30 = vadd.f32 %v8409_v4, %v13169_v1  ;;  %v14299_v4 = vld [vmem:[#allocation48_spill] sm:$0xff] }
 0x8cf   : > { %9644 = vmatmul.msk.bf16.gmra.mxu3 %vm1091_vm1, %v8124_v40 }
 0x8d0   : > { %9654 = vmatmul.msk.bf16.gmra.mxu0 %vm1091_vm1, %v13171_v7 }
 0x8d2   : > { %v7719_v27 = vpop.f32.mrf.mxu1 }
 0x8d3   : > { %v13344_v59 = vadd.f32 %v7719_v27, %v13140_v29 }
 0x8d5   : > { %v8411_v13 = vpop.f32.mrf.mxu0  ;;  %9663 = vmatmul.msk.bf16.vlgmr.msrb.gmra.mxu1 %vm1091_vm1, %v14294_v56  ;;  %v14302_v56 = vld [vmem:[#allocation56_spill] sm:$0xff] }
 0x8d6   : > { %v13351_v35 = vadd.f32 %v8411_v13, %v13180_v3  ;;  %v14297_v3 = vpack.c.bf16 %v14295_v10, %v14296_v32 }
 0x8da   : > { %v7721_v1 = vpop.f32.mrf.mxu1 }
 0x8db   : > { %v13354_v58 = vadd.f32 %v7721_v1, %v13154_v42 }
 0x8dd   : > { %v8414_v25 = vpop.f32.mrf.mxu0 }
 0x8de   : > { %v13357_v7 = vadd.f32 %v8414_v25, %v13192_v53  ;;  %v14304_v25 = vld [vmem:[#allocation87_spill] sm:$0xff] }
 0x8e0   : > { %9655 = vmatmul.msk.bf16.gmra.mxu0 %vm1091_vm1, %v13194_v48 }
 0x8e2   : > { %v7724_v29 = vpop.f32.mrf.mxu1 }
 0x8e3   : > { %v13362_v19 = vadd.f32 %v7724_v29, %v13162_v16  ;;  %v14305_v29 = vld [vmem:[#allocation64_spill] sm:$0xff] }
 0x8e5   : > { %v8416_v20 = vpop.f32.mrf.mxu0  ;;  %9664 = vmatmul.msk.bf16.gmra.mxu1 %vm1091_vm1, %v14297_v3  ;;  %v14308_v3 = vld [vmem:[#allocation74_spill] sm:$0xff] }
 0x8e6   : > { %v13369_v42 = vadd.f32 %v8416_v20, %v13204_v41  ;;  %v14300_v41 = vpack.c.bf16 %v14298_v54, %v14299_v4  ;;  %v14306_v20 = vpack.c.bf16 %v14304_v25, %v14305_v29  ;;  %v8329_v54 = vld [vmem:[#allocation2 + $0x118] sm:$0xff]  ;;  %v8330_v4 = vld [vmem:[#allocation2 + $0x120] sm:$0xff] }
 0x8e7   : > { %v14317_v25 = vld [vmem:[#allocation32_spill] sm:$0xff] }
 0x8ea   : > { %v7726_v17 = vpop.f32.mrf.mxu1 }
 0x8eb   : > { %v13372_v53 = vadd.f32 %v7726_v17, %v13176_v9 }
 0x8ed   : > { %v8419_v11 = vpop.f32.mrf.mxu0 }
 0x8ee   : > { %v13375_v48 = vadd.f32 %v8419_v11, %v13216_v46 }
 0x8f0   : > { %9656 = vmatmul.msk.bf16.gmra.mxu0 %vm1091_vm1, %v13218_v26 }
 0x8f2   : > { %v7729_v16 = vpop.f32.mrf.mxu1 }
 0x8f3   : > { %v13380_v55 = vadd.f32 %v7729_v16, %v13184_v61 }
 0x8f5   : > { %v8421_v31 = vpop.f32.mrf.mxu0  ;;  %9665 = vmatmul.msk.bf16.gmra.mxu1 %vm1091_vm1, %v14300_v41 }
 0x8f6   : > { %v13387_v9 = vadd.f32 %v8421_v31, %v13228_v0  ;;  %v14303_v0 = vpack.c.bf16 %v14301_v49, %v14302_v56  ;;  %v14311_v31 = vld [vmem:[#allocation79_spill] sm:$0xff] }
 0x8fa   : > { %v7731_v40 = vpop.f32.mrf.mxu1 }
 0x8fb   : > { %v13390_v46 = vadd.f32 %v7731_v40, %v13200_v62 }
 0x8fd   : > { %v8424_v27 = vpop.f32.mrf.mxu0 }
 0x8fe   : > { %v13393_v26 = vadd.f32 %v8424_v27, %v13242_v15 }
 0x900   : > { %9657 = vmatmul.msk.bf16.gmra.mxu0 %vm1091_vm1, %v13244_v18 }
 0x902   : > { %v7734_v61 = vpop.f32.mrf.mxu1 }
 0x903   : > { %v13398_v13 = vadd.f32 %v7734_v61, %v13208_v12  ;;  %v14314_v61 = vld [vmem:[#allocation82_spill] sm:$0xff] }
 0x905   : > { %v8426_v14 = vpop.f32.mrf.mxu0  ;;  %9666 = vmatmul.msk.bf16.gmra.mxu1 %vm1091_vm1, %v14303_v0 }
 0x906   : > { %v13405_v62 = vadd.f32 %v8426_v14, %v13256_v43 }
 0x90a   : > { %v7736_v1 = vpop.f32.mrf.mxu1 }
 0x90b   : > { %v13408_v15 = vadd.f32 %v7736_v1, %v13224_v47 }
 0x910   : > { %9658 = vmatmul.msk.bf16.gmra.mxu0 %vm1091_vm1, %v13270_v38  ;;  %v14307_v38 = vld [vmem:[#allocation50_spill] sm:$0xff] }
 0x912   : > { %v7739_v18 = vpop.f32.mrf.mxu1 }
 0x913   : > { %v13413_v12 = vadd.f32 %v7739_v18, %v13232_v36  ;;  %v14309_v36 = vpack.c.bf16 %v14307_v38, %v14308_v3  ;;  %v14316_v18 = vld [vmem:[#allocation34_spill] sm:$0xff]  ;;  %v13475_v38 = vpop.f32.mrf.mxu2 }
 0x914   : > { %v14318_v29 = vpack.c.bf16 %v14316_v18, %v14317_v25 }
 0x915   : > { %9667 = vmatmul.msk.bf16.gmra.mxu1 %vm1091_vm1, %v14306_v20 }
 0x91a   : > { %v7741_v10 = vpop.f32.mrf.mxu1 }
 0x91b   : > { %v13420_v43 = vadd.f32 %v7741_v10, %v13250_v60 }
 0x920   : > { %9659 = vmatmul.msk.bf16.gmra.mxu0 %vm1091_vm1, %v13296_v23  ;;  %v14310_v23 = vld [vmem:[#allocation21_spill] sm:$0xff] }
 0x922   : > { %v7744_v47 = vpop.f32.mrf.mxu1 }
 0x923   : > { %v13425_v32 = vadd.f32 %v7744_v47, %v13259_v28  ;;  %v14312_v28 = vpack.c.bf16 %v14310_v23, %v14311_v31 }
 0x925   : > { %9668 = vmatmul.msk.bf16.gmra.mxu1 %vm1091_vm1, %v14309_v36  ;;  %v13480_v36 = vpop.f32.mrf.mxu3 }
 0x92a   : > { %v7746_v17 = vpop.f32.mrf.mxu1 }
 0x92b   : > { %v13432_v11 = vadd.f32 %v7746_v17, %v13275_v8  ;;  %v8346_v8 = vpack.c.bf16 %v8330_v4, %v8329_v54  ;;  %v14319_v4 = vld [vmem:[#allocation30_spill] sm:$0xff] }
 0x930   : > { %9660 = vmatmul.msk.bf16.gmra.mxu0 %vm1091_vm1, %v13324_v37 }
 0x932   : > { %v7749_v60 = vpop.f32.mrf.mxu1 }
 0x933   : > { %v13437_v16 = vadd.f32 %v7749_v60, %v13285_v24  ;;  %v14313_v24 = vld [vmem:[#allocation70_spill] sm:$0xff]  ;;  %v13482_v60 = vpop.f32.mrf.mxu0 }
 0x934   : > { %v14315_v14 = vpack.c.bf16 %v14313_v24, %v14314_v61  ;;  %v13494_v61 = vpop.f32.mrf.mxu3 }
 0x935   : > { %9669 = vmatmul.msk.bf16.gmra.mxu1 %vm1091_vm1, %v14312_v28 }
 0x93a   : > { %v7751_v41 = vpop.f32.mrf.mxu1 }
 0x93b   : > { %v13444_v40 = vadd.f32 %v7751_v41, %v13301_v22  ;;  %v13460_v22 = vld [vmem:[%s13709_s12] ss:$0 sm:$0xff]  ;;  %v14320_v41 = vld [vmem:[#allocation75_spill] sm:$0xff] }
 0x940   : > { %9661 = vmatmul.msk.bf16.gmra.mxu0 %vm1091_vm1, %v8346_v8  ;;  %v14321_v8 = vpack.c.bf16 %v14319_v4, %v14320_v41 }
 0x942   : > { %v7754_v37 = vpop.f32.mrf.mxu1 }
 0x943   : > { %v13448_v27 = vadd.f32 %v7754_v37, %v13311_v34  ;;  %v13492_v37 = vpop.f32.mrf.mxu2 }
 0x945   : > { %9670 = vmatmul.msk.bf16.gmra.mxu1 %vm1091_vm1, %v14315_v14 }
 0x94a   : > { %v7756_v49 = vpop.f32.mrf.mxu1 }
 0x94b   : > { %v13455_v56 = vadd.f32 %v7756_v49, %v13330_v5  ;;  %v13496_v49 = vpop.f32.mrf.mxu0  ;;  %v13502_v25 = vpop.f32.mrf.mxu2 }
 0x952   : > { %v8663_v0 = vpop.f32.mrf.mxu1 }
 0x953   : > { %v8743_v1 = vadd.f32 %v8663_v0, %v13338_v30 }
 0x955   : > { %v8779_v34 = vadd.f32 %v13460_v22, %v8743_v1  ;;  %9671 = vmatmul.msk.bf16.gmra.mxu1 %vm1091_vm1, %v14318_v29 }
 0x957   : > { %vm8811_vm2 = vcmp.gt.f32.partialorder %v8779_v34, 0.0  ;;  %v8843_v20 = vmul.f32 0.1, %v8779_v34 }
 0x959   : > { %v8875_v5 = vsel %vm8811_vm2, %v8779_v34, %v8843_v20  ;;  %v13504_v20 = vpop.f32.mrf.mxu3 }
 0x95a   : > { %v8907_v10 = vpack.c.bf16 %v8875_v5, %v8875_v5  ;;  %v8665_v30 = vpop.f32.mrf.mxu1 }
 0x95b   : > { %v8744_v47 = vadd.f32 %v8665_v30, %v13351_v35 }
 0x95c   : > { %8940 = vst.msk [vmem:[%s13472_s20] sm:$0xf] %vm8939_vm9, %v8907_v10 }
 0x95d   : > { %v8780_v3 = vadd.f32 %v13460_v22, %v8744_v47  ;;  %v13507_v47 = vpop.f32.mrf.mxu0 }
 0x95f   : > { %vm8812_vm10 = vcmp.gt.f32.partialorder %v8780_v3, 0.0  ;;  %v8844_v17 = vmul.f32 0.1, %v8780_v3 }
 0x961   : > { %v8876_v23 = vsel %vm8812_vm10, %v8780_v3, %v8844_v17  ;;  %v14322_v3 = vld [vmem:[#allocation35_spill] sm:$0xff]  ;;  %v14323_v17 = vld [vmem:[#allocation37_spill] sm:$0xff]  ;;  %v13519_v41 = vpop.f32.mrf.mxu3 }
 0x962   : > { %v8908_v31 = vpack.c.bf16 %v8876_v23, %v8876_v23  ;;  %v8668_v28 = vpop.f32.mrf.mxu1  ;;  %v14324_v23 = vpack.c.bf16 %v14322_v3, %v14323_v17 }
 0x963   : > { %v8745_v54 = vadd.f32 %v8668_v28, %v13357_v7 }
 0x964   : > { %8941 = vst.msk [vmem:[%s13472_s20 + $0x4] sm:$0xf] %vm8939_vm9, %v8908_v31 }
 0x965   : > { %v8781_v35 = vadd.f32 %v13460_v22, %v8745_v54  ;;  %9672 = vmatmul.msk.bf16.gmra.mxu1 %vm1091_vm1, %v14321_v8  ;;  %v13516_v54 = vpop.f32.mrf.mxu2 }
 0x967   : > { %vm8813_vm11 = vcmp.gt.f32.partialorder %v8781_v35, 0.0  ;;  %v8845_v24 = vmul.f32 0.1, %v8781_v35 }
 0x969   : > { %v8877_v14 = vsel %vm8813_vm11, %v8781_v35, %v8845_v24  ;;  %v13524_v24 = vpop.f32.mrf.mxu0 }
 0x96a   : > { %v8909_v7 = vpack.c.bf16 %v8877_v14, %v8877_v14  ;;  %v8670_v0 = vpop.f32.mrf.mxu1 }
 0x96b   : > { %v8746_v1 = vadd.f32 %v8670_v0, %v13369_v42 }
 0x96c   : > { %8942 = vst.msk [vmem:[%s13472_s20 + $0x8] sm:$0xf] %vm8939_vm9, %v8909_v7 }
 0x96d   : > { %v8782_v34 = vadd.f32 %v13460_v22, %v8746_v1 }
 0x96f   : > { %vm8814_vm13 = vcmp.gt.f32.partialorder %v8782_v34, 0.0  ;;  %v8846_v18 = vmul.f32 0.1, %v8782_v34 }
 0x971   : > { %v8878_v29 = vsel %vm8814_vm13, %v8782_v34, %v8846_v18  ;;  %v13527_v18 = vpop.f32.mrf.mxu2 }
 0x972   : > { %v8910_v5 = vpack.c.bf16 %v8878_v29, %v8878_v29  ;;  %v8673_v10 = vpop.f32.mrf.mxu1  ;;  %v14325_v29 = vld [vmem:[#allocation39_spill] sm:$0xff] }
 0x973   : > { %v8747_v30 = vadd.f32 %v8673_v10, %v13375_v48  ;;  %v13536_v10 = vpop.f32.mrf.mxu3 }
 0x974   : > { %8943 = vst.msk [vmem:[%s13472_s20 + $0xc] sm:$0xf] %vm8939_vm9, %v8910_v5  ;;  %v14326_v5 = vpack.c.bf16 %v14325_v29, %v14281_v45 }
 0x975   : > { %v8783_v42 = vadd.f32 %v13460_v22, %v8747_v30  ;;  %9673 = vmatmul.msk.bf16.gmra.mxu1 %vm1091_vm1, %v14324_v23 }
 0x977   : > { %vm8815_vm14 = vcmp.gt.f32.partialorder %v8783_v42, 0.0  ;;  %v8847_v31 = vmul.f32 0.1, %v8783_v42 }
 0x979   : > { %v8879_v28 = vsel %vm8815_vm14, %v8783_v42, %v8847_v31  ;;  %v13538_v42 = vpop.f32.mrf.mxu0  ;;  %v8546_v31 = vld [vmem:[#allocation2 + $0xf1] sm:$0xff] }
 0x97a   : > { %v8911_v35 = vpack.c.bf16 %v8879_v28, %v8879_v28  ;;  %v8675_v4 = vpop.f32.mrf.mxu1  ;;  %v8021_v28 = vadd.f32 %v13475_v38, %v13240_v51  ;;  %v8545_v38 = vld [vmem:[#allocation2 + $0xe9] sm:$0xff] }
 0x97b   : > { %v8748_v48 = vadd.f32 %v8675_v4, %v13387_v9 }
 0x97c   : > { %8944 = vst.msk [vmem:[%s13472_s20 + $0x10] sm:$0xf] %vm8939_vm9, %v8911_v35  ;;  %v13546_v35 = vpop.f32.mrf.mxu2  ;;  %v8275_v4 = vadd.f32 %v13480_v36, %v8021_v28  ;;  %v8022_v36 = vadd.f32 %v13492_v37, %v13254_v21  ;;  %v8548_v21 = vld [vmem:[#allocation2 + $0x101] sm:$0xff]  ;;  %v8023_v37 = vadd.f32 %v13502_v25, %v13268_v39  ;;  %v8024_v25 = vadd.f32 %v13516_v54, %v13282_v44 }
 0x97d   : > { %v8784_v8 = vadd.f32 %v13460_v22, %v8748_v48  ;;  %v8025_v44 = vadd.f32 %v13527_v18, %v13294_v52  ;;  %v8026_v52 = vadd.f32 %v13546_v35, %v13308_v6  ;;  %v8552_v6 = vld [vmem:[#allocation2 + $0x121] sm:$0xff] }
 0x97f   : > { %vm8816_vm15 = vcmp.gt.f32.partialorder %v8784_v8, 0.0  ;;  %v8848_v14 = vmul.f32 0.1, %v8784_v8 }
 0x981   : > { %v8880_v7 = vsel %vm8816_vm15, %v8784_v8, %v8848_v14  ;;  %v8578_v8 = vmul.f32 %v14280_v50, %v8546_v31  ;;  %v13550_v14 = vpop.f32.mrf.mxu3 }
 0x982   : > { %v8912_v0 = vpack.c.bf16 %v8880_v7, %v8880_v7  ;;  %v8678_v1 = vpop.f32.mrf.mxu1 }
 0x983   : > { %v8749_v34 = vadd.f32 %v8678_v1, %v13393_v26 }
 0x984   : > { %8945 = vst.msk [vmem:[%s13472_s20 + $0x14] sm:$0xf] %vm8939_vm9, %v8912_v0  ;;  %v13553_v0 = vpop.f32.mrf.mxu0 }
 0x985   : > { %v8785_v9 = vadd.f32 %v13460_v22, %v8749_v34  ;;  %9674 = vmatmul.msk.bf16.gmra.mxu1 %vm1091_vm1, %v14326_v5  ;;  %v13562_v5 = vpop.f32.mrf.mxu2 }
 0x987   : > { %vm8817_vm3 = vcmp.gt.f32.partialorder %v8785_v9, 0.0  ;;  %v8849_v30 = vmul.f32 0.1, %v8785_v9 }
 0x989   : > { %v8881_v3 = vsel %vm8817_vm3, %v8785_v9, %v8849_v30  ;;  %v8597_v9 = vpack.c.bf16 %v8578_v8, %v8545_v38  ;;  %v8547_v38 = vld [vmem:[#allocation2 + $0xf9] sm:$0xff] }
 0x98a   : > { %v8913_v17 = vpack.c.bf16 %v8881_v3, %v8881_v3  ;;  %v8680_v26 = vpop.f32.mrf.mxu1 }
 0x98b   : > { %v8750_v23 = vadd.f32 %v8680_v26, %v13405_v62  ;;  %v8497_v62 = vadd.f32 %v13482_v60, %v8275_v4  ;;  %v8276_v60 = vadd.f32 %v13494_v61, %v8022_v36  ;;  %v14327_v4 = vld [vmem:[#allocation88_spill] sm:$0xff]  ;;  %v8278_v36 = vadd.f32 %v13519_v41, %v8024_v25 }
 0x98c   : > { %8946 = vst.msk [vmem:[%s13472_s20 + $0x18] sm:$0xf] %vm8939_vm9, %v8913_v17  ;;  %v13565_v17 = vpop.f32.mrf.mxu3  ;;  %v13567_v28 = vpop.f32.mrf.mxu0  ;;  %v8279_v41 = vadd.f32 %v13536_v10, %v8025_v44 }
 0x98d   : > { %v8786_v45 = vadd.f32 %v13460_v22, %v8750_v23  ;;  %v8498_v30 = vadd.f32 %v13496_v49, %v8276_v60  ;;  %v8500_v60 = vadd.f32 %v13524_v24, %v8278_v36  ;;  %v8551_v36 = vld [vmem:[#allocation2 + $0x119] sm:$0xff] }
 0x98e   : > { %v8501_v24 = vadd.f32 %v13538_v42, %v8279_v41  ;;  %v8280_v42 = vadd.f32 %v13550_v14, %v8026_v52  ;;  %v8584_v14 = vmul.f32 %v14290_v63, %v8552_v6 }
 0x98f   : > { %vm8818_vm4 = vcmp.gt.f32.partialorder %v8786_v45, 0.0  ;;  %v8850_v48 = vmul.f32 0.1, %v8786_v45 }
 0x991   : > { %v8882_v7 = vsel %vm8818_vm4, %v8786_v45, %v8850_v48  ;;  %v8277_v45 = vadd.f32 %v13504_v20, %v8023_v37  ;;  %v8580_v48 = vmul.f32 %v14327_v4, %v8548_v21 }
 0x992   : > { %v8914_v1 = vpack.c.bf16 %v8882_v7, %v8882_v7  ;;  %v8683_v51 = vpop.f32.mrf.mxu1  ;;  %v13577_v7 = vpop.f32.mrf.mxu2 }
 0x993   : > { %v8751_v34 = vadd.f32 %v8683_v51, %v8497_v62  ;;  %v8499_v8 = vadd.f32 %v13507_v47, %v8277_v45  ;;  %v8028_v63 = vadd.f32 %v13577_v7, %v13335_v2 }
 0x994   : > { %8947 = vst.msk [vmem:[%s13472_s20 + $0x1c] sm:$0xf] %vm8939_vm9, %v8914_v1  ;;  %v13579_v39 = vpop.f32.mrf.mxu3  ;;  %v13587_v47 = vpop.f32.mrf.mxu0 }
 0x995   : > { %v8787_v50 = vadd.f32 %v13460_v22, %v8751_v34  ;;  %9675 = vmatmul.msk.bf16.gmra.mxu1 %vm1091_vm1, %v8597_v9  ;;  %v8598_v9 = vpack.c.bf16 %v8580_v48, %v8547_v38  ;;  %v14328_v48 = vld [vmem:[#allocation20_spill] sm:$0xff] }
 0x996   : > { %v14329_v10 = vpack.c.bf16 %v14328_v48, %v12975_v33  ;;  %v8027_v33 = vadd.f32 %v13562_v5, %v13322_v57 }
 0x997   : > { %vm8819_vm5 = vcmp.gt.f32.partialorder %v8787_v50, 0.0  ;;  %v8851_v29 = vmul.f32 0.1, %v8787_v50 }
 0x999   : > { %v8883_v3 = vsel %vm8819_vm5, %v8787_v50, %v8851_v29 }
 0x99a   : > { %v8915_v26 = vpack.c.bf16 %v8883_v3, %v8883_v3  ;;  %v8685_v23 = vpop.f32.mrf.mxu1 }
 0x99b   : > { %v8752_v31 = vadd.f32 %v8685_v23, %v8498_v30  ;;  %v7973_v23 = vpop.f32.mrf.mxu2 }
 0x99c   : > { %8948 = vst.msk [vmem:[%s13472_s20 + $0x20] sm:$0xf] %vm8939_vm9, %v8915_v26  ;;  %v8449_v37 = vpop.f32.mrf.mxu0  ;;  %v8029_v2 = vadd.f32 %v7973_v23, %v13344_v59 }
 0x99d   : > { %v8788_v61 = vadd.f32 %v13460_v22, %v8752_v31  ;;  %v8227_v31 = vpop.f32.mrf.mxu3 }
 0x99e   : > { %v8283_v48 = vadd.f32 %v8227_v31, %v8029_v2 }
 0x99f   : > { %vm8820_vm6 = vcmp.gt.f32.partialorder %v8788_v61, 0.0  ;;  %v8852_v49 = vmul.f32 0.1, %v8788_v61 }
 0x9a1   : > { %v8884_v62 = vsel %vm8820_vm6, %v8788_v61, %v8852_v49 }
 0x9a2   : > { %v8916_v1 = vpack.c.bf16 %v8884_v62, %v8884_v62  ;;  %v8688_v51 = vpop.f32.mrf.mxu1 }
 0x9a3   : > { %v8753_v34 = vadd.f32 %v8688_v51, %v8499_v8  ;;  %v7975_v8 = vpop.f32.mrf.mxu2  ;;  %v8502_v51 = vadd.f32 %v13553_v0, %v8280_v42 }
 0x9a4   : > { %8949 = vst.msk [vmem:[%s13472_s20 + $0x24] sm:$0xf] %vm8939_vm9, %v8916_v1 }
 0x9a5   : > { %v8789_v20 = vadd.f32 %v13460_v22, %v8753_v34  ;;  %9676 = vmatmul.msk.bf16.gmra.mxu1 %vm1091_vm1, %v8598_v9  ;;  %v8229_v1 = vpop.f32.mrf.mxu3  ;;  %v8451_v34 = vpop.f32.mrf.mxu0 }
 0x9a7   : > { %vm8821_vm12 = vcmp.gt.f32.partialorder %v8789_v20, 0.0  ;;  %v8853_v50 = vmul.f32 0.1, %v8789_v20 }
 0x9a9   : > { %v8885_v29 = vsel %vm8821_vm12, %v8789_v20, %v8853_v50  ;;  %v8281_v50 = vadd.f32 %v13565_v17, %v8027_v33  ;;  %v8282_v17 = vadd.f32 %v13579_v39, %v8028_v63 }
 0x9aa   : > { %v8917_v30 = vpack.c.bf16 %v8885_v29, %v8885_v29  ;;  %v8690_v3 = vpop.f32.mrf.mxu1 }
 0x9ab   : > { %v8754_v26 = vadd.f32 %v8690_v3, %v8500_v60  ;;  %v7978_v60 = vpop.f32.mrf.mxu2  ;;  %v8503_v29 = vadd.f32 %v13567_v28, %v8281_v50  ;;  %v8600_v3 = vpack.c.bf16 %v8584_v14, %v8551_v36 }
 0x9ac   : > { %8950 = vst.msk [vmem:[%s13472_s20 + $0x28] sm:$0xf] %vm8939_vm9, %v8917_v30  ;;  %v8031_v36 = vadd.f32 %v7978_v60, %v13362_v19 }
 0x9ad   : > { %v8790_v54 = vadd.f32 %v13460_v22, %v8754_v26  ;;  %v8232_v26 = vpop.f32.mrf.mxu3  ;;  %v8454_v57 = vpop.f32.mrf.mxu0 }
 0x9af   : > { %vm8822_vm7 = vcmp.gt.f32.partialorder %v8790_v54, 0.0  ;;  %v8854_v21 = vmul.f32 0.1, %v8790_v54 }
 0x9b1   : > { %v8886_v61 = vsel %vm8822_vm7, %v8790_v54, %v8854_v21  ;;  %v8504_v21 = vadd.f32 %v13587_v47, %v8282_v17 }
 0x9b2   : > { %v8918_v45 = vpack.c.bf16 %v8886_v61, %v8886_v61  ;;  %v8693_v49 = vpop.f32.mrf.mxu1 }
 0x9b3   : > { %v8755_v4 = vadd.f32 %v8693_v49, %v8501_v24  ;;  %v7980_v61 = vpop.f32.mrf.mxu2 }
 0x9b4   : > { %8951 = vst.msk [vmem:[%s13472_s20 + $0x2c] sm:$0xf] %vm8939_vm9, %v8918_v45 }
 0x9b5   : > { %v8791_v18 = vadd.f32 %v13460_v22, %v8755_v4  ;;  %9677 = vmatmul.msk.bf16.gmra.mxu1 %vm1091_vm1, %v14329_v10  ;;  %v8234_v52 = vpop.f32.mrf.mxu3  ;;  %v8505_v10 = vadd.f32 %v8449_v37, %v8283_v48 }
 0x9b7   : > { %vm8823_vm0 = vcmp.gt.f32.partialorder %v8791_v18, 0.0  ;;  %v8855_v62 = vmul.f32 0.1, %v8791_v18 }
 0x9b9   : > { %v8887_v38 = vsel %vm8823_vm0, %v8791_v18, %v8855_v62  ;;  %v8456_v18 = vpop.f32.mrf.mxu0 }
 0x9ba   : > { %v8919_v9 = vpack.c.bf16 %v8887_v38, %v8887_v38  ;;  %v8695_v25 = vpop.f32.mrf.mxu1 }
 0x9bb   : > { %v8756_v35 = vadd.f32 %v8695_v25, %v8502_v51  ;;  %v7983_v38 = vpop.f32.mrf.mxu2 }
 0x9bc   : > { %8952 = vst.msk [vmem:[%s13472_s20 + $0x30] sm:$0xf] %vm8939_vm9, %v8919_v9  ;;  %v8030_v9 = vadd.f32 %v7975_v8, %v13354_v58  ;;  %v8285_v8 = vadd.f32 %v8232_v26, %v8031_v36 }
 0x9bd   : > { %v8792_v20 = vadd.f32 %v13460_v22, %v8756_v35  ;;  %v8237_v59 = vpop.f32.mrf.mxu3 }
 0x9be   : > { %v8284_v23 = vadd.f32 %v8229_v1, %v8030_v9 }
 0x9bf   : > { %vm8824_vm8 = vcmp.gt.f32.partialorder %v8792_v20, 0.0  ;;  %v8856_v0 = vmul.f32 0.1, %v8792_v20 }
 0x9c0   : > { %v8506_v35 = vadd.f32 %v8451_v34, %v8284_v23 }
 0x9c1   : > { %v8888_v30 = vsel %vm8824_vm8, %v8792_v20, %v8856_v0  ;;  %v8459_v31 = vpop.f32.mrf.mxu0 }
 0x9c2   : > { %v8920_v44 = vpack.c.bf16 %v8888_v30, %v8888_v30  ;;  %v8698_v54 = vpop.f32.mrf.mxu1 }
 0x9c3   : > { %v8757_v41 = vadd.f32 %v8698_v54, %v8503_v29  ;;  %v7985_v58 = vpop.f32.mrf.mxu2  ;;  %v8507_v29 = vadd.f32 %v8454_v57, %v8285_v8 }
 0x9c4   : > { %8953 = vst.msk [vmem:[%s13472_s20 + $0x34] sm:$0xf] %vm8939_vm9, %v8920_v44 }
 0x9c5   : > { %v8793_v5 = vadd.f32 %v13460_v22, %v8757_v41  ;;  %9678 = vmatmul.msk.bf16.gmra.mxu1 %vm1091_vm1, %v8600_v3  ;;  %v8239_v1 = vpop.f32.mrf.mxu3  ;;  %v8032_v41 = vadd.f32 %v7980_v61, %v13372_v53 }
 0x9c7   : > { %vm8825_vm2 = vcmp.gt.f32.partialorder %v8793_v5, 0.0  ;;  %v8857_v28 = vmul.f32 0.1, %v8793_v5  ;;  %v8286_v60 = vadd.f32 %v8234_v52, %v8032_v41 }
 0x9c9   : > { %v8889_v24 = vsel %vm8825_vm2, %v8793_v5, %v8857_v28  ;;  %v8461_v3 = vpop.f32.mrf.mxu0  ;;  %v8508_v5 = vadd.f32 %v8456_v18, %v8286_v60 }
 0x9ca   : > { %v8921_v45 = vpack.c.bf16 %v8889_v24, %v8889_v24  ;;  %v8700_v49 = vpop.f32.mrf.mxu1 }
 0x9cb   : > { %v8758_v4 = vadd.f32 %v8700_v49, %v8504_v21  ;;  %v7988_v26 = vpop.f32.mrf.mxu2  ;;  %v8033_v49 = vadd.f32 %v7983_v38, %v13380_v55 }
 0x9cc   : > { %8954 = vst.msk [vmem:[%s13472_s20 + $0x38] sm:$0xf] %vm8939_vm9, %v8921_v45 }
 0x9cd   : > { %v8794_v7 = vadd.f32 %v13460_v22, %v8758_v4  ;;  %v8242_v28 = vpop.f32.mrf.mxu3  ;;  %v8287_v61 = vadd.f32 %v8237_v59, %v8033_v49 }
 0x9cf   : > { %vm8826_vm1 = vcmp.gt.f32.partialorder %v8794_v7, 0.0  ;;  %v8858_v39 = vmul.f32 0.1, %v8794_v7  ;;  %v8509_v52 = vadd.f32 %v8459_v31, %v8287_v61  ;;  %v8035_v31 = vadd.f32 %v7988_v26, %v13398_v13 }
 0x9d1   : > { %v8890_v42 = vsel %vm8826_vm1, %v8794_v7, %v8858_v39  ;;  %v8464_v45 = vpop.f32.mrf.mxu0 }
 0x9d2   : > { %v8922_v47 = vpack.c.bf16 %v8890_v42, %v8890_v42  ;;  %v8703_v62 = vpop.f32.mrf.mxu1  ;;  %v8034_v42 = vadd.f32 %v7985_v58, %v13390_v46 }
 0x9d3   : > { %v8759_v51 = vadd.f32 %v8703_v62, %v8505_v10  ;;  %v7990_v7 = vpop.f32.mrf.mxu2 }
 0x9d4   : > { %8955 = vst.msk [vmem:[%s13472_s20 + $0x3c] sm:$0xf] %vm8939_vm9, %v8922_v47  ;;  %v8288_v62 = vadd.f32 %v8239_v1, %v8034_v42 }
 0x9d5   : > { %v8795_v25 = vadd.f32 %v13460_v22, %v8759_v51  ;;  %v8244_v10 = vpop.f32.mrf.mxu3 }
 0x9d6   : > { %v8510_v38 = vadd.f32 %v8461_v3, %v8288_v62 }
 0x9d7   : > { %vm8827_vm10 = vcmp.gt.f32.partialorder %v8795_v25, 0.0  ;;  %v8859_v6 = vmul.f32 0.1, %v8795_v25 }
 0x9d9   : > { %v8891_v33 = vsel %vm8827_vm10, %v8795_v25, %v8859_v6  ;;  %v8466_v55 = vpop.f32.mrf.mxu0 }
 0x9da   : > { %v8923_v37 = vpack.c.bf16 %v8891_v33, %v8891_v33  ;;  %v8705_v20 = vpop.f32.mrf.mxu1  ;;  %v8289_v33 = vadd.f32 %v8242_v28, %v8035_v31 }
 0x9db   : > { %v8760_v14 = vadd.f32 %v8705_v20, %v8506_v35  ;;  %v7993_v6 = vpop.f32.mrf.mxu2 }
 0x9dc   : > { %8956 = vst.msk [vmem:[%s13472_s20 + $0x40] sm:$0xf] %vm8939_vm9, %v8923_v37 }
 0x9dd   : > { %v8796_v50 = vadd.f32 %v13460_v22, %v8760_v14  ;;  %v8247_v46 = vpop.f32.mrf.mxu3  ;;  %v8511_v14 = vadd.f32 %v8464_v45, %v8289_v33 }
 0x9df   : > { %vm8828_vm11 = vcmp.gt.f32.partialorder %v8796_v50, 0.0  ;;  %v8860_v0 = vmul.f32 0.1, %v8796_v50 }
 0x9e1   : > { %v8892_v30 = vsel %vm8828_vm11, %v8796_v50, %v8860_v0  ;;  %v8469_v20 = vpop.f32.mrf.mxu0  ;;  %v8036_v0 = vadd.f32 %v7990_v7, %v13408_v15 }
 0x9e2   : > { %v8924_v34 = vpack.c.bf16 %v8892_v30, %v8892_v30  ;;  %v8708_v44 = vpop.f32.mrf.mxu1 }
 0x9e3   : > { %v8761_v54 = vadd.f32 %v8708_v44, %v8507_v29  ;;  %v7995_v13 = vpop.f32.mrf.mxu2  ;;  %v8290_v29 = vadd.f32 %v8244_v10, %v8036_v0 }
 0x9e4   : > { %8957 = vst.msk [vmem:[%s13472_s20 + $0x44] sm:$0xf] %vm8939_vm9, %v8924_v34  ;;  %v8038_v61 = vadd.f32 %v7995_v13, %v13420_v43 }
 0x9e5   : > { %v8797_v19 = vadd.f32 %v13460_v22, %v8761_v54  ;;  %v8249_v3 = vpop.f32.mrf.mxu3  ;;  %v8512_v34 = vadd.f32 %v8466_v55, %v8290_v29 }
 0x9e7   : > { %vm8829_vm13 = vcmp.gt.f32.partialorder %v8797_v19, 0.0  ;;  %v8861_v63 = vmul.f32 0.1, %v8797_v19 }
 0x9e9   : > { %v8893_v17 = vsel %vm8829_vm13, %v8797_v19, %v8861_v63  ;;  %v8471_v54 = vpop.f32.mrf.mxu0  ;;  %v8037_v63 = vadd.f32 %v7993_v6, %v13413_v12 }
 0x9ea   : > { %v8925_v57 = vpack.c.bf16 %v8893_v17, %v8893_v17  ;;  %v8710_v21 = vpop.f32.mrf.mxu1 }
 0x9eb   : > { %v8762_v24 = vadd.f32 %v8710_v21, %v8508_v5  ;;  %v8291_v26 = vadd.f32 %v8247_v46, %v8037_v63  ;;  %v7998_v17 = vpop.f32.mrf.mxu2 }
 0x9ec   : > { %8958 = vst.msk [vmem:[%s13472_s20 + $0x48] sm:$0xf] %vm8939_vm9, %v8925_v57 }
 0x9ed   : > { %v8798_v53 = vadd.f32 %v13460_v22, %v8762_v24  ;;  %v8513_v28 = vadd.f32 %v8469_v20, %v8291_v26  ;;  %v8252_v21 = vpop.f32.mrf.mxu3 }
 0x9ef   : > { %vm8830_vm14 = vcmp.gt.f32.partialorder %v8798_v53, 0.0  ;;  %v8862_v4 = vmul.f32 0.1, %v8798_v53 }
 0x9f1   : > { %v8894_v2 = vsel %vm8830_vm14, %v8798_v53, %v8862_v4  ;;  %v8474_v53 = vpop.f32.mrf.mxu0  ;;  %v8292_v4 = vadd.f32 %v8249_v3, %v8038_v61 }
 0x9f2   : > { %v8926_v18 = vpack.c.bf16 %v8894_v2, %v8894_v2  ;;  %v8713_v48 = vpop.f32.mrf.mxu1 }
 0x9f3   : > { %v8763_v39 = vadd.f32 %v8713_v48, %v8509_v52  ;;  %v8514_v2 = vadd.f32 %v8471_v54, %v8292_v4 }
 0x9f4   : > { %8959 = vst.msk [vmem:[%s13472_s20 + $0x4c] sm:$0xf] %vm8939_vm9, %v8926_v18  ;;  %v8000_v18 = vpop.f32.mrf.mxu2 }
 0x9f5   : > { %v8799_v47 = vadd.f32 %v13460_v22, %v8763_v39  ;;  %v8254_v42 = vpop.f32.mrf.mxu3  ;;  %v8040_v31 = vadd.f32 %v8000_v18, %v13432_v11 }
 0x9f7   : > { %vm8831_vm15 = vcmp.gt.f32.partialorder %v8799_v47, 0.0  ;;  %v8863_v51 = vmul.f32 0.1, %v8799_v47  ;;  %v8294_v46 = vadd.f32 %v8254_v42, %v8040_v31 }
 0x9f9   : > { %v8895_v9 = vsel %vm8831_vm15, %v8799_v47, %v8863_v51  ;;  %v8039_v47 = vadd.f32 %v7998_v17, %v13425_v32  ;;  %v8476_v43 = vpop.f32.mrf.mxu0 }
 0x9fa   : > { %v8927_v25 = vpack.c.bf16 %v8895_v9, %v8895_v9  ;;  %v8715_v59 = vpop.f32.mrf.mxu1  ;;  %v8516_v20 = vadd.f32 %v8476_v43, %v8294_v46 }
 0x9fb   : > { %v8764_v23 = vadd.f32 %v8715_v59, %v8510_v38  ;;  %v8293_v62 = vadd.f32 %v8252_v21, %v8039_v47 }
 0x9fc   : > { %8960 = vst.msk [vmem:[%s13472_s20 + $0x50] sm:$0xf] %vm8939_vm9, %v8927_v25  ;;  %v8003_v6 = vpop.f32.mrf.mxu2 }
 0x9fd   : > { %v8800_v35 = vadd.f32 %v13460_v22, %v8764_v23  ;;  %v8515_v38 = vadd.f32 %v8474_v53, %v8293_v62  ;;  %v8257_v32 = vpop.f32.mrf.mxu3 }
 0x9ff   : > { %vm8832_vm3 = vcmp.gt.f32.partialorder %v8800_v35, 0.0  ;;  %v8864_v37 = vmul.f32 0.1, %v8800_v35 }
 0xa01   : > { %v8896_v36 = vsel %vm8832_vm3, %v8800_v35, %v8864_v37  ;;  %v8479_v37 = vpop.f32.mrf.mxu0 }
 0xa02   : > { %v8928_v50 = vpack.c.bf16 %v8896_v36, %v8896_v36  ;;  %v8718_v58 = vpop.f32.mrf.mxu1 }
 0xa03   : > { %v8765_v8 = vadd.f32 %v8718_v58, %v8511_v14 }
 0xa04   : > { %8961 = vst.msk [vmem:[%s13472_s20 + $0x54] sm:$0xf] %vm8939_vm9, %v8928_v50  ;;  %v8005_v11 = vpop.f32.mrf.mxu2 }
 0xa05   : > { %v8801_v1 = vadd.f32 %v13460_v22, %v8765_v8  ;;  %v8041_v8 = vadd.f32 %v8003_v6, %v13437_v16  ;;  %v8259_v29 = vpop.f32.mrf.mxu3 }
 0xa07   : > { %vm8833_vm4 = vcmp.gt.f32.partialorder %v8801_v1, 0.0  ;;  %v8865_v30 = vmul.f32 0.1, %v8801_v1 }
 0xa09   : > { %v8897_v44 = vsel %vm8833_vm4, %v8801_v1, %v8865_v30  ;;  %v8295_v1 = vadd.f32 %v8257_v32, %v8041_v8 }
 0xa0a   : > { %v8929_v41 = vpack.c.bf16 %v8897_v44, %v8897_v44  ;;  %v8720_v19 = vpop.f32.mrf.mxu1 }
 0xa0b   : > { %v8766_v60 = vadd.f32 %v8720_v19, %v8512_v34  ;;  %v8517_v30 = vadd.f32 %v8479_v37, %v8295_v1  ;;  %v8481_v34 = vpop.f32.mrf.mxu0  ;;  %v8042_v19 = vadd.f32 %v8005_v11, %v13444_v40 }
 0xa0c   : > { %8962 = vst.msk [vmem:[%s13472_s20 + $0x58] sm:$0xf] %vm8939_vm9, %v8929_v41 }
 0xa0d   : > { %v8802_v15 = vadd.f32 %v13460_v22, %v8766_v60  ;;  %v8296_v60 = vadd.f32 %v8259_v29, %v8042_v19  ;;  %v8262_v17 = vpop.f32.mrf.mxu3 }
 0xa0f   : > { %vm8834_vm5 = vcmp.gt.f32.partialorder %v8802_v15, 0.0  ;;  %v8866_v5 = vmul.f32 0.1, %v8802_v15  ;;  %v8518_v26 = vadd.f32 %v8481_v34, %v8296_v60 }
 0xa11   : > { %v8898_v57 = vsel %vm8834_vm5, %v8802_v15, %v8866_v5  ;;  %v8008_v15 = vpop.f32.mrf.mxu2 }
 0xa12   : > { %v8930_v24 = vpack.c.bf16 %v8898_v57, %v8898_v57  ;;  %v8723_v45 = vpop.f32.mrf.mxu1 }
 0xa13   : > { %v8767_v49 = vadd.f32 %v8723_v45, %v8513_v28  ;;  %v8043_v45 = vadd.f32 %v8008_v15, %v13448_v27 }
 0xa14   : > { %8963 = vst.msk [vmem:[%s13472_s20 + $0x5c] sm:$0xf] %vm8939_vm9, %v8930_v24  ;;  %v8484_v24 = vpop.f32.mrf.mxu0 }
 0xa15   : > { %v8803_v12 = vadd.f32 %v13460_v22, %v8767_v49  ;;  %v8297_v49 = vadd.f32 %v8262_v17, %v8043_v45  ;;  %v8264_v18 = vpop.f32.mrf.mxu3 }
 0xa17   : > { %vm8835_vm6 = vcmp.gt.f32.partialorder %v8803_v12, 0.0  ;;  %v8867_v52 = vmul.f32 0.1, %v8803_v12  ;;  %v8519_v61 = vadd.f32 %v8484_v24, %v8297_v49 }
 0xa19   : > { %v8899_v7 = vsel %vm8835_vm6, %v8803_v12, %v8867_v52  ;;  %v8010_v4 = vpop.f32.mrf.mxu2 }
 0xa1a   : > { %v8931_v48 = vpack.c.bf16 %v8899_v7, %v8899_v7  ;;  %v8725_v39 = vpop.f32.mrf.mxu1 }
 0xa1b   : > { %v8768_v10 = vadd.f32 %v8725_v39, %v8514_v2 }
 0xa1c   : > { %8964 = vst.msk [vmem:[%s13472_s20 + $0x60] sm:$0xf] %vm8939_vm9, %v8931_v48  ;;  %v8044_v48 = vadd.f32 %v8010_v4, %v13455_v56  ;;  %v8486_v27 = vpop.f32.mrf.mxu0 }
 0xa1d   : > { %v8804_v55 = vadd.f32 %v13460_v22, %v8768_v10 }
 0xa1e   : > { %v8298_v10 = vadd.f32 %v8264_v18, %v8044_v48 }
 0xa1f   : > { %vm8836_vm12 = vcmp.gt.f32.partialorder %v8804_v55, 0.0  ;;  %v8868_v51 = vmul.f32 0.1, %v8804_v55 }
 0xa20   : > { %v8520_v47 = vadd.f32 %v8486_v27, %v8298_v10 }
 0xa21   : > { %v8900_v9 = vsel %vm8836_vm12, %v8804_v55, %v8868_v51 }
 0xa22   : > { %v8932_v25 = vpack.c.bf16 %v8900_v9, %v8900_v9  ;;  %v8728_v59 = vpop.f32.mrf.mxu1 }
 0xa23   : > { %v8769_v23 = vadd.f32 %v8728_v59, %v8515_v38 }
 0xa24   : > { %8965 = vst.msk [vmem:[%s13472_s20 + $0x64] sm:$0xf] %vm8939_vm9, %v8932_v25 }
 0xa25   : > { %v8805_v35 = vadd.f32 %v13460_v22, %v8769_v23 }
 0xa27   : > { %vm8837_vm7 = vcmp.gt.f32.partialorder %v8805_v35, 0.0  ;;  %v8869_v33 = vmul.f32 0.1, %v8805_v35 }
 0xa29   : > { %v8901_v14 = vsel %vm8837_vm7, %v8805_v35, %v8869_v33 }
 0xa2a   : > { %v8933_v36 = vpack.c.bf16 %v8901_v14, %v8901_v14  ;;  %v8730_v50 = vpop.f32.mrf.mxu1 }
 0xa2b   : > { %v8770_v58 = vadd.f32 %v8730_v50, %v8516_v20 }
 0xa2c   : > { %8966 = vst.msk [vmem:[%s13472_s20 + $0x68] sm:$0xf] %vm8939_vm9, %v8933_v36 }
 0xa2d   : > { %v8806_v0 = vadd.f32 %v13460_v22, %v8770_v58 }
 0xa2f   : > { %vm8838_vm0 = vcmp.gt.f32.partialorder %v8806_v0, 0.0  ;;  %v8870_v13 = vmul.f32 0.1, %v8806_v0 }
 0xa31   : > { %v8902_v3 = vsel %vm8838_vm0, %v8806_v0, %v8870_v13 }
 0xa32   : > { %v8934_v44 = vpack.c.bf16 %v8902_v3, %v8902_v3  ;;  %v8733_v54 = vpop.f32.mrf.mxu1 }
 0xa33   : > { %v8771_v41 = vadd.f32 %v8733_v54, %v8517_v30 }
 0xa34   : > { %8967 = vst.msk [vmem:[%s13472_s20 + $0x6c] sm:$0xf] %vm8939_vm9, %v8934_v44 }
 0xa35   : > { %v8807_v16 = vadd.f32 %v13460_v22, %v8771_v41 }
 0xa37   : > { %vm8839_vm8 = vcmp.gt.f32.partialorder %v8807_v16, 0.0  ;;  %v8871_v63 = vmul.f32 0.1, %v8807_v16 }
 0xa39   : > { %v8903_v5 = vsel %vm8839_vm8, %v8807_v16, %v8871_v63 }
 0xa3a   : > { %v8935_v28 = vpack.c.bf16 %v8903_v5, %v8903_v5  ;;  %v8735_v57 = vpop.f32.mrf.mxu1 }
 0xa3b   : > { %v8772_v21 = vadd.f32 %v8735_v57, %v8518_v26 }
 0xa3c   : > { %8968 = vst.msk [vmem:[%s13472_s20 + $0x70] sm:$0xf] %vm8939_vm9, %v8935_v28 }
 0xa3d   : > { %v8808_v40 = vadd.f32 %v13460_v22, %v8772_v21 }
 0xa3f   : > { %vm8840_vm2 = vcmp.gt.f32.partialorder %v8808_v40, 0.0  ;;  %v8872_v53 = vmul.f32 0.1, %v8808_v40 }
 0xa41   : > { %v8904_v12 = vsel %vm8840_vm2, %v8808_v40, %v8872_v53 }
 0xa42   : > { %v8936_v52 = vpack.c.bf16 %v8904_v12, %v8904_v12  ;;  %v8738_v2 = vpop.f32.mrf.mxu1 }
 0xa43   : > { %v8773_v7 = vadd.f32 %v8738_v2, %v8519_v61 }
 0xa44   : > { %8969 = vst.msk [vmem:[%s13472_s20 + $0x74] sm:$0xf] %vm8939_vm9, %v8936_v52 }
 0xa45   : > { %v8809_v39 = vadd.f32 %v13460_v22, %v8773_v7 }
 0xa47   : > { %vm8841_vm1 = vcmp.gt.f32.partialorder %v8809_v39, 0.0  ;;  %v8873_v42 = vmul.f32 0.1, %v8809_v39 }
 0xa49   : > { %v8905_v55 = vsel %vm8841_vm1, %v8809_v39, %v8873_v42 }
 0xa4a   : > { %v8937_v43 = vpack.c.bf16 %v8905_v55, %v8905_v55  ;;  %v8740_v62 = vpop.f32.mrf.mxu1 }
 0xa4b   : > { %v8774_v51 = vadd.f32 %v8740_v62, %v8520_v47 }
 0xa4c   : > { %8970 = vst.msk [vmem:[%s13472_s20 + $0x78] sm:$0xf] %vm8939_vm9, %v8937_v43 }
 0xa4d   : > { %v8810_v38 = vadd.f32 %v13460_v22, %v8774_v51 }
 0xa4f   : > { %vm8842_vm10 = vcmp.gt.f32.partialorder %v8810_v38, 0.0  ;;  %v8874_v9 = vmul.f32 0.1, %v8810_v38 }
 0xa51   : > { %v8906_v25 = vsel %vm8842_vm10, %v8810_v38, %v8874_v9 }
 0xa52   : > { %v8938_v56 = vpack.c.bf16 %v8906_v25, %v8906_v25 }
 0xa54   : > { %8971 = vst.msk [vmem:[%s13472_s20 + $0x7c] sm:$0xf] %vm8939_vm9, %v8938_v56 }
 0xa55 PF: > { %s25_s29 = sadd.s32 1, %s9747_s29  }
 0xa56   : > { %p22_p4 = scmp.ge.s32.totalorder %s25_s29, 4  }
 0xa58   :  { %24 = sbr.rel (!%p22_p4) target bundleno = 1 (0x1), region = 138 }

</bundles_post_ra>
